<compile_context>
chip_gen: v7x
topology: tpu7x:2x2x1
jax: 0.10.0
libtpu: 0.0.40
codegen_flags: <defaults>
</compile_context>

<pallas_src>
import functools

import numpy as np
import jax
import jax.numpy as jnp
from jax.experimental import pallas as pl
from jax.experimental.pallas import tpu as pltpu

_VMEM = pl.BlockSpec(memory_space=pltpu.MemorySpace.VMEM)
_LANE = 128   # padded channel width of the final layer (lane-dense output)


# --------------------------------- kernel ---------------------------------- #
def _generator_kernel(zexp_ref, w1_ref, gamma_ref, beta_ref,
                      w2_ref, s2_ref, w3_ref, s3_ref, out_ref,
                      *, n_layers, eps, c2, taps):
    f32 = jnp.float32

    # ---- ConvTranspose2d(z, 256, (3,4), 1, 0) on a 1x1 input: one bf16 matmul
    # zexp already encodes the (n, h, w) row expansion, so the result is the
    # (N*H1*W1, 256) slab directly -- no reshape/transpose needed.
    x1 = jnp.dot(zexp_ref[...], w1_ref[...], preferred_element_type=f32)

    # ---- BatchNorm2d(256), training-mode batch statistics, + ReLU ----
    inv_r1 = 1.0 / x1.shape[0]
    mean = jnp.sum(x1, axis=0, keepdims=True) * inv_r1
    xc = x1 - mean
    var = jnp.sum(xc * xc, axis=0, keepdims=True) * inv_r1       # biased, like PyTorch
    x1 = xc * jax.lax.rsqrt(var + eps) * gamma_ref[...] + beta_ref[...]
    x1 = jnp.maximum(x1, 0.0)

    # ---- ConvTranspose2d(256, 128, 4, 2, 1): gemm + col2im overlap-add, ReLU
    y2 = jnp.dot(x1.astype(jnp.bfloat16), w2_ref[...],
                 preferred_element_type=f32)                      # (N*12, 16*128)
    x2 = jnp.dot(s2_ref[0], y2[:, 0:c2], preferred_element_type=f32)
    for t in range(1, taps):
        x2 = x2 + jnp.dot(s2_ref[t], y2[:, t * c2:(t + 1) * c2],
                          preferred_element_type=f32)
    x2 = jnp.maximum(x2, 0.0)                                     # (N*48, 128)
    # TODO(synk): nn.Dropout is stochastic in train mode; treated as identity
    # (eval / p=0).  Train-mode parity would need pltpu.prng_seed + random bits.

    # ---- ConvTranspose2d(128, layers, 4, 2, 1), channels padded to 128 ----
    y3 = jnp.dot(x2.astype(jnp.bfloat16), w3_ref[...],
                 preferred_element_type=f32)                      # (N*48, 16*128)
    x3 = jnp.dot(s3_ref[0], y3[:, 0:_LANE], preferred_element_type=f32)
    for t in range(1, taps):
        x3 = x3 + jnp.dot(s3_ref[t], y3[:, t * _LANE:(t + 1) * _LANE],
                          preferred_element_type=f32)             # (N*192, 128)

    # ---- Softmax2d over the (real) channel lanes; padded lanes -> 0 ----
    lane = jax.lax.broadcasted_iota(jnp.int32, x3.shape, 1)
    logits = jnp.where(lane < n_layers, x3, -1e30)
    m = jnp.max(logits, axis=-1, keepdims=True)
    e = jnp.exp(logits - m)
    out_ref[...] = e / jnp.sum(e, axis=-1, keepdims=True)


# ----------------------- static col2im scatter matrices --------------------- #
@functools.lru_cache(maxsize=None)
def _col2im_scatter(n, hi, wi, k, stride, pad):
    """0/1 matrices S[t] of shape (N*Ho*Wo, N*Hi*Wi): overlap-add of kernel tap
    t = kh*K + kw for ConvTranspose2d(stride, pad) on an (Hi, Wi) input."""
    ho = (hi - 1) * stride - 2 * pad + k
    wo = (wi - 1) * stride - 2 * pad + k
    s = np.zeros((k * k, n * ho * wo, n * hi * wi), np.float32)
    for kh in range(k):
        for kw in range(k):
            t = kh * k + kw
            for b in range(n):
                for ih in range(hi):
                    oh = ih * stride - pad + kh
                    if oh < 0 or oh >= ho:
                        continue
                    for iw in range(wi):
                        ow = iw * stride - pad + kw
                        if ow < 0 or ow >= wo:
                            continue
                        s[t, (b * ho + oh) * wo + ow, (b * hi + ih) * wi + iw] = 1.0
    return jnp.asarray(s), (ho, wo)


# --------------------------------- Generator -------------------------------- #
class GeneratorPallas:
    H1, W1 = 3, 4
    K, STRIDE, PAD = 4, 2, 1

    def __init__(self, mapping, shapes, z_shape, dropout, key):
        self.z_size = z_shape[0]
        self.layers = len(mapping)
        self.dropout = dropout
        k1, k2, k3 = jax.random.split(key, 3)
        # Deterministic synthetic weights, PyTorch ConvTranspose2d layout (Cin, Cout, kH, kW).
        w1 = 0.05 * jax.random.normal(k1, (self.z_size, 256, self.H1, self.W1), jnp.float32)
        w2 = 0.05 * jax.random.normal(k2, (256, 128, self.K, self.K), jnp.float32)
        w3 = 0.05 * jax.random.normal(k3, (128, self.layers, self.K, self.K), jnp.float32)

        # Matmul-layout weights, prepared once (hoisted out of __call__), cast to bf16.
        # layer 1: W1mat[(kh*W1+kw)*z + ci, co] = w1[ci, co, kh, kw]
        self.w1_mat = jnp.transpose(w1, (2, 3, 0, 1)).reshape(
            self.H1 * self.W1 * self.z_size, 256).astype(jnp.bfloat16)
        # layers 2/3: W[ci, (kh*K+kw)*Cout + co] = w[ci, co, kh, kw]
        self.w2_mat = jnp.transpose(w2, (0, 2, 3, 1)).reshape(
            256, self.K * self.K * 128).astype(jnp.bfloat16)
        w3p = jnp.zeros((128, _LANE, self.K, self.K), jnp.float32).at[:, :self.layers].set(w3)
        self.w3_mat = jnp.transpose(w3p, (0, 2, 3, 1)).reshape(
            128, self.K * self.K * _LANE).astype(jnp.bfloat16)

        # BatchNorm2d(256) default affine params.
        self.gamma = jnp.ones((1, 256), jnp.float32)
        self.beta = jnp.zeros((1, 256), jnp.float32)

    def __call__(self, z):
        z2 = z.reshape(-1, self.z_size).astype(jnp.float32)
        n = z2.shape[0]
        hw1 = self.H1 * self.W1

        # Expand z so the layer-1 matmul directly emits the (N*H1*W1, 256) slab:
        # zexp[(b, hw), (hw', ci)] = z[b, ci] * (hw == hw').
        eye = jnp.eye(hw1, dtype=jnp.float32)
        zexp = (eye[None, :, :, None] * z2[:, None, None, :]).reshape(
            n * hw1, hw1 * self.z_size).astype(jnp.bfloat16)

        # Static col2im scatter matrices (cached per batch size, traced as constants).
        s2, (h2, w2) = _col2im_scatter(n, self.H1, self.W1, self.K, self.STRIDE, self.PAD)
        s3, (h3, w3) = _col2im_scatter(n, h2, w2, self.K, self.STRIDE, self.PAD)

        r3 = n * h3 * w3
        out_slab = pl.pallas_call(
            functools.partial(_generator_kernel, n_layers=self.layers, eps=1e-5,
                              c2=128, taps=self.K * self.K),
            out_shape=jax.ShapeDtypeStruct((r3, _LANE), jnp.float32),
            in_specs=[_VMEM] * 8,
            out_specs=_VMEM,
        )(zexp, self.w1_mat, self.gamma, self.beta, self.w2_mat, s2, self.w3_mat, s3)

        # Single layout conversion at the very end: lane-padded slab -> NCHW.
        out = out_slab[:, :self.layers].reshape(n, h3, w3, self.layers)
        return jnp.transpose(out, (0, 3, 1, 2))                  # (N, layers, 12, 16)


if __name__ == "__main__":
    key = jax.random.PRNGKey(0)
    k_param, k_z = jax.random.split(key)

    mapping = [0, 1, 2, 3]          # 4 output "layer" channels
    shapes = None                   # unused in forward
    z_shape = (32,)                 # latent size
    gen = GeneratorPallas(mapping, shapes, z_shape, dropout=0.0, key=k_param)

    z = jax.random.normal(k_z, (2, 32), jnp.float32)
    out = jax.jit(gen.__call__)(z)
    out = jax.block_until_ready(out)

    assert out.shape == (2, 4, 12, 16), out.shape
    assert bool(jnp.all(jnp.isfinite(out)))
    # Softmax2d: channel probabilities sum to 1 at every pixel.
    assert bool(jnp.allclose(jnp.sum(out, axis=1), 1.0, atol=1e-4))
    print("KERNEL_OK")
</pallas_src>

<mosaic_0001>
module attributes {stable_mosaic.version = 11 : i64} {
  func.func @_generator_kernel(%arg0: memref<24x384xbf16, #tpu.memory_space<vmem>>, %arg1: memref<384x256xbf16, #tpu.memory_space<vmem>>, %arg2: memref<1x256xf32, #tpu.memory_space<vmem>>, %arg3: memref<1x256xf32, #tpu.memory_space<vmem>>, %arg4: memref<256x2048xbf16, #tpu.memory_space<vmem>>, %arg5: memref<16x96x24xf32, #tpu.memory_space<vmem>>, %arg6: memref<128x2048xbf16, #tpu.memory_space<vmem>>, %arg7: memref<16x384x96xf32, #tpu.memory_space<vmem>>, %arg8: memref<384x128xf32, #tpu.memory_space<vmem>>) attributes {dimension_semantics = [], scalar_prefetch = 0 : i64, scratch_operands = 0 : i64, tpu.core_type = #tpu.core_type<tc>} {
    %c0 = arith.constant 0 : index
    %c0_0 = arith.constant 0 : index
    %0 = vector.load %arg0[%c0, %c0_0] : memref<24x384xbf16, #tpu.memory_space<vmem>>, vector<24x384xbf16>
    %c0_1 = arith.constant 0 : index
    %c0_2 = arith.constant 0 : index
    %1 = vector.load %arg1[%c0_1, %c0_2] : memref<384x256xbf16, #tpu.memory_space<vmem>>, vector<384x256xbf16>
    %cst = arith.constant dense<0.000000e+00> : vector<24x256xf32>
    %2 = tpu.matmul %0, %1, %cst {dimension_numbers = #tpu.dot_dimension_numbers<[1], [0], [0], [1], [0, 0, 1, 1], [], []>} : vector<24x384xbf16>, vector<384x256xbf16>, vector<24x256xf32> -> vector<24x256xf32>
    %cst_3 = arith.constant dense<0.000000e+00> : vector<256xf32>
    %3 = vector.multi_reduction <add>, %2, %cst_3 [0] : vector<24x256xf32> to vector<256xf32>
    %4 = vector.shape_cast %3 : vector<256xf32> to vector<1x256xf32>
    %cst_4 = arith.constant 0.0416666679 : f32
    %5 = vector.broadcast %cst_4 : f32 to vector<1x256xf32>
    %6 = arith.mulf %4, %5 : vector<1x256xf32>
    %7 = vector.broadcast %6 : vector<1x256xf32> to vector<24x256xf32>
    %8 = arith.subf %2, %7 : vector<24x256xf32>
    %9 = arith.mulf %8, %8 : vector<24x256xf32>
    %cst_5 = arith.constant dense<0.000000e+00> : vector<256xf32>
    %10 = vector.multi_reduction <add>, %9, %cst_5 [0] : vector<24x256xf32> to vector<256xf32>
    %11 = vector.shape_cast %10 : vector<256xf32> to vector<1x256xf32>
    %cst_6 = arith.constant 0.0416666679 : f32
    %12 = vector.broadcast %cst_6 : f32 to vector<1x256xf32>
    %13 = arith.mulf %11, %12 : vector<1x256xf32>
    %cst_7 = arith.constant 9.99999974E-6 : f32
    %14 = vector.broadcast %cst_7 : f32 to vector<1x256xf32>
    %15 = arith.addf %13, %14 : vector<1x256xf32>
    %16 = math.rsqrt %15 : vector<1x256xf32>
    %17 = vector.broadcast %16 : vector<1x256xf32> to vector<24x256xf32>
    %18 = arith.mulf %8, %17 : vector<24x256xf32>
    %c0_8 = arith.constant 0 : index
    %c0_9 = arith.constant 0 : index
    %19 = vector.load %arg2[%c0_8, %c0_9] : memref<1x256xf32, #tpu.memory_space<vmem>>, vector<1x256xf32>
    %20 = vector.broadcast %19 : vector<1x256xf32> to vector<24x256xf32>
    %21 = arith.mulf %18, %20 : vector<24x256xf32>
    %c0_10 = arith.constant 0 : index
    %c0_11 = arith.constant 0 : index
    %22 = vector.load %arg3[%c0_10, %c0_11] : memref<1x256xf32, #tpu.memory_space<vmem>>, vector<1x256xf32>
    %23 = vector.broadcast %22 : vector<1x256xf32> to vector<24x256xf32>
    %24 = arith.addf %21, %23 : vector<24x256xf32>
    %cst_12 = arith.constant 0.000000e+00 : f32
    %25 = vector.broadcast %cst_12 : f32 to vector<24x256xf32>
    %26 = arith.maximumf %24, %25 : vector<24x256xf32>
    %27 = arith.truncf %26 : vector<24x256xf32> to vector<24x256xbf16>
    %c0_13 = arith.constant 0 : index
    %c0_14 = arith.constant 0 : index
    %28 = vector.load %arg4[%c0_13, %c0_14] : memref<256x2048xbf16, #tpu.memory_space<vmem>>, vector<256x2048xbf16>
    %cst_15 = arith.constant dense<0.000000e+00> : vector<24x2048xf32>
    %29 = tpu.matmul %27, %28, %cst_15 {dimension_numbers = #tpu.dot_dimension_numbers<[1], [0], [0], [1], [0, 0, 1, 1], [], []>} : vector<24x256xbf16>, vector<256x2048xbf16>, vector<24x2048xf32> -> vector<24x2048xf32>
    %c0_16 = arith.constant 0 : index
    %c0_17 = arith.constant 0 : index
    %c0_18 = arith.constant 0 : index
    %30 = vector.load %arg5[%c0_16, %c0_17, %c0_18] : memref<16x96x24xf32, #tpu.memory_space<vmem>>, vector<1x96x24xf32>
    %31 = vector.shape_cast %30 : vector<1x96x24xf32> to vector<96x24xf32>
    %32 = vector.extract_strided_slice %29 {offsets = [0, 0], sizes = [24, 128], strides = [1, 1]} : vector<24x2048xf32> to vector<24x128xf32>
    %cst_19 = arith.constant dense<0.000000e+00> : vector<96x128xf32>
    %33 = tpu.matmul %31, %32, %cst_19 {dimension_numbers = #tpu.dot_dimension_numbers<[1], [0], [0], [1], [0, 0, 1, 1], [], []>} : vector<96x24xf32>, vector<24x128xf32>, vector<96x128xf32> -> vector<96x128xf32>
    %c1 = arith.constant 1 : index
    %c0_20 = arith.constant 0 : index
    %c0_21 = arith.constant 0 : index
    %34 = vector.load %arg5[%c1, %c0_20, %c0_21] : memref<16x96x24xf32, #tpu.memory_space<vmem>>, vector<1x96x24xf32>
    %35 = vector.shape_cast %34 : vector<1x96x24xf32> to vector<96x24xf32>
    %36 = vector.extract_strided_slice %29 {offsets = [0, 128], sizes = [24, 128], strides = [1, 1]} : vector<24x2048xf32> to vector<24x128xf32>
    %cst_22 = arith.constant dense<0.000000e+00> : vector<96x128xf32>
    %37 = tpu.matmul %35, %36, %cst_22 {dimension_numbers = #tpu.dot_dimension_numbers<[1], [0], [0], [1], [0, 0, 1, 1], [], []>} : vector<96x24xf32>, vector<24x128xf32>, vector<96x128xf32> -> vector<96x128xf32>
    %38 = arith.addf %33, %37 : vector<96x128xf32>
    %c2 = arith.constant 2 : index
    %c0_23 = arith.constant 0 : index
    %c0_24 = arith.constant 0 : index
    %39 = vector.load %arg5[%c2, %c0_23, %c0_24] : memref<16x96x24xf32, #tpu.memory_space<vmem>>, vector<1x96x24xf32>
    %40 = vector.shape_cast %39 : vector<1x96x24xf32> to vector<96x24xf32>
    %41 = vector.extract_strided_slice %29 {offsets = [0, 256], sizes = [24, 128], strides = [1, 1]} : vector<24x2048xf32> to vector<24x128xf32>
    %cst_25 = arith.constant dense<0.000000e+00> : vector<96x128xf32>
    %42 = tpu.matmul %40, %41, %cst_25 {dimension_numbers = #tpu.dot_dimension_numbers<[1], [0], [0], [1], [0, 0, 1, 1], [], []>} : vector<96x24xf32>, vector<24x128xf32>, vector<96x128xf32> -> vector<96x128xf32>
    %43 = arith.addf %38, %42 : vector<96x128xf32>
    %c3 = arith.constant 3 : index
    %c0_26 = arith.constant 0 : index
    %c0_27 = arith.constant 0 : index
    %44 = vector.load %arg5[%c3, %c0_26, %c0_27] : memref<16x96x24xf32, #tpu.memory_space<vmem>>, vector<1x96x24xf32>
    %45 = vector.shape_cast %44 : vector<1x96x24xf32> to vector<96x24xf32>
    %46 = vector.extract_strided_slice %29 {offsets = [0, 384], sizes = [24, 128], strides = [1, 1]} : vector<24x2048xf32> to vector<24x128xf32>
    %cst_28 = arith.constant dense<0.000000e+00> : vector<96x128xf32>
    %47 = tpu.matmul %45, %46, %cst_28 {dimension_numbers = #tpu.dot_dimension_numbers<[1], [0], [0], [1], [0, 0, 1, 1], [], []>} : vector<96x24xf32>, vector<24x128xf32>, vector<96x128xf32> -> vector<96x128xf32>
    %48 = arith.addf %43, %47 : vector<96x128xf32>
    %c4 = arith.constant 4 : index
    %c0_29 = arith.constant 0 : index
    %c0_30 = arith.constant 0 : index
    %49 = vector.load %arg5[%c4, %c0_29, %c0_30] : memref<16x96x24xf32, #tpu.memory_space<vmem>>, vector<1x96x24xf32>
    %50 = vector.shape_cast %49 : vector<1x96x24xf32> to vector<96x24xf32>
    %51 = vector.extract_strided_slice %29 {offsets = [0, 512], sizes = [24, 128], strides = [1, 1]} : vector<24x2048xf32> to vector<24x128xf32>
    %cst_31 = arith.constant dense<0.000000e+00> : vector<96x128xf32>
    %52 = tpu.matmul %50, %51, %cst_31 {dimension_numbers = #tpu.dot_dimension_numbers<[1], [0], [0], [1], [0, 0, 1, 1], [], []>} : vector<96x24xf32>, vector<24x128xf32>, vector<96x128xf32> -> vector<96x128xf32>
    %53 = arith.addf %48, %52 : vector<96x128xf32>
    %c5 = arith.constant 5 : index
    %c0_32 = arith.constant 0 : index
    %c0_33 = arith.constant 0 : index
    %54 = vector.load %arg5[%c5, %c0_32, %c0_33] : memref<16x96x24xf32, #tpu.memory_space<vmem>>, vector<1x96x24xf32>
    %55 = vector.shape_cast %54 : vector<1x96x24xf32> to vector<96x24xf32>
    %56 = vector.extract_strided_slice %29 {offsets = [0, 640], sizes = [24, 128], strides = [1, 1]} : vector<24x2048xf32> to vector<24x128xf32>
    %cst_34 = arith.constant dense<0.000000e+00> : vector<96x128xf32>
    %57 = tpu.matmul %55, %56, %cst_34 {dimension_numbers = #tpu.dot_dimension_numbers<[1], [0], [0], [1], [0, 0, 1, 1], [], []>} : vector<96x24xf32>, vector<24x128xf32>, vector<96x128xf32> -> vector<96x128xf32>
    %58 = arith.addf %53, %57 : vector<96x128xf32>
    %c6 = arith.constant 6 : index
    %c0_35 = arith.constant 0 : index
    %c0_36 = arith.constant 0 : index
    %59 = vector.load %arg5[%c6, %c0_35, %c0_36] : memref<16x96x24xf32, #tpu.memory_space<vmem>>, vector<1x96x24xf32>
    %60 = vector.shape_cast %59 : vector<1x96x24xf32> to vector<96x24xf32>
    %61 = vector.extract_strided_slice %29 {offsets = [0, 768], sizes = [24, 128], strides = [1, 1]} : vector<24x2048xf32> to vector<24x128xf32>
    %cst_37 = arith.constant dense<0.000000e+00> : vector<96x128xf32>
    %62 = tpu.matmul %60, %61, %cst_37 {dimension_numbers = #tpu.dot_dimension_numbers<[1], [0], [0], [1], [0, 0, 1, 1], [], []>} : vector<96x24xf32>, vector<24x128xf32>, vector<96x128xf32> -> vector<96x128xf32>
    %63 = arith.addf %58, %62 : vector<96x128xf32>
    %c7 = arith.constant 7 : index
    %c0_38 = arith.constant 0 : index
    %c0_39 = arith.constant 0 : index
    %64 = vector.load %arg5[%c7, %c0_38, %c0_39] : memref<16x96x24xf32, #tpu.memory_space<vmem>>, vector<1x96x24xf32>
    %65 = vector.shape_cast %64 : vector<1x96x24xf32> to vector<96x24xf32>
    %66 = vector.extract_strided_slice %29 {offsets = [0, 896], sizes = [24, 128], strides = [1, 1]} : vector<24x2048xf32> to vector<24x128xf32>
    %cst_40 = arith.constant dense<0.000000e+00> : vector<96x128xf32>
    %67 = tpu.matmul %65, %66, %cst_40 {dimension_numbers = #tpu.dot_dimension_numbers<[1], [0], [0], [1], [0, 0, 1, 1], [], []>} : vector<96x24xf32>, vector<24x128xf32>, vector<96x128xf32> -> vector<96x128xf32>
    %68 = arith.addf %63, %67 : vector<96x128xf32>
    %c8 = arith.constant 8 : index
    %c0_41 = arith.constant 0 : index
    %c0_42 = arith.constant 0 : index
    %69 = vector.load %arg5[%c8, %c0_41, %c0_42] : memref<16x96x24xf32, #tpu.memory_space<vmem>>, vector<1x96x24xf32>
    %70 = vector.shape_cast %69 : vector<1x96x24xf32> to vector<96x24xf32>
    %71 = vector.extract_strided_slice %29 {offsets = [0, 1024], sizes = [24, 128], strides = [1, 1]} : vector<24x2048xf32> to vector<24x128xf32>
    %cst_43 = arith.constant dense<0.000000e+00> : vector<96x128xf32>
    %72 = tpu.matmul %70, %71, %cst_43 {dimension_numbers = #tpu.dot_dimension_numbers<[1], [0], [0], [1], [0, 0, 1, 1], [], []>} : vector<96x24xf32>, vector<24x128xf32>, vector<96x128xf32> -> vector<96x128xf32>
    %73 = arith.addf %68, %72 : vector<96x128xf32>
    %c9 = arith.constant 9 : index
    %c0_44 = arith.constant 0 : index
    %c0_45 = arith.constant 0 : index
    %74 = vector.load %arg5[%c9, %c0_44, %c0_45] : memref<16x96x24xf32, #tpu.memory_space<vmem>>, vector<1x96x24xf32>
    %75 = vector.shape_cast %74 : vector<1x96x24xf32> to vector<96x24xf32>
    %76 = vector.extract_strided_slice %29 {offsets = [0, 1152], sizes = [24, 128], strides = [1, 1]} : vector<24x2048xf32> to vector<24x128xf32>
    %cst_46 = arith.constant dense<0.000000e+00> : vector<96x128xf32>
    %77 = tpu.matmul %75, %76, %cst_46 {dimension_numbers = #tpu.dot_dimension_numbers<[1], [0], [0], [1], [0, 0, 1, 1], [], []>} : vector<96x24xf32>, vector<24x128xf32>, vector<96x128xf32> -> vector<96x128xf32>
    %78 = arith.addf %73, %77 : vector<96x128xf32>
    %c10 = arith.constant 10 : index
    %c0_47 = arith.constant 0 : index
    %c0_48 = arith.constant 0 : index
    %79 = vector.load %arg5[%c10, %c0_47, %c0_48] : memref<16x96x24xf32, #tpu.memory_space<vmem>>, vector<1x96x24xf32>
    %80 = vector.shape_cast %79 : vector<1x96x24xf32> to vector<96x24xf32>
    %81 = vector.extract_strided_slice %29 {offsets = [0, 1280], sizes = [24, 128], strides = [1, 1]} : vector<24x2048xf32> to vector<24x128xf32>
    %cst_49 = arith.constant dense<0.000000e+00> : vector<96x128xf32>
    %82 = tpu.matmul %80, %81, %cst_49 {dimension_numbers = #tpu.dot_dimension_numbers<[1], [0], [0], [1], [0, 0, 1, 1], [], []>} : vector<96x24xf32>, vector<24x128xf32>, vector<96x128xf32> -> vector<96x128xf32>
    %83 = arith.addf %78, %82 : vector<96x128xf32>
    %c11 = arith.constant 11 : index
    %c0_50 = arith.constant 0 : index
    %c0_51 = arith.constant 0 : index
    %84 = vector.load %arg5[%c11, %c0_50, %c0_51] : memref<16x96x24xf32, #tpu.memory_space<vmem>>, vector<1x96x24xf32>
    %85 = vector.shape_cast %84 : vector<1x96x24xf32> to vector<96x24xf32>
    %86 = vector.extract_strided_slice %29 {offsets = [0, 1408], sizes = [24, 128], strides = [1, 1]} : vector<24x2048xf32> to vector<24x128xf32>
    %cst_52 = arith.constant dense<0.000000e+00> : vector<96x128xf32>
    %87 = tpu.matmul %85, %86, %cst_52 {dimension_numbers = #tpu.dot_dimension_numbers<[1], [0], [0], [1], [0, 0, 1, 1], [], []>} : vector<96x24xf32>, vector<24x128xf32>, vector<96x128xf32> -> vector<96x128xf32>
    %88 = arith.addf %83, %87 : vector<96x128xf32>
    %c12 = arith.constant 12 : index
    %c0_53 = arith.constant 0 : index
    %c0_54 = arith.constant 0 : index
    %89 = vector.load %arg5[%c12, %c0_53, %c0_54] : memref<16x96x24xf32, #tpu.memory_space<vmem>>, vector<1x96x24xf32>
    %90 = vector.shape_cast %89 : vector<1x96x24xf32> to vector<96x24xf32>
    %91 = vector.extract_strided_slice %29 {offsets = [0, 1536], sizes = [24, 128], strides = [1, 1]} : vector<24x2048xf32> to vector<24x128xf32>
    %cst_55 = arith.constant dense<0.000000e+00> : vector<96x128xf32>
    %92 = tpu.matmul %90, %91, %cst_55 {dimension_numbers = #tpu.dot_dimension_numbers<[1], [0], [0], [1], [0, 0, 1, 1], [], []>} : vector<96x24xf32>, vector<24x128xf32>, vector<96x128xf32> -> vector<96x128xf32>
    %93 = arith.addf %88, %92 : vector<96x128xf32>
    %c13 = arith.constant 13 : index
    %c0_56 = arith.constant 0 : index
    %c0_57 = arith.constant 0 : index
    %94 = vector.load %arg5[%c13, %c0_56, %c0_57] : memref<16x96x24xf32, #tpu.memory_space<vmem>>, vector<1x96x24xf32>
    %95 = vector.shape_cast %94 : vector<1x96x24xf32> to vector<96x24xf32>
    %96 = vector.extract_strided_slice %29 {offsets = [0, 1664], sizes = [24, 128], strides = [1, 1]} : vector<24x2048xf32> to vector<24x128xf32>
    %cst_58 = arith.constant dense<0.000000e+00> : vector<96x128xf32>
    %97 = tpu.matmul %95, %96, %cst_58 {dimension_numbers = #tpu.dot_dimension_numbers<[1], [0], [0], [1], [0, 0, 1, 1], [], []>} : vector<96x24xf32>, vector<24x128xf32>, vector<96x128xf32> -> vector<96x128xf32>
    %98 = arith.addf %93, %97 : vector<96x128xf32>
    %c14 = arith.constant 14 : index
    %c0_59 = arith.constant 0 : index
    %c0_60 = arith.constant 0 : index
    %99 = vector.load %arg5[%c14, %c0_59, %c0_60] : memref<16x96x24xf32, #tpu.memory_space<vmem>>, vector<1x96x24xf32>
    %100 = vector.shape_cast %99 : vector<1x96x24xf32> to vector<96x24xf32>
    %101 = vector.extract_strided_slice %29 {offsets = [0, 1792], sizes = [24, 128], strides = [1, 1]} : vector<24x2048xf32> to vector<24x128xf32>
    %cst_61 = arith.constant dense<0.000000e+00> : vector<96x128xf32>
    %102 = tpu.matmul %100, %101, %cst_61 {dimension_numbers = #tpu.dot_dimension_numbers<[1], [0], [0], [1], [0, 0, 1, 1], [], []>} : vector<96x24xf32>, vector<24x128xf32>, vector<96x128xf32> -> vector<96x128xf32>
    %103 = arith.addf %98, %102 : vector<96x128xf32>
    %c15 = arith.constant 15 : index
    %c0_62 = arith.constant 0 : index
    %c0_63 = arith.constant 0 : index
    %104 = vector.load %arg5[%c15, %c0_62, %c0_63] : memref<16x96x24xf32, #tpu.memory_space<vmem>>, vector<1x96x24xf32>
    %105 = vector.shape_cast %104 : vector<1x96x24xf32> to vector<96x24xf32>
    %106 = vector.extract_strided_slice %29 {offsets = [0, 1920], sizes = [24, 128], strides = [1, 1]} : vector<24x2048xf32> to vector<24x128xf32>
    %cst_64 = arith.constant dense<0.000000e+00> : vector<96x128xf32>
    %107 = tpu.matmul %105, %106, %cst_64 {dimension_numbers = #tpu.dot_dimension_numbers<[1], [0], [0], [1], [0, 0, 1, 1], [], []>} : vector<96x24xf32>, vector<24x128xf32>, vector<96x128xf32> -> vector<96x128xf32>
    %108 = arith.addf %103, %107 : vector<96x128xf32>
    %cst_65 = arith.constant 0.000000e+00 : f32
    %109 = vector.broadcast %cst_65 : f32 to vector<96x128xf32>
    %110 = arith.maximumf %108, %109 : vector<96x128xf32>
    %111 = arith.truncf %110 : vector<96x128xf32> to vector<96x128xbf16>
    %c0_66 = arith.constant 0 : index
    %c0_67 = arith.constant 0 : index
    %112 = vector.load %arg6[%c0_66, %c0_67] : memref<128x2048xbf16, #tpu.memory_space<vmem>>, vector<128x2048xbf16>
    %cst_68 = arith.constant dense<0.000000e+00> : vector<96x2048xf32>
    %113 = tpu.matmul %111, %112, %cst_68 {dimension_numbers = #tpu.dot_dimension_numbers<[1], [0], [0], [1], [0, 0, 1, 1], [], []>} : vector<96x128xbf16>, vector<128x2048xbf16>, vector<96x2048xf32> -> vector<96x2048xf32>
    %c0_69 = arith.constant 0 : index
    %c0_70 = arith.constant 0 : index
    %c0_71 = arith.constant 0 : index
    %114 = vector.load %arg7[%c0_69, %c0_70, %c0_71] : memref<16x384x96xf32, #tpu.memory_space<vmem>>, vector<1x384x96xf32>
    %115 = vector.shape_cast %114 : vector<1x384x96xf32> to vector<384x96xf32>
    %116 = vector.extract_strided_slice %113 {offsets = [0, 0], sizes = [96, 128], strides = [1, 1]} : vector<96x2048xf32> to vector<96x128xf32>
    %cst_72 = arith.constant dense<0.000000e+00> : vector<384x128xf32>
    %117 = tpu.matmul %115, %116, %cst_72 {dimension_numbers = #tpu.dot_dimension_numbers<[1], [0], [0], [1], [0, 0, 1, 1], [], []>} : vector<384x96xf32>, vector<96x128xf32>, vector<384x128xf32> -> vector<384x128xf32>
    %c1_73 = arith.constant 1 : index
    %c0_74 = arith.constant 0 : index
    %c0_75 = arith.constant 0 : index
    %118 = vector.load %arg7[%c1_73, %c0_74, %c0_75] : memref<16x384x96xf32, #tpu.memory_space<vmem>>, vector<1x384x96xf32>
    %119 = vector.shape_cast %118 : vector<1x384x96xf32> to vector<384x96xf32>
    %120 = vector.extract_strided_slice %113 {offsets = [0, 128], sizes = [96, 128], strides = [1, 1]} : vector<96x2048xf32> to vector<96x128xf32>
    %cst_76 = arith.constant dense<0.000000e+00> : vector<384x128xf32>
    %121 = tpu.matmul %119, %120, %cst_76 {dimension_numbers = #tpu.dot_dimension_numbers<[1], [0], [0], [1], [0, 0, 1, 1], [], []>} : vector<384x96xf32>, vector<96x128xf32>, vector<384x128xf32> -> vector<384x128xf32>
    %122 = arith.addf %117, %121 : vector<384x128xf32>
    %c2_77 = arith.constant 2 : index
    %c0_78 = arith.constant 0 : index
    %c0_79 = arith.constant 0 : index
    %123 = vector.load %arg7[%c2_77, %c0_78, %c0_79] : memref<16x384x96xf32, #tpu.memory_space<vmem>>, vector<1x384x96xf32>
    %124 = vector.shape_cast %123 : vector<1x384x96xf32> to vector<384x96xf32>
    %125 = vector.extract_strided_slice %113 {offsets = [0, 256], sizes = [96, 128], strides = [1, 1]} : vector<96x2048xf32> to vector<96x128xf32>
    %cst_80 = arith.constant dense<0.000000e+00> : vector<384x128xf32>
    %126 = tpu.matmul %124, %125, %cst_80 {dimension_numbers = #tpu.dot_dimension_numbers<[1], [0], [0], [1], [0, 0, 1, 1], [], []>} : vector<384x96xf32>, vector<96x128xf32>, vector<384x128xf32> -> vector<384x128xf32>
    %127 = arith.addf %122, %126 : vector<384x128xf32>
    %c3_81 = arith.constant 3 : index
    %c0_82 = arith.constant 0 : index
    %c0_83 = arith.constant 0 : index
    %128 = vector.load %arg7[%c3_81, %c0_82, %c0_83] : memref<16x384x96xf32, #tpu.memory_space<vmem>>, vector<1x384x96xf32>
    %129 = vector.shape_cast %128 : vector<1x384x96xf32> to vector<384x96xf32>
    %130 = vector.extract_strided_slice %113 {offsets = [0, 384], sizes = [96, 128], strides = [1, 1]} : vector<96x2048xf32> to vector<96x128xf32>
    %cst_84 = arith.constant dense<0.000000e+00> : vector<384x128xf32>
    %131 = tpu.matmul %129, %130, %cst_84 {dimension_numbers = #tpu.dot_dimension_numbers<[1], [0], [0], [1], [0, 0, 1, 1], [], []>} : vector<384x96xf32>, vector<96x128xf32>, vector<384x128xf32> -> vector<384x128xf32>
    %132 = arith.addf %127, %131 : vector<384x128xf32>
    %c4_85 = arith.constant 4 : index
    %c0_86 = arith.constant 0 : index
    %c0_87 = arith.constant 0 : index
    %133 = vector.load %arg7[%c4_85, %c0_86, %c0_87] : memref<16x384x96xf32, #tpu.memory_space<vmem>>, vector<1x384x96xf32>
    %134 = vector.shape_cast %133 : vector<1x384x96xf32> to vector<384x96xf32>
    %135 = vector.extract_strided_slice %113 {offsets = [0, 512], sizes = [96, 128], strides = [1, 1]} : vector<96x2048xf32> to vector<96x128xf32>
    %cst_88 = arith.constant dense<0.000000e+00> : vector<384x128xf32>
    %136 = tpu.matmul %134, %135, %cst_88 {dimension_numbers = #tpu.dot_dimension_numbers<[1], [0], [0], [1], [0, 0, 1, 1], [], []>} : vector<384x96xf32>, vector<96x128xf32>, vector<384x128xf32> -> vector<384x128xf32>
    %137 = arith.addf %132, %136 : vector<384x128xf32>
    %c5_89 = arith.constant 5 : index
    %c0_90 = arith.constant 0 : index
    %c0_91 = arith.constant 0 : index
    %138 = vector.load %arg7[%c5_89, %c0_90, %c0_91] : memref<16x384x96xf32, #tpu.memory_space<vmem>>, vector<1x384x96xf32>
    %139 = vector.shape_cast %138 : vector<1x384x96xf32> to vector<384x96xf32>
    %140 = vector.extract_strided_slice %113 {offsets = [0, 640], sizes = [96, 128], strides = [1, 1]} : vector<96x2048xf32> to vector<96x128xf32>
    %cst_92 = arith.constant dense<0.000000e+00> : vector<384x128xf32>
    %141 = tpu.matmul %139, %140, %cst_92 {dimension_numbers = #tpu.dot_dimension_numbers<[1], [0], [0], [1], [0, 0, 1, 1], [], []>} : vector<384x96xf32>, vector<96x128xf32>, vector<384x128xf32> -> vector<384x128xf32>
    %142 = arith.addf %137, %141 : vector<384x128xf32>
    %c6_93 = arith.constant 6 : index
    %c0_94 = arith.constant 0 : index
    %c0_95 = arith.constant 0 : index
    %143 = vector.load %arg7[%c6_93, %c0_94, %c0_95] : memref<16x384x96xf32, #tpu.memory_space<vmem>>, vector<1x384x96xf32>
    %144 = vector.shape_cast %143 : vector<1x384x96xf32> to vector<384x96xf32>
    %145 = vector.extract_strided_slice %113 {offsets = [0, 768], sizes = [96, 128], strides = [1, 1]} : vector<96x2048xf32> to vector<96x128xf32>
    %cst_96 = arith.constant dense<0.000000e+00> : vector<384x128xf32>
    %146 = tpu.matmul %144, %145, %cst_96 {dimension_numbers = #tpu.dot_dimension_numbers<[1], [0], [0], [1], [0, 0, 1, 1], [], []>} : vector<384x96xf32>, vector<96x128xf32>, vector<384x128xf32> -> vector<384x128xf32>
    %147 = arith.addf %142, %146 : vector<384x128xf32>
    %c7_97 = arith.constant 7 : index
    %c0_98 = arith.constant 0 : index
    %c0_99 = arith.constant 0 : index
    %148 = vector.load %arg7[%c7_97, %c0_98, %c0_99] : memref<16x384x96xf32, #tpu.memory_space<vmem>>, vector<1x384x96xf32>
    %149 = vector.shape_cast %148 : vector<1x384x96xf32> to vector<384x96xf32>
    %150 = vector.extract_strided_slice %113 {offsets = [0, 896], sizes = [96, 128], strides = [1, 1]} : vector<96x2048xf32> to vector<96x128xf32>
    %cst_100 = arith.constant dense<0.000000e+00> : vector<384x128xf32>
    %151 = tpu.matmul %149, %150, %cst_100 {dimension_numbers = #tpu.dot_dimension_numbers<[1], [0], [0], [1], [0, 0, 1, 1], [], []>} : vector<384x96xf32>, vector<96x128xf32>, vector<384x128xf32> -> vector<384x128xf32>
    %152 = arith.addf %147, %151 : vector<384x128xf32>
    %c8_101 = arith.constant 8 : index
    %c0_102 = arith.constant 0 : index
    %c0_103 = arith.constant 0 : index
    %153 = vector.load %arg7[%c8_101, %c0_102, %c0_103] : memref<16x384x96xf32, #tpu.memory_space<vmem>>, vector<1x384x96xf32>
    %154 = vector.shape_cast %153 : vector<1x384x96xf32> to vector<384x96xf32>
    %155 = vector.extract_strided_slice %113 {offsets = [0, 1024], sizes = [96, 128], strides = [1, 1]} : vector<96x2048xf32> to vector<96x128xf32>
    %cst_104 = arith.constant dense<0.000000e+00> : vector<384x128xf32>
    %156 = tpu.matmul %154, %155, %cst_104 {dimension_numbers = #tpu.dot_dimension_numbers<[1], [0], [0], [1], [0, 0, 1, 1], [], []>} : vector<384x96xf32>, vector<96x128xf32>, vector<384x128xf32> -> vector<384x128xf32>
    %157 = arith.addf %152, %156 : vector<384x128xf32>
    %c9_105 = arith.constant 9 : index
    %c0_106 = arith.constant 0 : index
    %c0_107 = arith.constant 0 : index
    %158 = vector.load %arg7[%c9_105, %c0_106, %c0_107] : memref<16x384x96xf32, #tpu.memory_space<vmem>>, vector<1x384x96xf32>
    %159 = vector.shape_cast %158 : vector<1x384x96xf32> to vector<384x96xf32>
    %160 = vector.extract_strided_slice %113 {offsets = [0, 1152], sizes = [96, 128], strides = [1, 1]} : vector<96x2048xf32> to vector<96x128xf32>
    %cst_108 = arith.constant dense<0.000000e+00> : vector<384x128xf32>
    %161 = tpu.matmul %159, %160, %cst_108 {dimension_numbers = #tpu.dot_dimension_numbers<[1], [0], [0], [1], [0, 0, 1, 1], [], []>} : vector<384x96xf32>, vector<96x128xf32>, vector<384x128xf32> -> vector<384x128xf32>
    %162 = arith.addf %157, %161 : vector<384x128xf32>
    %c10_109 = arith.constant 10 : index
    %c0_110 = arith.constant 0 : index
    %c0_111 = arith.constant 0 : index
    %163 = vector.load %arg7[%c10_109, %c0_110, %c0_111] : memref<16x384x96xf32, #tpu.memory_space<vmem>>, vector<1x384x96xf32>
    %164 = vector.shape_cast %163 : vector<1x384x96xf32> to vector<384x96xf32>
    %165 = vector.extract_strided_slice %113 {offsets = [0, 1280], sizes = [96, 128], strides = [1, 1]} : vector<96x2048xf32> to vector<96x128xf32>
    %cst_112 = arith.constant dense<0.000000e+00> : vector<384x128xf32>
    %166 = tpu.matmul %164, %165, %cst_112 {dimension_numbers = #tpu.dot_dimension_numbers<[1], [0], [0], [1], [0, 0, 1, 1], [], []>} : vector<384x96xf32>, vector<96x128xf32>, vector<384x128xf32> -> vector<384x128xf32>
    %167 = arith.addf %162, %166 : vector<384x128xf32>
    %c11_113 = arith.constant 11 : index
    %c0_114 = arith.constant 0 : index
    %c0_115 = arith.constant 0 : index
    %168 = vector.load %arg7[%c11_113, %c0_114, %c0_115] : memref<16x384x96xf32, #tpu.memory_space<vmem>>, vector<1x384x96xf32>
    %169 = vector.shape_cast %168 : vector<1x384x96xf32> to vector<384x96xf32>
    %170 = vector.extract_strided_slice %113 {offsets = [0, 1408], sizes = [96, 128], strides = [1, 1]} : vector<96x2048xf32> to vector<96x128xf32>
    %cst_116 = arith.constant dense<0.000000e+00> : vector<384x128xf32>
    %171 = tpu.matmul %169, %170, %cst_116 {dimension_numbers = #tpu.dot_dimension_numbers<[1], [0], [0], [1], [0, 0, 1, 1], [], []>} : vector<384x96xf32>, vector<96x128xf32>, vector<384x128xf32> -> vector<384x128xf32>
    %172 = arith.addf %167, %171 : vector<384x128xf32>
    %c12_117 = arith.constant 12 : index
    %c0_118 = arith.constant 0 : index
    %c0_119 = arith.constant 0 : index
    %173 = vector.load %arg7[%c12_117, %c0_118, %c0_119] : memref<16x384x96xf32, #tpu.memory_space<vmem>>, vector<1x384x96xf32>
    %174 = vector.shape_cast %173 : vector<1x384x96xf32> to vector<384x96xf32>
    %175 = vector.extract_strided_slice %113 {offsets = [0, 1536], sizes = [96, 128], strides = [1, 1]} : vector<96x2048xf32> to vector<96x128xf32>
    %cst_120 = arith.constant dense<0.000000e+00> : vector<384x128xf32>
    %176 = tpu.matmul %174, %175, %cst_120 {dimension_numbers = #tpu.dot_dimension_numbers<[1], [0], [0], [1], [0, 0, 1, 1], [], []>} : vector<384x96xf32>, vector<96x128xf32>, vector<384x128xf32> -> vector<384x128xf32>
    %177 = arith.addf %172, %176 : vector<384x128xf32>
    %c13_121 = arith.constant 13 : index
    %c0_122 = arith.constant 0 : index
    %c0_123 = arith.constant 0 : index
    %178 = vector.load %arg7[%c13_121, %c0_122, %c0_123] : memref<16x384x96xf32, #tpu.memory_space<vmem>>, vector<1x384x96xf32>
    %179 = vector.shape_cast %178 : vector<1x384x96xf32> to vector<384x96xf32>
    %180 = vector.extract_strided_slice %113 {offsets = [0, 1664], sizes = [96, 128], strides = [1, 1]} : vector<96x2048xf32> to vector<96x128xf32>
    %cst_124 = arith.constant dense<0.000000e+00> : vector<384x128xf32>
    %181 = tpu.matmul %179, %180, %cst_124 {dimension_numbers = #tpu.dot_dimension_numbers<[1], [0], [0], [1], [0, 0, 1, 1], [], []>} : vector<384x96xf32>, vector<96x128xf32>, vector<384x128xf32> -> vector<384x128xf32>
    %182 = arith.addf %177, %181 : vector<384x128xf32>
    %c14_125 = arith.constant 14 : index
    %c0_126 = arith.constant 0 : index
    %c0_127 = arith.constant 0 : index
    %183 = vector.load %arg7[%c14_125, %c0_126, %c0_127] : memref<16x384x96xf32, #tpu.memory_space<vmem>>, vector<1x384x96xf32>
    %184 = vector.shape_cast %183 : vector<1x384x96xf32> to vector<384x96xf32>
    %185 = vector.extract_strided_slice %113 {offsets = [0, 1792], sizes = [96, 128], strides = [1, 1]} : vector<96x2048xf32> to vector<96x128xf32>
    %cst_128 = arith.constant dense<0.000000e+00> : vector<384x128xf32>
    %186 = tpu.matmul %184, %185, %cst_128 {dimension_numbers = #tpu.dot_dimension_numbers<[1], [0], [0], [1], [0, 0, 1, 1], [], []>} : vector<384x96xf32>, vector<96x128xf32>, vector<384x128xf32> -> vector<384x128xf32>
    %187 = arith.addf %182, %186 : vector<384x128xf32>
    %c15_129 = arith.constant 15 : index
    %c0_130 = arith.constant 0 : index
    %c0_131 = arith.constant 0 : index
    %188 = vector.load %arg7[%c15_129, %c0_130, %c0_131] : memref<16x384x96xf32, #tpu.memory_space<vmem>>, vector<1x384x96xf32>
    %189 = vector.shape_cast %188 : vector<1x384x96xf32> to vector<384x96xf32>
    %190 = vector.extract_strided_slice %113 {offsets = [0, 1920], sizes = [96, 128], strides = [1, 1]} : vector<96x2048xf32> to vector<96x128xf32>
    %cst_132 = arith.constant dense<0.000000e+00> : vector<384x128xf32>
    %191 = tpu.matmul %189, %190, %cst_132 {dimension_numbers = #tpu.dot_dimension_numbers<[1], [0], [0], [1], [0, 0, 1, 1], [], []>} : vector<384x96xf32>, vector<96x128xf32>, vector<384x128xf32> -> vector<384x128xf32>
    %192 = arith.addf %187, %191 : vector<384x128xf32>
    %193 = tpu.iota {dimensions = array<i32: 1>} : vector<384x128xi32>
    %c4_i32 = arith.constant 4 : i32
    %194 = vector.broadcast %c4_i32 : i32 to vector<384x128xi32>
    %195 = arith.cmpi slt, %193, %194 : vector<384x128xi32>
    %cst_133 = arith.constant -1.000000e+30 : f32
    %196 = vector.broadcast %cst_133 : f32 to vector<384x128xf32>
    %197 = arith.select %195, %192, %196 : vector<384x128xi1>, vector<384x128xf32>
    %cst_134 = arith.constant dense<0xFF800000> : vector<384xf32>
    %198 = vector.multi_reduction <maximumf>, %197, %cst_134 [1] : vector<384x128xf32> to vector<384xf32>
    %199 = vector.shape_cast %198 : vector<384xf32> to vector<384x1xf32>
    %200 = vector.broadcast %199 : vector<384x1xf32> to vector<384x128xf32>
    %201 = arith.subf %197, %200 : vector<384x128xf32>
    %202 = math.exp %201 : vector<384x128xf32>
    %cst_135 = arith.constant dense<0.000000e+00> : vector<384xf32>
    %203 = vector.multi_reduction <add>, %202, %cst_135 [1] : vector<384x128xf32> to vector<384xf32>
    %204 = vector.shape_cast %203 : vector<384xf32> to vector<384x1xf32>
    %205 = vector.broadcast %204 : vector<384x1xf32> to vector<384x128xf32>
    %206 = arith.divf %202, %205 : vector<384x128xf32>
    %c0_136 = arith.constant 0 : index
    %c0_137 = arith.constant 0 : index
    %207 = vector.load %arg8[%c0_136, %c0_137] : memref<384x128xf32, #tpu.memory_space<vmem>>, vector<384x128xf32>
    tpu.vector_store %arg8[%c0_136, %c0_137], %206 {strides = array<i32>} : memref<384x128xf32, #tpu.memory_space<vmem>>, vector<384x128xf32>,
    return
  }
}

</mosaic_0001>

<bundles_post_ra>
// kernel: a_call__.1
= control target key start
LH: loop header
LB: loop body
LE: loop exit
PB: predicated region body
PF: predicated region fallthrough
CT: control target
= control target key end

     0   :  { %13 = vsyncpa [#allocation3], 0  ;;  %s23082_s27 = smov [#allocation2]   ;;  %s29117_s0 = inlined_call_operand.vmem [shape: bf16[24,384], index: 0, kind: input, shape index: {}]   ;;  %s29118_s1 = inlined_call_operand.vmem [shape: bf16[384,256], index: 1, kind: input, shape index: {}]   ;;  %s29119_s2 = inlined_call_operand.vmem [shape: f32[1,256], index: 2, kind: input, shape index: {}]   ;;  %s29120_s3 = inlined_call_operand.vmem [shape: f32[1,256], index: 3, kind: input, shape index: {}]   ;;  %s29121_s4 = inlined_call_operand.vmem [shape: bf16[256,2048], index: 4, kind: input, shape index: {}]   ;;  %s29122_s5 = inlined_call_operand.hbm [shape: f32[16,96,24], index: 5, kind: input, shape index: {}]   ;;  %s29123_s6 = inlined_call_operand.vmem [shape: bf16[128,2048], index: 6, kind: input, shape index: {}]   ;;  %s29124_s7 = inlined_call_operand.vmem [shape: f32[16,384,96], index: 7, kind: input, shape index: {}]   ;;  %s29125_s8 = inlined_call_operand.vmem [shape: f32[384,128], index: 8, kind: output, shape index: {}]  }
   0x1   :  { %s29_s28 = sshll.u32 %s23082_s27, 4  ;;  %s23058_s9 = scalar_lea.hbm %s29122_s5, 24576  ;;  %s30_s28 = int_to_ptr.vmem [resolvable:$true] %s29_s28 }
   0x2   :  { %p23059_p0 = scmp.ne.s32.totalorder %s29122_s5, %s23058_s9  ;;  %p23062_p1 = scmp.lt.u32.totalorder %s23058_s9, %s29122_s5 }
   0x4   :  { %p23064_p2 = pnand %p23062_p1, %p23059_p0 }
   0x6   :  { %23067 = shalt.err (!%p23064_p2)
}
   0x7   :  { %s23068_s14 = scalar_lea.vmem %s30_s28, 24576  ;;  %p23073_p4 = scmp.lt.s32.totalorder %s30_s28, %s30_s28 }
   0x8   :  { %p23069_p3 = scmp.ne.s32.totalorder %s30_s28, %s23068_s14  ;;  %p23074_p5 = scmp.lt.s32.totalorder %s23068_s14, %s23068_s14 }
   0xa   :  { %p23075_p6 = por %p23074_p5, %p23073_p4 }
   0xc   :  { %p23076_p7 = pnand %p23075_p6, %p23069_p3 }
   0xe   :  { %23079 = shalt.err (!%p23076_p7)
}
   0xf   :  { %s23083_s15 = smov 128   ;;  %s23084_s16 = smov 8  }
  0x10   :  { %35 = dma.hbm_to_vmem [thread:$0]  %s29122_s5, 24576, %s30_s28, [#allocation3], %s23083_s15, %s23083_s15, %s23084_s16  }
  0x11   :  { %23080 = dma.done.wait [#allocation3], 24576  }
  0x12   :  { %23081 = vsyncadd [#allocation3], 4294942720  ;;  %v22783_v0 = vld [vmem:[%s29118_s1 + $0x4] ss:$8 sps:$4 sm:$0xff]   ;;  %v22785_v1 = vld [vmem:[%s29118_s1] ss:$8 sps:$4 sm:$0xff]  }
  0x13   :  { %365 = vmatprep.subr.bf16.mxu0 %v22783_v0  ;;  %v22786_v2 = vld [vmem:[%s29118_s1 + $0x14] ss:$8 sps:$4 sm:$0xff]   ;;  %v22788_v3 = vld [vmem:[%s29118_s1 + $0x10] ss:$8 sps:$4 sm:$0xff]   ;;  %v22789_v4 = vld [vmem:[%s29118_s1 + $0x24] ss:$8 sps:$4 sm:$0xff]  }
  0x14   :  { %366 = vmatpush1.bf16.msra.mxu0 %v22785_v1  ;;  %v22791_v5 = vld [vmem:[%s29118_s1 + $0x20] ss:$8 sps:$4 sm:$0xff]   ;;  %v22792_v6 = vld [vmem:[%s29118_s1 + $0x34] ss:$8 sps:$4 sm:$0xff]   ;;  %v22794_v7 = vld [vmem:[%s29118_s1 + $0x30] ss:$8 sps:$4 sm:$0xff]  }
  0x15   :  { %367 = vmatprep.subr.bf16.mxu0 %v22786_v2  ;;  %v22795_v8 = vld [vmem:[%s29118_s1 + $0x44] ss:$8 sps:$4 sm:$0xff]   ;;  %v22797_v9 = vld [vmem:[%s29118_s1 + $0x40] ss:$8 sps:$4 sm:$0xff]   ;;  %v22798_v10 = vld [vmem:[%s29118_s1 + $0x54] ss:$8 sps:$4 sm:$0xff]  }
  0x16   :  { %v22800_v11 = vld [vmem:[%s29118_s1 + $0x50] ss:$8 sps:$4 sm:$0xff]   ;;  %v22801_v12 = vld [vmem:[%s29118_s1 + $0x64] ss:$8 sps:$4 sm:$0xff]   ;;  %v22803_v14 = vld [vmem:[%s29118_s1 + $0x60] ss:$8 sps:$4 sm:$0xff]  }
  0x17   :  { %v22833_v13 = vld [vmem:[%s29117_s0 + $0x4] ss:$12 sps:$4 sm:$0xff]   ;;  %v22804_v15 = vld [vmem:[%s29118_s1 + $0x74] ss:$8 sps:$4 sm:$0xff]   ;;  %v22809_v18 = vld [vmem:[%s29118_s1 + $0x80] ss:$8 sps:$4 sm:$0xff]  }
  0x18   :  { %368 = vmatpush1.bf16.msra.mxu0 %v22788_v3  ;;  %397 = vmatprep.mubr.bf16.mxu0 %v22833_v13  ;;  %v22806_v16 = vld [vmem:[%s29118_s1 + $0x70] ss:$8 sps:$4 sm:$0xff]   ;;  %v22807_v17 = vld [vmem:[%s29118_s1 + $0x84] ss:$8 sps:$4 sm:$0xff]   ;;  %v22810_v19 = vld [vmem:[%s29118_s1 + $0x94] ss:$8 sps:$4 sm:$0xff]  }
  0x19   :  { %369 = vmatprep.subr.bf16.mxu0 %v22789_v4  ;;  %v22812_v20 = vld [vmem:[%s29118_s1 + $0x90] ss:$8 sps:$4 sm:$0xff]   ;;  %v22813_v21 = vld [vmem:[%s29118_s1 + $0xa4] ss:$8 sps:$4 sm:$0xff]   ;;  %v22815_v22 = vld [vmem:[%s29118_s1 + $0xa0] ss:$8 sps:$4 sm:$0xff]  }
  0x1a   :  { %v22816_v23 = vld [vmem:[%s29118_s1 + $0xb4] ss:$8 sps:$4 sm:$0xff]   ;;  %v22818_v24 = vld [vmem:[%s29118_s1 + $0xb0] ss:$8 sps:$4 sm:$0xff]   ;;  %v22819_v25 = vld [vmem:[%s29118_s1 + $0xc4] ss:$8 sps:$4 sm:$0xff]  }
  0x1b   :  { %v22821_v26 = vld [vmem:[%s29118_s1 + $0xc0] ss:$8 sps:$4 sm:$0xff]   ;;  %v22822_v27 = vld [vmem:[%s29118_s1 + $0xd4] ss:$8 sps:$4 sm:$0xff]   ;;  %v22824_v28 = vld [vmem:[%s29118_s1 + $0xd0] ss:$8 sps:$4 sm:$0xff]  }
  0x1c   :  { %370 = vmatpush1.bf16.msra.mxu0 %v22791_v5  ;;  %v22825_v29 = vld [vmem:[%s29118_s1 + $0xe4] ss:$8 sps:$4 sm:$0xff]   ;;  %v22827_v30 = vld [vmem:[%s29118_s1 + $0xe0] ss:$8 sps:$4 sm:$0xff]   ;;  %v22828_v31 = vld [vmem:[%s29118_s1 + $0xf4] ss:$8 sps:$4 sm:$0xff]  }
  0x1d   :  { %371 = vmatprep.subr.bf16.mxu0 %v22792_v6  ;;  %v22830_v32 = vld [vmem:[%s29118_s1 + $0xf0] ss:$8 sps:$4 sm:$0xff]   ;;  %v22836_v33 = vld [vmem:[%s29118_s1 + $0x104] ss:$8 sps:$4 sm:$0xff]   ;;  %v22834_v36 = vld [vmem:[%s29118_s1 + $0x100] ss:$8 sps:$4 sm:$0xff]  }
  0x1e   :  { %v48_v34 = vld [vmem:[%s29117_s0 + $0x18] sm:$0xff]  ;;  %v22831_v35 = vld [vmem:[%s29117_s0] ss:$12 sps:$4 sm:$0xff]   ;;  %v23085_v45 = vmov 0   ;;  %v22860_v54 = vld [vmem:[%s29117_s0 + $0x8] ss:$12 sps:$4 sm:$0xff]  }
  0x1f   :  { %v16177_v37 = vcombine.high %v48_v34, %v48_v34  ;;  %v22839_v38 = vld [vmem:[%s29118_s1 + $0x114] ss:$8 sps:$4 sm:$0xff]   ;;  %v22837_v39 = vld [vmem:[%s29118_s1 + $0x110] ss:$8 sps:$4 sm:$0xff]   ;;  %v22842_v40 = vld [vmem:[%s29118_s1 + $0x124] ss:$8 sps:$4 sm:$0xff]   ;;  %v16176_v41 = vcombine.low %v48_v34, %v48_v34 }
  0x20   :  { %372 = vmatpush1.bf16.msra.mxu0 %v22794_v7  ;;  %v22840_v42 = vld [vmem:[%s29118_s1 + $0x120] ss:$8 sps:$4 sm:$0xff]   ;;  %v22845_v43 = vld [vmem:[%s29118_s1 + $0x134] ss:$8 sps:$4 sm:$0xff]   ;;  %v22843_v44 = vld [vmem:[%s29118_s1 + $0x130] ss:$8 sps:$4 sm:$0xff]  }
  0x21   :  { %373 = vmatprep.subr.bf16.mxu0 %v22795_v8  ;;  %v22848_v46 = vld [vmem:[%s29118_s1 + $0x144] ss:$8 sps:$4 sm:$0xff]   ;;  %v22846_v47 = vld [vmem:[%s29118_s1 + $0x140] ss:$8 sps:$4 sm:$0xff]   ;;  %v22851_v48 = vld [vmem:[%s29118_s1 + $0x154] ss:$8 sps:$4 sm:$0xff]  }
  0x22   :  { %v22849_v49 = vld [vmem:[%s29118_s1 + $0x150] ss:$8 sps:$4 sm:$0xff]   ;;  %v22856_v50 = vld [vmem:[%s29118_s1 + $0x164] ss:$8 sps:$4 sm:$0xff]   ;;  %v22854_v51 = vld [vmem:[%s29118_s1 + $0x160] ss:$8 sps:$4 sm:$0xff]  }
  0x23   :  { %v22859_v52 = vld [vmem:[%s29118_s1 + $0x174] ss:$8 sps:$4 sm:$0xff]   ;;  %v22857_v53 = vld [vmem:[%s29118_s1 + $0x170] ss:$8 sps:$4 sm:$0xff]   ;;  %v22861_v55 = vld [vmem:[%s29117_s0 + $0x20] ss:$0 sps:$4 sm:$0xff]  }
  0x24   :  { %374 = vmatpush1.bf16.msra.mxu0 %v22797_v9  ;;  %v571_v56 = vld [vmem:[%s29121_s4] sm:$0xff]  ;;  %v573_v58 = vld [vmem:[%s29121_s4 + $0x10] sm:$0xff]  ;;  %vm2540_vm0 = vcmask 195584   ;;  %vm7094_vm1 = vcmask 785408  }
  0x25   :  { %375 = vmatprep.subr.bf16.mxu0 %v22798_v10  ;;  %v579_v57 = vld [vmem:[%s29121_s4 + $0x40] sm:$0xff]  ;;  %v581_v60 = vld [vmem:[%s29121_s4 + $0x50] sm:$0xff] }
  0x26   :  { %v16228_v59 = vcombine.high %v571_v56, %v579_v57  ;;  %v16231_v61 = vcombine.low %v573_v58, %v581_v60  ;;  %v16232_v62 = vcombine.high %v573_v58, %v581_v60  ;;  %v16227_v63 = vcombine.low %v571_v56, %v579_v57  ;;  %v587_v0 = vld [vmem:[%s29121_s4 + $0x80] sm:$0xff]  ;;  %v589_v2 = vld [vmem:[%s29121_s4 + $0x90] sm:$0xff] }
  0x27   :  { %v595_v1 = vld [vmem:[%s29121_s4 + $0xc0] sm:$0xff]  ;;  %v597_v4 = vld [vmem:[%s29121_s4 + $0xd0] sm:$0xff] }
  0x28   :  { %376 = vmatpush1.bf16.msra.mxu0 %v22800_v11  ;;  %2107 = vmatprep.subr.bf16.mxu1 %v16228_v59  ;;  %v16244_v3 = vcombine.high %v587_v0, %v595_v1  ;;  %v16247_v5 = vcombine.low %v589_v2, %v597_v4  ;;  %v16248_v6 = vcombine.high %v589_v2, %v597_v4  ;;  %v603_v8 = vld [vmem:[%s29121_s4 + $0x100] sm:$0xff]  ;;  %v605_v10 = vld [vmem:[%s29121_s4 + $0x110] sm:$0xff] }
  0x29   :  { %377 = vmatprep.subr.bf16.mxu0 %v22801_v12  ;;  %2108 = vmatpush1.bf16.msra.mxu1 %v16227_v63  ;;  %v16243_v7 = vcombine.low %v587_v0, %v595_v1  ;;  %v611_v9 = vld [vmem:[%s29121_s4 + $0x140] sm:$0xff]  ;;  %v613_v12 = vld [vmem:[%s29121_s4 + $0x150] sm:$0xff] }
  0x2a   :  { %2109 = vmatprep.subr.bf16.mxu1 %v16244_v3  ;;  %v16260_v11 = vcombine.high %v603_v8, %v611_v9  ;;  %v16263_v13 = vcombine.low %v605_v10, %v613_v12  ;;  %v653_v34 = vld [vmem:[%s29121_s4 + $0x290] sm:$0xff]  ;;  %v699_v57 = vld [vmem:[%s29121_s4 + $0x400] sm:$0xff] }
  0x2b   :  { %v707_v58 = vld [vmem:[%s29121_s4 + $0x440] sm:$0xff]  ;;  %v701_v59 = vld [vmem:[%s29121_s4 + $0x410] sm:$0xff] }
  0x2c   :  { %378 = vmatpush1.bf16.msra.mxu0 %v22803_v14  ;;  %v16264_v14 = vcombine.high %v605_v10, %v613_v12  ;;  %v16356_v60 = vcombine.high %v699_v57, %v707_v58  ;;  %v16355_v0 = vcombine.low %v699_v57, %v707_v58  ;;  %v715_v1 = vld [vmem:[%s29121_s4 + $0x480] sm:$0xff]  ;;  %v717_v3 = vld [vmem:[%s29121_s4 + $0x490] sm:$0xff]  ;;  %v23499_v58 = vld [vmem:[%s29121_s4 + $0x8] sm:$0xff] }
  0x2d   :  { %379 = vmatprep.subr.bf16.mxu0 %v22804_v15  ;;  %2110 = vmatpush1.bf16.msra.mxu1 %v16243_v7  ;;  %v16259_v15 = vcombine.low %v603_v8, %v611_v9  ;;  %v723_v2 = vld [vmem:[%s29121_s4 + $0x4c0] sm:$0xff] }
  0x2e   :  { %2111 = vmatprep.subr.bf16.mxu1 %v16260_v11  ;;  %v16372_v4 = vcombine.high %v715_v1, %v723_v2  ;;  %v16371_v8 = vcombine.low %v715_v1, %v723_v2  ;;  %v731_v9 = vld [vmem:[%s29121_s4 + $0x500] sm:$0xff]  ;;  %v733_v11 = vld [vmem:[%s29121_s4 + $0x510] sm:$0xff] }
  0x2f   :  { %v739_v10 = vld [vmem:[%s29121_s4 + $0x540] sm:$0xff] }
  0x30   :  { %380 = vmatpush1.bf16.msra.mxu0 %v22806_v16  ;;  %v619_v16 = vld [vmem:[%s29121_s4 + $0x180] sm:$0xff]  ;;  %v16388_v12 = vcombine.high %v731_v9, %v739_v10 }
  0x31   :  { %381 = vmatprep.subr.bf16.mxu0 %v22807_v17  ;;  %2112 = vmatpush1.bf16.msra.mxu1 %v16259_v15  ;;  %v627_v17 = vld [vmem:[%s29121_s4 + $0x1c0] sm:$0xff] }
  0x34   :  { %382 = vmatpush1.bf16.msra.mxu0 %v22809_v18  ;;  %v621_v18 = vld [vmem:[%s29121_s4 + $0x190] sm:$0xff] }
  0x35   :  { %383 = vmatprep.subr.bf16.mxu0 %v22810_v19  ;;  %v16276_v19 = vcombine.high %v619_v16, %v627_v17 }
  0x37   :  { %2113 = vmatprep.subr.bf16.mxu1 %v16276_v19  ;;  %v749_v19 = vld [vmem:[%s29121_s4 + $0x590] sm:$0xff] }
  0x38   :  { %384 = vmatpush1.bf16.msra.mxu0 %v22812_v20  ;;  %v629_v20 = vld [vmem:[%s29121_s4 + $0x1d0] sm:$0xff] }
  0x39   :  { %385 = vmatprep.subr.bf16.mxu0 %v22813_v21  ;;  %v16279_v21 = vcombine.low %v621_v18, %v629_v20 }
  0x3c   :  { %386 = vmatpush1.bf16.msra.mxu0 %v22815_v22  ;;  %v16280_v22 = vcombine.high %v621_v18, %v629_v20  ;;  %v755_v18 = vld [vmem:[%s29121_s4 + $0x5c0] sm:$0xff] }
  0x3d   :  { %387 = vmatprep.subr.bf16.mxu0 %v22816_v23  ;;  %v16275_v23 = vcombine.low %v619_v16, %v627_v17  ;;  %v16387_v16 = vcombine.low %v731_v9, %v739_v10  ;;  %v747_v17 = vld [vmem:[%s29121_s4 + $0x580] sm:$0xff] }
  0x3e   :  { %v16404_v20 = vcombine.high %v747_v17, %v755_v18 }
  0x3f   :  { %2114 = vmatpush1.bf16.msra.mxu1 %v16275_v23 }
  0x40   :  { %388 = vmatpush1.bf16.msra.mxu0 %v22818_v24  ;;  %v635_v24 = vld [vmem:[%s29121_s4 + $0x200] sm:$0xff] }
  0x41   :  { %389 = vmatprep.subr.bf16.mxu0 %v22819_v25  ;;  %v643_v25 = vld [vmem:[%s29121_s4 + $0x240] sm:$0xff] }
  0x44   :  { %390 = vmatpush1.bf16.msra.mxu0 %v22821_v26  ;;  %v637_v26 = vld [vmem:[%s29121_s4 + $0x210] sm:$0xff] }
  0x45   :  { %391 = vmatprep.subr.bf16.mxu0 %v22822_v27  ;;  %v16292_v27 = vcombine.high %v635_v24, %v643_v25 }
  0x47   :  { %2115 = vmatprep.subr.bf16.mxu1 %v16292_v27  ;;  %v765_v27 = vld [vmem:[%s29121_s4 + $0x610] sm:$0xff] }
  0x48   :  { %392 = vmatpush1.bf16.msra.mxu0 %v22824_v28  ;;  %v645_v28 = vld [vmem:[%s29121_s4 + $0x250] sm:$0xff] }
  0x49   :  { %393 = vmatprep.subr.bf16.mxu0 %v22825_v29  ;;  %v16295_v29 = vcombine.low %v637_v26, %v645_v28 }
  0x4c   :  { %394 = vmatpush1.bf16.msra.mxu0 %v22827_v30  ;;  %v16296_v30 = vcombine.high %v637_v26, %v645_v28  ;;  %v771_v26 = vld [vmem:[%s29121_s4 + $0x640] sm:$0xff] }
  0x4d   :  { %395 = vmatprep.subr.bf16.mxu0 %v22828_v31  ;;  %v16291_v31 = vcombine.low %v635_v24, %v643_v25  ;;  %v16403_v24 = vcombine.low %v747_v17, %v755_v18  ;;  %v763_v25 = vld [vmem:[%s29121_s4 + $0x600] sm:$0xff] }
  0x4e   :  { %v16420_v28 = vcombine.high %v763_v25, %v771_v26 }
  0x4f   :  { %2116 = vmatpush1.bf16.msra.mxu1 %v16291_v31 }
  0x50   :  { %396 = vmatpush1.bf16.msra.mxu0 %v22830_v32  ;;  %v651_v32 = vld [vmem:[%s29121_s4 + $0x280] sm:$0xff] }
  0x51   :  { %416 = vmatprep.subr.bf16.mxu0 %v22836_v33  ;;  %v659_v33 = vld [vmem:[%s29121_s4 + $0x2c0] sm:$0xff] }
  0x53   :  { %398 = vmatmul.mubr.bf16.vlgmr.msra.gmra.mrb[0].mxu0 %v22831_v35  ;;  %v16308_v35 = vcombine.high %v651_v32, %v659_v33 }
  0x54   :  { %417 = vmatpush1.bf16.msra.mxu0 %v22834_v36  ;;  %407 = vmatprep.mubr.bf16.mxu0 %v16177_v37  ;;  %v661_v36 = vld [vmem:[%s29121_s4 + $0x2d0] sm:$0xff] }
  0x55   :  { %418 = vmatprep.subr.bf16.mxu0 %v22839_v38  ;;  %v16311_v37 = vcombine.low %v653_v34, %v661_v36  ;;  %v16312_v38 = vcombine.high %v653_v34, %v661_v36  ;;  %2117 = vmatprep.subr.bf16.mxu1 %v16308_v35  ;;  %v787_v34 = vld [vmem:[%s29121_s4 + $0x6c0] sm:$0xff]  ;;  %v781_v35 = vld [vmem:[%s29121_s4 + $0x690] sm:$0xff] }
  0x58   :  { %419 = vmatpush1.bf16.msra.mxu0 %v22837_v39  ;;  %v16307_v39 = vcombine.low %v651_v32, %v659_v33  ;;  %v16419_v32 = vcombine.low %v763_v25, %v771_v26  ;;  %v779_v33 = vld [vmem:[%s29121_s4 + $0x680] sm:$0xff] }
  0x59   :  { %420 = vmatprep.subr.bf16.mxu0 %v22842_v40  ;;  %v667_v40 = vld [vmem:[%s29121_s4 + $0x300] sm:$0xff]  ;;  %v16436_v36 = vcombine.high %v779_v33, %v787_v34 }
  0x5a   :  { %2118 = vmatpush1.bf16.msra.mxu1 %v16307_v39 }
  0x5b   :  { %408 = vmatmul.mubr.bf16.gmra.mrb[4].mxu0 %v16176_v41  ;;  %v675_v41 = vld [vmem:[%s29121_s4 + $0x340] sm:$0xff] }
  0x5c   :  { %421 = vmatpush1.bf16.msra.mxu0 %v22840_v42  ;;  %448 = vmatprep.mubr.bf16.mxu0 %v23085_v45  ;;  %v669_v42 = vld [vmem:[%s29121_s4 + $0x310] sm:$0xff] }
  0x5d   :  { %422 = vmatprep.subr.bf16.mxu0 %v22845_v43  ;;  %v16324_v43 = vcombine.high %v667_v40, %v675_v41 }
  0x5f   :  { %2119 = vmatprep.subr.bf16.mxu1 %v16324_v43  ;;  %v797_v43 = vld [vmem:[%s29121_s4 + $0x710] sm:$0xff] }
  0x60   :  { %423 = vmatpush1.bf16.msra.mxu0 %v22843_v44  ;;  %v677_v44 = vld [vmem:[%s29121_s4 + $0x350] sm:$0xff] }
  0x61   :  { %424 = vmatprep.subr.bf16.mxu0 %v22848_v46  ;;  %v16327_v46 = vcombine.low %v669_v42, %v677_v44 }
  0x64   :  { %425 = vmatpush1.bf16.msra.mxu0 %v22846_v47  ;;  %v16328_v47 = vcombine.high %v669_v42, %v677_v44  ;;  %v803_v42 = vld [vmem:[%s29121_s4 + $0x740] sm:$0xff] }
  0x65   :  { %426 = vmatprep.subr.bf16.mxu0 %v22851_v48  ;;  %v16323_v48 = vcombine.low %v667_v40, %v675_v41  ;;  %v16435_v40 = vcombine.low %v779_v33, %v787_v34  ;;  %v795_v41 = vld [vmem:[%s29121_s4 + $0x700] sm:$0xff] }
  0x66   :  { %v16452_v44 = vcombine.high %v795_v41, %v803_v42 }
  0x67   :  { %2120 = vmatpush1.bf16.msra.mxu1 %v16323_v48 }
  0x68   :  { %427 = vmatpush1.bf16.msra.mxu0 %v22849_v49  ;;  %v683_v49 = vld [vmem:[%s29121_s4 + $0x380] sm:$0xff] }
  0x69   :  { %428 = vmatprep.subr.bf16.mxu0 %v22856_v50  ;;  %v691_v50 = vld [vmem:[%s29121_s4 + $0x3c0] sm:$0xff] }
  0x6a   :  { %v16339_v56 = vcombine.low %v683_v49, %v691_v50 }
  0x6c   :  { %429 = vmatpush1.bf16.msra.mxu0 %v22854_v51  ;;  %v685_v51 = vld [vmem:[%s29121_s4 + $0x390] sm:$0xff] }
  0x6d   :  { %430 = vmatprep.subr.bf16.mxu0 %v22859_v52  ;;  %v16340_v52 = vcombine.high %v683_v49, %v691_v50  ;;  %v16451_v49 = vcombine.low %v795_v41, %v803_v42  ;;  %v811_v50 = vld [vmem:[%s29121_s4 + $0x780] sm:$0xff] }
  0x6f   :  { %2121 = vmatprep.subr.bf16.mxu1 %v16340_v52  ;;  %v813_v52 = vld [vmem:[%s29121_s4 + $0x790] sm:$0xff] }
  0x70   :  { %431 = vmatpush1.bf16.msra.mxu0 %v22857_v53  ;;  %v693_v53 = vld [vmem:[%s29121_s4 + $0x3d0] sm:$0xff]  ;;  %2122 = vmatpush1.bf16.msra.mxu1 %v16339_v56 }
  0x71   :  { %2209 = vmatprep.subr.bf16.mxu0 %v16232_v62  ;;  %2123 = vmatprep.subr.bf16.mxu1 %v16356_v60  ;;  %v23509_v60 = vld [vmem:[%s29121_s4 + $0x20] sm:$0xff] }
  0x73   :  { %449 = vmatmul.mubr.bf16.vlgmr.msra.gmra.mrb[0].mxu0 %v22860_v54  ;;  %v16343_v54 = vcombine.low %v685_v51, %v693_v53 }
  0x74   :  { %458 = vmatprep.mubr.bf16.mxu0 %v23085_v45  ;;  %2210 = vmatpush1.bf16.msra.mxu0 %v16231_v61  ;;  %v709_v61 = vld [vmem:[%s29121_s4 + $0x450] sm:$0xff] }
  0x75   :  { %2211 = vmatprep.subr.bf16.mxu0 %v16248_v6  ;;  %v16359_v62 = vcombine.low %v701_v59, %v709_v61  ;;  %v16360_v63 = vcombine.high %v701_v59, %v709_v61  ;;  %2124 = vmatpush1.bf16.msra.mxu1 %v16355_v0  ;;  %v23504_v59 = vld [vmem:[%s29121_s4 + $0x48] sm:$0xff] }
  0x76   :  { %2125 = vmatprep.subr.bf16.mxu1 %v16372_v4  ;;  %v16230_v61 = vcombine.high %v23499_v58, %v23504_v59 }
  0x78   :  { %2212 = vmatpush1.bf16.msra.mxu0 %v16247_v5  ;;  %v725_v5 = vld [vmem:[%s29121_s4 + $0x4d0] sm:$0xff] }
  0x79   :  { %2213 = vmatprep.subr.bf16.mxu0 %v16264_v14  ;;  %v16375_v6 = vcombine.low %v717_v3, %v725_v5  ;;  %v16376_v7 = vcombine.high %v717_v3, %v725_v5  ;;  %2126 = vmatpush1.bf16.msra.mxu1 %v16371_v8 }
  0x7a   :  { %2127 = vmatprep.subr.bf16.mxu1 %v16388_v12 }
  0x7b   :  { %459 = vmatmul.mubr.bf16.gmra.mrb[4].mxu0 %v22861_v55  ;;  %v16344_v55 = vcombine.high %v685_v51, %v693_v53  ;;  %v819_v51 = vld [vmem:[%s29121_s4 + $0x7c0] sm:$0xff] }
  0x7c   :  { %2214 = vmatpush1.bf16.msra.mxu0 %v16263_v13  ;;  %v741_v13 = vld [vmem:[%s29121_s4 + $0x550] sm:$0xff]  ;;  %v16468_v53 = vcombine.high %v811_v50, %v819_v51  ;;  %v16467_v57 = vcombine.low %v811_v50, %v819_v51 }
  0x7d   :  { %2215 = vmatprep.subr.bf16.mxu0 %v16280_v22  ;;  %v16391_v14 = vcombine.low %v733_v11, %v741_v13  ;;  %v16392_v15 = vcombine.high %v733_v11, %v741_v13  ;;  %2128 = vmatpush1.bf16.msra.mxu1 %v16387_v16 }
  0x7e   :  { %2129 = vmatprep.subr.bf16.mxu1 %v16404_v20 }
  0x80   :  { %2216 = vmatpush1.bf16.msra.mxu0 %v16279_v21  ;;  %v757_v21 = vld [vmem:[%s29121_s4 + $0x5d0] sm:$0xff] }
  0x81   :  { %2217 = vmatprep.subr.bf16.mxu0 %v16296_v30  ;;  %v16407_v22 = vcombine.low %v749_v19, %v757_v21  ;;  %v16408_v23 = vcombine.high %v749_v19, %v757_v21  ;;  %2130 = vmatpush1.bf16.msra.mxu1 %v16403_v24 }
  0x82   :  { %2131 = vmatprep.subr.bf16.mxu1 %v16420_v28 }
  0x84   :  { %2218 = vmatpush1.bf16.msra.mxu0 %v16295_v29  ;;  %v773_v29 = vld [vmem:[%s29121_s4 + $0x650] sm:$0xff] }
  0x85   :  { %2219 = vmatprep.subr.bf16.mxu0 %v16312_v38  ;;  %v16423_v30 = vcombine.low %v765_v27, %v773_v29  ;;  %v16424_v31 = vcombine.high %v765_v27, %v773_v29  ;;  %2132 = vmatpush1.bf16.msra.mxu1 %v16419_v32 }
  0x86   :  { %2133 = vmatprep.subr.bf16.mxu1 %v16436_v36 }
  0x88   :  { %2220 = vmatpush1.bf16.msra.mxu0 %v16311_v37  ;;  %v789_v37 = vld [vmem:[%s29121_s4 + $0x6d0] sm:$0xff] }
  0x89   :  { %2221 = vmatprep.subr.bf16.mxu0 %v16328_v47  ;;  %v16439_v38 = vcombine.low %v781_v35, %v789_v37  ;;  %v16440_v39 = vcombine.high %v781_v35, %v789_v37  ;;  %2134 = vmatpush1.bf16.msra.mxu1 %v16435_v40 }
  0x8a   :  { %2135 = vmatprep.subr.bf16.mxu1 %v16452_v44 }
  0x8c   :  { %2222 = vmatpush1.bf16.msra.mxu0 %v16327_v46  ;;  %v805_v46 = vld [vmem:[%s29121_s4 + $0x750] sm:$0xff] }
  0x8d   :  { %2223 = vmatprep.subr.bf16.mxu0 %v16344_v55  ;;  %v16455_v47 = vcombine.low %v797_v43, %v805_v46  ;;  %v16456_v48 = vcombine.high %v797_v43, %v805_v46  ;;  %2136 = vmatpush1.bf16.msra.mxu1 %v16451_v49 }
  0x8e   :  { %2137 = vmatprep.subr.bf16.mxu1 %v16468_v53 }
  0x90   :  { %2224 = vmatpush1.bf16.msra.mxu0 %v16343_v54  ;;  %v821_v54 = vld [vmem:[%s29121_s4 + $0x7d0] sm:$0xff] }
  0x91   :  { %2225 = vmatprep.subr.bf16.mxu0 %v16360_v63  ;;  %v16471_v55 = vcombine.low %v813_v52, %v821_v54  ;;  %v16472_v56 = vcombine.high %v813_v52, %v821_v54  ;;  %2138 = vmatpush1.bf16.msra.mxu1 %v16467_v57  ;;  %v16229_v63 = vcombine.low %v23499_v58, %v23504_v59  ;;  %v620_v58 = vld [vmem:[%s29121_s4 + $0x188] sm:$0xff] }
  0x92   :  { %2158 = vmatprep.subr.bf16.mxu1 %v16230_v61  ;;  %v29126_v61 = vlaneseq  ;;  %v628_v59 = vld [vmem:[%s29121_s4 + $0x1c8] sm:$0xff] }
  0x94   :  { %2226 = vmatpush1.bf16.msra.mxu0 %v16359_v62  ;;  %v23516_v62 = vld [vmem:[%s29121_s4 + $0x60] sm:$0xff] }
  0x95   :  { %2227 = vmatprep.subr.bf16.mxu0 %v16376_v7  ;;  %v16235_v0 = vcombine.low %v23509_v60, %v23516_v62  ;;  %v16236_v1 = vcombine.high %v23509_v60, %v23516_v62  ;;  %v623_v60 = vld [vmem:[%s29121_s4 + $0x1a0] sm:$0xff] }
  0x96   :  { %v631_v62 = vld [vmem:[%s29121_s4 + $0x1e0] sm:$0xff] }
  0x98   :  { %2228 = vmatpush1.bf16.msra.mxu0 %v16375_v6 }
  0x99   :  { %2229 = vmatprep.subr.bf16.mxu0 %v16392_v15 }
  0x9c   :  { %2230 = vmatpush1.bf16.msra.mxu0 %v16391_v14 }
  0x9d   :  { %2231 = vmatprep.subr.bf16.mxu0 %v16408_v23 }
  0xa0   :  { %2232 = vmatpush1.bf16.msra.mxu0 %v16407_v22 }
  0xa1   :  { %2233 = vmatprep.subr.bf16.mxu0 %v16424_v31 }
  0xa4   :  { %2234 = vmatpush1.bf16.msra.mxu0 %v16423_v30 }
  0xa5   :  { %2235 = vmatprep.subr.bf16.mxu0 %v16440_v39 }
  0xa8   :  { %2236 = vmatpush1.bf16.msra.mxu0 %v16439_v38 }
  0xa9   :  { %2237 = vmatprep.subr.bf16.mxu0 %v16456_v48 }
  0xac   :  { %2238 = vmatpush1.bf16.msra.mxu0 %v16455_v47 }
  0xad   :  { %2239 = vmatprep.subr.bf16.mxu0 %v16472_v56 }
  0xb0   :  { %2240 = vmatpush1.bf16.msra.mxu0 %v16471_v55 }
  0xb1   :  { %2311 = vmatprep.subr.bf16.mxu0 %v16236_v1 }
 0x146   :  { %v450_v2 = vpop.f32.mrb[0].mxu0 }
 0x147   :  { %v452_v3 = vpop.f32.mrb[1].mxu0 }
 0x148   :  { %v454_v4 = vpop.f32.mrb[2].mxu0 }
 0x149   :  { %v467_v5 = vadd.f32 %v454_v4, %v450_v2  ;;  %v456_v6 = vpop.f32.mrb[3].mxu0 }
 0x14a   :  { %v475_v7 = vadd.f32 %v456_v6, %v452_v3 }
 0x14e   :  { %v460_v8 = vpop.f32.mrb[4].mxu0 }
 0x14f   :  { %v468_v9 = vadd.f32 %v467_v5, %v460_v8  ;;  %v462_v10 = vpop.f32.mrb[5].mxu0 }
 0x150   :  { %v476_v11 = vadd.f32 %v475_v7, %v462_v10  ;;  %v464_v12 = vpop.f32.mrb[6].mxu0 }
 0x151   :  { %v469_v13 = vrot.slane %v468_v9, 4  ;;  %v465_v14 = vpop.f32.mrb[7].mxu0 }
 0x152   :  { %v477_v15 = vrot.slane %v476_v11, 4 }
 0x153   :  { %v470_v16 = vadd.f32 %v469_v13, %v468_v9 }
 0x154   :  { %v478_v17 = vadd.f32 %v477_v15, %v476_v11 }
 0x155   :  { %v471_v18 = vrot.slane %v470_v16, 2 }
 0x156   :  { %v479_v19 = vrot.slane %v478_v17, 2 }
 0x157   :  { %v472_v20 = vadd.f32 %v471_v18, %v470_v16 }
 0x158   :  { %v480_v21 = vadd.f32 %v479_v19, %v478_v17 }
 0x159   :  { %v473_v22 = vrot.slane %v472_v20, 1 }
 0x15a   :  { %v481_v23 = vrot.slane %v480_v21, 1 }
 0x15b   :  { %v474_v24 = vadd.f32 %v473_v22, %v472_v20 }
 0x15c   :  { %v482_v25 = vadd.f32 %v481_v23, %v480_v21 }
 0x15d   :  { %v483_v26 = vmul.f32 0.041666668, %v474_v24 }
 0x15e   :  { %v484_v27 = vmul.f32 0.041666668, %v482_v25 }
 0x15f   :  { %v485_v28 = vsub.f32 %v450_v2, %v483_v26  ;;  %v487_v29 = vsub.f32 %v454_v4, %v483_v26  ;;  %v489_v30 = vsub.f32 %v460_v8, %v483_v26  ;;  %v528_v4 = vshrl.u32 %v29126_v61, 7  ;;  %v543_v8 = vld [vmem:[%s29120_s3] sm:$0x3] }
 0x160   :  { %v486_v31 = vsub.f32 %v452_v3, %v484_v27  ;;  %v488_v32 = vsub.f32 %v456_v6, %v484_v27  ;;  %v490_v33 = vsub.f32 %v462_v10, %v484_v27  ;;  %v525_v6 = vld [vmem:[%s29119_s2] sm:$0x3] }
 0x161   :  { %v491_v34 = vmul.f32 %v485_v28, %v485_v28  ;;  %v493_v35 = vmul.f32 %v487_v29, %v487_v29  ;;  %v495_v38 = vmul.f32 %v489_v30, %v489_v30  ;;  %v529_v5 = vsub.s32 0, %v528_v4 }
 0x162   :  { %v492_v36 = vmul.f32 %v486_v31, %v486_v31  ;;  %v494_v37 = vmul.f32 %v488_v32, %v488_v32  ;;  %v496_v40 = vmul.f32 %v490_v33, %v490_v33  ;;  %v533_v7 = vsub.s32 1, %v528_v4  ;;  %v644_v4 = vld [vmem:[%s29121_s4 + $0x248] sm:$0xff] }
 0x163   :  { %v497_v39 = vadd.f32 %v493_v35, %v491_v34  ;;  %v530_v9 = vrot.slane %v525_v6, %v529_v5  ;;  %v548_v16 = vrot.slane %v543_v8, %v529_v5  ;;  %v639_v5 = vld [vmem:[%s29121_s4 + $0x220] sm:$0xff] }
 0x164   :  { %v505_v41 = vadd.f32 %v494_v37, %v492_v36  ;;  %v534_v11 = vrot.slane %v525_v6, %v533_v7  ;;  %v552_v20 = vrot.slane %v543_v8, %v533_v7  ;;  %v647_v6 = vld [vmem:[%s29121_s4 + $0x260] sm:$0xff]  ;;  %v16277_v7 = vcombine.low %v620_v58, %v628_v59 }
 0x165   :  { %v498_v42 = vadd.f32 %v497_v39, %v495_v38  ;;  %v596_v39 = vld [vmem:[%s29121_s4 + $0xc8] sm:$0xff]  ;;  %v16283_v8 = vcombine.low %v623_v60, %v631_v62 }
 0x166   :  { %v506_v43 = vadd.f32 %v505_v41, %v496_v40  ;;  %v591_v40 = vld [vmem:[%s29121_s4 + $0xa0] sm:$0xff] }
 0x167   :  { %v499_v44 = vrot.slane %v498_v42, 4  ;;  %v599_v41 = vld [vmem:[%s29121_s4 + $0xe0] sm:$0xff] }
 0x168   :  { %v507_v46 = vrot.slane %v506_v43, 4 }
 0x169   :  { %v500_v47 = vadd.f32 %v499_v44, %v498_v42  ;;  %v604_v44 = vld [vmem:[%s29121_s4 + $0x108] sm:$0xff] }
 0x16a   :  { %v508_v48 = vadd.f32 %v507_v46, %v506_v43 }
 0x16b   :  { %v501_v49 = vrot.slane %v500_v47, 2 }
 0x16c   :  { %v509_v50 = vrot.slane %v508_v48, 2 }
 0x16d   :  { %v502_v51 = vadd.f32 %v501_v49, %v500_v47  ;;  %v16252_v47 = vcombine.high %v591_v40, %v599_v41  ;;  %v607_v49 = vld [vmem:[%s29121_s4 + $0x120] sm:$0xff] }
 0x16e   :  { %v510_v52 = vadd.f32 %v509_v50, %v508_v48  ;;  %v612_v48 = vld [vmem:[%s29121_s4 + $0x148] sm:$0xff]  ;;  %v615_v50 = vld [vmem:[%s29121_s4 + $0x160] sm:$0xff] }
 0x16f   :  { %v503_v53 = vrot.slane %v502_v51, 1 }
 0x170   :  { %v511_v54 = vrot.slane %v510_v52, 1 }
 0x171   :  { %v504_v55 = vadd.f32 %v503_v53, %v502_v51  ;;  %v16251_v53 = vcombine.low %v591_v40, %v599_v41 }
 0x172   :  { %v512_v56 = vadd.f32 %v511_v54, %v510_v52 }
 0x173   :  { %v513_v57 = vmul.f32 0.041666668, %v504_v55  ;;  %v16262_v55 = vcombine.high %v604_v44, %v612_v48 }
 0x174   :  { %v514_v1 = vmul.f32 0.041666668, %v512_v56  ;;  %v16268_v56 = vcombine.high %v607_v49, %v615_v50 }
 0x175   :  { %v515_v2 = vadd.f32 1e-05, %v513_v57 }
 0x176   :  { %v516_v3 = vadd.f32 1e-05, %v514_v1  ;;  %v636_v1 = vld [vmem:[%s29121_s4 + $0x208] sm:$0xff] }
 0x177   :  { %22862 = vrsqrt.f32 %v515_v2  ;;  %v16278_v2 = vcombine.high %v620_v58, %v628_v59  ;;  %v735_v58 = vld [vmem:[%s29121_s4 + $0x520] sm:$0xff] }
 0x178   :  { %22864 = vrsqrt.f32 %v516_v3  ;;  %v16284_v3 = vcombine.high %v623_v60, %v631_v62  ;;  %v743_v59 = vld [vmem:[%s29121_s4 + $0x560] sm:$0xff] }
 0x181   :  { %v22863_v10 = vpop.eup %22862 }
 0x182   :  { %v22865_v12 = vpop.eup %22864  ;;  %v519_v13 = vmul.f32 %v22863_v10, %v485_v28  ;;  %v521_v14 = vmul.f32 %v22863_v10, %v487_v29  ;;  %v523_v15 = vmul.f32 %v22863_v10, %v489_v30  ;;  %v16300_v10 = vcombine.high %v639_v5, %v647_v6 }
 0x183   :  { %v520_v17 = vmul.f32 %v22865_v12, %v486_v31  ;;  %v522_v18 = vmul.f32 %v22865_v12, %v488_v32  ;;  %v524_v19 = vmul.f32 %v22865_v12, %v490_v33  ;;  %v588_v31 = vld [vmem:[%s29121_s4 + $0x88] sm:$0xff] }
 0x184   :  { %v537_v21 = vmul.f32 %v530_v9, %v519_v13  ;;  %v539_v22 = vmul.f32 %v530_v9, %v521_v14  ;;  %v541_v37 = vmul.f32 %v530_v9, %v523_v15  ;;  %v16246_v46 = vcombine.high %v588_v31, %v596_v39  ;;  %v660_v12 = vld [vmem:[%s29121_s4 + $0x2c8] sm:$0xff]  ;;  %v655_v13 = vld [vmem:[%s29121_s4 + $0x2a0] sm:$0xff] }
 0x185   :  { %v538_v23 = vmul.f32 %v534_v11, %v520_v17  ;;  %v540_v24 = vmul.f32 %v534_v11, %v522_v18  ;;  %v542_v25 = vmul.f32 %v534_v11, %v524_v19  ;;  %v16245_v52 = vcombine.low %v588_v31, %v596_v39  ;;  %v652_v11 = vld [vmem:[%s29121_s4 + $0x288] sm:$0xff]  ;;  %v663_v14 = vld [vmem:[%s29121_s4 + $0x2e0] sm:$0xff] }
 0x186   :  { %v555_v26 = vadd.f32 %v548_v16, %v537_v21  ;;  %v557_v27 = vadd.f32 %v548_v16, %v539_v22  ;;  %v559_v43 = vadd.f32 %v548_v16, %v541_v37  ;;  %v16294_v9 = vcombine.high %v636_v1, %v644_v4  ;;  %v668_v19 = vld [vmem:[%s29121_s4 + $0x308] sm:$0xff]  ;;  %v671_v21 = vld [vmem:[%s29121_s4 + $0x320] sm:$0xff] }
 0x187   :  { %v556_v34 = vadd.f32 %v552_v20, %v538_v23  ;;  %v558_v35 = vadd.f32 %v552_v20, %v540_v24  ;;  %v560_v36 = vadd.f32 %v552_v20, %v542_v25  ;;  %v16293_v15 = vcombine.low %v636_v1, %v644_v4  ;;  %v676_v20 = vld [vmem:[%s29121_s4 + $0x348] sm:$0xff]  ;;  %v679_v22 = vld [vmem:[%s29121_s4 + $0x360] sm:$0xff] }
 0x188   :  { %v561_v38 = vmax.f32 %v555_v26, 0.0  ;;  %v563_v28 = vmax.f32 %v557_v27, 0.0  ;;  %v565_v54 = vmax.f32 %v559_v43, 0.0  ;;  %v16299_v16 = vcombine.low %v639_v5, %v647_v6  ;;  %v684_v27 = vld [vmem:[%s29121_s4 + $0x388] sm:$0xff]  ;;  %v711_v39 = vld [vmem:[%s29121_s4 + $0x460] sm:$0xff] }
 0x189   :  { %v562_v29 = vmax.f32 %v556_v34, 0.0  ;;  %v564_v30 = vmax.f32 %v558_v35, 0.0  ;;  %v566_v33 = vmax.f32 %v560_v36, 0.0  ;;  %v16310_v17 = vcombine.high %v652_v11, %v660_v12  ;;  %v692_v34 = vld [vmem:[%s29121_s4 + $0x3c8] sm:$0xff]  ;;  %v687_v35 = vld [vmem:[%s29121_s4 + $0x3a0] sm:$0xff] }
 0x18a   :  { %v23534_v32 = vpack.c.bf16 %v563_v28, %v561_v38  ;;  %v23585_v57 = vpack.c.bf16 %v565_v54, %v565_v54  ;;  %v16316_v18 = vcombine.high %v655_v13, %v663_v14  ;;  %v16309_v23 = vcombine.low %v652_v11, %v660_v12  ;;  %v695_v36 = vld [vmem:[%s29121_s4 + $0x3e0] sm:$0xff]  ;;  %v708_v31 = vld [vmem:[%s29121_s4 + $0x448] sm:$0xff] }
 0x18b   :  { %v23545_v42 = vpack.c.bf16 %v564_v30, %v562_v29  ;;  %v23561_v51 = vpack.c.bf16 %v566_v33, %v566_v33  ;;  %v16315_v24 = vcombine.low %v655_v13, %v663_v14  ;;  %v16326_v25 = vcombine.high %v668_v19, %v676_v20  ;;  %v700_v30 = vld [vmem:[%s29121_s4 + $0x408] sm:$0xff]  ;;  %v703_v33 = vld [vmem:[%s29121_s4 + $0x420] sm:$0xff] }
 0x18c   :  { %v16332_v26 = vcombine.high %v671_v21, %v679_v22  ;;  %v16325_v37 = vcombine.low %v668_v19, %v676_v20  ;;  %v16331_v38 = vcombine.low %v671_v21, %v679_v22  ;;  %v16342_v28 = vcombine.high %v684_v27, %v692_v34  ;;  %v748_v1 = vld [vmem:[%s29121_s4 + $0x588] sm:$0xff]  ;;  %v759_v4 = vld [vmem:[%s29121_s4 + $0x5e0] sm:$0xff] }
 0x18d   :  { %2139 = vmatprep.mubr.bf16.mxu1 %v23545_v42  ;;  %2241 = vmatprep.mubr.bf16.mxu0 %v23545_v42  ;;  %v16348_v29 = vcombine.high %v687_v35, %v695_v36  ;;  %v16341_v40 = vcombine.low %v684_v27, %v692_v34  ;;  %v16347_v41 = vcombine.low %v687_v35, %v695_v36  ;;  %v767_v11 = vld [vmem:[%s29121_s4 + $0x620] sm:$0xff] }
 0x18e   :  { %2140 = vmatmul.mubr.bf16.vlgmr.msra.gmra.mrb[0].mxu1 %v23534_v32  ;;  %2242 = vmatmul.mubr.bf16.vlgmr.msra.gmra.mrb[8].mxu0 %v23534_v32  ;;  %v16358_v43 = vcombine.high %v700_v30, %v708_v31  ;;  %v16395_v6 = vcombine.low %v735_v58, %v743_v59  ;;  %v775_v12 = vld [vmem:[%s29121_s4 + $0x660] sm:$0xff] }
 0x18f   :  { %2159 = vmatpush1.bf16.msra.mxu1 %v16229_v63  ;;  %2312 = vmatpush1.bf16.msra.mxu0 %v16235_v0  ;;  %v16261_v63 = vcombine.low %v604_v44, %v612_v48  ;;  %v16267_v0 = vcombine.low %v607_v49, %v615_v50  ;;  %v16364_v44 = vcombine.high %v703_v33, %v711_v39  ;;  %v719_v48 = vld [vmem:[%s29121_s4 + $0x4a0] sm:$0xff] }
 0x190   :  { %2149 = vmatprep.mubr.bf16.mxu1 %v23561_v51  ;;  %2251 = vmatprep.mubr.bf16.mxu0 %v23561_v51  ;;  %v727_v49 = vld [vmem:[%s29121_s4 + $0x4e0] sm:$0xff]  ;;  %v16357_v50 = vcombine.low %v700_v30, %v708_v31  ;;  %v16427_v22 = vcombine.low %v767_v11, %v775_v12 }
 0x191   :  { %2160 = vmatprep.subr.bf16.mxu1 %v16246_v46  ;;  %2313 = vmatprep.subr.bf16.mxu0 %v16252_v47  ;;  %v716_v46 = vld [vmem:[%s29121_s4 + $0x488] sm:$0xff]  ;;  %v16380_v54 = vcombine.high %v719_v48, %v727_v49  ;;  %v16379_v62 = vcombine.low %v719_v48, %v727_v49  ;;  %v783_v19 = vld [vmem:[%s29121_s4 + $0x6a0] sm:$0xff] }
 0x192   :  { %v724_v47 = vld [vmem:[%s29121_s4 + $0x4c8] sm:$0xff]  ;;  %v791_v20 = vld [vmem:[%s29121_s4 + $0x6e0] sm:$0xff] }
 0x193   :  { %2161 = vmatpush1.bf16.msra.mxu1 %v16245_v52  ;;  %2314 = vmatpush1.bf16.msra.mxu0 %v16251_v53  ;;  %v16363_v52 = vcombine.low %v703_v33, %v711_v39  ;;  %v16374_v53 = vcombine.high %v716_v46, %v724_v47  ;;  %v16373_v60 = vcombine.low %v716_v46, %v724_v47  ;;  %v799_v27 = vld [vmem:[%s29121_s4 + $0x720] sm:$0xff]  ;;  %v577_v46 = vld [vmem:[%s29121_s4 + $0x30] sm:$0xff] }
 0x194   :  { %2162 = vmatprep.subr.bf16.mxu1 %v16262_v55  ;;  %2315 = vmatprep.subr.bf16.mxu0 %v16268_v56  ;;  %v732_v55 = vld [vmem:[%s29121_s4 + $0x508] sm:$0xff]  ;;  %v807_v34 = vld [vmem:[%s29121_s4 + $0x760] sm:$0xff]  ;;  %v16443_v36 = vcombine.low %v783_v19, %v791_v20  ;;  %v585_v47 = vld [vmem:[%s29121_s4 + $0x70] sm:$0xff] }
 0x195   :  { %v740_v56 = vld [vmem:[%s29121_s4 + $0x548] sm:$0xff]  ;;  %v815_v30 = vld [vmem:[%s29121_s4 + $0x7a0] sm:$0xff]  ;;  %v16459_v39 = vcombine.low %v799_v27, %v807_v34 }
 0x196   :  { %2150 = vmatmul.mubr.bf16.gmra.mrb[4].mxu1 %v23585_v57  ;;  %2252 = vmatmul.mubr.bf16.gmra.mrb[12].mxu0 %v23585_v57  ;;  %v16389_v5 = vcombine.low %v732_v55, %v740_v56  ;;  %v823_v31 = vld [vmem:[%s29121_s4 + $0x7e0] sm:$0xff] }
 0x197   :  { %2163 = vmatpush1.bf16.msra.mxu1 %v16261_v63  ;;  %2316 = vmatpush1.bf16.msra.mxu0 %v16267_v0  ;;  %v16390_v63 = vcombine.high %v732_v55, %v740_v56  ;;  %v16396_v0 = vcombine.high %v735_v58, %v743_v59  ;;  %v16475_v49 = vcombine.low %v815_v30, %v823_v31  ;;  %v593_v55 = vld [vmem:[%s29121_s4 + $0xb0] sm:$0xff] }
 0x198   :  { %2190 = vmatprep.mubr.bf16.mxu1 %v23545_v42  ;;  %2343 = vmatprep.mubr.bf16.mxu0 %v23545_v42  ;;  %v601_v56 = vld [vmem:[%s29121_s4 + $0xf0] sm:$0xff]  ;;  %v16239_v59 = vcombine.low %v577_v46, %v585_v47 }
 0x199   :  { %2164 = vmatprep.subr.bf16.mxu1 %v16278_v2  ;;  %2317 = vmatprep.subr.bf16.mxu0 %v16284_v3  ;;  %v756_v2 = vld [vmem:[%s29121_s4 + $0x5c8] sm:$0xff]  ;;  %v751_v3 = vld [vmem:[%s29121_s4 + $0x5a0] sm:$0xff] }
 0x19a   :  { %v16405_v13 = vcombine.low %v748_v1, %v756_v2  ;;  %v16411_v14 = vcombine.low %v751_v3, %v759_v4 }
 0x19b   :  { %2165 = vmatpush1.bf16.msra.mxu1 %v16277_v7  ;;  %2318 = vmatpush1.bf16.msra.mxu0 %v16283_v8  ;;  %v16406_v7 = vcombine.high %v748_v1, %v756_v2  ;;  %v16412_v8 = vcombine.high %v751_v3, %v759_v4  ;;  %v609_v1 = vld [vmem:[%s29121_s4 + $0x130] sm:$0xff]  ;;  %v16255_v4 = vcombine.low %v593_v55, %v601_v56 }
 0x19c   :  { %2166 = vmatprep.subr.bf16.mxu1 %v16294_v9  ;;  %2319 = vmatprep.subr.bf16.mxu0 %v16300_v10  ;;  %v764_v9 = vld [vmem:[%s29121_s4 + $0x608] sm:$0xff]  ;;  %v617_v2 = vld [vmem:[%s29121_s4 + $0x170] sm:$0xff] }
 0x19d   :  { %v772_v10 = vld [vmem:[%s29121_s4 + $0x648] sm:$0xff] }
 0x19e   :  { %v16421_v21 = vcombine.low %v764_v9, %v772_v10 }
 0x19f   :  { %2167 = vmatpush1.bf16.msra.mxu1 %v16293_v15  ;;  %2320 = vmatpush1.bf16.msra.mxu0 %v16299_v16  ;;  %v16422_v15 = vcombine.high %v764_v9, %v772_v10  ;;  %v16428_v16 = vcombine.high %v767_v11, %v775_v12  ;;  %v625_v9 = vld [vmem:[%s29121_s4 + $0x1b0] sm:$0xff]  ;;  %v16271_v12 = vcombine.low %v609_v1, %v617_v2 }
 0x1a0   :  { %2168 = vmatprep.subr.bf16.mxu1 %v16310_v17  ;;  %2321 = vmatprep.subr.bf16.mxu0 %v16316_v18  ;;  %v780_v17 = vld [vmem:[%s29121_s4 + $0x688] sm:$0xff]  ;;  %v633_v10 = vld [vmem:[%s29121_s4 + $0x1f0] sm:$0xff] }
 0x1a1   :  { %v788_v18 = vld [vmem:[%s29121_s4 + $0x6c8] sm:$0xff] }
 0x1a2   :  { %v16437_v35 = vcombine.low %v780_v17, %v788_v18 }
 0x1a3   :  { %2169 = vmatpush1.bf16.msra.mxu1 %v16309_v23  ;;  %2322 = vmatpush1.bf16.msra.mxu0 %v16315_v24  ;;  %v16438_v23 = vcombine.high %v780_v17, %v788_v18  ;;  %v16444_v24 = vcombine.high %v783_v19, %v791_v20  ;;  %v641_v17 = vld [vmem:[%s29121_s4 + $0x230] sm:$0xff]  ;;  %v16287_v20 = vcombine.low %v625_v9, %v633_v10 }
 0x1a4   :  { %2170 = vmatprep.subr.bf16.mxu1 %v16326_v25  ;;  %2323 = vmatprep.subr.bf16.mxu0 %v16332_v26  ;;  %v796_v25 = vld [vmem:[%s29121_s4 + $0x708] sm:$0xff]  ;;  %v649_v18 = vld [vmem:[%s29121_s4 + $0x270] sm:$0xff] }
 0x1a5   :  { %v804_v26 = vld [vmem:[%s29121_s4 + $0x748] sm:$0xff] }
 0x1a6   :  { %v16453_v33 = vcombine.low %v796_v25, %v804_v26 }
 0x1a7   :  { %2171 = vmatpush1.bf16.msra.mxu1 %v16325_v37  ;;  %2324 = vmatpush1.bf16.msra.mxu0 %v16331_v38  ;;  %v16454_v37 = vcombine.high %v796_v25, %v804_v26  ;;  %v16460_v38 = vcombine.high %v799_v27, %v807_v34  ;;  %v657_v25 = vld [vmem:[%s29121_s4 + $0x2b0] sm:$0xff]  ;;  %v16303_v34 = vcombine.low %v641_v17, %v649_v18 }
 0x1a8   :  { %2172 = vmatprep.subr.bf16.mxu1 %v16342_v28  ;;  %2325 = vmatprep.subr.bf16.mxu0 %v16348_v29  ;;  %v812_v28 = vld [vmem:[%s29121_s4 + $0x788] sm:$0xff]  ;;  %v665_v26 = vld [vmem:[%s29121_s4 + $0x2f0] sm:$0xff] }
 0x1a9   :  { %v820_v29 = vld [vmem:[%s29121_s4 + $0x7c8] sm:$0xff] }
 0x1aa   :  { %v16469_v48 = vcombine.low %v812_v28, %v820_v29 }
 0x1ab   :  { %2173 = vmatpush1.bf16.msra.mxu1 %v16341_v40  ;;  %2326 = vmatpush1.bf16.msra.mxu0 %v16347_v41  ;;  %v16470_v40 = vcombine.high %v812_v28, %v820_v29  ;;  %v16476_v41 = vcombine.high %v815_v30, %v823_v31  ;;  %v673_v28 = vld [vmem:[%s29121_s4 + $0x330] sm:$0xff]  ;;  %v16319_v31 = vcombine.low %v657_v25, %v665_v26 }
 0x1ac   :  { %2174 = vmatprep.subr.bf16.mxu1 %v16358_v43  ;;  %2327 = vmatprep.subr.bf16.mxu0 %v16364_v44  ;;  %v574_v43 = vld [vmem:[%s29121_s4 + $0x18] sm:$0xff]  ;;  %v681_v29 = vld [vmem:[%s29121_s4 + $0x370] sm:$0xff] }
 0x1ad   :  { %v582_v44 = vld [vmem:[%s29121_s4 + $0x58] sm:$0xff] }
 0x1ae   :  { %v16233_v58 = vcombine.low %v574_v43, %v582_v44 }
 0x1af   :  { %2175 = vmatpush1.bf16.msra.mxu1 %v16357_v50  ;;  %2328 = vmatpush1.bf16.msra.mxu0 %v16363_v52  ;;  %v16234_v50 = vcombine.high %v574_v43, %v582_v44  ;;  %v16240_v52 = vcombine.high %v577_v46, %v585_v47  ;;  %v689_v43 = vld [vmem:[%s29121_s4 + $0x3b0] sm:$0xff]  ;;  %v16335_v47 = vcombine.low %v673_v28, %v681_v29 }
 0x1b0   :  { %2176 = vmatprep.subr.bf16.mxu1 %v16374_v53  ;;  %2329 = vmatprep.subr.bf16.mxu0 %v16380_v54  ;;  %v590_v53 = vld [vmem:[%s29121_s4 + $0x98] sm:$0xff]  ;;  %v697_v44 = vld [vmem:[%s29121_s4 + $0x3f0] sm:$0xff] }
 0x1b1   :  { %v598_v54 = vld [vmem:[%s29121_s4 + $0xd8] sm:$0xff] }
 0x1b2   :  { %v16249_v3 = vcombine.low %v590_v53, %v598_v54 }
 0x1b3   :  { %2177 = vmatpush1.bf16.msra.mxu1 %v16373_v60  ;;  %2330 = vmatpush1.bf16.msra.mxu0 %v16379_v62  ;;  %v16250_v60 = vcombine.high %v590_v53, %v598_v54  ;;  %v16256_v62 = vcombine.high %v593_v55, %v601_v56  ;;  %v705_v53 = vld [vmem:[%s29121_s4 + $0x430] sm:$0xff]  ;;  %v16351_v56 = vcombine.low %v689_v43, %v697_v44 }
 0x1b4   :  { %2178 = vmatprep.subr.bf16.mxu1 %v16390_v63  ;;  %2331 = vmatprep.subr.bf16.mxu0 %v16396_v0  ;;  %v606_v63 = vld [vmem:[%s29121_s4 + $0x118] sm:$0xff]  ;;  %v713_v54 = vld [vmem:[%s29121_s4 + $0x470] sm:$0xff] }
 0x1b5   :  { %v614_v0 = vld [vmem:[%s29121_s4 + $0x158] sm:$0xff] }
 0x1b6   :  { %v16265_v11 = vcombine.low %v606_v63, %v614_v0 }
 0x1b7   :  { %2179 = vmatpush1.bf16.msra.mxu1 %v16389_v5  ;;  %2332 = vmatpush1.bf16.msra.mxu0 %v16395_v6  ;;  %v16266_v5 = vcombine.high %v606_v63, %v614_v0  ;;  %v16272_v6 = vcombine.high %v609_v1, %v617_v2  ;;  %v721_v63 = vld [vmem:[%s29121_s4 + $0x4b0] sm:$0xff]  ;;  %v16367_v2 = vcombine.low %v705_v53, %v713_v54 }
 0x1b8   :  { %2180 = vmatprep.subr.bf16.mxu1 %v16406_v7  ;;  %2333 = vmatprep.subr.bf16.mxu0 %v16412_v8  ;;  %v622_v7 = vld [vmem:[%s29121_s4 + $0x198] sm:$0xff]  ;;  %v729_v0 = vld [vmem:[%s29121_s4 + $0x4f0] sm:$0xff] }
 0x1b9   :  { %v630_v8 = vld [vmem:[%s29121_s4 + $0x1d8] sm:$0xff] }
 0x1ba   :  { %v16281_v19 = vcombine.low %v622_v7, %v630_v8 }
 0x1bb   :  { %2181 = vmatpush1.bf16.msra.mxu1 %v16405_v13  ;;  %2334 = vmatpush1.bf16.msra.mxu0 %v16411_v14  ;;  %v16282_v13 = vcombine.high %v622_v7, %v630_v8  ;;  %v16288_v14 = vcombine.high %v625_v9, %v633_v10  ;;  %v737_v7 = vld [vmem:[%s29121_s4 + $0x530] sm:$0xff]  ;;  %v16383_v10 = vcombine.low %v721_v63, %v729_v0 }
 0x1bc   :  { %2182 = vmatprep.subr.bf16.mxu1 %v16422_v15  ;;  %2335 = vmatprep.subr.bf16.mxu0 %v16428_v16  ;;  %v638_v15 = vld [vmem:[%s29121_s4 + $0x218] sm:$0xff]  ;;  %v745_v8 = vld [vmem:[%s29121_s4 + $0x570] sm:$0xff] }
 0x1bd   :  { %v646_v16 = vld [vmem:[%s29121_s4 + $0x258] sm:$0xff] }
 0x1be   :  { %v16297_v27 = vcombine.low %v638_v15, %v646_v16 }
 0x1bf   :  { %2183 = vmatpush1.bf16.msra.mxu1 %v16421_v21  ;;  %2336 = vmatpush1.bf16.msra.mxu0 %v16427_v22  ;;  %v16298_v21 = vcombine.high %v638_v15, %v646_v16  ;;  %v16304_v22 = vcombine.high %v641_v17, %v649_v18  ;;  %v753_v15 = vld [vmem:[%s29121_s4 + $0x5b0] sm:$0xff]  ;;  %v16399_v18 = vcombine.low %v737_v7, %v745_v8 }
 0x1c0   :  { %2184 = vmatprep.subr.bf16.mxu1 %v16438_v23  ;;  %2337 = vmatprep.subr.bf16.mxu0 %v16444_v24  ;;  %v654_v23 = vld [vmem:[%s29121_s4 + $0x298] sm:$0xff]  ;;  %v761_v16 = vld [vmem:[%s29121_s4 + $0x5f0] sm:$0xff] }
 0x1c1   :  { %v662_v24 = vld [vmem:[%s29121_s4 + $0x2d8] sm:$0xff] }
 0x1c2   :  { %v16313_v30 = vcombine.low %v654_v23, %v662_v24 }
 0x1c3   :  { %2185 = vmatpush1.bf16.msra.mxu1 %v16437_v35  ;;  %2338 = vmatpush1.bf16.msra.mxu0 %v16443_v36  ;;  %v16314_v35 = vcombine.high %v654_v23, %v662_v24  ;;  %v16320_v36 = vcombine.high %v657_v25, %v665_v26  ;;  %v769_v23 = vld [vmem:[%s29121_s4 + $0x630] sm:$0xff]  ;;  %v16415_v26 = vcombine.low %v753_v15, %v761_v16 }
 0x1c4   :  { %2186 = vmatprep.subr.bf16.mxu1 %v16454_v37  ;;  %2339 = vmatprep.subr.bf16.mxu0 %v16460_v38  ;;  %v670_v37 = vld [vmem:[%s29121_s4 + $0x318] sm:$0xff]  ;;  %v777_v24 = vld [vmem:[%s29121_s4 + $0x670] sm:$0xff] }
 0x1c5   :  { %v678_v38 = vld [vmem:[%s29121_s4 + $0x358] sm:$0xff] }
 0x1c6   :  { %v16329_v46 = vcombine.low %v670_v37, %v678_v38 }
 0x1c7   :  { %2187 = vmatpush1.bf16.msra.mxu1 %v16453_v33  ;;  %2340 = vmatpush1.bf16.msra.mxu0 %v16459_v39  ;;  %v16330_v33 = vcombine.high %v670_v37, %v678_v38  ;;  %v16336_v39 = vcombine.high %v673_v28, %v681_v29  ;;  %v785_v37 = vld [vmem:[%s29121_s4 + $0x6b0] sm:$0xff]  ;;  %v16431_v29 = vcombine.low %v769_v23, %v777_v24 }
 0x1c8   :  { %2188 = vmatprep.subr.bf16.mxu1 %v16470_v40  ;;  %2341 = vmatprep.subr.bf16.mxu0 %v16476_v41  ;;  %v686_v40 = vld [vmem:[%s29121_s4 + $0x398] sm:$0xff]  ;;  %v793_v38 = vld [vmem:[%s29121_s4 + $0x6f0] sm:$0xff] }
 0x1c9   :  { %v694_v41 = vld [vmem:[%s29121_s4 + $0x3d8] sm:$0xff] }
 0x1ca   :  { %v16345_v55 = vcombine.low %v686_v40, %v694_v41 }
 0x1cb   :  { %2189 = vmatpush1.bf16.msra.mxu1 %v16469_v48  ;;  %2342 = vmatpush1.bf16.msra.mxu0 %v16475_v49  ;;  %v16346_v48 = vcombine.high %v686_v40, %v694_v41  ;;  %v16352_v49 = vcombine.high %v689_v43, %v697_v44  ;;  %v801_v40 = vld [vmem:[%s29121_s4 + $0x730] sm:$0xff]  ;;  %v16447_v44 = vcombine.low %v785_v37, %v793_v38 }
 0x1cc   :  { %2260 = vmatprep.subr.bf16.mxu1 %v16234_v50  ;;  %2413 = vmatprep.subr.bf16.mxu0 %v16240_v52  ;;  %v702_v50 = vld [vmem:[%s29121_s4 + $0x418] sm:$0xff]  ;;  %v809_v41 = vld [vmem:[%s29121_s4 + $0x770] sm:$0xff] }
 0x1cd   :  { %v710_v52 = vld [vmem:[%s29121_s4 + $0x458] sm:$0xff] }
 0x1ce   :  { %2191 = vmatmul.mubr.bf16.vlgmr.msra.gmra.mrb[8].mxu1 %v23534_v32  ;;  %2344 = vmatmul.mubr.bf16.vlgmr.msra.gmra.mrb[16].mxu0 %v23534_v32  ;;  %v16361_v1 = vcombine.low %v702_v50, %v710_v52 }
 0x1cf   :  { %2200 = vmatprep.mubr.bf16.mxu1 %v23561_v51  ;;  %2261 = vmatpush1.bf16.msra.mxu1 %v16233_v58  ;;  %v16362_v58 = vcombine.high %v702_v50, %v710_v52  ;;  %v817_v50 = vld [vmem:[%s29121_s4 + $0x7b0] sm:$0xff] }
 0x1d0   :  { %2353 = vmatprep.mubr.bf16.mxu0 %v23561_v51  ;;  %2414 = vmatpush1.bf16.msra.mxu0 %v16239_v59  ;;  %v16368_v59 = vcombine.high %v705_v53, %v713_v54  ;;  %v825_v52 = vld [vmem:[%s29121_s4 + $0x7f0] sm:$0xff]  ;;  %v16463_v54 = vcombine.low %v801_v40, %v809_v41 }
 0x1d1   :  { %2262 = vmatprep.subr.bf16.mxu1 %v16250_v60  ;;  %2415 = vmatprep.subr.bf16.mxu0 %v16256_v62  ;;  %v718_v60 = vld [vmem:[%s29121_s4 + $0x498] sm:$0xff] }
 0x1d2   :  { %v726_v62 = vld [vmem:[%s29121_s4 + $0x4d8] sm:$0xff] }
 0x1d3   :  { %2263 = vmatpush1.bf16.msra.mxu1 %v16249_v3  ;;  %v16378_v3 = vcombine.high %v718_v60, %v726_v62  ;;  %v16377_v9 = vcombine.low %v718_v60, %v726_v62  ;;  %v16479_v62 = vcombine.low %v817_v50, %v825_v52 }
 0x1d4   :  { %2416 = vmatpush1.bf16.msra.mxu0 %v16255_v4  ;;  %2264 = vmatprep.subr.bf16.mxu1 %v16266_v5  ;;  %v16384_v4 = vcombine.high %v721_v63, %v729_v0  ;;  %v734_v5 = vld [vmem:[%s29121_s4 + $0x518] sm:$0xff]  ;;  %v592_v0 = vld [vmem:[%s29121_s4 + $0xa8] sm:$0xff] }
 0x1d5   :  { %2417 = vmatprep.subr.bf16.mxu0 %v16272_v6  ;;  %v742_v6 = vld [vmem:[%s29121_s4 + $0x558] sm:$0xff] }
 0x1d6   :  { %2201 = vmatmul.mubr.bf16.gmra.mrb[12].mxu1 %v23585_v57  ;;  %2354 = vmatmul.mubr.bf16.gmra.mrb[20].mxu0 %v23585_v57  ;;  %v16393_v17 = vcombine.low %v734_v5, %v742_v6 }
 0x1d7   :  { %2265 = vmatpush1.bf16.msra.mxu1 %v16265_v11  ;;  %2292 = vmatprep.mubr.bf16.mxu1 %v23545_v42  ;;  %v16394_v11 = vcombine.high %v734_v5, %v742_v6  ;;  %v616_v5 = vld [vmem:[%s29121_s4 + $0x168] sm:$0xff] }
 0x1d8   :  { %2418 = vmatpush1.bf16.msra.mxu0 %v16271_v12  ;;  %2445 = vmatprep.mubr.bf16.mxu0 %v23545_v42  ;;  %v16400_v12 = vcombine.high %v737_v7, %v745_v8  ;;  %v624_v8 = vld [vmem:[%s29121_s4 + $0x1a8] sm:$0xff] }
 0x1d9   :  { %2266 = vmatprep.subr.bf16.mxu1 %v16282_v13  ;;  %2419 = vmatprep.subr.bf16.mxu0 %v16288_v14  ;;  %v750_v13 = vld [vmem:[%s29121_s4 + $0x598] sm:$0xff] }
 0x1da   :  { %v758_v14 = vld [vmem:[%s29121_s4 + $0x5d8] sm:$0xff] }
 0x1db   :  { %2267 = vmatpush1.bf16.msra.mxu1 %v16281_v19  ;;  %v16410_v19 = vcombine.high %v750_v13, %v758_v14  ;;  %v16409_v25 = vcombine.low %v750_v13, %v758_v14  ;;  %v640_v13 = vld [vmem:[%s29121_s4 + $0x228] sm:$0xff] }
 0x1dc   :  { %2420 = vmatpush1.bf16.msra.mxu0 %v16287_v20  ;;  %2268 = vmatprep.subr.bf16.mxu1 %v16298_v21  ;;  %v16416_v20 = vcombine.high %v753_v15, %v761_v16  ;;  %v766_v21 = vld [vmem:[%s29121_s4 + $0x618] sm:$0xff]  ;;  %v648_v14 = vld [vmem:[%s29121_s4 + $0x268] sm:$0xff] }
 0x1dd   :  { %2421 = vmatprep.subr.bf16.mxu0 %v16304_v22  ;;  %v774_v22 = vld [vmem:[%s29121_s4 + $0x658] sm:$0xff]  ;;  %v16302_v16 = vcombine.high %v640_v13, %v648_v14 }
 0x1de   :  { %v16425_v28 = vcombine.low %v766_v21, %v774_v22 }
 0x1df   :  { %2269 = vmatpush1.bf16.msra.mxu1 %v16297_v27  ;;  %v16426_v27 = vcombine.high %v766_v21, %v774_v22  ;;  %v672_v21 = vld [vmem:[%s29121_s4 + $0x328] sm:$0xff] }
 0x1e0   :  { %2422 = vmatpush1.bf16.msra.mxu0 %v16303_v34  ;;  %2270 = vmatprep.subr.bf16.mxu1 %v16314_v35  ;;  %v16432_v34 = vcombine.high %v769_v23, %v777_v24  ;;  %v782_v35 = vld [vmem:[%s29121_s4 + $0x698] sm:$0xff]  ;;  %v680_v22 = vld [vmem:[%s29121_s4 + $0x368] sm:$0xff] }
 0x1e1   :  { %2423 = vmatprep.subr.bf16.mxu0 %v16320_v36  ;;  %v790_v36 = vld [vmem:[%s29121_s4 + $0x6d8] sm:$0xff]  ;;  %v16334_v24 = vcombine.high %v672_v21, %v680_v22 }
 0x1e2   :  { %v16441_v43 = vcombine.low %v782_v35, %v790_v36 }
 0x1e3   :  { %2271 = vmatpush1.bf16.msra.mxu1 %v16313_v30  ;;  %v16442_v30 = vcombine.high %v782_v35, %v790_v36  ;;  %v704_v35 = vld [vmem:[%s29121_s4 + $0x428] sm:$0xff] }
 0x1e4   :  { %2424 = vmatpush1.bf16.msra.mxu0 %v16319_v31  ;;  %2272 = vmatprep.subr.bf16.mxu1 %v16330_v33  ;;  %v16448_v31 = vcombine.high %v785_v37, %v793_v38  ;;  %v798_v33 = vld [vmem:[%s29121_s4 + $0x718] sm:$0xff]  ;;  %v712_v36 = vld [vmem:[%s29121_s4 + $0x468] sm:$0xff] }
 0x1e5   :  { %2425 = vmatprep.subr.bf16.mxu0 %v16336_v39  ;;  %v806_v39 = vld [vmem:[%s29121_s4 + $0x758] sm:$0xff]  ;;  %v16366_v38 = vcombine.high %v704_v35, %v712_v36 }
 0x1e6   :  { %v16457_v53 = vcombine.low %v798_v33, %v806_v39 }
 0x1e7   :  { %2273 = vmatpush1.bf16.msra.mxu1 %v16329_v46  ;;  %v16458_v46 = vcombine.high %v798_v33, %v806_v39  ;;  %v736_v33 = vld [vmem:[%s29121_s4 + $0x528] sm:$0xff] }
 0x1e8   :  { %2426 = vmatpush1.bf16.msra.mxu0 %v16335_v47  ;;  %2274 = vmatprep.subr.bf16.mxu1 %v16346_v48  ;;  %v16464_v47 = vcombine.high %v801_v40, %v809_v41  ;;  %v814_v48 = vld [vmem:[%s29121_s4 + $0x798] sm:$0xff]  ;;  %v744_v39 = vld [vmem:[%s29121_s4 + $0x568] sm:$0xff] }
 0x1e9   :  { %2427 = vmatprep.subr.bf16.mxu0 %v16352_v49  ;;  %v822_v49 = vld [vmem:[%s29121_s4 + $0x7d8] sm:$0xff]  ;;  %v16398_v41 = vcombine.high %v736_v33, %v744_v39 }
 0x1ea   :  { %v16473_v60 = vcombine.low %v814_v48, %v822_v49 }
 0x1eb   :  { %2275 = vmatpush1.bf16.msra.mxu1 %v16345_v55  ;;  %v16474_v55 = vcombine.high %v814_v48, %v822_v49  ;;  %v768_v48 = vld [vmem:[%s29121_s4 + $0x628] sm:$0xff] }
 0x1ec   :  { %2428 = vmatpush1.bf16.msra.mxu0 %v16351_v56  ;;  %2276 = vmatprep.subr.bf16.mxu1 %v16362_v58  ;;  %v16480_v56 = vcombine.high %v817_v50, %v825_v52  ;;  %v576_v58 = vld [vmem:[%s29121_s4 + $0x28] sm:$0xff] }
 0x1ed   :  { %2429 = vmatprep.subr.bf16.mxu0 %v16368_v59  ;;  %v584_v59 = vld [vmem:[%s29121_s4 + $0x68] sm:$0xff] }
 0x1ee   :  { %v16238_v63 = vcombine.high %v576_v58, %v584_v59  ;;  %v776_v49 = vld [vmem:[%s29121_s4 + $0x668] sm:$0xff] }
 0x1ef   :  { %2277 = vmatpush1.bf16.msra.mxu1 %v16361_v1  ;;  %v600_v1 = vld [vmem:[%s29121_s4 + $0xe8] sm:$0xff]  ;;  %v16430_v52 = vcombine.high %v768_v48, %v776_v49 }
 0x1f0   :  { %2430 = vmatpush1.bf16.msra.mxu0 %v16367_v2  ;;  %2278 = vmatprep.subr.bf16.mxu1 %v16378_v3  ;;  %v16237_v2 = vcombine.low %v576_v58, %v584_v59  ;;  %v16254_v3 = vcombine.high %v592_v0, %v600_v1  ;;  %v16253_v6 = vcombine.low %v592_v0, %v600_v1  ;;  %v800_v58 = vld [vmem:[%s29121_s4 + $0x728] sm:$0xff] }
 0x1f1   :  { %2431 = vmatprep.subr.bf16.mxu0 %v16384_v4  ;;  %v608_v4 = vld [vmem:[%s29121_s4 + $0x128] sm:$0xff] }
 0x1f2   :  { %v16270_v7 = vcombine.high %v608_v4, %v616_v5  ;;  %v808_v59 = vld [vmem:[%s29121_s4 + $0x768] sm:$0xff] }
 0x1f3   :  { %2279 = vmatpush1.bf16.msra.mxu1 %v16377_v9  ;;  %v632_v9 = vld [vmem:[%s29121_s4 + $0x1e8] sm:$0xff]  ;;  %v16461_v1 = vcombine.low %v800_v58, %v808_v59 }
 0x1f4   :  { %2432 = vmatpush1.bf16.msra.mxu0 %v16383_v10  ;;  %2280 = vmatprep.subr.bf16.mxu1 %v16394_v11  ;;  %v16269_v10 = vcombine.low %v608_v4, %v616_v5  ;;  %v16286_v11 = vcombine.high %v624_v8, %v632_v9  ;;  %v16285_v15 = vcombine.low %v624_v8, %v632_v9  ;;  %v824_v0 = vld [vmem:[%s29121_s4 + $0x7e8] sm:$0xff]  ;;  %v586_v4 = vld [vmem:[%s29121_s4 + $0x78] sm:$0xff] }
 0x1f5   :  { %2433 = vmatprep.subr.bf16.mxu0 %v16400_v12  ;;  %v2528_v12 = vld [vmem:[#allocation2 + $0x60] sm:$0xff]  ;;  %v602_v8 = vld [vmem:[%s29121_s4 + $0xf8] sm:$0xff] }
 0x1f7   :  { %2281 = vmatpush1.bf16.msra.mxu1 %v16393_v17  ;;  %v656_v17 = vld [vmem:[%s29121_s4 + $0x2a8] sm:$0xff] }
 0x1f8   :  { %2434 = vmatpush1.bf16.msra.mxu0 %v16399_v18  ;;  %2282 = vmatprep.subr.bf16.mxu1 %v16410_v19  ;;  %v664_v18 = vld [vmem:[%s29121_s4 + $0x2e8] sm:$0xff]  ;;  %v16301_v19 = vcombine.low %v640_v13, %v648_v14 }
 0x1f9   :  { %2435 = vmatprep.subr.bf16.mxu0 %v16416_v20  ;;  %v16318_v20 = vcombine.high %v656_v17, %v664_v18  ;;  %v16317_v23 = vcombine.low %v656_v17, %v664_v18 }
 0x1fb   :  { %2283 = vmatpush1.bf16.msra.mxu1 %v16409_v25  ;;  %v688_v25 = vld [vmem:[%s29121_s4 + $0x3a8] sm:$0xff] }
 0x1fc   :  { %2436 = vmatpush1.bf16.msra.mxu0 %v16415_v26  ;;  %2284 = vmatprep.subr.bf16.mxu1 %v16426_v27  ;;  %v696_v26 = vld [vmem:[%s29121_s4 + $0x3e8] sm:$0xff]  ;;  %v16333_v27 = vcombine.low %v672_v21, %v680_v22 }
 0x1fd   :  { %2437 = vmatprep.subr.bf16.mxu0 %v16432_v34  ;;  %v16350_v34 = vcombine.high %v688_v25, %v696_v26  ;;  %v16349_v37 = vcombine.low %v688_v25, %v696_v26 }
 0x1ff   :  { %2285 = vmatpush1.bf16.msra.mxu1 %v16425_v28  ;;  %v720_v28 = vld [vmem:[%s29121_s4 + $0x4a8] sm:$0xff] }
 0x200   :  { %2438 = vmatpush1.bf16.msra.mxu0 %v16431_v29  ;;  %2286 = vmatprep.subr.bf16.mxu1 %v16442_v30  ;;  %v728_v29 = vld [vmem:[%s29121_s4 + $0x4e8] sm:$0xff]  ;;  %v16365_v30 = vcombine.low %v704_v35, %v712_v36 }
 0x201   :  { %2439 = vmatprep.subr.bf16.mxu0 %v16448_v31  ;;  %v16382_v31 = vcombine.high %v720_v28, %v728_v29  ;;  %v16381_v40 = vcombine.low %v720_v28, %v728_v29  ;;  %v690_v29 = vld [vmem:[%s29121_s4 + $0x3b8] sm:$0xff] }
 0x203   :  { %2287 = vmatpush1.bf16.msra.mxu1 %v16441_v43  ;;  %v752_v43 = vld [vmem:[%s29121_s4 + $0x5a8] sm:$0xff] }
 0x204   :  { %2440 = vmatpush1.bf16.msra.mxu0 %v16447_v44  ;;  %2288 = vmatprep.subr.bf16.mxu1 %v16458_v46  ;;  %v760_v44 = vld [vmem:[%s29121_s4 + $0x5e8] sm:$0xff]  ;;  %v16397_v46 = vcombine.low %v736_v33, %v744_v39 }
 0x205   :  { %2441 = vmatprep.subr.bf16.mxu0 %v16464_v47  ;;  %v16414_v47 = vcombine.high %v752_v43, %v760_v44  ;;  %v16413_v50 = vcombine.low %v752_v43, %v760_v44 }
 0x207   :  { %2289 = vmatpush1.bf16.msra.mxu1 %v16457_v53  ;;  %v784_v53 = vld [vmem:[%s29121_s4 + $0x6a8] sm:$0xff] }
 0x208   :  { %2442 = vmatpush1.bf16.msra.mxu0 %v16463_v54  ;;  %2290 = vmatprep.subr.bf16.mxu1 %v16474_v55  ;;  %v792_v54 = vld [vmem:[%s29121_s4 + $0x6e8] sm:$0xff]  ;;  %v16429_v55 = vcombine.low %v768_v48, %v776_v49  ;;  %v706_v49 = vld [vmem:[%s29121_s4 + $0x438] sm:$0xff] }
 0x209   :  { %2443 = vmatprep.subr.bf16.mxu0 %v16480_v56  ;;  %v16446_v56 = vcombine.high %v784_v53, %v792_v54 }
 0x20b   :  { %2291 = vmatpush1.bf16.msra.mxu1 %v16473_v60  ;;  %v16445_v60 = vcombine.low %v784_v53, %v792_v54 }
 0x20c   :  { %2444 = vmatpush1.bf16.msra.mxu0 %v16479_v62  ;;  %2362 = vmatprep.subr.bf16.mxu1 %v16238_v63  ;;  %v16462_v62 = vcombine.high %v800_v58, %v808_v59  ;;  %v816_v63 = vld [vmem:[%s29121_s4 + $0x7a8] sm:$0xff]  ;;  %v722_v59 = vld [vmem:[%s29121_s4 + $0x4b8] sm:$0xff] }
 0x20d   :  { %v16477_v5 = vcombine.low %v816_v63, %v824_v0 }
 0x20e   :  { %2293 = vmatmul.mubr.bf16.vlgmr.msra.gmra.mrb[16].mxu1 %v23534_v32 }
 0x20f   :  { %2446 = vmatmul.mubr.bf16.vlgmr.msra.gmra.mrb[24].mxu0 %v23534_v32  ;;  %2302 = vmatprep.mubr.bf16.mxu1 %v23561_v51 }
 0x210   :  { %2363 = vmatpush1.bf16.msra.mxu1 %v16237_v2  ;;  %2455 = vmatprep.mubr.bf16.mxu0 %v23561_v51  ;;  %v16478_v2 = vcombine.high %v816_v63, %v824_v0  ;;  %v2529_v0 = vld [vmem:[#allocation2 + $0x68] sm:$0xff] }
 0x211   :  { %2364 = vmatprep.subr.bf16.mxu1 %v16254_v3  ;;  %v578_v3 = vld [vmem:[%s29121_s4 + $0x38] sm:$0xff] }
 0x212   :  { %v16241_v9 = vcombine.low %v578_v3, %v586_v4 }
 0x214   :  { %2365 = vmatpush1.bf16.msra.mxu1 %v16253_v6  ;;  %v16242_v6 = vcombine.high %v578_v3, %v586_v4  ;;  %v2530_v4 = vld [vmem:[#allocation2 + $0x70] sm:$0xff] }
 0x215   :  { %2366 = vmatprep.subr.bf16.mxu1 %v16270_v7  ;;  %v594_v7 = vld [vmem:[%s29121_s4 + $0xb8] sm:$0xff] }
 0x216   :  { %2303 = vmatmul.mubr.bf16.gmra.mrb[20].mxu1 %v23585_v57  ;;  %v16257_v13 = vcombine.low %v594_v7, %v602_v8 }
 0x217   :  { %2456 = vmatmul.mubr.bf16.gmra.mrb[28].mxu0 %v23585_v57  ;;  %2394 = vmatprep.mubr.bf16.mxu1 %v23545_v42 }
 0x218   :  { %2367 = vmatpush1.bf16.msra.mxu1 %v16269_v10  ;;  %19497 = vmatprep.mubr.msk.f32.mxu0 %vm2540_vm0, %v2528_v12  ;;  %v16258_v10 = vcombine.high %v594_v7, %v602_v8  ;;  %v618_v12 = vld [vmem:[%s29121_s4 + $0x178] sm:$0xff] }
 0x219   :  { %2368 = vmatprep.subr.bf16.mxu1 %v16286_v11  ;;  %v610_v11 = vld [vmem:[%s29121_s4 + $0x138] sm:$0xff] }
 0x21a   :  { %v16274_v14 = vcombine.high %v610_v11, %v618_v12  ;;  %v16273_v17 = vcombine.low %v610_v11, %v618_v12  ;;  %v746_v7 = vld [vmem:[%s29121_s4 + $0x578] sm:$0xff] }
 0x21b   :  { %v2531_v8 = vld [vmem:[#allocation2 + $0x78] sm:$0xff] }
 0x21c   :  { %2369 = vmatpush1.bf16.msra.mxu1 %v16285_v15  ;;  %v626_v15 = vld [vmem:[%s29121_s4 + $0x1b8] sm:$0xff] }
 0x21d   :  { %2370 = vmatprep.subr.bf16.mxu1 %v16302_v16  ;;  %v634_v16 = vld [vmem:[%s29121_s4 + $0x1f8] sm:$0xff] }
 0x21e   :  { %v16290_v18 = vcombine.high %v626_v15, %v634_v16  ;;  %v16289_v21 = vcombine.low %v626_v15, %v634_v16  ;;  %v754_v12 = vld [vmem:[%s29121_s4 + $0x5b8] sm:$0xff]  ;;  %v2534_v16 = vld [vmem:[#allocation2 + $0x90] sm:$0xff] }
 0x220   :  { %2371 = vmatpush1.bf16.msra.mxu1 %v16301_v19  ;;  %v642_v19 = vld [vmem:[%s29121_s4 + $0x238] sm:$0xff] }
 0x221   :  { %2372 = vmatprep.subr.bf16.mxu1 %v16318_v20  ;;  %v650_v20 = vld [vmem:[%s29121_s4 + $0x278] sm:$0xff] }
 0x222   :  { %v16306_v22 = vcombine.high %v642_v19, %v650_v20  ;;  %v16305_v25 = vcombine.low %v642_v19, %v650_v20  ;;  %v778_v19 = vld [vmem:[%s29121_s4 + $0x678] sm:$0xff] }
 0x223   :  { %v2535_v20 = vld [vmem:[#allocation2 + $0x98] sm:$0xff] }
 0x224   :  { %2373 = vmatpush1.bf16.msra.mxu1 %v16317_v23  ;;  %v658_v23 = vld [vmem:[%s29121_s4 + $0x2b8] sm:$0xff] }
 0x225   :  { %2374 = vmatprep.subr.bf16.mxu1 %v16334_v24  ;;  %v666_v24 = vld [vmem:[%s29121_s4 + $0x2f8] sm:$0xff] }
 0x226   :  { %v16322_v26 = vcombine.high %v658_v23, %v666_v24 }
 0x228   :  { %2375 = vmatpush1.bf16.msra.mxu1 %v16333_v27  ;;  %v674_v27 = vld [vmem:[%s29121_s4 + $0x338] sm:$0xff] }
 0x229   :  { %2376 = vmatprep.subr.bf16.mxu1 %v16350_v34  ;;  %v16321_v34 = vcombine.low %v658_v23, %v666_v24  ;;  %v786_v24 = vld [vmem:[%s29121_s4 + $0x6b8] sm:$0xff] }
 0x22c   :  { %2377 = vmatpush1.bf16.msra.mxu1 %v16349_v37 }
 0x22d   :  { %2378 = vmatprep.subr.bf16.mxu1 %v16366_v38 }
 0x230   :  { %2379 = vmatpush1.bf16.msra.mxu1 %v16365_v30  ;;  %v698_v30 = vld [vmem:[%s29121_s4 + $0x3f8] sm:$0xff] }
 0x231   :  { %2380 = vmatprep.subr.bf16.mxu1 %v16382_v31  ;;  %v16354_v48 = vcombine.high %v690_v29, %v698_v30 }
 0x234   :  { %2381 = vmatpush1.bf16.msra.mxu1 %v16381_v40 }
 0x235   :  { %2382 = vmatprep.subr.bf16.mxu1 %v16398_v41 }
 0x238   :  { %2383 = vmatpush1.bf16.msra.mxu1 %v16397_v46 }
 0x239   :  { %2384 = vmatprep.subr.bf16.mxu1 %v16414_v47 }
 0x23c   :  { %2385 = vmatpush1.bf16.msra.mxu1 %v16413_v50  ;;  %v714_v50 = vld [vmem:[%s29121_s4 + $0x478] sm:$0xff] }
 0x23d   :  { %2386 = vmatprep.subr.bf16.mxu1 %v16430_v52  ;;  %v16353_v52 = vcombine.low %v690_v29, %v698_v30  ;;  %v16369_v3 = vcombine.low %v706_v49, %v714_v50  ;;  %v818_v30 = vld [vmem:[%s29121_s4 + $0x7b8] sm:$0xff] }
 0x240   :  { %2387 = vmatpush1.bf16.msra.mxu1 %v16429_v55  ;;  %v16370_v55 = vcombine.high %v706_v49, %v714_v50  ;;  %v2520_v49 = vld [vmem:[#allocation2 + $0x28] sm:$0xff]  ;;  %v2521_v50 = vld [vmem:[#allocation2 + $0x30] sm:$0xff] }
 0x241   :  { %2388 = vmatprep.subr.bf16.mxu1 %v16446_v56 }
 0x244   :  { %2389 = vmatpush1.bf16.msra.mxu1 %v16445_v60  ;;  %v730_v60 = vld [vmem:[%s29121_s4 + $0x4f8] sm:$0xff] }
 0x245   :  { %2390 = vmatprep.subr.bf16.mxu1 %v16462_v62 }
 0x248   :  { %2391 = vmatpush1.bf16.msra.mxu1 %v16461_v1 }
 0x249   :  { %2392 = vmatprep.subr.bf16.mxu1 %v16478_v2 }
 0x24c   :  { %2393 = vmatpush1.bf16.msra.mxu1 %v16477_v5  ;;  %v16386_v5 = vcombine.high %v722_v59, %v730_v60 }
 0x24d   :  { %2464 = vmatprep.subr.bf16.mxu1 %v16242_v6  ;;  %v738_v6 = vld [vmem:[%s29121_s4 + $0x538] sm:$0xff] }
 0x24e   :  { %v16402_v11 = vcombine.high %v738_v6, %v746_v7  ;;  %v16401_v15 = vcombine.low %v738_v6, %v746_v7 }
 0x24f   :  { %2395 = vmatmul.mubr.bf16.vlgmr.msra.gmra.mrb[24].mxu1 %v23534_v32 }
 0x250   :  { %2404 = vmatprep.mubr.bf16.mxu1 %v23561_v51  ;;  %2465 = vmatpush1.bf16.msra.mxu1 %v16241_v9  ;;  %v16385_v9 = vcombine.low %v722_v59, %v730_v60  ;;  %v2526_v59 = vld [vmem:[#allocation2 + $0x58] sm:$0xff] }
 0x251   :  { %2466 = vmatprep.subr.bf16.mxu1 %v16258_v10  ;;  %v2532_v10 = vld [vmem:[#allocation2 + $0x80] sm:$0xff] }
 0x254   :  { %2467 = vmatpush1.bf16.msra.mxu1 %v16257_v13  ;;  %v762_v13 = vld [vmem:[%s29121_s4 + $0x5f8] sm:$0xff] }
 0x255   :  { %2468 = vmatprep.subr.bf16.mxu1 %v16274_v14  ;;  %v2533_v14 = vld [vmem:[#allocation2 + $0x88] sm:$0xff] }
 0x257   :  { %2405 = vmatmul.mubr.bf16.gmra.mrb[28].mxu1 %v23585_v57 }
 0x258   :  { %2469 = vmatpush1.bf16.msra.mxu1 %v16273_v17  ;;  %2496 = vmatprep.mubr.bf16.mxu1 %v23545_v42  ;;  %v682_v42 = vld [vmem:[%s29121_s4 + $0x378] sm:$0xff]  ;;  %v16418_v17 = vcombine.high %v754_v12, %v762_v13 }
 0x259   :  { %2470 = vmatprep.subr.bf16.mxu1 %v16290_v18  ;;  %v16338_v37 = vcombine.high %v674_v27, %v682_v42  ;;  %v16337_v43 = vcombine.low %v674_v27, %v682_v42  ;;  %v770_v18 = vld [vmem:[%s29121_s4 + $0x638] sm:$0xff]  ;;  %v2538_v42 = vld [vmem:[#allocation2 + $0xb0] sm:$0xff] }
 0x25a   :  { %v16434_v23 = vcombine.high %v770_v18, %v778_v19  ;;  %v16433_v27 = vcombine.low %v770_v18, %v778_v19  ;;  %v2868_v18 = vld [vmem:[#allocation2 + $0xe0] sm:$0xff]  ;;  %v2869_v19 = vld [vmem:[#allocation2 + $0xe8] sm:$0xff] }
 0x25c   :  { %2471 = vmatpush1.bf16.msra.mxu1 %v16289_v21  ;;  %v16417_v21 = vcombine.low %v754_v12, %v762_v13  ;;  %v2866_v12 = vld [vmem:[#allocation2 + $0xd0] sm:$0xff] }
 0x25d   :  { %2472 = vmatprep.subr.bf16.mxu1 %v16306_v22  ;;  %v2536_v22 = vld [vmem:[#allocation2 + $0xa0] sm:$0xff] }
 0x260   :  { %2473 = vmatpush1.bf16.msra.mxu1 %v16305_v25  ;;  %v794_v25 = vld [vmem:[%s29121_s4 + $0x6f8] sm:$0xff] }
 0x261   :  { %v2141_v35 = vpop.f32.mrb[0].mxu1  ;;  %v2243_v36 = vpop.f32.mrb[8].mxu0  ;;  %2474 = vmatprep.subr.bf16.mxu1 %v16322_v26  ;;  %v2537_v26 = vld [vmem:[#allocation2 + $0xa8] sm:$0xff] }
 0x262   :  { %v2143_v38 = vpop.f32.mrb[1].mxu1  ;;  %v2245_v28 = vpop.f32.mrb[9].mxu0 }
 0x263   :  { %v2145_v31 = vpop.f32.mrb[2].mxu1  ;;  %v2247_v33 = vpop.f32.mrb[10].mxu0 }
 0x264   :  { %2475 = vmatpush1.bf16.msra.mxu1 %v16321_v34  ;;  %v24091_v39 = vpack.c.bf16 %v2247_v33, %v2243_v36  ;;  %v2147_v40 = vpop.f32.mrb[3].mxu1  ;;  %v2249_v41 = vpop.f32.mrb[11].mxu0  ;;  %v21415_v44 = vpack.c.bf16 %v2145_v31, %v2141_v35  ;;  %v16450_v34 = vcombine.high %v786_v24, %v794_v25  ;;  %v802_v35 = vld [vmem:[%s29121_s4 + $0x738] sm:$0xff]  ;;  %v2516_v33 = vld [vmem:[#allocation2 + $0x8] sm:$0xff] }
 0x265   :  { %v24093_v46 = vpack.c.bf16 %v2249_v41, %v2245_v28  ;;  %2476 = vmatprep.subr.bf16.mxu1 %v16338_v37  ;;  %v21411_v47 = vpack.c.bf16 %v2147_v40, %v2143_v38  ;;  %v810_v36 = vld [vmem:[%s29121_s4 + $0x778] sm:$0xff]  ;;  %v16449_v38 = vcombine.low %v786_v24, %v794_v25  ;;  %v2515_v28 = vld [vmem:[#allocation2] sm:$0xff]  ;;  %v2517_v41 = vld [vmem:[#allocation2 + $0x10] sm:$0xff] }
 0x266   :  { %v2539_v37 = vld [vmem:[#allocation2 + $0xb8] sm:$0xff]  ;;  %v16466_v29 = vcombine.high %v802_v35, %v810_v36  ;;  %v16465_v40 = vcombine.low %v802_v35, %v810_v36  ;;  %v2874_v24 = vld [vmem:[#allocation2 + $0x110] sm:$0xff]  ;;  %v3054_v35 = vld [vmem:[#allocation2 + $0x140] sm:$0xff] }
 0x267   :  { %21412 = vmatprep.subr.bf16.mxu0 %v21411_v47  ;;  %v826_v31 = vld [vmem:[%s29121_s4 + $0x7f8] sm:$0xff]  ;;  %v3055_v36 = vld [vmem:[#allocation2 + $0x148] sm:$0xff] }
 0x268   :  { %2477 = vmatpush1.bf16.msra.mxu1 %v16337_v43  ;;  %21414 = vmatpush3.bf16.msra.mxu0 %v21411_v47  ;;  %v16482_v43 = vcombine.high %v818_v30, %v826_v31  ;;  %v16481_v47 = vcombine.low %v818_v30, %v826_v31  ;;  %v2875_v25 = vld [vmem:[#allocation2 + $0x118] sm:$0xff]  ;;  %v3236_v30 = vld [vmem:[#allocation2 + $0x180] sm:$0xff]  ;;  %v3237_v31 = vld [vmem:[#allocation2 + $0x188] sm:$0xff] }
 0x269   :  { %v2151_v53 = vpop.f32.mrb[4].mxu1  ;;  %v24101_v54 = vpop.f32.mrb[12].mxu0  ;;  %2478 = vmatprep.subr.bf16.mxu1 %v16354_v48  ;;  %v2519_v48 = vld [vmem:[#allocation2 + $0x20] sm:$0xff] }
 0x26a   :  { %v2153_v56 = vpop.f32.mrb[5].mxu1  ;;  %v24103_v58 = vpop.f32.mrb[13].mxu0 }
 0x26b   :  { %v2155_v62 = vpop.f32.mrb[6].mxu1  ;;  %v2257_v63 = vpop.f32.mrb[14].mxu0  ;;  %19495 = vmatprep.subr.mxu0 %v2153_v56 }
 0x26c   :  { %2479 = vmatpush1.bf16.msra.mxu1 %v16353_v52  ;;  %v2156_v1 = vpop.f32.mrb[7].mxu1  ;;  %v2258_v2 = vpop.f32.mrb[15].mxu0  ;;  %19496 = vmatpush3.msra.mxu0 %v2153_v56  ;;  %v2522_v52 = vld [vmem:[#allocation2 + $0x38] sm:$0xff]  ;;  %v2525_v56 = vld [vmem:[#allocation2 + $0x50] sm:$0xff] }
 0x26d   :  { %2480 = vmatprep.subr.bf16.mxu1 %v16370_v55  ;;  %21416 = vmatprep.subr.bf16.mxu0 %v21415_v44  ;;  %v2524_v55 = vld [vmem:[#allocation2 + $0x48] sm:$0xff] }
 0x26e   :  { %19498 = vmatmul.mubr.msk.f32.vlgmr.msra.gmra.mrb[32].mxu0 %vm2540_vm0, %v2529_v0 }
 0x26f   :  { %21418 = vmatpush3.bf16.msra.mxu0 %v21415_v44  ;;  %19500 = vmatprep.mubr.msk.f32.mxu0 %vm2540_vm0, %v2530_v4  ;;  %v2518_v44 = vld [vmem:[#allocation2 + $0x18] sm:$0xff] }
 0x270   :  { %2481 = vmatpush1.bf16.msra.mxu1 %v16369_v3  ;;  %19519 = vmatprep.subr.mxu0 %v2151_v53 }
 0x271   :  { %2482 = vmatprep.subr.bf16.mxu1 %v16386_v5 }
 0x272   :  { %19501 = vmatmul.mubr.msk.f32.gmra.mrb[34].mxu0 %vm2540_vm0, %v2531_v8 }
 0x273   :  { %19520 = vmatpush3.msra.mxu0 %v2151_v53  ;;  %19503 = vmatprep.mubr.msk.f32.mxu0 %vm2540_vm0, %v2532_v10  ;;  %v2523_v53 = vld [vmem:[#allocation2 + $0x40] sm:$0xff] }
 0x274   :  { %2483 = vmatpush1.bf16.msra.mxu1 %v16385_v9  ;;  %v2865_v9 = vld [vmem:[#allocation2 + $0xc8] sm:$0xff] }
 0x275   :  { %2484 = vmatprep.subr.bf16.mxu1 %v16402_v11 }
 0x276   :  { %19504 = vmatmul.mubr.msk.f32.gmra.mrb[36].mxu0 %vm2540_vm0, %v2533_v14 }
 0x277   :  { %19506 = vmatprep.mubr.msk.f32.mxu0 %vm2540_vm0, %v2534_v16 }
 0x278   :  { %2485 = vmatpush1.bf16.msra.mxu1 %v16401_v15 }
 0x279   :  { %2486 = vmatprep.subr.bf16.mxu1 %v16418_v17  ;;  %v2867_v17 = vld [vmem:[#allocation2 + $0xd8] sm:$0xff] }
 0x27a   :  { %19507 = vmatmul.mubr.msk.f32.gmra.mrb[38].mxu0 %vm2540_vm0, %v2535_v20  ;;  %v2870_v20 = vld [vmem:[#allocation2 + $0xf0] sm:$0xff] }
 0x27b   :  { %19509 = vmatprep.mubr.msk.f32.mxu0 %vm2540_vm0, %v2536_v22  ;;  %v2872_v22 = vld [vmem:[#allocation2 + $0x100] sm:$0xff] }
 0x27c   :  { %2487 = vmatpush1.bf16.msra.mxu1 %v16417_v21  ;;  %v2871_v21 = vld [vmem:[#allocation2 + $0xf8] sm:$0xff] }
 0x27d   :  { %2488 = vmatprep.subr.bf16.mxu1 %v16434_v23  ;;  %v2873_v23 = vld [vmem:[#allocation2 + $0x108] sm:$0xff] }
 0x27e   :  { %19510 = vmatmul.mubr.msk.f32.gmra.mrb[40].mxu0 %vm2540_vm0, %v2537_v26  ;;  %v3050_v26 = vld [vmem:[#allocation2 + $0x120] sm:$0xff] }
 0x27f   :  { %19512 = vmatprep.mubr.msk.f32.mxu0 %vm2540_vm0, %v2538_v42  ;;  %v3052_v42 = vld [vmem:[#allocation2 + $0x130] sm:$0xff] }
 0x280   :  { %2489 = vmatpush1.bf16.msra.mxu1 %v16433_v27  ;;  %v3051_v27 = vld [vmem:[#allocation2 + $0x128] sm:$0xff] }
 0x281   :  { %2490 = vmatprep.subr.bf16.mxu1 %v16450_v34  ;;  %v3053_v34 = vld [vmem:[#allocation2 + $0x138] sm:$0xff] }
 0x282   :  { %19513 = vmatmul.mubr.msk.f32.gmra.mrb[42].mxu0 %vm2540_vm0, %v2539_v37  ;;  %v3056_v37 = vld [vmem:[#allocation2 + $0x150] sm:$0xff] }
 0x283   :  { %19521 = vmatprep.mubr.msk.f32.mxu0 %vm2540_vm0, %v2515_v28  ;;  %v3059_v28 = vld [vmem:[#allocation2 + $0x168] sm:$0xff] }
 0x284   :  { %2491 = vmatpush1.bf16.msra.mxu1 %v16449_v38  ;;  %v3058_v38 = vld [vmem:[#allocation2 + $0x160] sm:$0xff] }
 0x285   :  { %2492 = vmatprep.subr.bf16.mxu1 %v16466_v29  ;;  %v3060_v29 = vld [vmem:[#allocation2 + $0x170] sm:$0xff] }
 0x286   :  { %19522 = vmatmul.mubr.msk.f32.vlgmr.msra.gmra.mrb[32].mxu0 %vm2540_vm0, %v2516_v33  ;;  %v3238_v33 = vld [vmem:[#allocation2 + $0x190] sm:$0xff] }
 0x287   :  { %19524 = vmatprep.mubr.msk.f32.mxu0 %vm2540_vm0, %v2517_v41  ;;  %v3240_v41 = vld [vmem:[#allocation2 + $0x1a0] sm:$0xff] }
 0x288   :  { %2493 = vmatpush1.bf16.msra.mxu1 %v16465_v40  ;;  %v3239_v40 = vld [vmem:[#allocation2 + $0x198] sm:$0xff] }
 0x289   :  { %2494 = vmatprep.subr.bf16.mxu1 %v16482_v43 }
 0x28a   :  { %19525 = vmatmul.mubr.msk.f32.gmra.mrb[34].mxu0 %vm2540_vm0, %v2518_v44  ;;  %v3241_v44 = vld [vmem:[#allocation2 + $0x1a8] sm:$0xff] }
 0x28b   :  { %19527 = vmatprep.mubr.msk.f32.mxu0 %vm2540_vm0, %v2519_v48 }
 0x28c   :  { %2495 = vmatpush1.bf16.msra.mxu1 %v16481_v47 }
 0x28e   :  { %19528 = vmatmul.mubr.msk.f32.gmra.mrb[36].mxu0 %vm2540_vm0, %v2520_v49  ;;  %v3242_v49 = vld [vmem:[#allocation2 + $0x1b0] sm:$0xff] }
 0x28f   :  { %2497 = vmatmul.mubr.bf16.vlgmr.msra.gmra.mrb[32].mxu1 %v23534_v32  ;;  %19530 = vmatprep.mubr.msk.f32.mxu0 %vm2540_vm0, %v2521_v50  ;;  %v2864_v32 = vld [vmem:[#allocation2 + $0xc0] sm:$0xff] }
 0x290   :  { %2506 = vmatprep.mubr.bf16.mxu1 %v23561_v51 }
 0x292   :  { %19531 = vmatmul.mubr.msk.f32.gmra.mrb[38].mxu0 %vm2540_vm0, %v2522_v52 }
 0x293   :  { %19533 = vmatprep.mubr.msk.f32.mxu0 %vm2540_vm0, %v2523_v53 }
 0x296   :  { %19534 = vmatmul.mubr.msk.f32.gmra.mrb[40].mxu0 %vm2540_vm0, %v2524_v55 }
 0x297   :  { %2507 = vmatmul.mubr.bf16.gmra.mrb[36].mxu1 %v23585_v57  ;;  %19536 = vmatprep.mubr.msk.f32.mxu0 %vm2540_vm0, %v2525_v56 }
 0x298   :  { %6285 = vmatprep.mubr.bf16.mxu1 %v23085_v45 }
 0x29a   :  { %19537 = vmatmul.mubr.msk.f32.gmra.mrb[42].mxu0 %vm2540_vm0, %v2526_v59 }
 0x29b   :  { %19545 = vmatprep.mubr.msk.f32.mxu0 %vm2540_vm0, %v2864_v32 }
 0x2a1   :  { %v2192_v51 = vpop.f32.mrb[8].mxu1  ;;  %v2345_v60 = vpop.f32.mrb[16].mxu0 }
 0x2a2   :  { %v2194_v62 = vpop.f32.mrb[9].mxu1  ;;  %v2347_v63 = vpop.f32.mrb[17].mxu0 }
 0x2a3   :  { %v2196_v0 = vpop.f32.mrb[10].mxu1  ;;  %v2349_v1 = vpop.f32.mrb[18].mxu0 }
 0x2a4   :  { %v24175_v2 = vpack.c.bf16 %v2349_v1, %v2345_v60  ;;  %v2198_v3 = vpop.f32.mrb[11].mxu1  ;;  %v2351_v57 = vpop.f32.mrb[19].mxu0  ;;  %v21419_v4 = vpack.c.bf16 %v2196_v0, %v2192_v51  ;;  %v3244_v60 = vld [vmem:[#allocation2 + $0x1c0] sm:$0xff] }
 0x2a5   :  { %v24177_v5 = vpack.c.bf16 %v2351_v57, %v2347_v63  ;;  %v21423_v6 = vpack.c.bf16 %v2198_v3, %v2194_v62  ;;  %v3245_v63 = vld [vmem:[#allocation2 + $0x1c8] sm:$0xff]  ;;  %v3246_v3 = vld [vmem:[#allocation2 + $0x1d0] sm:$0xff] }
 0x2a6   :  { %21420 = vmatprep.subr.bf16.mxu0 %v21419_v4 }
 0x2a7   :  { %21422 = vmatpush3.bf16.msra.mxu0 %v21419_v4 }
 0x2a9   :  { %v2202_v7 = vpop.f32.mrb[12].mxu1  ;;  %v24179_v8 = vpop.f32.mrb[20].mxu0 }
 0x2aa   :  { %v2204_v10 = vpop.f32.mrb[13].mxu1  ;;  %v24181_v11 = vpop.f32.mrb[21].mxu0  ;;  %19543 = vmatprep.subr.mxu0 %v2202_v7 }
 0x2ab   :  { %v2206_v13 = vpop.f32.mrb[14].mxu1  ;;  %v2359_v14 = vpop.f32.mrb[22].mxu0  ;;  %19544 = vmatpush3.msra.mxu0 %v2202_v7 }
 0x2ac   :  { %v2207_v15 = vpop.f32.mrb[15].mxu1  ;;  %v2360_v16 = vpop.f32.mrb[23].mxu0  ;;  %19546 = vmatmul.mubr.msk.f32.vlgmr.msra.gmra.mrb[32].mxu0 %vm2540_vm0, %v2865_v9  ;;  %21424 = vmatprep.subr.bf16.mxu0 %v21423_v6  ;;  %v3423_v13 = vld [vmem:[#allocation2 + $0x1e8] sm:$0xff]  ;;  %v3424_v14 = vld [vmem:[#allocation2 + $0x1f0] sm:$0xff] }
 0x2ad   :  { %21426 = vmatpush3.bf16.msra.mxu0 %v21423_v6  ;;  %19548 = vmatprep.mubr.msk.f32.mxu0 %vm2540_vm0, %v2866_v12  ;;  %v3422_v12 = vld [vmem:[#allocation2 + $0x1e0] sm:$0xff]  ;;  %v3425_v15 = vld [vmem:[#allocation2 + $0x1f8] sm:$0xff] }
 0x2ae   :  { %19567 = vmatprep.subr.mxu0 %v2204_v10  ;;  %v3426_v16 = vld [vmem:[#allocation2 + $0x200] sm:$0xff] }
 0x2b0   :  { %19549 = vmatmul.mubr.msk.f32.gmra.mrb[34].mxu0 %vm2540_vm0, %v2867_v17  ;;  %v3427_v17 = vld [vmem:[#allocation2 + $0x208] sm:$0xff] }
 0x2b1   :  { %19568 = vmatpush3.msra.mxu0 %v2204_v10  ;;  %19551 = vmatprep.mubr.msk.f32.mxu0 %vm2540_vm0, %v2868_v18  ;;  %v3247_v10 = vld [vmem:[#allocation2 + $0x1d8] sm:$0xff]  ;;  %v3428_v18 = vld [vmem:[#allocation2 + $0x210] sm:$0xff] }
 0x2b2   :  { %21428 = vmatprep.subr.bf16.mxu0 %v24091_v39 }
 0x2b4   :  { %19552 = vmatmul.mubr.msk.f32.gmra.mrb[36].mxu0 %vm2540_vm0, %v2869_v19  ;;  %v3429_v19 = vld [vmem:[#allocation2 + $0x218] sm:$0xff] }
 0x2b5   :  { %19554 = vmatprep.mubr.msk.f32.mxu0 %vm2540_vm0, %v2870_v20  ;;  %v3430_v20 = vld [vmem:[#allocation2 + $0x220] sm:$0xff] }
 0x2b8   :  { %19555 = vmatmul.mubr.msk.f32.gmra.mrb[38].mxu0 %vm2540_vm0, %v2871_v21  ;;  %v3431_v21 = vld [vmem:[#allocation2 + $0x228] sm:$0xff] }
 0x2b9   :  { %19557 = vmatprep.mubr.msk.f32.mxu0 %vm2540_vm0, %v2872_v22  ;;  %v3432_v22 = vld [vmem:[#allocation2 + $0x230] sm:$0xff] }
 0x2bc   :  { %19558 = vmatmul.mubr.msk.f32.gmra.mrb[40].mxu0 %vm2540_vm0, %v2873_v23  ;;  %v3433_v23 = vld [vmem:[#allocation2 + $0x238] sm:$0xff] }
 0x2bd   :  { %19560 = vmatprep.mubr.msk.f32.mxu0 %vm2540_vm0, %v2874_v24  ;;  %v3608_v24 = vld [vmem:[#allocation2 + $0x240] sm:$0xff] }
 0x2c0   :  { %19561 = vmatmul.mubr.msk.f32.gmra.mrb[42].mxu0 %vm2540_vm0, %v2875_v25  ;;  %v3609_v25 = vld [vmem:[#allocation2 + $0x248] sm:$0xff] }
 0x2c1   :  { %19569 = vmatprep.mubr.msk.f32.mxu0 %vm2540_vm0, %v3050_v26  ;;  %v3610_v26 = vld [vmem:[#allocation2 + $0x250] sm:$0xff] }
 0x2c4   :  { %19570 = vmatmul.mubr.msk.f32.vlgmr.msra.gmra.mrb[32].mxu0 %vm2540_vm0, %v3051_v27  ;;  %v3611_v27 = vld [vmem:[#allocation2 + $0x258] sm:$0xff] }
 0x2c5   :  { %21430 = vmatpush3.bf16.msra.mxu0 %v24091_v39  ;;  %19572 = vmatprep.mubr.msk.f32.mxu0 %vm2540_vm0, %v3052_v42  ;;  %v3057_v39 = vld [vmem:[#allocation2 + $0x158] sm:$0xff]  ;;  %v3612_v42 = vld [vmem:[#allocation2 + $0x260] sm:$0xff] }
 0x2c6   :  { %19591 = vmatprep.subr.mxu0 %v24101_v54 }
 0x2c8   :  { %19573 = vmatmul.mubr.msk.f32.gmra.mrb[34].mxu0 %vm2540_vm0, %v3053_v34  ;;  %v3613_v34 = vld [vmem:[#allocation2 + $0x268] sm:$0xff] }
 0x2c9   :  { %19592 = vmatpush3.msra.mxu0 %v24101_v54  ;;  %19575 = vmatprep.mubr.msk.f32.mxu0 %vm2540_vm0, %v3054_v35  ;;  %v3061_v54 = vld [vmem:[#allocation2 + $0x178] sm:$0xff]  ;;  %v3614_v35 = vld [vmem:[#allocation2 + $0x270] sm:$0xff] }
 0x2ca   :  { %21432 = vmatprep.subr.bf16.mxu0 %v24093_v46 }
 0x2cc   :  { %19576 = vmatmul.mubr.msk.f32.gmra.mrb[36].mxu0 %vm2540_vm0, %v3055_v36  ;;  %v3615_v36 = vld [vmem:[#allocation2 + $0x278] sm:$0xff] }
 0x2cd   :  { %19578 = vmatprep.mubr.msk.f32.mxu0 %vm2540_vm0, %v3056_v37  ;;  %v3616_v37 = vld [vmem:[#allocation2 + $0x280] sm:$0xff] }
 0x2d0   :  { %19579 = vmatmul.mubr.msk.f32.gmra.mrb[38].mxu0 %vm2540_vm0, %v3057_v39  ;;  %v3617_v39 = vld [vmem:[#allocation2 + $0x288] sm:$0xff] }
 0x2d1   :  { %19581 = vmatprep.mubr.msk.f32.mxu0 %vm2540_vm0, %v3058_v38  ;;  %v3618_v38 = vld [vmem:[#allocation2 + $0x290] sm:$0xff] }
 0x2d4   :  { %19582 = vmatmul.mubr.msk.f32.gmra.mrb[40].mxu0 %vm2540_vm0, %v3059_v28  ;;  %v3619_v28 = vld [vmem:[#allocation2 + $0x298] sm:$0xff] }
 0x2d5   :  { %19584 = vmatprep.mubr.msk.f32.mxu0 %vm2540_vm0, %v3060_v29  ;;  %v3794_v29 = vld [vmem:[#allocation2 + $0x2a0] sm:$0xff] }
 0x2d8   :  { %19585 = vmatmul.mubr.msk.f32.gmra.mrb[42].mxu0 %vm2540_vm0, %v3061_v54  ;;  %v3795_v54 = vld [vmem:[#allocation2 + $0x2a8] sm:$0xff] }
 0x2d9   :  { %19593 = vmatprep.mubr.msk.f32.mxu0 %vm2540_vm0, %v3236_v30 }
 0x2dc   :  { %19594 = vmatmul.mubr.msk.f32.vlgmr.msra.gmra.mrb[32].mxu0 %vm2540_vm0, %v3237_v31  ;;  %v3796_v31 = vld [vmem:[#allocation2 + $0x2b0] sm:$0xff] }
 0x2dd   :  { %21434 = vmatpush3.bf16.msra.mxu0 %v24093_v46  ;;  %19596 = vmatprep.mubr.msk.f32.mxu0 %vm2540_vm0, %v3238_v33 }
 0x2de   :  { %19615 = vmatprep.subr.mxu0 %v24103_v58 }
 0x2e0   :  { %19597 = vmatmul.mubr.msk.f32.gmra.mrb[34].mxu0 %vm2540_vm0, %v3239_v40 }
 0x2e1   :  { %19616 = vmatpush3.msra.mxu0 %v24103_v58  ;;  %v2294_v43 = vpop.f32.mrb[16].mxu1  ;;  %19599 = vmatprep.mubr.msk.f32.mxu0 %vm2540_vm0, %v3240_v41  ;;  %v3243_v58 = vld [vmem:[#allocation2 + $0x1b8] sm:$0xff] }
 0x2e2   :  { %v2447_v47 = vpop.f32.mrb[24].mxu0  ;;  %v2296_v48 = vpop.f32.mrb[17].mxu1 }
 0x2e3   :  { %v2449_v50 = vpop.f32.mrb[25].mxu0  ;;  %v2298_v52 = vpop.f32.mrb[18].mxu1 }
 0x2e4   :  { %v2451_v46 = vpop.f32.mrb[26].mxu0  ;;  %v2300_v53 = vpop.f32.mrb[19].mxu1  ;;  %19600 = vmatmul.mubr.msk.f32.gmra.mrb[36].mxu0 %vm2540_vm0, %v3241_v44  ;;  %v21435_v55 = vpack.c.bf16 %v2298_v52, %v2294_v43  ;;  %v3797_v44 = vld [vmem:[#allocation2 + $0x2b8] sm:$0xff]  ;;  %v3800_v52 = vld [vmem:[#allocation2 + $0x2d0] sm:$0xff] }
 0x2e5   :  { %v24220_v56 = vpack.c.bf16 %v2451_v46, %v2447_v47  ;;  %v2453_v59 = vpop.f32.mrb[27].mxu0  ;;  %19602 = vmatprep.mubr.msk.f32.mxu0 %vm2540_vm0, %v3242_v49  ;;  %v21439_v32 = vpack.c.bf16 %v2300_v53, %v2296_v48  ;;  %v3798_v48 = vld [vmem:[#allocation2 + $0x2c0] sm:$0xff]  ;;  %v3799_v49 = vld [vmem:[#allocation2 + $0x2c8] sm:$0xff] }
 0x2e6   :  { %v24223_v51 = vpack.c.bf16 %v2453_v59, %v2449_v50  ;;  %21436 = vmatprep.subr.bf16.mxu0 %v21435_v55  ;;  %v3802_v59 = vld [vmem:[#allocation2 + $0x2e0] sm:$0xff] }
 0x2e8   :  { %19603 = vmatmul.mubr.msk.f32.gmra.mrb[38].mxu0 %vm2540_vm0, %v3243_v58  ;;  %v3804_v58 = vld [vmem:[#allocation2 + $0x2f0] sm:$0xff] }
 0x2e9   :  { %v2304_v62 = vpop.f32.mrb[20].mxu1  ;;  %19605 = vmatprep.mubr.msk.f32.mxu0 %vm2540_vm0, %v3244_v60  ;;  %v3980_v60 = vld [vmem:[#allocation2 + $0x300] sm:$0xff] }
 0x2ea   :  { %v24227_v0 = vpop.f32.mrb[28].mxu0  ;;  %v2306_v1 = vpop.f32.mrb[21].mxu1 }
 0x2eb   :  { %v24229_v57 = vpop.f32.mrb[29].mxu0  ;;  %v2308_v4 = vpop.f32.mrb[22].mxu1 }
 0x2ec   :  { %v2461_v6 = vpop.f32.mrb[30].mxu0  ;;  %v2309_v7 = vpop.f32.mrb[23].mxu1  ;;  %19606 = vmatmul.mubr.msk.f32.gmra.mrb[40].mxu0 %vm2540_vm0, %v3245_v63  ;;  %v3982_v63 = vld [vmem:[#allocation2 + $0x310] sm:$0xff]  ;;  %v3985_v4 = vld [vmem:[#allocation2 + $0x328] sm:$0xff] }
 0x2ed   :  { %v2462_v9 = vpop.f32.mrb[31].mxu0  ;;  %19608 = vmatprep.mubr.msk.f32.mxu0 %vm2540_vm0, %v3246_v3  ;;  %v3984_v3 = vld [vmem:[#allocation2 + $0x320] sm:$0xff]  ;;  %v3986_v6 = vld [vmem:[#allocation2 + $0x330] sm:$0xff] }
 0x2ee   :  { %v3988_v7 = vld [vmem:[#allocation2 + $0x340] sm:$0xff]  ;;  %v3989_v9 = vld [vmem:[#allocation2 + $0x348] sm:$0xff] }
 0x2f0   :  { %19609 = vmatmul.mubr.msk.f32.gmra.mrb[42].mxu0 %vm2540_vm0, %v3247_v10  ;;  %v3990_v10 = vld [vmem:[#allocation2 + $0x350] sm:$0xff] }
 0x2f1   :  { %19617 = vmatprep.mubr.msk.f32.mxu0 %vm2540_vm0, %v3422_v12  ;;  %v4166_v12 = vld [vmem:[#allocation2 + $0x360] sm:$0xff] }
 0x2f4   :  { %19618 = vmatmul.mubr.msk.f32.vlgmr.msra.gmra.mrb[32].mxu0 %vm2540_vm0, %v3423_v13  ;;  %v4167_v13 = vld [vmem:[#allocation2 + $0x368] sm:$0xff] }
 0x2f5   :  { %21438 = vmatpush3.bf16.msra.mxu0 %v21435_v55  ;;  %19620 = vmatprep.mubr.msk.f32.mxu0 %vm2540_vm0, %v3424_v14  ;;  %v3801_v55 = vld [vmem:[#allocation2 + $0x2d8] sm:$0xff]  ;;  %v4168_v14 = vld [vmem:[#allocation2 + $0x370] sm:$0xff] }
 0x2f6   :  { %19639 = vmatprep.subr.mxu0 %v2304_v62 }
 0x2f8   :  { %19621 = vmatmul.mubr.msk.f32.gmra.mrb[34].mxu0 %vm2540_vm0, %v3425_v15  ;;  %v4169_v15 = vld [vmem:[#allocation2 + $0x378] sm:$0xff] }
 0x2f9   :  { %19640 = vmatpush3.msra.mxu0 %v2304_v62  ;;  %19623 = vmatprep.mubr.msk.f32.mxu0 %vm2540_vm0, %v3426_v16  ;;  %v3981_v62 = vld [vmem:[#allocation2 + $0x308] sm:$0xff]  ;;  %v4170_v16 = vld [vmem:[#allocation2 + $0x380] sm:$0xff] }
 0x2fa   :  { %21440 = vmatprep.subr.bf16.mxu0 %v21439_v32 }
 0x2fc   :  { %19624 = vmatmul.mubr.msk.f32.gmra.mrb[36].mxu0 %vm2540_vm0, %v3427_v17  ;;  %v4171_v17 = vld [vmem:[#allocation2 + $0x388] sm:$0xff] }
 0x2fd   :  { %19626 = vmatprep.mubr.msk.f32.mxu0 %vm2540_vm0, %v3428_v18  ;;  %v4172_v18 = vld [vmem:[#allocation2 + $0x390] sm:$0xff] }
 0x300   :  { %19627 = vmatmul.mubr.msk.f32.gmra.mrb[38].mxu0 %vm2540_vm0, %v3429_v19  ;;  %v4173_v19 = vld [vmem:[#allocation2 + $0x398] sm:$0xff] }
 0x301   :  { %19629 = vmatprep.mubr.msk.f32.mxu0 %vm2540_vm0, %v3430_v20  ;;  %v4174_v20 = vld [vmem:[#allocation2 + $0x3a0] sm:$0xff] }
 0x304   :  { %19630 = vmatmul.mubr.msk.f32.gmra.mrb[40].mxu0 %vm2540_vm0, %v3431_v21  ;;  %v4175_v21 = vld [vmem:[#allocation2 + $0x3a8] sm:$0xff] }
 0x305   :  { %19632 = vmatprep.mubr.msk.f32.mxu0 %vm2540_vm0, %v3432_v22 }
 0x308   :  { %19633 = vmatmul.mubr.msk.f32.gmra.mrb[42].mxu0 %vm2540_vm0, %v3433_v23  ;;  %v4176_v23 = vld [vmem:[#allocation2 + $0x3b0] sm:$0xff] }
 0x309   :  { %19641 = vmatprep.mubr.msk.f32.mxu0 %vm2540_vm0, %v3608_v24 }
 0x30c   :  { %19642 = vmatmul.mubr.msk.f32.vlgmr.msra.gmra.mrb[32].mxu0 %vm2540_vm0, %v3609_v25 }
 0x30d   :  { %21442 = vmatpush3.bf16.msra.mxu0 %v21439_v32  ;;  %19644 = vmatprep.mubr.msk.f32.mxu0 %vm2540_vm0, %v3610_v26  ;;  %v3805_v32 = vld [vmem:[#allocation2 + $0x2f8] sm:$0xff] }
 0x30e   :  { %19663 = vmatprep.subr.mxu0 %v2306_v1 }
 0x310   :  { %19645 = vmatmul.mubr.msk.f32.gmra.mrb[34].mxu0 %vm2540_vm0, %v3611_v27 }
 0x311   :  { %19664 = vmatpush3.msra.mxu0 %v2306_v1  ;;  %19647 = vmatprep.mubr.msk.f32.mxu0 %vm2540_vm0, %v3612_v42  ;;  %v3983_v1 = vld [vmem:[#allocation2 + $0x318] sm:$0xff] }
 0x312   :  { %21444 = vmatprep.subr.bf16.mxu0 %v24175_v2  ;;  %v4177_v42 = vld [vmem:[#allocation2 + $0x3b8] sm:$0xff] }
 0x314   :  { %19648 = vmatmul.mubr.msk.f32.gmra.mrb[36].mxu0 %vm2540_vm0, %v3613_v34 }
 0x315   :  { %19650 = vmatprep.mubr.msk.f32.mxu0 %vm2540_vm0, %v3614_v35  ;;  %v4352_v35 = vld [vmem:[#allocation2 + $0x3c0] sm:$0xff] }
 0x318   :  { %19651 = vmatmul.mubr.msk.f32.gmra.mrb[38].mxu0 %vm2540_vm0, %v3615_v36  ;;  %v4353_v36 = vld [vmem:[#allocation2 + $0x3c8] sm:$0xff] }
 0x319   :  { %19653 = vmatprep.mubr.msk.f32.mxu0 %vm2540_vm0, %v3616_v37 }
 0x31c   :  { %19654 = vmatmul.mubr.msk.f32.gmra.mrb[40].mxu0 %vm2540_vm0, %v3617_v39  ;;  %v4354_v39 = vld [vmem:[#allocation2 + $0x3d0] sm:$0xff] }
 0x31d   :  { %19656 = vmatprep.mubr.msk.f32.mxu0 %vm2540_vm0, %v3618_v38 }
 0x320   :  { %19657 = vmatmul.mubr.msk.f32.gmra.mrb[42].mxu0 %vm2540_vm0, %v3619_v28 }
 0x321   :  { %19665 = vmatprep.mubr.msk.f32.mxu0 %vm2540_vm0, %v3794_v29 }
 0x322   :  { %v2396_v30 = vpop.f32.mrb[24].mxu1 }
 0x323   :  { %v2398_v33 = vpop.f32.mrb[25].mxu1 }
 0x324   :  { %v2400_v40 = vpop.f32.mrb[26].mxu1  ;;  %19666 = vmatmul.mubr.msk.f32.vlgmr.msra.gmra.mrb[32].mxu0 %vm2540_vm0, %v3795_v54  ;;  %v4355_v54 = vld [vmem:[#allocation2 + $0x3d8] sm:$0xff] }
 0x325   :  { %v24261_v41 = vpack.c.bf16 %v2400_v40, %v2396_v30  ;;  %v2402_v43 = vpop.f32.mrb[27].mxu1  ;;  %21446 = vmatpush3.bf16.msra.mxu0 %v24175_v2  ;;  %19668 = vmatprep.mubr.msk.f32.mxu0 %vm2540_vm0, %v3796_v31  ;;  %v4356_v30 = vld [vmem:[#allocation2 + $0x3e0] sm:$0xff]  ;;  %v4357_v31 = vld [vmem:[#allocation2 + $0x3e8] sm:$0xff]  ;;  %v4359_v40 = vld [vmem:[#allocation2 + $0x3f8] sm:$0xff] }
 0x326   :  { %v24265_v47 = vpack.c.bf16 %v2402_v43, %v2398_v33  ;;  %19687 = vmatprep.subr.mxu0 %v24179_v8  ;;  %v4358_v33 = vld [vmem:[#allocation2 + $0x3f0] sm:$0xff]  ;;  %v5485_v43 = vld [vmem:[%s29123_s6] sm:$0xff] }
 0x328   :  { %19669 = vmatmul.mubr.msk.f32.gmra.mrb[34].mxu0 %vm2540_vm0, %v3797_v44  ;;  %v5493_v44 = vld [vmem:[%s29123_s6 + $0x40] sm:$0xff] }
 0x329   :  { %19688 = vmatpush3.msra.mxu0 %v24179_v8  ;;  %19671 = vmatprep.mubr.msk.f32.mxu0 %vm2540_vm0, %v3798_v48  ;;  %v3803_v8 = vld [vmem:[#allocation2 + $0x2e8] sm:$0xff] }
 0x32a   :  { %v2406_v50 = vpop.f32.mrb[28].mxu1  ;;  %21448 = vmatprep.subr.bf16.mxu0 %v24177_v5  ;;  %v4361_v48 = vld [vmem:[#allocation2 + $0x408] sm:$0xff] }
 0x32b   :  { %v24272_v2 = vpop.f32.mrb[29].mxu1 }
 0x32c   :  { %v2410_v46 = vpop.f32.mrb[30].mxu1  ;;  %19672 = vmatmul.mubr.msk.f32.gmra.mrb[36].mxu0 %vm2540_vm0, %v3799_v49  ;;  %v16675_v49 = vcombine.low %v5485_v43, %v5493_v44 }
 0x32d   :  { %v2411_v53 = vpop.f32.mrb[31].mxu1  ;;  %19674 = vmatprep.mubr.msk.f32.mxu0 %vm2540_vm0, %v3800_v52  ;;  %v5509_v52 = vld [vmem:[%s29123_s6 + $0xc0] sm:$0xff] }
 0x32e   :  { %v5517_v53 = vld [vmem:[%s29123_s6 + $0x100] sm:$0xff] }
 0x330   :  { %19675 = vmatmul.mubr.msk.f32.gmra.mrb[38].mxu0 %vm2540_vm0, %v3801_v55  ;;  %v5525_v55 = vld [vmem:[%s29123_s6 + $0x140] sm:$0xff] }
 0x331   :  { %19677 = vmatprep.mubr.msk.f32.mxu0 %vm2540_vm0, %v3802_v59 }
 0x334   :  { %19678 = vmatmul.mubr.msk.f32.gmra.mrb[40].mxu0 %vm2540_vm0, %v3803_v8  ;;  %v4363_v8 = vld [vmem:[#allocation2 + $0x418] sm:$0xff] }
 0x335   :  { %19680 = vmatprep.mubr.msk.f32.mxu0 %vm2540_vm0, %v3804_v58  ;;  %v16708_v58 = vcombine.high %v5517_v53, %v5525_v55 }
 0x338   :  { %19681 = vmatmul.mubr.msk.f32.gmra.mrb[42].mxu0 %vm2540_vm0, %v3805_v32  ;;  %v4538_v32 = vld [vmem:[#allocation2 + $0x420] sm:$0xff] }
 0x339   :  { %19689 = vmatprep.mubr.msk.f32.mxu0 %vm2540_vm0, %v3980_v60  ;;  %v5533_v60 = vld [vmem:[%s29123_s6 + $0x180] sm:$0xff] }
 0x33c   :  { %19690 = vmatmul.mubr.msk.f32.vlgmr.msra.gmra.mrb[32].mxu0 %vm2540_vm0, %v3981_v62  ;;  %v5541_v62 = vld [vmem:[%s29123_s6 + $0x1c0] sm:$0xff] }
 0x33d   :  { %21450 = vmatpush3.bf16.msra.mxu0 %v24177_v5  ;;  %19692 = vmatprep.mubr.msk.f32.mxu0 %vm2540_vm0, %v3982_v63  ;;  %v3987_v5 = vld [vmem:[#allocation2 + $0x338] sm:$0xff]  ;;  %v16707_v63 = vcombine.low %v5517_v53, %v5525_v55  ;;  %v5098_v53 = vld [vmem:[#allocation2 + $0x550] sm:$0xff] }
 0x33e   :  { %19711 = vmatprep.subr.mxu0 %v24181_v11  ;;  %v5099_v55 = vld [vmem:[#allocation2 + $0x558] sm:$0xff] }
 0x340   :  { %19693 = vmatmul.mubr.msk.f32.gmra.mrb[34].mxu0 %vm2540_vm0, %v3983_v1  ;;  %v4539_v1 = vld [vmem:[#allocation2 + $0x428] sm:$0xff] }
 0x341   :  { %19712 = vmatpush3.msra.mxu0 %v24181_v11  ;;  %19695 = vmatprep.mubr.msk.f32.mxu0 %vm2540_vm0, %v3984_v3  ;;  %v3991_v11 = vld [vmem:[#allocation2 + $0x358] sm:$0xff]  ;;  %v4540_v3 = vld [vmem:[#allocation2 + $0x430] sm:$0xff] }
 0x342   :  { %21452 = vmatprep.subr.bf16.mxu0 %v24261_v41 }
 0x344   :  { %19696 = vmatmul.mubr.msk.f32.gmra.mrb[36].mxu0 %vm2540_vm0, %v3985_v4  ;;  %v16724_v4 = vcombine.high %v5533_v60, %v5541_v62 }
 0x345   :  { %19698 = vmatprep.mubr.msk.f32.mxu0 %vm2540_vm0, %v3986_v6  ;;  %v5549_v6 = vld [vmem:[%s29123_s6 + $0x200] sm:$0xff] }
 0x348   :  { %19699 = vmatmul.mubr.msk.f32.gmra.mrb[38].mxu0 %vm2540_vm0, %v3987_v5  ;;  %v5557_v5 = vld [vmem:[%s29123_s6 + $0x240] sm:$0xff] }
 0x349   :  { %19701 = vmatprep.mubr.msk.f32.mxu0 %vm2540_vm0, %v3988_v7  ;;  %v16723_v7 = vcombine.low %v5533_v60, %v5541_v62  ;;  %v5105_v60 = vld [vmem:[#allocation2 + $0x588] sm:$0xff]  ;;  %v5106_v62 = vld [vmem:[#allocation2 + $0x590] sm:$0xff] }
 0x34c   :  { %19702 = vmatmul.mubr.msk.f32.gmra.mrb[40].mxu0 %vm2540_vm0, %v3989_v9  ;;  %v4541_v9 = vld [vmem:[#allocation2 + $0x438] sm:$0xff] }
 0x34d   :  { %19704 = vmatprep.mubr.msk.f32.mxu0 %vm2540_vm0, %v3990_v10  ;;  %v4542_v10 = vld [vmem:[#allocation2 + $0x440] sm:$0xff] }
 0x350   :  { %19705 = vmatmul.mubr.msk.f32.gmra.mrb[42].mxu0 %vm2540_vm0, %v3991_v11  ;;  %v16740_v11 = vcombine.high %v5549_v6, %v5557_v5 }
 0x351   :  { %19713 = vmatprep.mubr.msk.f32.mxu0 %vm2540_vm0, %v4166_v12  ;;  %v5565_v12 = vld [vmem:[%s29123_s6 + $0x280] sm:$0xff] }
 0x354   :  { %19714 = vmatmul.mubr.msk.f32.vlgmr.msra.gmra.mrb[32].mxu0 %vm2540_vm0, %v4167_v13  ;;  %v5573_v13 = vld [vmem:[%s29123_s6 + $0x2c0] sm:$0xff] }
 0x355   :  { %21454 = vmatpush3.bf16.msra.mxu0 %v24261_v41  ;;  %19716 = vmatprep.mubr.msk.f32.mxu0 %vm2540_vm0, %v4168_v14  ;;  %v4360_v41 = vld [vmem:[#allocation2 + $0x400] sm:$0xff]  ;;  %v4543_v14 = vld [vmem:[#allocation2 + $0x448] sm:$0xff] }
 0x356   :  { %19735 = vmatprep.subr.mxu0 %v2406_v50 }
 0x358   :  { %19717 = vmatmul.mubr.msk.f32.gmra.mrb[34].mxu0 %vm2540_vm0, %v4169_v15  ;;  %v16756_v15 = vcombine.high %v5565_v12, %v5573_v13 }
 0x359   :  { %19736 = vmatpush3.msra.mxu0 %v2406_v50  ;;  %19719 = vmatprep.mubr.msk.f32.mxu0 %vm2540_vm0, %v4170_v16  ;;  %v16676_v50 = vcombine.high %v5485_v43, %v5493_v44  ;;  %v4544_v16 = vld [vmem:[#allocation2 + $0x450] sm:$0xff]  ;;  %v4913_v43 = vld [vmem:[#allocation2 + $0x4f8] sm:$0xff]  ;;  %v4914_v44 = vld [vmem:[#allocation2 + $0x500] sm:$0xff] }
 0x35a   :  { %21456 = vmatprep.subr.bf16.mxu0 %v24265_v47 }
 0x35b   :  { %6253 = vmatprep.subr.bf16.mxu1 %v16676_v50  ;;  %v4919_v50 = vld [vmem:[#allocation2 + $0x528] sm:$0xff] }
 0x35c   :  { %19720 = vmatmul.mubr.msk.f32.gmra.mrb[36].mxu0 %vm2540_vm0, %v4171_v17  ;;  %6254 = vmatpush1.bf16.msra.mxu1 %v16675_v49  ;;  %v5581_v17 = vld [vmem:[%s29123_s6 + $0x300] sm:$0xff] }
 0x35d   :  { %19722 = vmatprep.mubr.msk.f32.mxu0 %vm2540_vm0, %v4172_v18  ;;  %v5589_v18 = vld [vmem:[%s29123_s6 + $0x340] sm:$0xff] }
 0x35e   :  { %v4918_v49 = vld [vmem:[#allocation2 + $0x520] sm:$0xff] }
 0x360   :  { %19723 = vmatmul.mubr.msk.f32.gmra.mrb[38].mxu0 %vm2540_vm0, %v4173_v19  ;;  %v4545_v19 = vld [vmem:[#allocation2 + $0x458] sm:$0xff] }
 0x361   :  { %19725 = vmatprep.mubr.msk.f32.mxu0 %vm2540_vm0, %v4174_v20  ;;  %v16772_v20 = vcombine.high %v5581_v17, %v5589_v18 }
 0x362   :  { %v2498_v22 = vpop.f32.mrb[32].mxu1 }
 0x363   :  { %v2500_v24 = vpop.f32.mrb[33].mxu1 }
 0x364   :  { %v2502_v25 = vpop.f32.mrb[34].mxu1  ;;  %19726 = vmatmul.mubr.msk.f32.gmra.mrb[40].mxu0 %vm2540_vm0, %v4175_v21  ;;  %v4546_v21 = vld [vmem:[#allocation2 + $0x460] sm:$0xff] }
 0x365   :  { %v24309_v26 = vpack.c.bf16 %v2502_v25, %v2498_v22  ;;  %v2504_v27 = vpop.f32.mrb[35].mxu1  ;;  %19728 = vmatprep.mubr.msk.f32.mxu0 %vm2540_vm0, %v4176_v23  ;;  %v16771_v22 = vcombine.low %v5581_v17, %v5589_v18  ;;  %v4547_v23 = vld [vmem:[#allocation2 + $0x468] sm:$0xff]  ;;  %v4549_v25 = vld [vmem:[#allocation2 + $0x478] sm:$0xff] }
 0x366   :  { %v24312_v34 = vpack.c.bf16 %v2504_v27, %v2500_v24  ;;  %v4548_v24 = vld [vmem:[#allocation2 + $0x470] sm:$0xff]  ;;  %v4724_v27 = vld [vmem:[#allocation2 + $0x480] sm:$0xff]  ;;  %v5486_v17 = vld [vmem:[%s29123_s6 + $0x8] sm:$0xff] }
 0x367   :  { %v5494_v18 = vld [vmem:[%s29123_s6 + $0x48] sm:$0xff] }
 0x368   :  { %19729 = vmatmul.mubr.msk.f32.gmra.mrb[42].mxu0 %vm2540_vm0, %v4177_v42  ;;  %v4725_v42 = vld [vmem:[#allocation2 + $0x488] sm:$0xff] }
 0x369   :  { %19737 = vmatprep.mubr.msk.f32.mxu0 %vm2540_vm0, %v4352_v35  ;;  %v4726_v35 = vld [vmem:[#allocation2 + $0x490] sm:$0xff] }
 0x36a   :  { %v24316_v37 = vpop.f32.mrb[36].mxu1 }
 0x36b   :  { %v24318_v38 = vpop.f32.mrb[37].mxu1 }
 0x36c   :  { %v2512_v28 = vpop.f32.mrb[38].mxu1  ;;  %19738 = vmatmul.mubr.msk.f32.vlgmr.msra.gmra.mrb[32].mxu0 %vm2540_vm0, %v4353_v36  ;;  %v4727_v36 = vld [vmem:[#allocation2 + $0x498] sm:$0xff] }
 0x36d   :  { %v2513_v29 = vpop.f32.mrb[39].mxu1  ;;  %21458 = vmatpush3.bf16.msra.mxu0 %v24265_v47  ;;  %19740 = vmatprep.mubr.msk.f32.mxu0 %vm2540_vm0, %v4354_v39  ;;  %v5501_v47 = vld [vmem:[%s29123_s6 + $0x80] sm:$0xff]  ;;  %v4729_v28 = vld [vmem:[#allocation2 + $0x4a8] sm:$0xff] }
 0x36e   :  { %19759 = vmatprep.subr.mxu0 %v24272_v2  ;;  %v16692_v46 = vcombine.high %v5501_v47, %v5509_v52  ;;  %v16691_v59 = vcombine.low %v5501_v47, %v5509_v52  ;;  %v4728_v39 = vld [vmem:[#allocation2 + $0x4a0] sm:$0xff]  ;;  %v4730_v29 = vld [vmem:[#allocation2 + $0x4b0] sm:$0xff]  ;;  %v4915_v47 = vld [vmem:[#allocation2 + $0x508] sm:$0xff] }
 0x36f   :  { %v4920_v52 = vld [vmem:[#allocation2 + $0x530] sm:$0xff] }
 0x370   :  { %19741 = vmatmul.mubr.msk.f32.gmra.mrb[34].mxu0 %vm2540_vm0, %v4355_v54  ;;  %6255 = vmatprep.subr.bf16.mxu1 %v16692_v46  ;;  %v4732_v54 = vld [vmem:[#allocation2 + $0x4c0] sm:$0xff]  ;;  %v5097_v46 = vld [vmem:[#allocation2 + $0x548] sm:$0xff] }
 0x371   :  { %19760 = vmatpush3.msra.mxu0 %v24272_v2  ;;  %19743 = vmatprep.mubr.msk.f32.mxu0 %vm2540_vm0, %v4356_v30  ;;  %v4362_v2 = vld [vmem:[#allocation2 + $0x410] sm:$0xff]  ;;  %v4733_v30 = vld [vmem:[#allocation2 + $0x4c8] sm:$0xff] }
 0x372   :  { %21460 = vmatprep.subr.bf16.mxu0 %v24220_v56  ;;  %6256 = vmatpush1.bf16.msra.mxu1 %v16691_v59  ;;  %v5100_v59 = vld [vmem:[#allocation2 + $0x560] sm:$0xff] }
 0x373   :  { %6257 = vmatprep.subr.bf16.mxu1 %v16708_v58  ;;  %v5102_v58 = vld [vmem:[#allocation2 + $0x570] sm:$0xff] }
 0x374   :  { %19744 = vmatmul.mubr.msk.f32.gmra.mrb[36].mxu0 %vm2540_vm0, %v4357_v31  ;;  %v4734_v31 = vld [vmem:[#allocation2 + $0x4d0] sm:$0xff] }
 0x375   :  { %19746 = vmatprep.mubr.msk.f32.mxu0 %vm2540_vm0, %v4358_v33  ;;  %v4910_v33 = vld [vmem:[#allocation2 + $0x4e0] sm:$0xff] }
 0x376   :  { %6258 = vmatpush1.bf16.msra.mxu1 %v16707_v63  ;;  %v5282_v63 = vld [vmem:[#allocation2 + $0x5a0] sm:$0xff] }
 0x377   :  { %6259 = vmatprep.subr.bf16.mxu1 %v16724_v4  ;;  %v5285_v4 = vld [vmem:[#allocation2 + $0x5b8] sm:$0xff] }
 0x378   :  { %19747 = vmatmul.mubr.msk.f32.gmra.mrb[38].mxu0 %vm2540_vm0, %v4359_v40  ;;  %v4911_v40 = vld [vmem:[#allocation2 + $0x4e8] sm:$0xff] }
 0x379   :  { %19749 = vmatprep.mubr.msk.f32.mxu0 %vm2540_vm0, %v4360_v41  ;;  %v4912_v41 = vld [vmem:[#allocation2 + $0x4f0] sm:$0xff] }
 0x37a   :  { %6260 = vmatpush1.bf16.msra.mxu1 %v16723_v7  ;;  %v5288_v7 = vld [vmem:[#allocation2 + $0x5d0] sm:$0xff] }
 0x37b   :  { %6261 = vmatprep.subr.bf16.mxu1 %v16740_v11  ;;  %v5291_v11 = vld [vmem:[#allocation2 + $0x5e8] sm:$0xff] }
 0x37c   :  { %19750 = vmatmul.mubr.msk.f32.gmra.mrb[40].mxu0 %vm2540_vm0, %v4361_v48  ;;  %v4916_v48 = vld [vmem:[#allocation2 + $0x510] sm:$0xff] }
 0x37d   :  { %19752 = vmatprep.mubr.msk.f32.mxu0 %vm2540_vm0, %v4362_v2  ;;  %v5096_v2 = vld [vmem:[#allocation2 + $0x540] sm:$0xff] }
 0x380   :  { %19753 = vmatmul.mubr.msk.f32.gmra.mrb[42].mxu0 %vm2540_vm0, %v4363_v8  ;;  %v5101_v8 = vld [vmem:[#allocation2 + $0x568] sm:$0xff] }
 0x381   :  { %19761 = vmatprep.mubr.msk.f32.mxu0 %vm2540_vm0, %v4538_v32  ;;  %v5103_v32 = vld [vmem:[#allocation2 + $0x578] sm:$0xff] }
 0x384   :  { %19762 = vmatmul.mubr.msk.f32.vlgmr.msra.gmra.mrb[32].mxu0 %vm2540_vm0, %v4539_v1  ;;  %v5283_v1 = vld [vmem:[#allocation2 + $0x5a8] sm:$0xff] }
 0x385   :  { %21462 = vmatpush3.bf16.msra.mxu0 %v24220_v56  ;;  %19764 = vmatprep.mubr.msk.f32.mxu0 %vm2540_vm0, %v4540_v3  ;;  %v16739_v56 = vcombine.low %v5549_v6, %v5557_v5  ;;  %v5284_v3 = vld [vmem:[#allocation2 + $0x5b0] sm:$0xff]  ;;  %v5286_v6 = vld [vmem:[#allocation2 + $0x5c0] sm:$0xff]  ;;  %v5287_v5 = vld [vmem:[#allocation2 + $0x5c8] sm:$0xff] }
 0x386   :  { %19783 = vmatprep.subr.mxu0 %v24227_v0 }
 0x387   :  { %6262 = vmatpush1.bf16.msra.mxu1 %v16739_v56  ;;  %v5597_v56 = vld [vmem:[%s29123_s6 + $0x380] sm:$0xff] }
 0x388   :  { %19765 = vmatmul.mubr.msk.f32.gmra.mrb[34].mxu0 %vm2540_vm0, %v4541_v9  ;;  %6263 = vmatprep.subr.bf16.mxu1 %v16756_v15  ;;  %v5289_v9 = vld [vmem:[#allocation2 + $0x5d8] sm:$0xff] }
 0x389   :  { %19784 = vmatpush3.msra.mxu0 %v24227_v0  ;;  %19767 = vmatprep.mubr.msk.f32.mxu0 %vm2540_vm0, %v4542_v10  ;;  %v16755_v0 = vcombine.low %v5565_v12, %v5573_v13  ;;  %v5290_v10 = vld [vmem:[#allocation2 + $0x5e0] sm:$0xff]  ;;  %v5292_v12 = vld [vmem:[#allocation2 + $0x5f0] sm:$0xff]  ;;  %v5293_v13 = vld [vmem:[#allocation2 + $0x5f8] sm:$0xff] }
 0x38a   :  { %21464 = vmatprep.subr.bf16.mxu0 %v24223_v51 }
 0x38b   :  { %6264 = vmatpush1.bf16.msra.mxu1 %v16755_v0  ;;  %v16678_v0 = vcombine.high %v5486_v17, %v5494_v18 }
 0x38c   :  { %19768 = vmatmul.mubr.msk.f32.gmra.mrb[36].mxu0 %vm2540_vm0, %v4543_v14  ;;  %6265 = vmatprep.subr.bf16.mxu1 %v16772_v20  ;;  %v5605_v14 = vld [vmem:[%s29123_s6 + $0x3c0] sm:$0xff] }
 0x38d   :  { %19770 = vmatprep.mubr.msk.f32.mxu0 %vm2540_vm0, %v4544_v16  ;;  %v16788_v15 = vcombine.high %v5597_v56, %v5605_v14  ;;  %v16787_v16 = vcombine.low %v5597_v56, %v5605_v14  ;;  %v5606_v56 = vld [vmem:[%s29123_s6 + $0x3c8] sm:$0xff] }
 0x38f   :  { %6266 = vmatpush1.bf16.msra.mxu1 %v16771_v22 }
 0x390   :  { %19771 = vmatmul.mubr.msk.f32.gmra.mrb[38].mxu0 %vm2540_vm0, %v4545_v19  ;;  %6267 = vmatprep.subr.bf16.mxu1 %v16788_v15  ;;  %v16677_v19 = vcombine.low %v5486_v17, %v5494_v18  ;;  %v5495_v17 = vld [vmem:[%s29123_s6 + $0x50] sm:$0xff] }
 0x391   :  { %19773 = vmatprep.mubr.msk.f32.mxu0 %vm2540_vm0, %v4546_v21 }
 0x393   :  { %6268 = vmatpush1.bf16.msra.mxu1 %v16787_v16  ;;  %v5487_v16 = vld [vmem:[%s29123_s6 + $0x10] sm:$0xff] }
 0x394   :  { %19774 = vmatmul.mubr.msk.f32.gmra.mrb[40].mxu0 %vm2540_vm0, %v4547_v23  ;;  %6346 = vmatprep.subr.bf16.mxu1 %v16678_v0  ;;  %v5502_v23 = vld [vmem:[%s29123_s6 + $0x88] sm:$0xff]  ;;  %v16680_v0 = vcombine.high %v5487_v16, %v5495_v17 }
 0x395   :  { %19776 = vmatprep.mubr.msk.f32.mxu0 %vm2540_vm0, %v4548_v24  ;;  %v5510_v24 = vld [vmem:[%s29123_s6 + $0xc8] sm:$0xff] }
 0x398   :  { %19777 = vmatmul.mubr.msk.f32.gmra.mrb[42].mxu0 %vm2540_vm0, %v4549_v25 }
 0x399   :  { %19785 = vmatprep.mubr.msk.f32.mxu0 %vm2540_vm0, %v4724_v27 }
 0x39c   :  { %19786 = vmatmul.mubr.msk.f32.vlgmr.msra.gmra.mrb[32].mxu0 %vm2540_vm0, %v4725_v42 }
 0x39d   :  { %21466 = vmatpush3.bf16.msra.mxu0 %v24223_v51  ;;  %19788 = vmatprep.mubr.msk.f32.mxu0 %vm2540_vm0, %v4726_v35  ;;  %v4731_v51 = vld [vmem:[#allocation2 + $0x4b8] sm:$0xff]  ;;  %v16694_v35 = vcombine.high %v5502_v23, %v5510_v24 }
 0x39e   :  { %19807 = vmatprep.subr.mxu0 %v24229_v57 }
 0x3a0   :  { %19789 = vmatmul.mubr.msk.f32.gmra.mrb[34].mxu0 %vm2540_vm0, %v4727_v36 }
 0x3a1   :  { %19808 = vmatpush3.msra.mxu0 %v24229_v57  ;;  %19791 = vmatprep.mubr.msk.f32.mxu0 %vm2540_vm0, %v4728_v39  ;;  %v4735_v57 = vld [vmem:[#allocation2 + $0x4d8] sm:$0xff] }
 0x3a2   :  { %21468 = vmatprep.subr.bf16.mxu0 %v24309_v26 }
 0x3a4   :  { %19792 = vmatmul.mubr.msk.f32.gmra.mrb[36].mxu0 %vm2540_vm0, %v4729_v28  ;;  %v5518_v28 = vld [vmem:[%s29123_s6 + $0x108] sm:$0xff] }
 0x3a5   :  { %19794 = vmatprep.mubr.msk.f32.mxu0 %vm2540_vm0, %v4730_v29  ;;  %v5526_v29 = vld [vmem:[%s29123_s6 + $0x148] sm:$0xff] }
 0x3a8   :  { %19795 = vmatmul.mubr.msk.f32.gmra.mrb[38].mxu0 %vm2540_vm0, %v4731_v51 }
 0x3a9   :  { %19797 = vmatprep.mubr.msk.f32.mxu0 %vm2540_vm0, %v4732_v54  ;;  %v16693_v54 = vcombine.low %v5502_v23, %v5510_v24  ;;  %v5519_v23 = vld [vmem:[%s29123_s6 + $0x110] sm:$0xff] }
 0x3aa   :  { %v5527_v24 = vld [vmem:[%s29123_s6 + $0x150] sm:$0xff] }
 0x3ac   :  { %19798 = vmatmul.mubr.msk.f32.gmra.mrb[40].mxu0 %vm2540_vm0, %v4733_v30 }
 0x3ad   :  { %19800 = vmatprep.mubr.msk.f32.mxu0 %vm2540_vm0, %v4734_v31 }
 0x3b0   :  { %19801 = vmatmul.mubr.msk.f32.gmra.mrb[42].mxu0 %vm2540_vm0, %v4735_v57  ;;  %v16710_v57 = vcombine.high %v5518_v28, %v5526_v29 }
 0x3b1   :  { %19809 = vmatprep.mubr.msk.f32.mxu0 %vm2540_vm0, %v4910_v33 }
 0x3b4   :  { %19810 = vmatmul.mubr.msk.f32.vlgmr.msra.gmra.mrb[32].mxu0 %vm2540_vm0, %v4911_v40 }
 0x3b5   :  { %21470 = vmatpush3.bf16.msra.mxu0 %v24309_v26  ;;  %19812 = vmatprep.mubr.msk.f32.mxu0 %vm2540_vm0, %v4912_v41  ;;  %v4917_v26 = vld [vmem:[#allocation2 + $0x518] sm:$0xff]  ;;  %v5534_v41 = vld [vmem:[%s29123_s6 + $0x188] sm:$0xff] }
 0x3b6   :  { %19831 = vmatprep.subr.mxu0 %v24316_v37 }
 0x3b8   :  { %19813 = vmatmul.mubr.msk.f32.gmra.mrb[34].mxu0 %vm2540_vm0, %v4913_v43  ;;  %v5542_v43 = vld [vmem:[%s29123_s6 + $0x1c8] sm:$0xff] }
 0x3b9   :  { %19832 = vmatpush3.msra.mxu0 %v24316_v37  ;;  %19815 = vmatprep.mubr.msk.f32.mxu0 %vm2540_vm0, %v4914_v44  ;;  %v4921_v37 = vld [vmem:[#allocation2 + $0x538] sm:$0xff] }
 0x3ba   :  { %21472 = vmatprep.subr.bf16.mxu0 %v24312_v34 }
 0x3bc   :  { %19816 = vmatmul.mubr.msk.f32.gmra.mrb[36].mxu0 %vm2540_vm0, %v4915_v47  ;;  %v16709_v47 = vcombine.low %v5518_v28, %v5526_v29  ;;  %v5551_v29 = vld [vmem:[%s29123_s6 + $0x210] sm:$0xff] }
 0x3bd   :  { %19818 = vmatprep.mubr.msk.f32.mxu0 %vm2540_vm0, %v4916_v48 }
 0x3c0   :  { %19819 = vmatmul.mubr.msk.f32.gmra.mrb[38].mxu0 %vm2540_vm0, %v4917_v26 }
 0x3c1   :  { %19821 = vmatprep.mubr.msk.f32.mxu0 %vm2540_vm0, %v4918_v49  ;;  %v16726_v49 = vcombine.high %v5534_v41, %v5542_v43 }
 0x3c4   :  { %19822 = vmatmul.mubr.msk.f32.gmra.mrb[40].mxu0 %vm2540_vm0, %v4919_v50 }
 0x3c5   :  { %19824 = vmatprep.mubr.msk.f32.mxu0 %vm2540_vm0, %v4920_v52 }
 0x3c8   :  { %19825 = vmatmul.mubr.msk.f32.gmra.mrb[42].mxu0 %vm2540_vm0, %v4921_v37  ;;  %v5550_v37 = vld [vmem:[%s29123_s6 + $0x208] sm:$0xff] }
 0x3c9   :  { %19833 = vmatprep.mubr.msk.f32.mxu0 %vm2540_vm0, %v5096_v2  ;;  %v5558_v2 = vld [vmem:[%s29123_s6 + $0x248] sm:$0xff] }
 0x3cc   :  { %19834 = vmatmul.mubr.msk.f32.vlgmr.msra.gmra.mrb[32].mxu0 %vm2540_vm0, %v5097_v46 }
 0x3cd   :  { %21474 = vmatpush3.bf16.msra.mxu0 %v24312_v34  ;;  %19836 = vmatprep.mubr.msk.f32.mxu0 %vm2540_vm0, %v5098_v53  ;;  %v5104_v34 = vld [vmem:[#allocation2 + $0x580] sm:$0xff]  ;;  %v16725_v53 = vcombine.low %v5534_v41, %v5542_v43  ;;  %v5583_v43 = vld [vmem:[%s29123_s6 + $0x310] sm:$0xff] }
 0x3ce   :  { %19855 = vmatprep.subr.mxu0 %v24318_v38 }
 0x3d0   :  { %19837 = vmatmul.mubr.msk.f32.gmra.mrb[34].mxu0 %vm2540_vm0, %v5099_v55 }
 0x3d1   :  { %19856 = vmatpush3.msra.mxu0 %v24318_v38  ;;  %19839 = vmatprep.mubr.msk.f32.mxu0 %vm2540_vm0, %v5100_v59  ;;  %v5107_v38 = vld [vmem:[#allocation2 + $0x598] sm:$0xff] }
 0x3d4   :  { %19840 = vmatmul.mubr.msk.f32.gmra.mrb[36].mxu0 %vm2540_vm0, %v5101_v8  ;;  %v16742_v8 = vcombine.high %v5550_v37, %v5558_v2 }
 0x3d5   :  { %19842 = vmatprep.mubr.msk.f32.mxu0 %vm2540_vm0, %v5102_v58 }
 0x3d8   :  { %19843 = vmatmul.mubr.msk.f32.gmra.mrb[38].mxu0 %vm2540_vm0, %v5103_v32 }
 0x3d9   :  { %19845 = vmatprep.mubr.msk.f32.mxu0 %vm2540_vm0, %v5104_v34  ;;  %v5566_v34 = vld [vmem:[%s29123_s6 + $0x288] sm:$0xff] }
 0x3dc   :  { %19846 = vmatmul.mubr.msk.f32.gmra.mrb[40].mxu0 %vm2540_vm0, %v5105_v60  ;;  %v5574_v60 = vld [vmem:[%s29123_s6 + $0x2c8] sm:$0xff] }
 0x3dd   :  { %19848 = vmatprep.mubr.msk.f32.mxu0 %vm2540_vm0, %v5106_v62 }
 0x3e0   :  { %19849 = vmatmul.mubr.msk.f32.gmra.mrb[42].mxu0 %vm2540_vm0, %v5107_v38  ;;  %v16741_v38 = vcombine.low %v5550_v37, %v5558_v2  ;;  %v5488_v2 = vld [vmem:[%s29123_s6 + $0x18] sm:$0xff] }
 0x3e1   :  { %19857 = vmatprep.mubr.msk.f32.mxu0 %vm2540_vm0, %v5282_v63 }
 0x3e4   :  { %19858 = vmatmul.mubr.msk.f32.vlgmr.msra.gmra.mrb[32].mxu0 %vm2540_vm0, %v5283_v1 }
 0x3e5   :  { %19860 = vmatprep.mubr.msk.f32.mxu0 %vm2540_vm0, %v5284_v3  ;;  %v16758_v3 = vcombine.high %v5566_v34, %v5574_v60 }
 0x3e8   :  { %19861 = vmatmul.mubr.msk.f32.gmra.mrb[34].mxu0 %vm2540_vm0, %v5285_v4 }
 0x3e9   :  { %19863 = vmatprep.mubr.msk.f32.mxu0 %vm2540_vm0, %v5286_v6 }
 0x3ec   :  { %19864 = vmatmul.mubr.msk.f32.gmra.mrb[36].mxu0 %vm2540_vm0, %v5287_v5  ;;  %v5582_v5 = vld [vmem:[%s29123_s6 + $0x308] sm:$0xff] }
 0x3ed   :  { %19866 = vmatprep.mubr.msk.f32.mxu0 %vm2540_vm0, %v5288_v7  ;;  %v5590_v7 = vld [vmem:[%s29123_s6 + $0x348] sm:$0xff] }
 0x3ee   :  { %v16773_v14 = vcombine.low %v5582_v5, %v5590_v7 }
 0x3f0   :  { %19867 = vmatmul.mubr.msk.f32.gmra.mrb[38].mxu0 %vm2540_vm0, %v5289_v9 }
 0x3f1   :  { %19869 = vmatprep.mubr.msk.f32.mxu0 %vm2540_vm0, %v5290_v10  ;;  %v16757_v10 = vcombine.low %v5566_v34, %v5574_v60  ;;  %v5520_v60 = vld [vmem:[%s29123_s6 + $0x118] sm:$0xff] }
 0x3f4   :  { %19870 = vmatmul.mubr.msk.f32.gmra.mrb[40].mxu0 %vm2540_vm0, %v5291_v11 }
 0x3f5   :  { %19872 = vmatprep.mubr.msk.f32.mxu0 %vm2540_vm0, %v5292_v12  ;;  %v16774_v12 = vcombine.high %v5582_v5, %v5590_v7  ;;  %v5552_v7 = vld [vmem:[%s29123_s6 + $0x218] sm:$0xff] }
 0x3f8   :  { %19873 = vmatmul.mubr.msk.f32.gmra.mrb[42].mxu0 %vm2540_vm0, %v5293_v13  ;;  %v5598_v13 = vld [vmem:[%s29123_s6 + $0x388] sm:$0xff] }
 0x3f9   :  { %v16790_v15 = vcombine.high %v5598_v13, %v5606_v56  ;;  %v16789_v18 = vcombine.low %v5598_v13, %v5606_v56  ;;  %v5568_v13 = vld [vmem:[%s29123_s6 + $0x298] sm:$0xff] }
 0x3fa   :  { %v5576_v56 = vld [vmem:[%s29123_s6 + $0x2d8] sm:$0xff] }
 0x4b7   :  { %v19859_v20 = vpop.f32.mrb[32].mxu0 }
 0x4b8   :  { %v5468_v21 = vmax.f32 %v19859_v20, 0.0  ;;  %v5396_v22 = vpop.f32.mrb[33].mxu0  ;;  %v5511_v20 = vld [vmem:[%s29123_s6 + $0xd0] sm:$0xff] }
 0x4b9   :  { %v5467_v25 = vmax.f32 %v5396_v22, 0.0 }
 0x4bb   :  { %v24470_v27 = vpack.c.bf16 %v5468_v21, %v5467_v25  ;;  %v19862_v42 = vpop.f32.mrb[34].mxu0  ;;  %v16679_v21 = vcombine.low %v5487_v16, %v5495_v17  ;;  %v5584_v16 = vld [vmem:[%s29123_s6 + $0x318] sm:$0xff] }
 0x4bc   :  { %v5470_v36 = vmax.f32 %v19862_v42, 0.0  ;;  %v5406_v39 = vpop.f32.mrb[35].mxu0  ;;  %v16712_v42 = vcombine.high %v5519_v23, %v5527_v24  ;;  %v5592_v17 = vld [vmem:[%s29123_s6 + $0x358] sm:$0xff] }
 0x4bd   :  { %v5469_v51 = vmax.f32 %v5406_v39, 0.0  ;;  %6286 = vmatmul.mubr.bf16.vlgmr.msra.gmra.mrb[40].mxu1 %v24470_v27  ;;  %v16711_v39 = vcombine.low %v5519_v23, %v5527_v24  ;;  %v5489_v23 = vld [vmem:[%s29123_s6 + $0x20] sm:$0xff] }
 0x4be   :  { %6295 = vmatprep.mubr.bf16.mxu1 %v23085_v45  ;;  %6347 = vmatpush1.bf16.msra.mxu1 %v16677_v19  ;;  %v5503_v19 = vld [vmem:[%s29123_s6 + $0x90] sm:$0xff]  ;;  %v5497_v24 = vld [vmem:[%s29123_s6 + $0x60] sm:$0xff] }
 0x4bf   :  { %v24480_v30 = vpack.c.bf16 %v5470_v36, %v5469_v51  ;;  %v19865_v31 = vpop.f32.mrb[36].mxu0  ;;  %6348 = vmatprep.subr.bf16.mxu1 %v16694_v35  ;;  %v16696_v22 = vcombine.high %v5503_v19, %v5511_v20  ;;  %v16695_v25 = vcombine.low %v5503_v19, %v5511_v20  ;;  %v5535_v35 = vld [vmem:[%s29123_s6 + $0x190] sm:$0xff]  ;;  %v5600_v19 = vld [vmem:[%s29123_s6 + $0x398] sm:$0xff] }
 0x4c0   :  { %v5472_v33 = vmax.f32 %v19865_v31, 0.0  ;;  %v5416_v40 = vpop.f32.mrb[37].mxu0  ;;  %v5543_v36 = vld [vmem:[%s29123_s6 + $0x1d0] sm:$0xff]  ;;  %v5608_v20 = vld [vmem:[%s29123_s6 + $0x3d8] sm:$0xff] }
 0x4c1   :  { %v5471_v44 = vmax.f32 %v5416_v40, 0.0  ;;  %v16728_v28 = vcombine.high %v5535_v35, %v5543_v36  ;;  %v5559_v51 = vld [vmem:[%s29123_s6 + $0x250] sm:$0xff] }
 0x4c2   :  { %6349 = vmatpush1.bf16.msra.mxu1 %v16693_v54  ;;  %v16727_v54 = vcombine.low %v5535_v35, %v5543_v36  ;;  %v16744_v31 = vcombine.high %v5551_v29, %v5559_v51  ;;  %v16743_v40 = vcombine.low %v5551_v29, %v5559_v51  ;;  %v5505_v35 = vld [vmem:[%s29123_s6 + $0xa0] sm:$0xff] }
 0x4c3   :  { %v24488_v48 = vpack.c.bf16 %v5472_v33, %v5471_v44  ;;  %v19868_v26 = vpop.f32.mrb[38].mxu0  ;;  %6350 = vmatprep.subr.bf16.mxu1 %v16710_v57  ;;  %v5567_v57 = vld [vmem:[%s29123_s6 + $0x290] sm:$0xff]  ;;  %v5513_v36 = vld [vmem:[%s29123_s6 + $0xe0] sm:$0xff] }
 0x4c4   :  { %v5474_v50 = vmax.f32 %v19868_v26, 0.0  ;;  %v5426_v52 = vpop.f32.mrb[39].mxu0  ;;  %v5575_v33 = vld [vmem:[%s29123_s6 + $0x2d0] sm:$0xff]  ;;  %v5521_v29 = vld [vmem:[%s29123_s6 + $0x120] sm:$0xff] }
 0x4c5   :  { %v5473_v46 = vmax.f32 %v5426_v52, 0.0  ;;  %6296 = vmatmul.mubr.bf16.gmra.mrb[44].mxu1 %v24480_v30  ;;  %v16760_v41 = vcombine.high %v5567_v57, %v5575_v33  ;;  %v5591_v44 = vld [vmem:[%s29123_s6 + $0x350] sm:$0xff]  ;;  %v5529_v51 = vld [vmem:[%s29123_s6 + $0x160] sm:$0xff] }
 0x4c6   :  { %6305 = vmatprep.mubr.bf16.mxu1 %v23085_v45  ;;  %6351 = vmatpush1.bf16.msra.mxu1 %v16709_v47  ;;  %v16759_v47 = vcombine.low %v5567_v57, %v5575_v33  ;;  %v16776_v26 = vcombine.high %v5583_v43, %v5591_v44  ;;  %v16775_v52 = vcombine.low %v5583_v43, %v5591_v44  ;;  %v5537_v57 = vld [vmem:[%s29123_s6 + $0x1a0] sm:$0xff] }
 0x4c7   :  { %v24498_v55 = vpack.c.bf16 %v5474_v50, %v5473_v46  ;;  %v19871_v59 = vpop.f32.mrb[40].mxu0  ;;  %6352 = vmatprep.subr.bf16.mxu1 %v16726_v49  ;;  %v5599_v49 = vld [vmem:[%s29123_s6 + $0x390] sm:$0xff]  ;;  %v5496_v46 = vld [vmem:[%s29123_s6 + $0x58] sm:$0xff]  ;;  %v5545_v33 = vld [vmem:[%s29123_s6 + $0x1e0] sm:$0xff] }
 0x4c8   :  { %v5476_v58 = vmax.f32 %v19871_v59, 0.0  ;;  %v5436_v32 = vpop.f32.mrb[41].mxu0  ;;  %v5607_v50 = vld [vmem:[%s29123_s6 + $0x3d0] sm:$0xff]  ;;  %v16682_v59 = vcombine.high %v5488_v2, %v5496_v46  ;;  %v5553_v43 = vld [vmem:[%s29123_s6 + $0x220] sm:$0xff] }
 0x4c9   :  { %v5475_v62 = vmax.f32 %v5436_v32, 0.0  ;;  %v16792_v37 = vcombine.high %v5599_v49, %v5607_v50  ;;  %v16681_v32 = vcombine.low %v5488_v2, %v5496_v46  ;;  %v5561_v44 = vld [vmem:[%s29123_s6 + $0x260] sm:$0xff] }
 0x4ca   :  { %6353 = vmatpush1.bf16.msra.mxu1 %v16725_v53  ;;  %v16791_v53 = vcombine.low %v5599_v49, %v5607_v50  ;;  %v5569_v49 = vld [vmem:[%s29123_s6 + $0x2a0] sm:$0xff] }
 0x4cb   :  { %v24506_v63 = vpack.c.bf16 %v5476_v58, %v5475_v62  ;;  %v19874_v1 = vpop.f32.mrb[42].mxu0  ;;  %6354 = vmatprep.subr.bf16.mxu1 %v16742_v8  ;;  %v5504_v8 = vld [vmem:[%s29123_s6 + $0x98] sm:$0xff]  ;;  %v5577_v50 = vld [vmem:[%s29123_s6 + $0x2e0] sm:$0xff] }
 0x4cc   :  { %v5478_v4 = vmax.f32 %v19874_v1, 0.0  ;;  %v5446_v6 = vpop.f32.mrb[43].mxu0  ;;  %v5512_v58 = vld [vmem:[%s29123_s6 + $0xd8] sm:$0xff]  ;;  %v5585_v2 = vld [vmem:[%s29123_s6 + $0x320] sm:$0xff] }
 0x4cd   :  { %v5477_v9 = vmax.f32 %v5446_v6, 0.0  ;;  %6306 = vmatmul.mubr.bf16.gmra.mrb[48].mxu1 %v24488_v48  ;;  %v16698_v34 = vcombine.high %v5504_v8, %v5512_v58  ;;  %v5528_v62 = vld [vmem:[%s29123_s6 + $0x158] sm:$0xff]  ;;  %v5593_v46 = vld [vmem:[%s29123_s6 + $0x360] sm:$0xff] }
 0x4ce   :  { %6315 = vmatprep.mubr.bf16.mxu1 %v23085_v45  ;;  %6355 = vmatpush1.bf16.msra.mxu1 %v16741_v38  ;;  %v16697_v38 = vcombine.low %v5504_v8, %v5512_v58  ;;  %v16714_v1 = vcombine.high %v5520_v60, %v5528_v62  ;;  %v16713_v6 = vcombine.low %v5520_v60, %v5528_v62  ;;  %v5601_v8 = vld [vmem:[%s29123_s6 + $0x3a0] sm:$0xff]  ;;  %v5490_v60 = vld [vmem:[%s29123_s6 + $0x28] sm:$0xff] }
 0x4cf   :  { %v24516_v11 = vpack.c.bf16 %v5478_v4, %v5477_v9  ;;  %6356 = vmatprep.subr.bf16.mxu1 %v16758_v3  ;;  %v5536_v3 = vld [vmem:[%s29123_s6 + $0x198] sm:$0xff]  ;;  %v5609_v58 = vld [vmem:[%s29123_s6 + $0x3e0] sm:$0xff]  ;;  %v5498_v62 = vld [vmem:[%s29123_s6 + $0x68] sm:$0xff] }
 0x4d0   :  { %v5544_v4 = vld [vmem:[%s29123_s6 + $0x1d8] sm:$0xff] }
 0x4d1   :  { %v16730_v5 = vcombine.high %v5536_v3, %v5544_v4  ;;  %v5560_v9 = vld [vmem:[%s29123_s6 + $0x258] sm:$0xff] }
 0x4d2   :  { %6357 = vmatpush1.bf16.msra.mxu1 %v16757_v10  ;;  %v16729_v10 = vcombine.low %v5536_v3, %v5544_v4  ;;  %v5506_v3 = vld [vmem:[%s29123_s6 + $0xa8] sm:$0xff] }
 0x4d3   :  { %6358 = vmatprep.subr.bf16.mxu1 %v16774_v12  ;;  %v16746_v12 = vcombine.high %v5552_v7, %v5560_v9  ;;  %v5514_v4 = vld [vmem:[%s29123_s6 + $0xe8] sm:$0xff] }
 0x4d5   :  { %6316 = vmatmul.mubr.bf16.gmra.mrb[52].mxu1 %v24498_v55 }
 0x4d6   :  { %6325 = vmatprep.mubr.bf16.mxu1 %v23085_v45  ;;  %6359 = vmatpush1.bf16.msra.mxu1 %v16773_v14  ;;  %v16745_v14 = vcombine.low %v5552_v7, %v5560_v9  ;;  %v5522_v7 = vld [vmem:[%s29123_s6 + $0x128] sm:$0xff] }
 0x4d7   :  { %6360 = vmatprep.subr.bf16.mxu1 %v16790_v15  ;;  %v16762_v15 = vcombine.high %v5568_v13, %v5576_v56  ;;  %v5530_v9 = vld [vmem:[%s29123_s6 + $0x168] sm:$0xff] }
 0x4da   :  { %6361 = vmatpush1.bf16.msra.mxu1 %v16789_v18  ;;  %v16761_v18 = vcombine.low %v5568_v13, %v5576_v56  ;;  %v5538_v13 = vld [vmem:[%s29123_s6 + $0x1a8] sm:$0xff] }
 0x4db   :  { %6439 = vmatprep.subr.bf16.mxu1 %v16680_v0  ;;  %v16778_v0 = vcombine.high %v5584_v16, %v5592_v17  ;;  %v5546_v56 = vld [vmem:[%s29123_s6 + $0x1e8] sm:$0xff] }
 0x4dd   :  { %6326 = vmatmul.mubr.bf16.gmra.mrb[56].mxu1 %v24506_v63 }
 0x4de   :  { %6335 = vmatprep.mubr.bf16.mxu1 %v23085_v45 }
 0x4e5   :  { %6336 = vmatmul.mubr.bf16.gmra.mrb[60].mxu1 %v24516_v11 }
 0x4e6   :  { %6378 = vmatprep.mubr.bf16.mxu1 %v23085_v45 }
 0x4ed   :  { %6379 = vmatmul.mubr.bf16.vlgmr.msra.gmra.mrb[64].mxu1 %v24470_v27 }
 0x4ee   :  { %6388 = vmatprep.mubr.bf16.mxu1 %v23085_v45  ;;  %6440 = vmatpush1.bf16.msra.mxu1 %v16679_v21  ;;  %v16777_v21 = vcombine.low %v5584_v16, %v5592_v17  ;;  %v5554_v16 = vld [vmem:[%s29123_s6 + $0x228] sm:$0xff] }
 0x4ef   :  { %6441 = vmatprep.subr.bf16.mxu1 %v16696_v22  ;;  %v16794_v22 = vcombine.high %v5600_v19, %v5608_v20  ;;  %v5562_v17 = vld [vmem:[%s29123_s6 + $0x268] sm:$0xff] }
 0x4f2   :  { %6442 = vmatpush1.bf16.msra.mxu1 %v16695_v25  ;;  %v16793_v25 = vcombine.low %v5600_v19, %v5608_v20  ;;  %v5570_v19 = vld [vmem:[%s29123_s6 + $0x2a8] sm:$0xff] }
 0x4f3   :  { %6443 = vmatprep.subr.bf16.mxu1 %v16712_v42  ;;  %v16684_v42 = vcombine.high %v5489_v23, %v5497_v24  ;;  %v5578_v20 = vld [vmem:[%s29123_s6 + $0x2e8] sm:$0xff] }
 0x4f5   :  { %6389 = vmatmul.mubr.bf16.gmra.mrb[68].mxu1 %v24480_v30 }
 0x4f6   :  { %6398 = vmatprep.mubr.bf16.mxu1 %v23085_v45  ;;  %6444 = vmatpush1.bf16.msra.mxu1 %v16711_v39  ;;  %v16683_v39 = vcombine.low %v5489_v23, %v5497_v24  ;;  %v5586_v23 = vld [vmem:[%s29123_s6 + $0x328] sm:$0xff] }
 0x4f7   :  { %6445 = vmatprep.subr.bf16.mxu1 %v16728_v28  ;;  %v16700_v28 = vcombine.high %v5505_v35, %v5513_v36  ;;  %v5594_v24 = vld [vmem:[%s29123_s6 + $0x368] sm:$0xff] }
 0x4fa   :  { %6446 = vmatpush1.bf16.msra.mxu1 %v16727_v54  ;;  %v16699_v54 = vcombine.low %v5505_v35, %v5513_v36  ;;  %v5602_v36 = vld [vmem:[%s29123_s6 + $0x3a8] sm:$0xff] }
 0x4fb   :  { %6447 = vmatprep.subr.bf16.mxu1 %v16744_v31  ;;  %v16716_v31 = vcombine.high %v5521_v29, %v5529_v51 }
 0x4fd   :  { %6399 = vmatmul.mubr.bf16.gmra.mrb[72].mxu1 %v24488_v48 }
 0x4fe   :  { %6408 = vmatprep.mubr.bf16.mxu1 %v23085_v45  ;;  %6448 = vmatpush1.bf16.msra.mxu1 %v16743_v40  ;;  %v16715_v40 = vcombine.low %v5521_v29, %v5529_v51  ;;  %v16781_v51 = vcombine.low %v5586_v23, %v5594_v24 }
 0x4ff   :  { %6449 = vmatprep.subr.bf16.mxu1 %v16760_v41  ;;  %v16732_v41 = vcombine.high %v5537_v57, %v5545_v33 }
 0x502   :  { %6450 = vmatpush1.bf16.msra.mxu1 %v16759_v47  ;;  %v16731_v47 = vcombine.low %v5537_v57, %v5545_v33 }
 0x503   :  { %6451 = vmatprep.subr.bf16.mxu1 %v16776_v26  ;;  %v16748_v26 = vcombine.high %v5553_v43, %v5561_v44 }
 0x505   :  { %6409 = vmatmul.mubr.bf16.gmra.mrb[76].mxu1 %v24498_v55 }
 0x506   :  { %6418 = vmatprep.mubr.bf16.mxu1 %v23085_v45  ;;  %6452 = vmatpush1.bf16.msra.mxu1 %v16775_v52  ;;  %v16747_v52 = vcombine.low %v5553_v43, %v5561_v44 }
 0x507   :  { %6453 = vmatprep.subr.bf16.mxu1 %v16792_v37  ;;  %v16764_v37 = vcombine.high %v5569_v49, %v5577_v50 }
 0x50a   :  { %6454 = vmatpush1.bf16.msra.mxu1 %v16791_v53  ;;  %v16763_v53 = vcombine.low %v5569_v49, %v5577_v50 }
 0x50b   :  { %6532 = vmatprep.subr.bf16.mxu1 %v16682_v59  ;;  %v16780_v59 = vcombine.high %v5585_v2, %v5593_v46 }
 0x50d   :  { %6419 = vmatmul.mubr.bf16.gmra.mrb[80].mxu1 %v24506_v63 }
 0x50e   :  { %6428 = vmatprep.mubr.bf16.mxu1 %v23085_v45 }
 0x515   :  { %6429 = vmatmul.mubr.bf16.gmra.mrb[84].mxu1 %v24516_v11 }
 0x516   :  { %6471 = vmatprep.mubr.bf16.mxu1 %v23085_v45 }
 0x51d   :  { %6472 = vmatmul.mubr.bf16.vlgmr.msra.gmra.mrb[88].mxu1 %v24470_v27 }
 0x51e   :  { %6481 = vmatprep.mubr.bf16.mxu1 %v23085_v45  ;;  %6533 = vmatpush1.bf16.msra.mxu1 %v16681_v32  ;;  %v16779_v32 = vcombine.low %v5585_v2, %v5593_v46 }
 0x51f   :  { %6534 = vmatprep.subr.bf16.mxu1 %v16698_v34  ;;  %v16796_v34 = vcombine.high %v5601_v8, %v5609_v58 }
 0x522   :  { %6535 = vmatpush1.bf16.msra.mxu1 %v16697_v38  ;;  %v16795_v38 = vcombine.low %v5601_v8, %v5609_v58 }
 0x523   :  { %6536 = vmatprep.subr.bf16.mxu1 %v16714_v1  ;;  %v16686_v1 = vcombine.high %v5490_v60, %v5498_v62 }
 0x525   :  { %6482 = vmatmul.mubr.bf16.gmra.mrb[92].mxu1 %v24480_v30 }
 0x526   :  { %6491 = vmatprep.mubr.bf16.mxu1 %v23085_v45  ;;  %6537 = vmatpush1.bf16.msra.mxu1 %v16713_v6  ;;  %v16685_v6 = vcombine.low %v5490_v60, %v5498_v62  ;;  %v5515_v60 = vld [vmem:[%s29123_s6 + $0xf0] sm:$0xff] }
 0x527   :  { %6538 = vmatprep.subr.bf16.mxu1 %v16730_v5  ;;  %v16702_v5 = vcombine.high %v5506_v3, %v5514_v4 }
 0x52a   :  { %6539 = vmatpush1.bf16.msra.mxu1 %v16729_v10  ;;  %v16701_v10 = vcombine.low %v5506_v3, %v5514_v4 }
 0x52b   :  { %6540 = vmatprep.subr.bf16.mxu1 %v16746_v12  ;;  %v16718_v12 = vcombine.high %v5522_v7, %v5530_v9 }
 0x52d   :  { %6492 = vmatmul.mubr.bf16.gmra.mrb[96].mxu1 %v24488_v48 }
 0x52e   :  { %6501 = vmatprep.mubr.bf16.mxu1 %v23085_v45  ;;  %6541 = vmatpush1.bf16.msra.mxu1 %v16745_v14  ;;  %v16717_v14 = vcombine.low %v5522_v7, %v5530_v9  ;;  %v5523_v7 = vld [vmem:[%s29123_s6 + $0x130] sm:$0xff] }
 0x52f   :  { %6542 = vmatprep.subr.bf16.mxu1 %v16762_v15  ;;  %v16734_v15 = vcombine.high %v5538_v13, %v5546_v56  ;;  %v5531_v9 = vld [vmem:[%s29123_s6 + $0x170] sm:$0xff] }
 0x532   :  { %6543 = vmatpush1.bf16.msra.mxu1 %v16761_v18  ;;  %v16733_v18 = vcombine.low %v5538_v13, %v5546_v56  ;;  %v5539_v56 = vld [vmem:[%s29123_s6 + $0x1b0] sm:$0xff] }
 0x533   :  { %6544 = vmatprep.subr.bf16.mxu1 %v16778_v0  ;;  %v16750_v0 = vcombine.high %v5554_v16, %v5562_v17 }
 0x535   :  { %6502 = vmatmul.mubr.bf16.gmra.mrb[100].mxu1 %v24498_v55 }
 0x536   :  { %6511 = vmatprep.mubr.bf16.mxu1 %v23085_v45  ;;  %6545 = vmatpush1.bf16.msra.mxu1 %v16777_v21  ;;  %v16749_v21 = vcombine.low %v5554_v16, %v5562_v17  ;;  %v16719_v17 = vcombine.low %v5523_v7, %v5531_v9 }
 0x537   :  { %6546 = vmatprep.subr.bf16.mxu1 %v16794_v22  ;;  %v16766_v22 = vcombine.high %v5570_v19, %v5578_v20 }
 0x53a   :  { %6547 = vmatpush1.bf16.msra.mxu1 %v16793_v25  ;;  %v16765_v25 = vcombine.low %v5570_v19, %v5578_v20 }
 0x53b   :  { %6625 = vmatprep.subr.bf16.mxu1 %v16684_v42  ;;  %v16782_v42 = vcombine.high %v5586_v23, %v5594_v24 }
 0x53d   :  { %6512 = vmatmul.mubr.bf16.gmra.mrb[104].mxu1 %v24506_v63 }
 0x53e   :  { %6521 = vmatprep.mubr.bf16.mxu1 %v23085_v45 }
 0x545   :  { %6522 = vmatmul.mubr.bf16.gmra.mrb[108].mxu1 %v24516_v11 }
 0x546   :  { %6564 = vmatprep.mubr.bf16.mxu1 %v23085_v45 }
 0x54d   :  { %6565 = vmatmul.mubr.bf16.vlgmr.msra.gmra.mrb[112].mxu1 %v24470_v27 }
 0x54e   :  { %6574 = vmatprep.mubr.bf16.mxu1 %v23085_v45  ;;  %6626 = vmatpush1.bf16.msra.mxu1 %v16683_v39  ;;  %v5610_v39 = vld [vmem:[%s29123_s6 + $0x3e8] sm:$0xff] }
 0x54f   :  { %6627 = vmatprep.subr.bf16.mxu1 %v16700_v28  ;;  %v16798_v57 = vcombine.high %v5602_v36, %v5610_v39  ;;  %v16797_v43 = vcombine.low %v5602_v36, %v5610_v39 }
 0x552   :  { %6628 = vmatpush1.bf16.msra.mxu1 %v16699_v54 }
 0x553   :  { %6629 = vmatprep.subr.bf16.mxu1 %v16716_v31 }
 0x555   :  { %6575 = vmatmul.mubr.bf16.gmra.mrb[116].mxu1 %v24480_v30 }
 0x556   :  { %6584 = vmatprep.mubr.bf16.mxu1 %v23085_v45  ;;  %6630 = vmatpush1.bf16.msra.mxu1 %v16715_v40  ;;  %v5491_v40 = vld [vmem:[%s29123_s6 + $0x30] sm:$0xff] }
 0x557   :  { %6631 = vmatprep.subr.bf16.mxu1 %v16732_v41  ;;  %v5499_v41 = vld [vmem:[%s29123_s6 + $0x70] sm:$0xff] }
 0x558   :  { %v16688_v44 = vcombine.high %v5491_v40, %v5499_v41 }
 0x55a   :  { %6632 = vmatpush1.bf16.msra.mxu1 %v16731_v47 }
 0x55b   :  { %6633 = vmatprep.subr.bf16.mxu1 %v16748_v26 }
 0x55d   :  { %6585 = vmatmul.mubr.bf16.gmra.mrb[120].mxu1 %v24488_v48 }
 0x55e   :  { %6594 = vmatprep.mubr.bf16.mxu1 %v23085_v45  ;;  %6634 = vmatpush1.bf16.msra.mxu1 %v16747_v52 }
 0x55f   :  { %6635 = vmatprep.subr.bf16.mxu1 %v16764_v37 }
 0x562   :  { %6636 = vmatpush1.bf16.msra.mxu1 %v16763_v53 }
 0x563   :  { %6637 = vmatprep.subr.bf16.mxu1 %v16780_v59 }
 0x565   :  { %6595 = vmatmul.mubr.bf16.gmra.mrb[124].mxu1 %v24498_v55 }
 0x566   :  { %6604 = vmatprep.mubr.bf16.mxu1 %v23085_v45  ;;  %6638 = vmatpush1.bf16.msra.mxu1 %v16779_v32 }
 0x567   :  { %6639 = vmatprep.subr.bf16.mxu1 %v16796_v34  ;;  %v5507_v34 = vld [vmem:[%s29123_s6 + $0xb0] sm:$0xff] }
 0x56a   :  { %6640 = vmatpush1.bf16.msra.mxu1 %v16795_v38 }
 0x56b   :  { %6718 = vmatprep.subr.bf16.mxu1 %v16686_v1  ;;  %v16687_v1 = vcombine.low %v5491_v40, %v5499_v41  ;;  %v5587_v40 = vld [vmem:[%s29123_s6 + $0x330] sm:$0xff] }
 0x56c   :  { %v5595_v41 = vld [vmem:[%s29123_s6 + $0x370] sm:$0xff] }
 0x56d   :  { %6605 = vmatmul.mubr.bf16.gmra.mrb[128].mxu1 %v24506_v63 }
 0x56e   :  { %6614 = vmatprep.mubr.bf16.mxu1 %v23085_v45 }
 0x575   :  { %6615 = vmatmul.mubr.bf16.gmra.mrb[132].mxu1 %v24516_v11 }
 0x576   :  { %6657 = vmatprep.mubr.bf16.mxu1 %v23085_v45 }
 0x57d   :  { %6658 = vmatmul.mubr.bf16.vlgmr.msra.gmra.mrb[136].mxu1 %v24470_v27 }
 0x57e   :  { %6667 = vmatprep.mubr.bf16.mxu1 %v23085_v45  ;;  %6719 = vmatpush1.bf16.msra.mxu1 %v16685_v6  ;;  %v16704_v6 = vcombine.high %v5507_v34, %v5515_v60 }
 0x57f   :  { %6720 = vmatprep.subr.bf16.mxu1 %v16702_v5 }
 0x582   :  { %6721 = vmatpush1.bf16.msra.mxu1 %v16701_v10  ;;  %v16703_v10 = vcombine.low %v5507_v34, %v5515_v60  ;;  %v5492_v60 = vld [vmem:[%s29123_s6 + $0x38] sm:$0xff] }
 0x583   :  { %6722 = vmatprep.subr.bf16.mxu1 %v16718_v12  ;;  %v16720_v12 = vcombine.high %v5523_v7, %v5531_v9 }
 0x585   :  { %6668 = vmatmul.mubr.bf16.gmra.mrb[140].mxu1 %v24480_v30 }
 0x586   :  { %6677 = vmatprep.mubr.bf16.mxu1 %v23085_v45  ;;  %6723 = vmatpush1.bf16.msra.mxu1 %v16717_v14  ;;  %v5547_v14 = vld [vmem:[%s29123_s6 + $0x1f0] sm:$0xff] }
 0x587   :  { %6724 = vmatprep.subr.bf16.mxu1 %v16734_v15  ;;  %v16736_v19 = vcombine.high %v5539_v56, %v5547_v14  ;;  %v16735_v23 = vcombine.low %v5539_v56, %v5547_v14 }
 0x58a   :  { %6725 = vmatpush1.bf16.msra.mxu1 %v16733_v18 }
 0x58b   :  { %6726 = vmatprep.subr.bf16.mxu1 %v16750_v0 }
 0x58d   :  { %6678 = vmatmul.mubr.bf16.gmra.mrb[144].mxu1 %v24488_v48 }
 0x58e   :  { %6687 = vmatprep.mubr.bf16.mxu1 %v23085_v45  ;;  %6727 = vmatpush1.bf16.msra.mxu1 %v16749_v21  ;;  %v5555_v21 = vld [vmem:[%s29123_s6 + $0x230] sm:$0xff] }
 0x58f   :  { %6728 = vmatprep.subr.bf16.mxu1 %v16766_v22  ;;  %v5563_v22 = vld [vmem:[%s29123_s6 + $0x270] sm:$0xff] }
 0x590   :  { %v6287_v35 = vpop.f32.mrb[40].mxu1  ;;  %v16752_v24 = vcombine.high %v5555_v21, %v5563_v22 }
 0x591   :  { %v6289_v28 = vpop.f32.mrb[41].mxu1 }
 0x592   :  { %v6291_v29 = vpop.f32.mrb[42].mxu1  ;;  %6729 = vmatpush1.bf16.msra.mxu1 %v16765_v25 }
 0x593   :  { %v24764_v54 = vpack.c.bf16 %v6291_v29, %v6287_v35  ;;  %v6293_v31 = vpop.f32.mrb[43].mxu1  ;;  %6730 = vmatprep.subr.bf16.mxu1 %v16782_v42  ;;  %v5571_v42 = vld [vmem:[%s29123_s6 + $0x2b0] sm:$0xff] }
 0x594   :  { %v24766_v33 = vpack.c.bf16 %v6293_v31, %v6289_v28  ;;  %v5579_v35 = vld [vmem:[%s29123_s6 + $0x2f0] sm:$0xff]  ;;  %v16751_v28 = vcombine.low %v5555_v21, %v5563_v22  ;;  %v5508_v21 = vld [vmem:[%s29123_s6 + $0xb8] sm:$0xff] }
 0x595   :  { %6688 = vmatmul.mubr.bf16.gmra.mrb[148].mxu1 %v24498_v55  ;;  %v16768_v31 = vcombine.high %v5571_v42, %v5579_v35  ;;  %v5516_v22 = vld [vmem:[%s29123_s6 + $0xf8] sm:$0xff] }
 0x596   :  { %6697 = vmatprep.mubr.bf16.mxu1 %v23085_v45  ;;  %6731 = vmatpush1.bf16.msra.mxu1 %v16781_v51 }
 0x597   :  { %6732 = vmatprep.subr.bf16.mxu1 %v16798_v57 }
 0x598   :  { %v6297_v47 = vpop.f32.mrb[44].mxu1 }
 0x599   :  { %v6299_v26 = vpop.f32.mrb[45].mxu1 }
 0x59a   :  { %v6301_v49 = vpop.f32.mrb[46].mxu1  ;;  %6733 = vmatpush1.bf16.msra.mxu1 %v16797_v43  ;;  %v16767_v43 = vcombine.low %v5571_v42, %v5579_v35 }
 0x59b   :  { %v24776_v50 = vpack.c.bf16 %v6301_v49, %v6297_v47  ;;  %v6303_v52 = vpop.f32.mrb[47].mxu1  ;;  %6811 = vmatprep.subr.bf16.mxu1 %v16688_v44  ;;  %v16784_v44 = vcombine.high %v5587_v40, %v5595_v41  ;;  %v5611_v49 = vld [vmem:[%s29123_s6 + $0x3f0] sm:$0xff] }
 0x59c   :  { %v24778_v37 = vpack.c.bf16 %v6303_v52, %v6299_v26  ;;  %v5603_v26 = vld [vmem:[%s29123_s6 + $0x3b0] sm:$0xff] }
 0x59d   :  { %6698 = vmatmul.mubr.bf16.gmra.mrb[152].mxu1 %v24506_v63 }
 0x59e   :  { %6707 = vmatprep.mubr.bf16.mxu1 %v23085_v45 }
 0x5a0   :  { %v6307_v2 = vpop.f32.mrb[48].mxu1 }
 0x5a1   :  { %v6309_v46 = vpop.f32.mrb[49].mxu1 }
 0x5a2   :  { %v6311_v53 = vpop.f32.mrb[50].mxu1 }
 0x5a3   :  { %v24782_v59 = vpack.c.bf16 %v6311_v53, %v6307_v2  ;;  %v6313_v8 = vpop.f32.mrb[51].mxu1 }
 0x5a4   :  { %v24784_v58 = vpack.c.bf16 %v6313_v8, %v6309_v46  ;;  %v16783_v46 = vcombine.low %v5587_v40, %v5595_v41 }
 0x5a5   :  { %6708 = vmatmul.mubr.bf16.gmra.mrb[156].mxu1 %v24516_v11 }
 0x5a6   :  { %6750 = vmatprep.mubr.bf16.mxu1 %v23085_v45 }
 0x5a8   :  { %v6317_v32 = vpop.f32.mrb[52].mxu1 }
 0x5a9   :  { %v6319_v62 = vpop.f32.mrb[53].mxu1 }
 0x5aa   :  { %v6321_v38 = vpop.f32.mrb[54].mxu1 }
 0x5ab   :  { %v24794_v3 = vpack.c.bf16 %v6321_v38, %v6317_v32  ;;  %v6323_v4 = vpop.f32.mrb[55].mxu1  ;;  %v16800_v32 = vcombine.high %v5603_v26, %v5611_v49  ;;  %v16799_v38 = vcombine.low %v5603_v26, %v5611_v49 }
 0x5ac   :  { %v24796_v5 = vpack.c.bf16 %v6323_v4, %v6319_v62  ;;  %v5500_v62 = vld [vmem:[%s29123_s6 + $0x78] sm:$0xff] }
 0x5ad   :  { %6751 = vmatmul.mubr.bf16.vlgmr.msra.gmra.mrb[160].mxu1 %v24470_v27 }
 0x5ae   :  { %6760 = vmatprep.mubr.bf16.mxu1 %v23085_v45  ;;  %6812 = vmatpush1.bf16.msra.mxu1 %v16687_v1  ;;  %v16690_v1 = vcombine.high %v5492_v60, %v5500_v62 }
 0x5af   :  { %6813 = vmatprep.subr.bf16.mxu1 %v16704_v6 }
 0x5b0   :  { %v6327_v13 = vpop.f32.mrb[56].mxu1 }
 0x5b1   :  { %v6329_v15 = vpop.f32.mrb[57].mxu1 }
 0x5b2   :  { %v6331_v16 = vpop.f32.mrb[58].mxu1  ;;  %6814 = vmatpush1.bf16.msra.mxu1 %v16703_v10 }
 0x5b3   :  { %v24812_v18 = vpack.c.bf16 %v6331_v16, %v6327_v13  ;;  %v6333_v0 = vpop.f32.mrb[59].mxu1  ;;  %6815 = vmatprep.subr.bf16.mxu1 %v16720_v12 }
 0x5b4   :  { %v24814_v20 = vpack.c.bf16 %v6333_v0, %v6329_v15  ;;  %v17427_v0 = vld [vmem:[%s29124_s7 + $0xa80] sm:$0xff] }
 0x5b5   :  { %6761 = vmatmul.mubr.bf16.gmra.mrb[164].mxu1 %v24480_v30  ;;  %20571 = vmatprep.mubr.msk.f32.mxu0 %vm7094_vm1, %v17427_v0 }
 0x5b6   :  { %6770 = vmatprep.mubr.bf16.mxu1 %v23085_v45  ;;  %6816 = vmatpush1.bf16.msra.mxu1 %v16719_v17 }
 0x5b7   :  { %6817 = vmatprep.subr.bf16.mxu1 %v16736_v19 }
 0x5b8   :  { %v6337_v25 = vpop.f32.mrb[60].mxu1 }
 0x5b9   :  { %v6339_v36 = vpop.f32.mrb[61].mxu1 }
 0x5ba   :  { %v6341_v39 = vpop.f32.mrb[62].mxu1  ;;  %6818 = vmatpush1.bf16.msra.mxu1 %v16735_v23 }
 0x5bb   :  { %v24830_v29 = vpack.c.bf16 %v6341_v39, %v6337_v25  ;;  %v6343_v51 = vpop.f32.mrb[63].mxu1  ;;  %6819 = vmatprep.subr.bf16.mxu1 %v16752_v24  ;;  %v16689_v25 = vcombine.low %v5492_v60, %v5500_v62  ;;  %v5564_v60 = vld [vmem:[%s29123_s6 + $0x278] sm:$0xff] }
 0x5bc   :  { %v24832_v57 = vpack.c.bf16 %v6343_v51, %v6339_v36  ;;  %v16706_v36 = vcombine.high %v5508_v21, %v5516_v22  ;;  %v5532_v51 = vld [vmem:[%s29123_s6 + $0x178] sm:$0xff] }
 0x5bd   :  { %6771 = vmatmul.mubr.bf16.gmra.mrb[168].mxu1 %v24488_v48 }
 0x5be   :  { %6780 = vmatprep.mubr.bf16.mxu1 %v23085_v45  ;;  %6820 = vmatpush1.bf16.msra.mxu1 %v16751_v28  ;;  %v5524_v28 = vld [vmem:[%s29123_s6 + $0x138] sm:$0xff] }
 0x5bf   :  { %6821 = vmatprep.subr.bf16.mxu1 %v16768_v31  ;;  %v16705_v31 = vcombine.low %v5508_v21, %v5516_v22  ;;  %v16722_v40 = vcombine.high %v5524_v28, %v5532_v51  ;;  %v16721_v49 = vcombine.low %v5524_v28, %v5532_v51  ;;  %v5596_v21 = vld [vmem:[%s29123_s6 + $0x378] sm:$0xff] }
 0x5c0   :  { %v6380_v47 = vpop.f32.mrb[64].mxu1 }
 0x5c1   :  { %v6382_v52 = vpop.f32.mrb[65].mxu1 }
 0x5c2   :  { %v6384_v2 = vpop.f32.mrb[66].mxu1  ;;  %6822 = vmatpush1.bf16.msra.mxu1 %v16767_v43  ;;  %v5540_v43 = vld [vmem:[%s29123_s6 + $0x1b8] sm:$0xff] }
 0x5c3   :  { %v24848_v53 = vpack.c.bf16 %v6384_v2, %v6380_v47  ;;  %v6386_v8 = vpop.f32.mrb[67].mxu1  ;;  %6823 = vmatprep.subr.bf16.mxu1 %v16784_v44  ;;  %v5548_v44 = vld [vmem:[%s29123_s6 + $0x1f8] sm:$0xff] }
 0x5c4   :  { %v24850_v34 = vpack.c.bf16 %v6386_v8, %v6382_v52  ;;  %v16737_v62 = vcombine.low %v5540_v43, %v5548_v44 }
 0x5c5   :  { %6781 = vmatmul.mubr.bf16.gmra.mrb[172].mxu1 %v24498_v55 }
 0x5c6   :  { %6790 = vmatprep.mubr.bf16.mxu1 %v23085_v45  ;;  %6824 = vmatpush1.bf16.msra.mxu1 %v16783_v46  ;;  %v16738_v46 = vcombine.high %v5540_v43, %v5548_v44 }
 0x5c7   :  { %6825 = vmatprep.subr.bf16.mxu1 %v16800_v32  ;;  %v5556_v32 = vld [vmem:[%s29123_s6 + $0x238] sm:$0xff] }
 0x5c8   :  { %v6390_v4 = vpop.f32.mrb[68].mxu1 }
 0x5c9   :  { %v6392_v6 = vpop.f32.mrb[69].mxu1 }
 0x5ca   :  { %v6394_v7 = vpop.f32.mrb[70].mxu1  ;;  %6826 = vmatpush1.bf16.msra.mxu1 %v16799_v38  ;;  %v16754_v38 = vcombine.high %v5556_v32, %v5564_v60 }
 0x5cb   :  { %v24860_v9 = vpack.c.bf16 %v6394_v7, %v6390_v4  ;;  %v6396_v10 = vpop.f32.mrb[71].mxu1  ;;  %6904 = vmatprep.subr.bf16.mxu1 %v16690_v1  ;;  %v5572_v4 = vld [vmem:[%s29123_s6 + $0x2b8] sm:$0xff] }
 0x5cc   :  { %v24862_v12 = vpack.c.bf16 %v6396_v10, %v6392_v6  ;;  %v5580_v6 = vld [vmem:[%s29123_s6 + $0x2f8] sm:$0xff] }
 0x5cd   :  { %6791 = vmatmul.mubr.bf16.gmra.mrb[176].mxu1 %v24506_v63  ;;  %v16769_v22 = vcombine.low %v5572_v4, %v5580_v6 }
 0x5ce   :  { %6800 = vmatprep.mubr.bf16.mxu1 %v23085_v45 }
 0x5d0   :  { %v6400_v13 = vpop.f32.mrb[72].mxu1 }
 0x5d1   :  { %v6402_v56 = vpop.f32.mrb[73].mxu1 }
 0x5d2   :  { %v6404_v14 = vpop.f32.mrb[74].mxu1 }
 0x5d3   :  { %v24866_v15 = vpack.c.bf16 %v6404_v14, %v6400_v13  ;;  %v6406_v16 = vpop.f32.mrb[75].mxu1  ;;  %v16753_v13 = vcombine.low %v5556_v32, %v5564_v60 }
 0x5d4   :  { %v24868_v17 = vpack.c.bf16 %v6406_v16, %v6402_v56  ;;  %v16770_v16 = vcombine.high %v5572_v4, %v5580_v6 }
 0x5d5   :  { %6801 = vmatmul.mubr.bf16.gmra.mrb[180].mxu1 %v24516_v11 }
 0x5d6   :  { %6843 = vmatprep.mubr.bf16.mxu1 %v23085_v45 }
 0x5d8   :  { %v6410_v19 = vpop.f32.mrb[76].mxu1 }
 0x5d9   :  { %v6412_v23 = vpop.f32.mrb[77].mxu1 }
 0x5da   :  { %v6414_v24 = vpop.f32.mrb[78].mxu1 }
 0x5db   :  { %v24882_v42 = vpack.c.bf16 %v6414_v24, %v6410_v19  ;;  %v6416_v35 = vpop.f32.mrb[79].mxu1  ;;  %v5588_v19 = vld [vmem:[%s29123_s6 + $0x338] sm:$0xff] }
 0x5dc   :  { %v24884_v39 = vpack.c.bf16 %v6416_v35, %v6412_v23  ;;  %v16786_v23 = vcombine.high %v5588_v19, %v5596_v21  ;;  %v5612_v35 = vld [vmem:[%s29123_s6 + $0x3f8] sm:$0xff]  ;;  %v16785_v51 = vcombine.low %v5588_v19, %v5596_v21 }
 0x5dd   :  { %6844 = vmatmul.mubr.bf16.vlgmr.msra.gmra.mrb[184].mxu1 %v24470_v27 }
 0x5de   :  { %6905 = vmatpush1.bf16.msra.mxu1 %v16689_v25  ;;  %6853 = vmatprep.mubr.bf16.mxu1 %v23085_v45  ;;  %v5604_v25 = vld [vmem:[%s29123_s6 + $0x3b8] sm:$0xff] }
 0x5df   :  { %6906 = vmatprep.subr.bf16.mxu1 %v16706_v36  ;;  %v16801_v44 = vcombine.low %v5604_v25, %v5612_v35 }
 0x5e0   :  { %v6420_v41 = vpop.f32.mrb[80].mxu1 }
 0x5e1   :  { %v6422_v47 = vpop.f32.mrb[81].mxu1 }
 0x5e2   :  { %6907 = vmatpush1.bf16.msra.mxu1 %v16705_v31  ;;  %v6424_v26 = vpop.f32.mrb[82].mxu1 }
 0x5e3   :  { %v24900_v52 = vpack.c.bf16 %v6424_v26, %v6420_v41  ;;  %v6426_v2 = vpop.f32.mrb[83].mxu1  ;;  %6908 = vmatprep.subr.bf16.mxu1 %v16722_v40  ;;  %v16802_v41 = vcombine.high %v5604_v25, %v5612_v35 }
 0x5e4   :  { %v24902_v8 = vpack.c.bf16 %v6426_v2, %v6422_v47 }
 0x5e5   :  { %6854 = vmatmul.mubr.bf16.gmra.mrb[188].mxu1 %v24480_v30 }
 0x5e6   :  { %6909 = vmatpush1.bf16.msra.mxu1 %v16721_v49  ;;  %6863 = vmatprep.mubr.bf16.mxu1 %v23085_v45 }
 0x5e7   :  { %6910 = vmatprep.subr.bf16.mxu1 %v16738_v46 }
 0x5e8   :  { %v6430_v1 = vpop.f32.mrb[84].mxu1 }
 0x5e9   :  { %v6432_v7 = vpop.f32.mrb[85].mxu1 }
 0x5ea   :  { %6911 = vmatpush1.bf16.msra.mxu1 %v16737_v62  ;;  %v6434_v10 = vpop.f32.mrb[86].mxu1 }
 0x5eb   :  { %v24918_v56 = vpack.c.bf16 %v6434_v10, %v6430_v1  ;;  %v6436_v14 = vpop.f32.mrb[87].mxu1  ;;  %6912 = vmatprep.subr.bf16.mxu1 %v16754_v38 }
 0x5ec   :  { %v24920_v0 = vpack.c.bf16 %v6436_v14, %v6432_v7 }
 0x5ed   :  { %6864 = vmatmul.mubr.bf16.gmra.mrb[192].mxu1 %v24488_v48 }
 0x5ee   :  { %6913 = vmatpush1.bf16.msra.mxu1 %v16753_v13  ;;  %6873 = vmatprep.mubr.bf16.mxu1 %v23085_v45 }
 0x5ef   :  { %6914 = vmatprep.subr.bf16.mxu1 %v16770_v16 }
 0x5f0   :  { %v6473_v24 = vpop.f32.mrb[88].mxu1 }
 0x5f1   :  { %v6475_v36 = vpop.f32.mrb[89].mxu1 }
 0x5f2   :  { %6915 = vmatpush1.bf16.msra.mxu1 %v16769_v22  ;;  %v6477_v28 = vpop.f32.mrb[90].mxu1 }
 0x5f3   :  { %v24936_v31 = vpack.c.bf16 %v6477_v28, %v6473_v24  ;;  %v6479_v40 = vpop.f32.mrb[91].mxu1  ;;  %6916 = vmatprep.subr.bf16.mxu1 %v16786_v23 }
 0x5f4   :  { %v24938_v43 = vpack.c.bf16 %v6479_v40, %v6475_v36 }
 0x5f5   :  { %6874 = vmatmul.mubr.bf16.gmra.mrb[196].mxu1 %v24498_v55 }
 0x5f6   :  { %6917 = vmatpush1.bf16.msra.mxu1 %v16785_v51  ;;  %6883 = vmatprep.mubr.bf16.mxu1 %v23085_v45 }
 0x5f7   :  { %6918 = vmatprep.subr.bf16.mxu1 %v16802_v41 }
 0x5f8   :  { %v6483_v47 = vpop.f32.mrb[92].mxu1 }
 0x5f9   :  { %v6485_v26 = vpop.f32.mrb[93].mxu1 }
 0x5fa   :  { %6919 = vmatpush1.bf16.msra.mxu1 %v16801_v44  ;;  %v6487_v49 = vpop.f32.mrb[94].mxu1 }
 0x5fb   :  { %v24942_v2 = vpack.c.bf16 %v6487_v49, %v6483_v47  ;;  %21476 = vmatprep.subr.bf16.mxu1 %v24766_v33  ;;  %v6489_v46 = vpop.f32.mrb[95].mxu1 }
 0x5fc   :  { %v24945_v32 = vpack.c.bf16 %v6489_v46, %v6485_v26 }
 0x5fd   :  { %6884 = vmatmul.mubr.bf16.gmra.mrb[200].mxu1 %v24506_v63 }
 0x5fe   :  { %6893 = vmatprep.mubr.bf16.mxu1 %v23085_v45 }
 0x600   :  { %v6493_v60 = vpop.f32.mrb[96].mxu1 }
 0x601   :  { %v6495_v62 = vpop.f32.mrb[97].mxu1 }
 0x602   :  { %v6497_v38 = vpop.f32.mrb[98].mxu1 }
 0x603   :  { %v24949_v1 = vpack.c.bf16 %v6497_v38, %v6493_v60  ;;  %v6499_v4 = vpop.f32.mrb[99].mxu1 }
 0x604   :  { %v24951_v6 = vpack.c.bf16 %v6499_v4, %v6495_v62  ;;  %v16803_v4 = vld [vmem:[%s29124_s7 + $0x180] sm:$0xff] }
 0x605   :  { %6894 = vmatmul.mubr.bf16.gmra.mrb[204].mxu1 %v24516_v11 }
 0x606   :  { %6936 = vmatprep.mubr.bf16.mxu1 %v23085_v45 }
 0x608   :  { %v6503_v7 = vpop.f32.mrb[100].mxu1 }
 0x609   :  { %v6505_v10 = vpop.f32.mrb[101].mxu1 }
 0x60a   :  { %v6507_v13 = vpop.f32.mrb[102].mxu1 }
 0x60b   :  { %v24955_v14 = vpack.c.bf16 %v6507_v13, %v6503_v7  ;;  %v6509_v16 = vpop.f32.mrb[103].mxu1  ;;  %v16804_v13 = vld [vmem:[%s29124_s7 + $0x188] sm:$0xff] }
 0x60c   :  { %v24957_v19 = vpack.c.bf16 %v6509_v16, %v6505_v10 }
 0x60d   :  { %6937 = vmatmul.mubr.bf16.vlgmr.msra.gmra.mrb[208].mxu1 %v24470_v27 }
 0x60e   :  { %21478 = vmatpush3.bf16.msra.mxu1 %v24766_v33  ;;  %6946 = vmatprep.mubr.bf16.mxu1 %v23085_v45 }
 0x60f   :  { %21480 = vmatprep.subr.bf16.mxu1 %v24778_v37 }
 0x610   :  { %v6513_v21 = vpop.f32.mrb[104].mxu1 }
 0x611   :  { %v6515_v22 = vpop.f32.mrb[105].mxu1 }
 0x612   :  { %21482 = vmatpush3.bf16.msra.mxu1 %v24778_v37  ;;  %v6517_v23 = vpop.f32.mrb[106].mxu1 }
 0x613   :  { %v24964_v24 = vpack.c.bf16 %v6517_v23, %v6513_v21  ;;  %21484 = vmatprep.subr.bf16.mxu1 %v24784_v58  ;;  %v6519_v25 = vpop.f32.mrb[107].mxu1  ;;  %v16806_v23 = vld [vmem:[%s29124_s7 + $0x198] sm:$0xff] }
 0x614   :  { %v24967_v35 = vpack.c.bf16 %v6519_v25, %v6515_v22  ;;  %v16807_v25 = vld [vmem:[%s29124_s7 + $0x1a0] sm:$0xff] }
 0x615   :  { %6947 = vmatmul.mubr.bf16.gmra.mrb[212].mxu1 %v24480_v30 }
 0x616   :  { %21486 = vmatpush3.bf16.msra.mxu1 %v24784_v58  ;;  %6956 = vmatprep.mubr.bf16.mxu1 %v23085_v45 }
 0x617   :  { %21488 = vmatprep.subr.bf16.mxu1 %v24796_v5 }
 0x618   :  { %v6523_v27 = vpop.f32.mrb[108].mxu1 }
 0x619   :  { %v6525_v33 = vpop.f32.mrb[109].mxu1 }
 0x61a   :  { %21490 = vmatpush3.bf16.msra.mxu1 %v24796_v5  ;;  %v6527_v37 = vpop.f32.mrb[110].mxu1 }
 0x61b   :  { %v24974_v36 = vpack.c.bf16 %v6527_v37, %v6523_v27  ;;  %21492 = vmatprep.subr.bf16.mxu1 %v24814_v20  ;;  %v6529_v28 = vpop.f32.mrb[111].mxu1  ;;  %v16808_v37 = vld [vmem:[%s29124_s7 + $0x1a8] sm:$0xff] }
 0x61c   :  { %v24977_v51 = vpack.c.bf16 %v6529_v28, %v6525_v33 }
 0x61d   :  { %6957 = vmatmul.mubr.bf16.gmra.mrb[216].mxu1 %v24488_v48 }
 0x61e   :  { %21494 = vmatpush3.bf16.msra.mxu1 %v24814_v20  ;;  %6966 = vmatprep.mubr.bf16.mxu1 %v23085_v45 }
 0x61f   :  { %21496 = vmatprep.subr.bf16.mxu1 %v24832_v57 }
 0x620   :  { %v6566_v30 = vpop.f32.mrb[112].mxu1 }
 0x621   :  { %v6568_v58 = vpop.f32.mrb[113].mxu1 }
 0x622   :  { %21498 = vmatpush3.bf16.msra.mxu1 %v24832_v57  ;;  %v6570_v5 = vpop.f32.mrb[114].mxu1 }
 0x623   :  { %v24984_v40 = vpack.c.bf16 %v6570_v5, %v6566_v30  ;;  %21500 = vmatprep.subr.bf16.mxu1 %v24764_v54  ;;  %v6572_v41 = vpop.f32.mrb[115].mxu1  ;;  %v16810_v5 = vld [vmem:[%s29124_s7 + $0x1b8] sm:$0xff] }
 0x624   :  { %v24987_v44 = vpack.c.bf16 %v6572_v41, %v6568_v58  ;;  %v16811_v41 = vld [vmem:[%s29124_s7 + $0x1c0] sm:$0xff] }
 0x625   :  { %6967 = vmatmul.mubr.bf16.gmra.mrb[220].mxu1 %v24498_v55 }
 0x626   :  { %21644 = vmatprep.subr.bf16.mxu0 %v24987_v44  ;;  %6976 = vmatprep.mubr.bf16.mxu1 %v23085_v45 }
 0x627   :  { %21646 = vmatpush3.bf16.msra.mxu0 %v24987_v44 }
 0x628   :  { %v6576_v48 = vpop.f32.mrb[116].mxu1 }
 0x629   :  { %v6578_v20 = vpop.f32.mrb[117].mxu1 }
 0x62a   :  { %v6580_v47 = vpop.f32.mrb[118].mxu1 }
 0x62b   :  { %v24993_v57 = vpack.c.bf16 %v6580_v47, %v6576_v48  ;;  %v6582_v26 = vpop.f32.mrb[119].mxu1  ;;  %v16812_v47 = vld [vmem:[%s29124_s7 + $0x1c8] sm:$0xff] }
 0x62c   :  { %v24995_v49 = vpack.c.bf16 %v6582_v26, %v6578_v20 }
 0x62d   :  { %6977 = vmatmul.mubr.bf16.gmra.mrb[224].mxu1 %v24506_v63 }
 0x62e   :  { %21648 = vmatprep.subr.bf16.mxu0 %v24995_v49  ;;  %6986 = vmatprep.mubr.bf16.mxu1 %v23085_v45 }
 0x62f   :  { %21650 = vmatpush3.bf16.msra.mxu0 %v24995_v49 }
 0x630   :  { %v6586_v55 = vpop.f32.mrb[120].mxu1 }
 0x631   :  { %v6588_v46 = vpop.f32.mrb[121].mxu1 }
 0x632   :  { %v6590_v60 = vpop.f32.mrb[122].mxu1 }
 0x633   :  { %v25001_v62 = vpack.c.bf16 %v6590_v60, %v6586_v55  ;;  %v6592_v38 = vpop.f32.mrb[123].mxu1  ;;  %v16814_v60 = vld [vmem:[%s29124_s7 + $0x1d8] sm:$0xff] }
 0x634   :  { %v25006_v7 = vpack.c.bf16 %v6592_v38, %v6588_v46  ;;  %v16815_v38 = vld [vmem:[%s29124_s7 + $0x1e0] sm:$0xff] }
 0x635   :  { %6987 = vmatmul.mubr.bf16.gmra.mrb[228].mxu1 %v24516_v11  ;;  %v16805_v11 = vld [vmem:[%s29124_s7 + $0x190] sm:$0xff] }
 0x636   :  { %21652 = vmatprep.subr.bf16.mxu0 %v25006_v7  ;;  %19899 = vmatprep.mubr.msk.f32.mxu1 %vm7094_vm1, %v16803_v4 }
 0x637   :  { %21654 = vmatpush3.bf16.msra.mxu0 %v25006_v7 }
 0x638   :  { %v6596_v45 = vpop.f32.mrb[124].mxu1 }
 0x639   :  { %v6598_v63 = vpop.f32.mrb[125].mxu1 }
 0x63a   :  { %v6600_v10 = vpop.f32.mrb[126].mxu1 }
 0x63b   :  { %v25015_v16 = vpack.c.bf16 %v6600_v10, %v6596_v45  ;;  %v6602_v21 = vpop.f32.mrb[127].mxu1 }
 0x63c   :  { %v25017_v22 = vpack.c.bf16 %v6602_v21, %v6598_v63  ;;  %v17429_v63 = vld [vmem:[%s29124_s7 + $0xa90] sm:$0xff] }
 0x63d   :  { %19900 = vmatmul.mubr.msk.f32.vlgmr.msra.gmra.mrb[232].mxu1 %vm7094_vm1, %v16804_v13  ;;  %v16816_v13 = vld [vmem:[%s29124_s7 + $0x1e8] sm:$0xff] }
 0x63e   :  { %21502 = vmatpush3.bf16.msra.mxu1 %v24764_v54  ;;  %21656 = vmatprep.subr.bf16.mxu0 %v25017_v22 }
 0x63f   :  { %21504 = vmatprep.subr.bf16.mxu1 %v24776_v50  ;;  %21658 = vmatpush3.bf16.msra.mxu0 %v25017_v22 }
 0x640   :  { %v6606_v27 = vpop.f32.mrb[128].mxu1  ;;  %19902 = vmatprep.mubr.msk.f32.mxu1 %vm7094_vm1, %v16805_v11 }
 0x641   :  { %v6608_v33 = vpop.f32.mrb[129].mxu1  ;;  %19903 = vmatmul.mubr.msk.f32.gmra.mrb[234].mxu1 %vm7094_vm1, %v16806_v23  ;;  %v16817_v23 = vld [vmem:[%s29124_s7 + $0x1f0] sm:$0xff] }
 0x642   :  { %21506 = vmatpush3.bf16.msra.mxu1 %v24776_v50  ;;  %v6610_v54 = vpop.f32.mrb[130].mxu1  ;;  %19905 = vmatprep.mubr.msk.f32.mxu1 %vm7094_vm1, %v16807_v25  ;;  %v16809_v50 = vld [vmem:[%s29124_s7 + $0x1b0] sm:$0xff] }
 0x643   :  { %v25040_v28 = vpack.c.bf16 %v6610_v54, %v6606_v27  ;;  %21508 = vmatprep.subr.bf16.mxu1 %v24782_v59  ;;  %v6612_v30 = vpop.f32.mrb[131].mxu1  ;;  %v17431_v27 = vld [vmem:[%s29124_s7 + $0xaa0] sm:$0xff] }
 0x644   :  { %v25043_v58 = vpack.c.bf16 %v6612_v30, %v6608_v33  ;;  %v16818_v33 = vld [vmem:[%s29124_s7 + $0x1f8] sm:$0xff]  ;;  %v16819_v54 = vld [vmem:[%s29124_s7 + $0x200] sm:$0xff]  ;;  %v17432_v30 = vld [vmem:[%s29124_s7 + $0xaa8] sm:$0xff] }
 0x645   :  { %19906 = vmatmul.mubr.msk.f32.gmra.mrb[236].mxu1 %vm7094_vm1, %v16808_v37 }
 0x646   :  { %21510 = vmatpush3.bf16.msra.mxu1 %v24782_v59  ;;  %21660 = vmatprep.subr.bf16.mxu0 %v25043_v58 }
 0x647   :  { %21512 = vmatprep.subr.bf16.mxu1 %v24794_v3  ;;  %21662 = vmatpush3.bf16.msra.mxu0 %v25043_v58 }
 0x648   :  { %v6616_v48 = vpop.f32.mrb[132].mxu1  ;;  %19908 = vmatprep.mubr.msk.f32.mxu1 %vm7094_vm1, %v16809_v50 }
 0x649   :  { %v6618_v20 = vpop.f32.mrb[133].mxu1  ;;  %19909 = vmatmul.mubr.msk.f32.gmra.mrb[238].mxu1 %vm7094_vm1, %v16810_v5  ;;  %v17433_v5 = vld [vmem:[%s29124_s7 + $0xab0] sm:$0xff] }
 0x64a   :  { %21514 = vmatpush3.bf16.msra.mxu1 %v24794_v3  ;;  %v6620_v59 = vpop.f32.mrb[134].mxu1  ;;  %19911 = vmatprep.mubr.msk.f32.mxu1 %vm7094_vm1, %v16811_v41  ;;  %v16813_v3 = vld [vmem:[%s29124_s7 + $0x1d0] sm:$0xff] }
 0x64b   :  { %v25066_v26 = vpack.c.bf16 %v6620_v59, %v6616_v48  ;;  %21516 = vmatprep.subr.bf16.mxu1 %v24812_v18  ;;  %v6622_v55 = vpop.f32.mrb[135].mxu1  ;;  %v16820_v48 = vld [vmem:[%s29124_s7 + $0x208] sm:$0xff] }
 0x64c   :  { %v25069_v46 = vpack.c.bf16 %v6622_v55, %v6618_v20 }
 0x64d   :  { %19912 = vmatmul.mubr.msk.f32.gmra.mrb[240].mxu1 %vm7094_vm1, %v16812_v47  ;;  %v16821_v47 = vld [vmem:[%s29124_s7 + $0x210] sm:$0xff] }
 0x64e   :  { %21518 = vmatpush3.bf16.msra.mxu1 %v24812_v18  ;;  %21664 = vmatprep.subr.bf16.mxu0 %v25069_v46  ;;  %v17428_v18 = vld [vmem:[%s29124_s7 + $0xa88] sm:$0xff] }
 0x64f   :  { %21520 = vmatprep.subr.bf16.mxu1 %v24830_v29  ;;  %21666 = vmatpush3.bf16.msra.mxu0 %v25069_v46 }
 0x650   :  { %v6659_v4 = vpop.f32.mrb[136].mxu1  ;;  %19914 = vmatprep.mubr.msk.f32.mxu1 %vm7094_vm1, %v16813_v3  ;;  %v17434_v3 = vld [vmem:[%s29124_s7 + $0xab8] sm:$0xff] }
 0x651   :  { %v6661_v45 = vpop.f32.mrb[137].mxu1  ;;  %19915 = vmatmul.mubr.msk.f32.gmra.mrb[242].mxu1 %vm7094_vm1, %v16814_v60  ;;  %v17435_v60 = vld [vmem:[%s29124_s7 + $0xac0] sm:$0xff] }
 0x652   :  { %21522 = vmatpush3.bf16.msra.mxu1 %v24830_v29  ;;  %v6663_v10 = vpop.f32.mrb[138].mxu1  ;;  %19917 = vmatprep.mubr.msk.f32.mxu1 %vm7094_vm1, %v16815_v38  ;;  %v17430_v29 = vld [vmem:[%s29124_s7 + $0xa98] sm:$0xff] }
 0x653   :  { %v21667_v21 = vpack.c.bf16 %v6663_v10, %v6659_v4  ;;  %21524 = vmatprep.subr.bf16.mxu1 %v24848_v53  ;;  %v6665_v11 = vpop.f32.mrb[139].mxu1  ;;  %20572 = vmatmul.mubr.msk.f32.vlgmr.msra.gmra.mrb[44].mxu0 %vm7094_vm1, %v17428_v18  ;;  %v16822_v38 = vld [vmem:[%s29124_s7 + $0x218] sm:$0xff]  ;;  %v16823_v4 = vld [vmem:[%s29124_s7 + $0x220] sm:$0xff]  ;;  %v17437_v10 = vld [vmem:[%s29124_s7 + $0xad0] sm:$0xff] }
 0x654   :  { %v25103_v25 = vpack.c.bf16 %v6665_v11, %v6661_v45  ;;  %20574 = vmatprep.mubr.msk.f32.mxu0 %vm7094_vm1, %v17429_v63  ;;  %v17436_v45 = vld [vmem:[%s29124_s7 + $0xac8] sm:$0xff] }
 0x655   :  { %19918 = vmatmul.mubr.msk.f32.gmra.mrb[244].mxu1 %vm7094_vm1, %v16816_v13  ;;  %21668 = vmatprep.subr.bf16.mxu0 %v21667_v21 }
 0x656   :  { %21670 = vmatpush3.bf16.msra.mxu0 %v21667_v21  ;;  %19920 = vmatprep.mubr.msk.f32.mxu1 %vm7094_vm1, %v16817_v23  ;;  %v16824_v21 = vld [vmem:[%s29124_s7 + $0x228] sm:$0xff] }
 0x657   :  { %20575 = vmatmul.mubr.msk.f32.gmra.mrb[46].mxu0 %vm7094_vm1, %v17430_v29  ;;  %v16825_v29 = vld [vmem:[%s29124_s7 + $0x230] sm:$0xff] }
 0x658   :  { %v6669_v37 = vpop.f32.mrb[140].mxu1  ;;  %20577 = vmatprep.mubr.msk.f32.mxu0 %vm7094_vm1, %v17431_v27 }
 0x659   :  { %v6671_v50 = vpop.f32.mrb[141].mxu1  ;;  %19921 = vmatmul.mubr.msk.f32.gmra.mrb[246].mxu1 %vm7094_vm1, %v16818_v33  ;;  %v17438_v33 = vld [vmem:[%s29124_s7 + $0xad8] sm:$0xff] }
 0x65a   :  { %v6673_v41 = vpop.f32.mrb[142].mxu1  ;;  %19923 = vmatprep.mubr.msk.f32.mxu1 %vm7094_vm1, %v16819_v54  ;;  %v17523_v54 = vld [vmem:[%s29124_s7 + $0xc00] sm:$0xff] }
 0x65b   :  { %v21671_v20 = vpack.c.bf16 %v6673_v41, %v6669_v37  ;;  %v6675_v59 = vpop.f32.mrb[143].mxu1  ;;  %20578 = vmatmul.mubr.msk.f32.gmra.mrb[48].mxu0 %vm7094_vm1, %v17432_v30  ;;  %v16826_v37 = vld [vmem:[%s29124_s7 + $0x238] sm:$0xff]  ;;  %v16827_v30 = vld [vmem:[%s29124_s7 + $0x240] sm:$0xff] }
 0x65c   :  { %v25137_v55 = vpack.c.bf16 %v6675_v59, %v6671_v50  ;;  %20580 = vmatprep.mubr.msk.f32.mxu0 %vm7094_vm1, %v17433_v5 }
 0x65d   :  { %19924 = vmatmul.mubr.msk.f32.gmra.mrb[248].mxu1 %vm7094_vm1, %v16820_v48  ;;  %21672 = vmatprep.subr.bf16.mxu0 %v21671_v20  ;;  %v16828_v48 = vld [vmem:[%s29124_s7 + $0x248] sm:$0xff] }
 0x65e   :  { %21674 = vmatpush3.bf16.msra.mxu0 %v21671_v20  ;;  %19926 = vmatprep.mubr.msk.f32.mxu1 %vm7094_vm1, %v16821_v47  ;;  %v16829_v47 = vld [vmem:[%s29124_s7 + $0x250] sm:$0xff] }
 0x65f   :  { %20581 = vmatmul.mubr.msk.f32.gmra.mrb[50].mxu0 %vm7094_vm1, %v17434_v3 }
 0x660   :  { %v6679_v18 = vpop.f32.mrb[144].mxu1  ;;  %20583 = vmatprep.mubr.msk.f32.mxu0 %vm7094_vm1, %v17435_v60  ;;  %v16830_v60 = vld [vmem:[%s29124_s7 + $0x258] sm:$0xff] }
 0x661   :  { %v6681_v63 = vpop.f32.mrb[145].mxu1  ;;  %19927 = vmatmul.mubr.msk.f32.gmra.mrb[250].mxu1 %vm7094_vm1, %v16822_v38  ;;  %v16831_v38 = vld [vmem:[%s29124_s7 + $0x260] sm:$0xff] }
 0x662   :  { %v6683_v13 = vpop.f32.mrb[146].mxu1  ;;  %19929 = vmatprep.mubr.msk.f32.mxu1 %vm7094_vm1, %v16823_v4 }
 0x663   :  { %v21675_v11 = vpack.c.bf16 %v6683_v13, %v6679_v18  ;;  %v6685_v23 = vpop.f32.mrb[147].mxu1  ;;  %20584 = vmatmul.mubr.msk.f32.gmra.mrb[52].mxu0 %vm7094_vm1, %v17436_v45 }
 0x664   :  { %v25171_v27 = vpack.c.bf16 %v6685_v23, %v6681_v63  ;;  %20586 = vmatprep.mubr.msk.f32.mxu0 %vm7094_vm1, %v17437_v10  ;;  %v16832_v63 = vld [vmem:[%s29124_s7 + $0x268] sm:$0xff]  ;;  %v16834_v23 = vld [vmem:[%s29124_s7 + $0x278] sm:$0xff] }
 0x665   :  { %19930 = vmatmul.mubr.msk.f32.gmra.mrb[252].mxu1 %vm7094_vm1, %v16824_v21  ;;  %21676 = vmatprep.subr.bf16.mxu0 %v21675_v11  ;;  %v16833_v21 = vld [vmem:[%s29124_s7 + $0x270] sm:$0xff] }
 0x666   :  { %21678 = vmatpush3.bf16.msra.mxu0 %v21675_v11  ;;  %19932 = vmatprep.mubr.msk.f32.mxu1 %vm7094_vm1, %v16825_v29  ;;  %v16835_v29 = vld [vmem:[%s29124_s7 + $0x280] sm:$0xff] }
 0x667   :  { %20587 = vmatmul.mubr.msk.f32.gmra.mrb[54].mxu0 %vm7094_vm1, %v17438_v33 }
 0x668   :  { %v6689_v50 = vpop.f32.mrb[148].mxu1  ;;  %20667 = vmatprep.mubr.msk.f32.mxu0 %vm7094_vm1, %v17523_v54 }
 0x669   :  { %v6691_v5 = vpop.f32.mrb[149].mxu1  ;;  %19933 = vmatmul.mubr.msk.f32.gmra.mrb[254].mxu1 %vm7094_vm1, %v16826_v37 }
 0x66a   :  { %v6693_v41 = vpop.f32.mrb[150].mxu1  ;;  %19935 = vmatprep.mubr.msk.f32.mxu1 %vm7094_vm1, %v16827_v30  ;;  %v16836_v30 = vld [vmem:[%s29124_s7 + $0x288] sm:$0xff] }
 0x66b   :  { %v21679_v20 = vpack.c.bf16 %v6693_v41, %v6689_v50  ;;  %v6695_v59 = vpop.f32.mrb[151].mxu1  ;;  %v16837_v41 = vld [vmem:[%s29124_s7 + $0x290] sm:$0xff] }
 0x66c   :  { %v25198_v3 = vpack.c.bf16 %v6695_v59, %v6691_v5  ;;  %v17524_v59 = vld [vmem:[%s29124_s7 + $0xc08] sm:$0xff] }
 0x66d   :  { %19936 = vmatmul.mubr.msk.f32.gmra.mrb[0].mxu1 %vm7094_vm1, %v16828_v48  ;;  %21680 = vmatprep.subr.bf16.mxu0 %v21679_v20 }
 0x66e   :  { %21682 = vmatpush3.bf16.msra.mxu0 %v21679_v20  ;;  %19938 = vmatprep.mubr.msk.f32.mxu1 %vm7094_vm1, %v16829_v47  ;;  %v16838_v20 = vld [vmem:[%s29124_s7 + $0x298] sm:$0xff]  ;;  %v16839_v47 = vld [vmem:[%s29124_s7 + $0x2a0] sm:$0xff] }
 0x670   :  { %v6699_v4 = vpop.f32.mrb[152].mxu1 }
 0x671   :  { %v6701_v18 = vpop.f32.mrb[153].mxu1  ;;  %19939 = vmatmul.mubr.msk.f32.gmra.mrb[2].mxu1 %vm7094_vm1, %v16830_v60 }
 0x672   :  { %v6703_v45 = vpop.f32.mrb[154].mxu1  ;;  %19941 = vmatprep.mubr.msk.f32.mxu1 %vm7094_vm1, %v16831_v38  ;;  %v17525_v38 = vld [vmem:[%s29124_s7 + $0xc10] sm:$0xff] }
 0x673   :  { %v21683_v10 = vpack.c.bf16 %v6703_v45, %v6699_v4  ;;  %v6705_v13 = vpop.f32.mrb[155].mxu1  ;;  %v16840_v45 = vld [vmem:[%s29124_s7 + $0x2a8] sm:$0xff] }
 0x674   :  { %v25216_v11 = vpack.c.bf16 %v6705_v13, %v6701_v18 }
 0x675   :  { %19942 = vmatmul.mubr.msk.f32.gmra.mrb[4].mxu1 %vm7094_vm1, %v16832_v63  ;;  %21684 = vmatprep.subr.bf16.mxu0 %v21683_v10  ;;  %v17526_v63 = vld [vmem:[%s29124_s7 + $0xc18] sm:$0xff] }
 0x676   :  { %21686 = vmatpush3.bf16.msra.mxu0 %v21683_v10  ;;  %19944 = vmatprep.mubr.msk.f32.mxu1 %vm7094_vm1, %v16833_v21 }
 0x678   :  { %v6709_v33 = vpop.f32.mrb[156].mxu1 }
 0x679   :  { %v6711_v54 = vpop.f32.mrb[157].mxu1  ;;  %19945 = vmatmul.mubr.msk.f32.gmra.mrb[6].mxu1 %vm7094_vm1, %v16834_v23  ;;  %v17527_v23 = vld [vmem:[%s29124_s7 + $0xc20] sm:$0xff] }
 0x67a   :  { %v6713_v37 = vpop.f32.mrb[158].mxu1  ;;  %19947 = vmatprep.mubr.msk.f32.mxu1 %vm7094_vm1, %v16835_v29  ;;  %v16842_v29 = vld [vmem:[%s29124_s7 + $0x2b8] sm:$0xff] }
 0x67b   :  { %v21687_v50 = vpack.c.bf16 %v6713_v37, %v6709_v33  ;;  %v6715_v5 = vpop.f32.mrb[159].mxu1  ;;  %v17528_v33 = vld [vmem:[%s29124_s7 + $0xc28] sm:$0xff] }
 0x67c   :  { %v25234_v48 = vpack.c.bf16 %v6715_v5, %v6711_v54  ;;  %v16843_v54 = vld [vmem:[%s29124_s7 + $0x2c0] sm:$0xff]  ;;  %v16844_v5 = vld [vmem:[%s29124_s7 + $0x2c8] sm:$0xff] }
 0x67d   :  { %19948 = vmatmul.mubr.msk.f32.gmra.mrb[8].mxu1 %vm7094_vm1, %v16836_v30  ;;  %21688 = vmatprep.subr.bf16.mxu0 %v21687_v50 }
 0x67e   :  { %21690 = vmatpush3.bf16.msra.mxu0 %v21687_v50  ;;  %19950 = vmatprep.mubr.msk.f32.mxu1 %vm7094_vm1, %v16837_v41  ;;  %v17530_v41 = vld [vmem:[%s29124_s7 + $0xc38] sm:$0xff] }
 0x67f   :  { %21692 = vmatprep.subr.bf16.mxu0 %v25103_v25 }
 0x680   :  { %v6752_v60 = vpop.f32.mrb[160].mxu1 }
 0x681   :  { %v6754_v4 = vpop.f32.mrb[161].mxu1  ;;  %19951 = vmatmul.mubr.msk.f32.gmra.mrb[10].mxu1 %vm7094_vm1, %v16838_v20  ;;  %20668 = vmatmul.mubr.msk.f32.vlgmr.msra.gmra.mrb[44].mxu0 %vm7094_vm1, %v17524_v59 }
 0x682   :  { %v6756_v18 = vpop.f32.mrb[162].mxu1  ;;  %21694 = vmatpush3.bf16.msra.mxu0 %v25103_v25  ;;  %19953 = vmatprep.mubr.msk.f32.mxu1 %vm7094_vm1, %v16839_v47  ;;  %v16841_v25 = vld [vmem:[%s29124_s7 + $0x2b0] sm:$0xff] }
 0x683   :  { %v25261_v10 = vpack.c.bf16 %v6756_v18, %v6752_v60  ;;  %v6758_v13 = vpop.f32.mrb[163].mxu1  ;;  %21696 = vmatprep.subr.bf16.mxu0 %v25137_v55  ;;  %20670 = vmatprep.mubr.msk.f32.mxu0 %vm7094_vm1, %v17525_v38  ;;  %v17531_v60 = vld [vmem:[%s29124_s7 + $0xc40] sm:$0xff]  ;;  %v16846_v38 = vld [vmem:[%s29124_s7 + $0x2d8] sm:$0xff] }
 0x684   :  { %v25268_v21 = vpack.c.bf16 %v6758_v13, %v6754_v4  ;;  %v17532_v4 = vld [vmem:[%s29124_s7 + $0xc48] sm:$0xff]  ;;  %v16847_v18 = vld [vmem:[%s29124_s7 + $0x2e0] sm:$0xff] }
 0x685   :  { %19954 = vmatmul.mubr.msk.f32.gmra.mrb[12].mxu1 %vm7094_vm1, %v16840_v45  ;;  %20671 = vmatmul.mubr.msk.f32.gmra.mrb[46].mxu0 %vm7094_vm1, %v17526_v63 }
 0x686   :  { %21698 = vmatpush3.bf16.msra.mxu0 %v25137_v55  ;;  %19956 = vmatprep.mubr.msk.f32.mxu1 %vm7094_vm1, %v16841_v25  ;;  %v17529_v55 = vld [vmem:[%s29124_s7 + $0xc30] sm:$0xff]  ;;  %v16848_v25 = vld [vmem:[%s29124_s7 + $0x2e8] sm:$0xff] }
 0x687   :  { %21700 = vmatprep.subr.bf16.mxu0 %v25171_v27  ;;  %20673 = vmatprep.mubr.msk.f32.mxu0 %vm7094_vm1, %v17527_v23  ;;  %v17534_v23 = vld [vmem:[%s29124_s7 + $0xc58] sm:$0xff] }
 0x688   :  { %v6762_v37 = vpop.f32.mrb[164].mxu1 }
 0x689   :  { %v6764_v30 = vpop.f32.mrb[165].mxu1  ;;  %19957 = vmatmul.mubr.msk.f32.gmra.mrb[14].mxu1 %vm7094_vm1, %v16842_v29  ;;  %20674 = vmatmul.mubr.msk.f32.gmra.mrb[48].mxu0 %vm7094_vm1, %v17528_v33 }
 0x68a   :  { %v6766_v50 = vpop.f32.mrb[166].mxu1  ;;  %21702 = vmatpush3.bf16.msra.mxu0 %v25171_v27  ;;  %19959 = vmatprep.mubr.msk.f32.mxu1 %vm7094_vm1, %v16843_v54  ;;  %v16845_v27 = vld [vmem:[%s29124_s7 + $0x2d0] sm:$0xff] }
 0x68b   :  { %v25301_v20 = vpack.c.bf16 %v6766_v50, %v6762_v37  ;;  %v6768_v59 = vpop.f32.mrb[167].mxu1  ;;  %21704 = vmatprep.subr.bf16.mxu0 %v25198_v3  ;;  %20676 = vmatprep.mubr.msk.f32.mxu0 %vm7094_vm1, %v17529_v55  ;;  %v17535_v37 = vld [vmem:[%s29124_s7 + $0xc60] sm:$0xff]  ;;  %v16850_v55 = vld [vmem:[%s29124_s7 + $0x2f8] sm:$0xff] }
 0x68c   :  { %v25308_v47 = vpack.c.bf16 %v6768_v59, %v6764_v30  ;;  %v17536_v30 = vld [vmem:[%s29124_s7 + $0xc68] sm:$0xff]  ;;  %v6997_v50 = vld [vmem:[%s29124_s7] sm:$0xff] }
 0x68d   :  { %19960 = vmatmul.mubr.msk.f32.gmra.mrb[16].mxu1 %vm7094_vm1, %v16844_v5  ;;  %20677 = vmatmul.mubr.msk.f32.gmra.mrb[50].mxu0 %vm7094_vm1, %v17530_v41 }
 0x68e   :  { %21706 = vmatpush3.bf16.msra.mxu0 %v25198_v3  ;;  %19962 = vmatprep.mubr.msk.f32.mxu1 %vm7094_vm1, %v16845_v27  ;;  %v17533_v3 = vld [vmem:[%s29124_s7 + $0xc50] sm:$0xff]  ;;  %v6998_v27 = vld [vmem:[%s29124_s7 + $0x8] sm:$0xff] }
 0x68f   :  { %21708 = vmatprep.subr.bf16.mxu0 %v25216_v11  ;;  %20679 = vmatprep.mubr.msk.f32.mxu0 %vm7094_vm1, %v17531_v60  ;;  %v17538_v60 = vld [vmem:[%s29124_s7 + $0xc78] sm:$0xff] }
 0x690   :  { %v6772_v45 = vpop.f32.mrb[168].mxu1 }
 0x691   :  { %v6774_v63 = vpop.f32.mrb[169].mxu1  ;;  %19963 = vmatmul.mubr.msk.f32.gmra.mrb[18].mxu1 %vm7094_vm1, %v16846_v38  ;;  %20680 = vmatmul.mubr.msk.f32.gmra.mrb[52].mxu0 %vm7094_vm1, %v17532_v4 }
 0x692   :  { %v6776_v13 = vpop.f32.mrb[170].mxu1  ;;  %21710 = vmatpush3.bf16.msra.mxu0 %v25216_v11  ;;  %19965 = vmatprep.mubr.msk.f32.mxu1 %vm7094_vm1, %v16847_v18  ;;  %v16849_v11 = vld [vmem:[%s29124_s7 + $0x2f0] sm:$0xff] }
 0x693   :  { %v25341_v29 = vpack.c.bf16 %v6776_v13, %v6772_v45  ;;  %v6778_v33 = vpop.f32.mrb[171].mxu1  ;;  %21712 = vmatprep.subr.bf16.mxu0 %v25234_v48  ;;  %20682 = vmatprep.mubr.msk.f32.mxu0 %vm7094_vm1, %v17533_v3  ;;  %v6999_v18 = vld [vmem:[%s29124_s7 + $0x10] sm:$0xff]  ;;  %v17539_v3 = vld [vmem:[%s29124_s7 + $0xc80] sm:$0xff]  ;;  %v17540_v13 = vld [vmem:[%s29124_s7 + $0xc88] sm:$0xff] }
 0x694   :  { %v25348_v54 = vpack.c.bf16 %v6778_v33, %v6774_v63  ;;  %v7000_v63 = vld [vmem:[%s29124_s7 + $0x18] sm:$0xff] }
 0x695   :  { %19966 = vmatmul.mubr.msk.f32.gmra.mrb[20].mxu1 %vm7094_vm1, %v16848_v25  ;;  %20683 = vmatmul.mubr.msk.f32.gmra.mrb[54].mxu0 %vm7094_vm1, %v17534_v23  ;;  %v7001_v25 = vld [vmem:[%s29124_s7 + $0x20] sm:$0xff] }
 0x696   :  { %21714 = vmatpush3.bf16.msra.mxu0 %v25234_v48  ;;  %19968 = vmatprep.mubr.msk.f32.mxu1 %vm7094_vm1, %v16849_v11  ;;  %v17537_v48 = vld [vmem:[%s29124_s7 + $0xc70] sm:$0xff] }
 0x697   :  { %21716 = vmatprep.subr.bf16.mxu0 %v25261_v10  ;;  %20685 = vmatprep.mubr.msk.f32.mxu0 %vm7094_vm1, %v17535_v37  ;;  %v7002_v37 = vld [vmem:[%s29124_s7 + $0x28] sm:$0xff] }
 0x698   :  { %v6782_v5 = vpop.f32.mrb[172].mxu1 }
 0x699   :  { %v6784_v41 = vpop.f32.mrb[173].mxu1  ;;  %19969 = vmatmul.mubr.msk.f32.gmra.mrb[22].mxu1 %vm7094_vm1, %v16850_v55  ;;  %20686 = vmatmul.mubr.msk.f32.gmra.mrb[56].mxu0 %vm7094_vm1, %v17536_v30  ;;  %v17542_v55 = vld [vmem:[%s29124_s7 + $0xc98] sm:$0xff] }
 0x69a   :  { %v6786_v59 = vpop.f32.mrb[174].mxu1  ;;  %19995 = vmatprep.mubr.msk.f32.mxu1 %vm7094_vm1, %v6997_v50  ;;  %20688 = vmatprep.mubr.msk.f32.mxu0 %vm7094_vm1, %v17537_v48 }
 0x69b   :  { %v25381_v38 = vpack.c.bf16 %v6786_v59, %v6782_v5  ;;  %v6788_v4 = vpop.f32.mrb[175].mxu1  ;;  %v17543_v5 = vld [vmem:[%s29124_s7 + $0xca0] sm:$0xff]  ;;  %v17544_v59 = vld [vmem:[%s29124_s7 + $0xca8] sm:$0xff] }
 0x69c   :  { %v25386_v45 = vpack.c.bf16 %v6788_v4, %v6784_v41  ;;  %v7004_v41 = vld [vmem:[%s29124_s7 + $0x38] sm:$0xff] }
 0x69d   :  { %19996 = vmatmul.mubr.msk.f32.vlgmr.msra.gmra.mrb[232].mxu1 %vm7094_vm1, %v6998_v27  ;;  %20689 = vmatmul.mubr.msk.f32.gmra.mrb[58].mxu0 %vm7094_vm1, %v17538_v60  ;;  %v7005_v27 = vld [vmem:[%s29124_s7 + $0x40] sm:$0xff] }
 0x69e   :  { %21526 = vmatpush3.bf16.msra.mxu1 %v24848_v53  ;;  %19998 = vmatprep.mubr.msk.f32.mxu1 %vm7094_vm1, %v6999_v18  ;;  %v17541_v53 = vld [vmem:[%s29124_s7 + $0xc90] sm:$0xff] }
 0x69f   :  { %21528 = vmatprep.subr.bf16.mxu1 %v24860_v9  ;;  %20691 = vmatprep.mubr.msk.f32.mxu0 %vm7094_vm1, %v17539_v3  ;;  %v7006_v3 = vld [vmem:[%s29124_s7 + $0x48] sm:$0xff] }
 0x6a0   :  { %v6792_v23 = vpop.f32.mrb[176].mxu1 }
 0x6a1   :  { %v6794_v33 = vpop.f32.mrb[177].mxu1  ;;  %19999 = vmatmul.mubr.msk.f32.gmra.mrb[234].mxu1 %vm7094_vm1, %v7000_v63  ;;  %20692 = vmatmul.mubr.msk.f32.gmra.mrb[60].mxu0 %vm7094_vm1, %v17540_v13  ;;  %v17546_v63 = vld [vmem:[%s29124_s7 + $0xcb8] sm:$0xff] }
 0x6a2   :  { %21530 = vmatpush3.bf16.msra.mxu1 %v24860_v9  ;;  %v6796_v11 = vpop.f32.mrb[178].mxu1  ;;  %20001 = vmatprep.mubr.msk.f32.mxu1 %vm7094_vm1, %v7001_v25  ;;  %v7003_v9 = vld [vmem:[%s29124_s7 + $0x30] sm:$0xff] }
 0x6a3   :  { %v25419_v30 = vpack.c.bf16 %v6796_v11, %v6792_v23  ;;  %21532 = vmatprep.subr.bf16.mxu1 %v24866_v15  ;;  %v6798_v50 = vpop.f32.mrb[179].mxu1  ;;  %20694 = vmatprep.mubr.msk.f32.mxu0 %vm7094_vm1, %v17541_v53  ;;  %v17547_v53 = vld [vmem:[%s29124_s7 + $0xcc0] sm:$0xff]  ;;  %v17548_v11 = vld [vmem:[%s29124_s7 + $0xcc8] sm:$0xff] }
 0x6a4   :  { %v25426_v48 = vpack.c.bf16 %v6798_v50, %v6794_v33  ;;  %v7008_v33 = vld [vmem:[%s29124_s7 + $0x58] sm:$0xff] }
 0x6a5   :  { %20002 = vmatmul.mubr.msk.f32.gmra.mrb[236].mxu1 %vm7094_vm1, %v7002_v37  ;;  %20695 = vmatmul.mubr.msk.f32.gmra.mrb[62].mxu0 %vm7094_vm1, %v17542_v55  ;;  %v7009_v37 = vld [vmem:[%s29124_s7 + $0x60] sm:$0xff] }
 0x6a6   :  { %21534 = vmatpush3.bf16.msra.mxu1 %v24866_v15  ;;  %20004 = vmatprep.mubr.msk.f32.mxu1 %vm7094_vm1, %v7003_v9  ;;  %v17545_v15 = vld [vmem:[%s29124_s7 + $0xcb0] sm:$0xff] }
 0x6a7   :  { %21536 = vmatprep.subr.bf16.mxu1 %v24882_v42  ;;  %20697 = vmatprep.mubr.msk.f32.mxu0 %vm7094_vm1, %v17543_v5  ;;  %v7010_v5 = vld [vmem:[%s29124_s7 + $0x68] sm:$0xff] }
 0x6a8   :  { %v6802_v60 = vpop.f32.mrb[180].mxu1 }
 0x6a9   :  { %v6804_v4 = vpop.f32.mrb[181].mxu1  ;;  %20005 = vmatmul.mubr.msk.f32.gmra.mrb[238].mxu1 %vm7094_vm1, %v7004_v41  ;;  %20698 = vmatmul.mubr.msk.f32.gmra.mrb[64].mxu0 %vm7094_vm1, %v17544_v59  ;;  %v17550_v41 = vld [vmem:[%s29124_s7 + $0xcd8] sm:$0xff] }
 0x6aa   :  { %21538 = vmatpush3.bf16.msra.mxu1 %v24882_v42  ;;  %v6806_v18 = vpop.f32.mrb[182].mxu1  ;;  %20007 = vmatprep.mubr.msk.f32.mxu1 %vm7094_vm1, %v7005_v27  ;;  %v7007_v42 = vld [vmem:[%s29124_s7 + $0x50] sm:$0xff] }
 0x6ab   :  { %v25459_v13 = vpack.c.bf16 %v6806_v18, %v6802_v60  ;;  %21540 = vmatprep.subr.bf16.mxu1 %v24900_v52  ;;  %v6808_v25 = vpop.f32.mrb[183].mxu1  ;;  %20700 = vmatprep.mubr.msk.f32.mxu0 %vm7094_vm1, %v17545_v15  ;;  %v17551_v60 = vld [vmem:[%s29124_s7 + $0xce0] sm:$0xff]  ;;  %v17552_v18 = vld [vmem:[%s29124_s7 + $0xce8] sm:$0xff] }
 0x6ac   :  { %v25466_v23 = vpack.c.bf16 %v6808_v25, %v6804_v4  ;;  %v7012_v4 = vld [vmem:[%s29124_s7 + $0x78] sm:$0xff] }
 0x6ad   :  { %20008 = vmatmul.mubr.msk.f32.gmra.mrb[240].mxu1 %vm7094_vm1, %v7006_v3  ;;  %20701 = vmatmul.mubr.msk.f32.gmra.mrb[66].mxu0 %vm7094_vm1, %v17546_v63  ;;  %v7013_v3 = vld [vmem:[%s29124_s7 + $0x80] sm:$0xff]  ;;  %v17553_v63 = vld [vmem:[%s29124_s7 + $0xcf0] sm:$0xff] }
 0x6ae   :  { %21542 = vmatpush3.bf16.msra.mxu1 %v24900_v52  ;;  %20010 = vmatprep.mubr.msk.f32.mxu1 %vm7094_vm1, %v7007_v42  ;;  %v17549_v52 = vld [vmem:[%s29124_s7 + $0xcd0] sm:$0xff] }
 0x6af   :  { %21544 = vmatprep.subr.bf16.mxu1 %v24918_v56  ;;  %20703 = vmatprep.mubr.msk.f32.mxu0 %vm7094_vm1, %v17547_v53 }
 0x6b0   :  { %v6845_v55 = vpop.f32.mrb[184].mxu1 }
 0x6b1   :  { %v6847_v50 = vpop.f32.mrb[185].mxu1  ;;  %20011 = vmatmul.mubr.msk.f32.gmra.mrb[242].mxu1 %vm7094_vm1, %v7008_v33  ;;  %20704 = vmatmul.mubr.msk.f32.gmra.mrb[68].mxu0 %vm7094_vm1, %v17548_v11  ;;  %v7014_v33 = vld [vmem:[%s29124_s7 + $0x88] sm:$0xff]  ;;  %v17554_v11 = vld [vmem:[%s29124_s7 + $0xcf8] sm:$0xff] }
 0x6b2   :  { %21546 = vmatpush3.bf16.msra.mxu1 %v24918_v56  ;;  %v6849_v9 = vpop.f32.mrb[186].mxu1  ;;  %20013 = vmatprep.mubr.msk.f32.mxu1 %vm7094_vm1, %v7009_v37  ;;  %v7011_v56 = vld [vmem:[%s29124_s7 + $0x70] sm:$0xff] }
 0x6b3   :  { %v25499_v59 = vpack.c.bf16 %v6849_v9, %v6845_v55  ;;  %21548 = vmatprep.subr.bf16.mxu1 %v24850_v34  ;;  %v6851_v27 = vpop.f32.mrb[187].mxu1  ;;  %20706 = vmatprep.mubr.msk.f32.mxu0 %vm7094_vm1, %v17549_v52  ;;  %v7015_v52 = vld [vmem:[%s29124_s7 + $0x90] sm:$0xff] }
 0x6b4   :  { %v25509_v15 = vpack.c.bf16 %v6851_v27, %v6847_v50  ;;  %v17555_v50 = vld [vmem:[%s29124_s7 + $0xd00] sm:$0xff] }
 0x6b5   :  { %20014 = vmatmul.mubr.msk.f32.gmra.mrb[244].mxu1 %vm7094_vm1, %v7010_v5  ;;  %20707 = vmatmul.mubr.msk.f32.gmra.mrb[70].mxu0 %vm7094_vm1, %v17550_v41  ;;  %v7016_v5 = vld [vmem:[%s29124_s7 + $0x98] sm:$0xff]  ;;  %v17556_v41 = vld [vmem:[%s29124_s7 + $0xd08] sm:$0xff]  ;;  %v7017_v27 = vld [vmem:[%s29124_s7 + $0xa0] sm:$0xff] }
 0x6b6   :  { %20016 = vmatprep.mubr.msk.f32.mxu1 %vm7094_vm1, %v7011_v56  ;;  %20709 = vmatprep.mubr.msk.f32.mxu0 %vm7094_vm1, %v17551_v60  ;;  %v17557_v56 = vld [vmem:[%s29124_s7 + $0xd10] sm:$0xff] }
 0x6b8   :  { %v6855_v25 = vpop.f32.mrb[188].mxu1 }
 0x6b9   :  { %v6857_v42 = vpop.f32.mrb[189].mxu1  ;;  %20017 = vmatmul.mubr.msk.f32.gmra.mrb[246].mxu1 %vm7094_vm1, %v7012_v4  ;;  %20710 = vmatmul.mubr.msk.f32.gmra.mrb[72].mxu0 %vm7094_vm1, %v17552_v18 }
 0x6ba   :  { %v6859_v53 = vpop.f32.mrb[190].mxu1  ;;  %20019 = vmatprep.mubr.msk.f32.mxu1 %vm7094_vm1, %v7013_v3  ;;  %20712 = vmatprep.mubr.msk.f32.mxu0 %vm7094_vm1, %v17553_v63  ;;  %v7018_v3 = vld [vmem:[%s29124_s7 + $0xa8] sm:$0xff]  ;;  %v17558_v63 = vld [vmem:[%s29124_s7 + $0xd18] sm:$0xff] }
 0x6bb   :  { %v25537_v37 = vpack.c.bf16 %v6859_v53, %v6855_v25  ;;  %v6861_v55 = vpop.f32.mrb[191].mxu1  ;;  %v7019_v53 = vld [vmem:[%s29124_s7 + $0xb0] sm:$0xff] }
 0x6bc   :  { %v25545_v9 = vpack.c.bf16 %v6861_v55, %v6857_v42  ;;  %v7020_v55 = vld [vmem:[%s29124_s7 + $0xb8] sm:$0xff] }
 0x6bd   :  { %20020 = vmatmul.mubr.msk.f32.gmra.mrb[248].mxu1 %vm7094_vm1, %v7014_v33  ;;  %20713 = vmatmul.mubr.msk.f32.gmra.mrb[74].mxu0 %vm7094_vm1, %v17554_v11  ;;  %v17559_v33 = vld [vmem:[%s29124_s7 + $0xd20] sm:$0xff] }
 0x6be   :  { %20022 = vmatprep.mubr.msk.f32.mxu1 %vm7094_vm1, %v7015_v52  ;;  %20715 = vmatprep.mubr.msk.f32.mxu0 %vm7094_vm1, %v17555_v50  ;;  %v17560_v52 = vld [vmem:[%s29124_s7 + $0xd28] sm:$0xff]  ;;  %v7021_v50 = vld [vmem:[%s29124_s7 + $0xc0] sm:$0xff] }
 0x6c0   :  { %v6865_v60 = vpop.f32.mrb[192].mxu1 }
 0x6c1   :  { %v6867_v4 = vpop.f32.mrb[193].mxu1  ;;  %20023 = vmatmul.mubr.msk.f32.gmra.mrb[250].mxu1 %vm7094_vm1, %v7016_v5  ;;  %20716 = vmatmul.mubr.msk.f32.gmra.mrb[76].mxu0 %vm7094_vm1, %v17556_v41  ;;  %v17561_v5 = vld [vmem:[%s29124_s7 + $0xd30] sm:$0xff] }
 0x6c2   :  { %v6869_v18 = vpop.f32.mrb[194].mxu1  ;;  %20025 = vmatprep.mubr.msk.f32.mxu1 %vm7094_vm1, %v7017_v27  ;;  %20718 = vmatprep.mubr.msk.f32.mxu0 %vm7094_vm1, %v17557_v56 }
 0x6c3   :  { %v25573_v25 = vpack.c.bf16 %v6869_v18, %v6865_v60  ;;  %v6871_v42 = vpop.f32.mrb[195].mxu1  ;;  %v7022_v60 = vld [vmem:[%s29124_s7 + $0xc8] sm:$0xff] }
 0x6c4   :  { %v25581_v11 = vpack.c.bf16 %v6871_v42, %v6867_v4  ;;  %v17562_v4 = vld [vmem:[%s29124_s7 + $0xd38] sm:$0xff]  ;;  %v17563_v42 = vld [vmem:[%s29124_s7 + $0xd40] sm:$0xff] }
 0x6c5   :  { %20026 = vmatmul.mubr.msk.f32.gmra.mrb[252].mxu1 %vm7094_vm1, %v7018_v3  ;;  %20719 = vmatmul.mubr.msk.f32.gmra.mrb[78].mxu0 %vm7094_vm1, %v17558_v63  ;;  %v7023_v63 = vld [vmem:[%s29124_s7 + $0xd0] sm:$0xff] }
 0x6c6   :  { %20028 = vmatprep.mubr.msk.f32.mxu1 %vm7094_vm1, %v7019_v53  ;;  %20721 = vmatprep.mubr.msk.f32.mxu0 %vm7094_vm1, %v17559_v33  ;;  %v7024_v33 = vld [vmem:[%s29124_s7 + $0xd8] sm:$0xff] }
 0x6c8   :  { %v6875_v41 = vpop.f32.mrb[196].mxu1 }
 0x6c9   :  { %v6877_v27 = vpop.f32.mrb[197].mxu1  ;;  %20029 = vmatmul.mubr.msk.f32.gmra.mrb[254].mxu1 %vm7094_vm1, %v7020_v55  ;;  %20722 = vmatmul.mubr.msk.f32.gmra.mrb[80].mxu0 %vm7094_vm1, %v17560_v52  ;;  %v17564_v55 = vld [vmem:[%s29124_s7 + $0xd48] sm:$0xff]  ;;  %v7025_v52 = vld [vmem:[%s29124_s7 + $0xe0] sm:$0xff] }
 0x6ca   :  { %v6879_v56 = vpop.f32.mrb[198].mxu1  ;;  %20031 = vmatprep.mubr.msk.f32.mxu1 %vm7094_vm1, %v7021_v50  ;;  %20724 = vmatprep.mubr.msk.f32.mxu0 %vm7094_vm1, %v17561_v5  ;;  %v17565_v50 = vld [vmem:[%s29124_s7 + $0xd50] sm:$0xff] }
 0x6cb   :  { %v25609_v18 = vpack.c.bf16 %v6879_v56, %v6875_v41  ;;  %v6881_v3 = vpop.f32.mrb[199].mxu1  ;;  %v7026_v56 = vld [vmem:[%s29124_s7 + $0xe8] sm:$0xff] }
 0x6cc   :  { %v25617_v53 = vpack.c.bf16 %v6881_v3, %v6877_v27 }
 0x6cd   :  { %20032 = vmatmul.mubr.msk.f32.gmra.mrb[0].mxu1 %vm7094_vm1, %v7022_v60  ;;  %20725 = vmatmul.mubr.msk.f32.gmra.mrb[82].mxu0 %vm7094_vm1, %v17562_v4  ;;  %v17566_v60 = vld [vmem:[%s29124_s7 + $0xd58] sm:$0xff] }
 0x6ce   :  { %20034 = vmatprep.mubr.msk.f32.mxu1 %vm7094_vm1, %v7023_v63  ;;  %20727 = vmatprep.mubr.msk.f32.mxu0 %vm7094_vm1, %v17563_v42  ;;  %v7027_v63 = vld [vmem:[%s29124_s7 + $0xf0] sm:$0xff]  ;;  %v17567_v42 = vld [vmem:[%s29124_s7 + $0xd60] sm:$0xff] }
 0x6d0   :  { %v6885_v5 = vpop.f32.mrb[200].mxu1 }
 0x6d1   :  { %v6887_v41 = vpop.f32.mrb[201].mxu1  ;;  %20035 = vmatmul.mubr.msk.f32.gmra.mrb[2].mxu1 %vm7094_vm1, %v7024_v33  ;;  %20728 = vmatmul.mubr.msk.f32.gmra.mrb[84].mxu0 %vm7094_vm1, %v17564_v55  ;;  %v7028_v55 = vld [vmem:[%s29124_s7 + $0xf8] sm:$0xff] }
 0x6d2   :  { %v6889_v27 = vpop.f32.mrb[202].mxu1  ;;  %20037 = vmatprep.mubr.msk.f32.mxu1 %vm7094_vm1, %v7025_v52  ;;  %20730 = vmatprep.mubr.msk.f32.mxu0 %vm7094_vm1, %v17565_v50  ;;  %v17568_v52 = vld [vmem:[%s29124_s7 + $0xd68] sm:$0xff]  ;;  %v7029_v50 = vld [vmem:[%s29124_s7 + $0x100] sm:$0xff] }
 0x6d3   :  { %v25645_v4 = vpack.c.bf16 %v6889_v27, %v6885_v5  ;;  %v6891_v3 = vpop.f32.mrb[203].mxu1  ;;  %v17569_v5 = vld [vmem:[%s29124_s7 + $0xd70] sm:$0xff] }
 0x6d4   :  { %v25653_v33 = vpack.c.bf16 %v6891_v3, %v6887_v41  ;;  %v17570_v3 = vld [vmem:[%s29124_s7 + $0xd78] sm:$0xff] }
 0x6d5   :  { %20038 = vmatmul.mubr.msk.f32.gmra.mrb[4].mxu1 %vm7094_vm1, %v7026_v56  ;;  %20731 = vmatmul.mubr.msk.f32.gmra.mrb[86].mxu0 %vm7094_vm1, %v17566_v60  ;;  %v7030_v60 = vld [vmem:[%s29124_s7 + $0x108] sm:$0xff] }
 0x6d6   :  { %20040 = vmatprep.mubr.msk.f32.mxu1 %vm7094_vm1, %v7027_v63  ;;  %20733 = vmatprep.mubr.msk.f32.mxu0 %vm7094_vm1, %v17567_v42 }
 0x6d8   :  { %v6895_v41 = vpop.f32.mrb[204].mxu1 }
 0x6d9   :  { %v6897_v27 = vpop.f32.mrb[205].mxu1  ;;  %20041 = vmatmul.mubr.msk.f32.gmra.mrb[6].mxu1 %vm7094_vm1, %v7028_v55  ;;  %20734 = vmatmul.mubr.msk.f32.gmra.mrb[88].mxu0 %vm7094_vm1, %v17568_v52  ;;  %v7031_v55 = vld [vmem:[%s29124_s7 + $0x110] sm:$0xff]  ;;  %v17619_v52 = vld [vmem:[%s29124_s7 + $0xd80] sm:$0xff] }
 0x6da   :  { %v6899_v56 = vpop.f32.mrb[206].mxu1  ;;  %20043 = vmatprep.mubr.msk.f32.mxu1 %vm7094_vm1, %v7029_v50  ;;  %20736 = vmatprep.mubr.msk.f32.mxu0 %vm7094_vm1, %v17569_v5  ;;  %v7032_v5 = vld [vmem:[%s29124_s7 + $0x118] sm:$0xff] }
 0x6db   :  { %v25681_v63 = vpack.c.bf16 %v6899_v56, %v6895_v41  ;;  %v6901_v42 = vpop.f32.mrb[207].mxu1  ;;  %v17620_v41 = vld [vmem:[%s29124_s7 + $0xd88] sm:$0xff] }
 0x6dc   :  { %v25689_v50 = vpack.c.bf16 %v6901_v42, %v6897_v27  ;;  %v7033_v27 = vld [vmem:[%s29124_s7 + $0x120] sm:$0xff] }
 0x6dd   :  { %20044 = vmatmul.mubr.msk.f32.gmra.mrb[8].mxu1 %vm7094_vm1, %v7030_v60  ;;  %20737 = vmatmul.mubr.msk.f32.gmra.mrb[90].mxu0 %vm7094_vm1, %v17570_v3  ;;  %v17621_v60 = vld [vmem:[%s29124_s7 + $0xd90] sm:$0xff] }
 0x6de   :  { %20046 = vmatprep.mubr.msk.f32.mxu1 %vm7094_vm1, %v7031_v55  ;;  %20763 = vmatprep.mubr.msk.f32.mxu0 %vm7094_vm1, %v17619_v52  ;;  %v7034_v55 = vld [vmem:[%s29124_s7 + $0x128] sm:$0xff]  ;;  %v17622_v52 = vld [vmem:[%s29124_s7 + $0xd98] sm:$0xff] }
 0x6e0   :  { %v6938_v56 = vpop.f32.mrb[208].mxu1 }
 0x6e1   :  { %v6940_v3 = vpop.f32.mrb[209].mxu1  ;;  %20047 = vmatmul.mubr.msk.f32.gmra.mrb[10].mxu1 %vm7094_vm1, %v7032_v5  ;;  %20764 = vmatmul.mubr.msk.f32.vlgmr.msra.gmra.mrb[44].mxu0 %vm7094_vm1, %v17620_v41 }
 0x6e2   :  { %21718 = vmatpush3.bf16.msra.mxu0 %v25261_v10  ;;  %v6942_v42 = vpop.f32.mrb[210].mxu1  ;;  %20049 = vmatprep.mubr.msk.f32.mxu1 %vm7094_vm1, %v7033_v27  ;;  %v7035_v10 = vld [vmem:[%s29124_s7 + $0x130] sm:$0xff]  ;;  %v17623_v27 = vld [vmem:[%s29124_s7 + $0xda0] sm:$0xff] }
 0x6e3   :  { %v25717_v61 = vpack.c.bf16 %v6942_v42, %v6938_v56  ;;  %21720 = vmatprep.subr.bf16.mxu0 %v25301_v20  ;;  %v6944_v5 = vpop.f32.mrb[211].mxu1  ;;  %20766 = vmatprep.mubr.msk.f32.mxu0 %vm7094_vm1, %v17621_v60  ;;  %v7036_v56 = vld [vmem:[%s29124_s7 + $0x138] sm:$0xff]  ;;  %v17624_v60 = vld [vmem:[%s29124_s7 + $0xda8] sm:$0xff] }
 0x6e4   :  { %v25724_v41 = vpack.c.bf16 %v6944_v5, %v6940_v3  ;;  %v7037_v3 = vld [vmem:[%s29124_s7 + $0x140] sm:$0xff]  ;;  %v7038_v5 = vld [vmem:[%s29124_s7 + $0x148] sm:$0xff] }
 0x6e5   :  { %20050 = vmatmul.mubr.msk.f32.gmra.mrb[12].mxu1 %vm7094_vm1, %v7034_v55  ;;  %20767 = vmatmul.mubr.msk.f32.gmra.mrb[46].mxu0 %vm7094_vm1, %v17622_v52 }
 0x6e6   :  { %21722 = vmatpush3.bf16.msra.mxu0 %v25301_v20  ;;  %20052 = vmatprep.mubr.msk.f32.mxu1 %vm7094_vm1, %v7035_v10  ;;  %v17625_v20 = vld [vmem:[%s29124_s7 + $0xdb0] sm:$0xff]  ;;  %v17626_v10 = vld [vmem:[%s29124_s7 + $0xdb8] sm:$0xff] }
 0x6e7   :  { %21724 = vmatprep.subr.bf16.mxu0 %v25341_v29  ;;  %20769 = vmatprep.mubr.msk.f32.mxu0 %vm7094_vm1, %v17623_v27 }
 0x6e8   :  { %v6948_v42 = vpop.f32.mrb[212].mxu1 }
 0x6e9   :  { %v6950_v55 = vpop.f32.mrb[213].mxu1  ;;  %20053 = vmatmul.mubr.msk.f32.gmra.mrb[14].mxu1 %vm7094_vm1, %v7036_v56  ;;  %20770 = vmatmul.mubr.msk.f32.gmra.mrb[48].mxu0 %vm7094_vm1, %v17624_v60 }
 0x6ea   :  { %21726 = vmatpush3.bf16.msra.mxu0 %v25341_v29  ;;  %v6952_v52 = vpop.f32.mrb[214].mxu1  ;;  %20055 = vmatprep.mubr.msk.f32.mxu1 %vm7094_vm1, %v7037_v3  ;;  %v7039_v29 = vld [vmem:[%s29124_s7 + $0x150] sm:$0xff]  ;;  %v17627_v3 = vld [vmem:[%s29124_s7 + $0xdc0] sm:$0xff] }
 0x6eb   :  { %v25757_v27 = vpack.c.bf16 %v6952_v52, %v6948_v42  ;;  %21728 = vmatprep.subr.bf16.mxu0 %v25381_v38  ;;  %v6954_v56 = vpop.f32.mrb[215].mxu1  ;;  %20772 = vmatprep.mubr.msk.f32.mxu0 %vm7094_vm1, %v17625_v20  ;;  %v7040_v42 = vld [vmem:[%s29124_s7 + $0x158] sm:$0xff]  ;;  %v17628_v20 = vld [vmem:[%s29124_s7 + $0xdc8] sm:$0xff] }
 0x6ec   :  { %v25764_v60 = vpack.c.bf16 %v6954_v56, %v6950_v55  ;;  %v7041_v55 = vld [vmem:[%s29124_s7 + $0x160] sm:$0xff]  ;;  %v7042_v56 = vld [vmem:[%s29124_s7 + $0x168] sm:$0xff] }
 0x6ed   :  { %20056 = vmatmul.mubr.msk.f32.gmra.mrb[16].mxu1 %vm7094_vm1, %v7038_v5  ;;  %20773 = vmatmul.mubr.msk.f32.gmra.mrb[50].mxu0 %vm7094_vm1, %v17626_v10 }
 0x6ee   :  { %21730 = vmatpush3.bf16.msra.mxu0 %v25381_v38  ;;  %20058 = vmatprep.mubr.msk.f32.mxu1 %vm7094_vm1, %v7039_v29  ;;  %v17629_v38 = vld [vmem:[%s29124_s7 + $0xdd0] sm:$0xff]  ;;  %v17630_v29 = vld [vmem:[%s29124_s7 + $0xdd8] sm:$0xff] }
 0x6ef   :  { %21732 = vmatprep.subr.bf16.mxu0 %v25419_v30  ;;  %20775 = vmatprep.mubr.msk.f32.mxu0 %vm7094_vm1, %v17627_v3 }
 0x6f0   :  { %v6958_v52 = vpop.f32.mrb[216].mxu1 }
 0x6f1   :  { %v6960_v5 = vpop.f32.mrb[217].mxu1  ;;  %20059 = vmatmul.mubr.msk.f32.gmra.mrb[18].mxu1 %vm7094_vm1, %v7040_v42  ;;  %20776 = vmatmul.mubr.msk.f32.gmra.mrb[52].mxu0 %vm7094_vm1, %v17628_v20 }
 0x6f2   :  { %21734 = vmatpush3.bf16.msra.mxu0 %v25419_v30  ;;  %v6962_v10 = vpop.f32.mrb[218].mxu1  ;;  %20061 = vmatprep.mubr.msk.f32.mxu1 %vm7094_vm1, %v7041_v55  ;;  %v7043_v30 = vld [vmem:[%s29124_s7 + $0x170] sm:$0xff]  ;;  %v17631_v55 = vld [vmem:[%s29124_s7 + $0xde0] sm:$0xff] }
 0x6f3   :  { %v25797_v3 = vpack.c.bf16 %v6962_v10, %v6958_v52  ;;  %21736 = vmatprep.subr.bf16.mxu0 %v25459_v13  ;;  %v6964_v42 = vpop.f32.mrb[219].mxu1  ;;  %20778 = vmatprep.mubr.msk.f32.mxu0 %vm7094_vm1, %v17629_v38  ;;  %v7044_v52 = vld [vmem:[%s29124_s7 + $0x178] sm:$0xff]  ;;  %v17632_v38 = vld [vmem:[%s29124_s7 + $0xde8] sm:$0xff] }
 0x6f4   :  { %v25804_v20 = vpack.c.bf16 %v6964_v42, %v6960_v5  ;;  %v16947_v5 = vld [vmem:[%s29124_s7 + $0x300] sm:$0xff]  ;;  %v16948_v42 = vld [vmem:[%s29124_s7 + $0x308] sm:$0xff] }
 0x6f5   :  { %20062 = vmatmul.mubr.msk.f32.gmra.mrb[20].mxu1 %vm7094_vm1, %v7042_v56  ;;  %20779 = vmatmul.mubr.msk.f32.gmra.mrb[54].mxu0 %vm7094_vm1, %v17630_v29 }
 0x6f6   :  { %29128 = vst [vmem:[#allocation5_spill] sm:$0xff] %v25804_v20  ;;  %21738 = vmatpush3.bf16.msra.mxu0 %v25459_v13  ;;  %20064 = vmatprep.mubr.msk.f32.mxu1 %vm7094_vm1, %v7043_v30  ;;  %v17633_v13 = vld [vmem:[%s29124_s7 + $0xdf0] sm:$0xff]  ;;  %v17634_v30 = vld [vmem:[%s29124_s7 + $0xdf8] sm:$0xff] }
 0x6f7   :  { %21740 = vmatprep.subr.bf16.mxu0 %v25268_v21  ;;  %20781 = vmatprep.mubr.msk.f32.mxu0 %vm7094_vm1, %v17631_v55 }
 0x6f8   :  { %v6968_v10 = vpop.f32.mrb[220].mxu1 }
 0x6f9   :  { %v6970_v56 = vpop.f32.mrb[221].mxu1  ;;  %20065 = vmatmul.mubr.msk.f32.gmra.mrb[22].mxu1 %vm7094_vm1, %v7044_v52  ;;  %20782 = vmatmul.mubr.msk.f32.gmra.mrb[56].mxu0 %vm7094_vm1, %v17632_v38  ;;  %v16949_v52 = vld [vmem:[%s29124_s7 + $0x310] sm:$0xff] }
 0x6fa   :  { %v6972_v29 = vpop.f32.mrb[222].mxu1  ;;  %20091 = vmatprep.mubr.msk.f32.mxu1 %vm7094_vm1, %v16947_v5  ;;  %20784 = vmatprep.mubr.msk.f32.mxu0 %vm7094_vm1, %v17633_v13  ;;  %v17635_v5 = vld [vmem:[%s29124_s7 + $0xe00] sm:$0xff]  ;;  %v16950_v13 = vld [vmem:[%s29124_s7 + $0x318] sm:$0xff] }
 0x6fb   :  { %v25837_v55 = vpack.c.bf16 %v6972_v29, %v6968_v10  ;;  %v6974_v20 = vpop.f32.mrb[223].mxu1  ;;  %v16951_v10 = vld [vmem:[%s29124_s7 + $0x320] sm:$0xff] }
 0x6fc   :  { %v25842_v38 = vpack.c.bf16 %v6974_v20, %v6970_v56  ;;  %v17636_v20 = vld [vmem:[%s29124_s7 + $0xe08] sm:$0xff] }
 0x6fd   :  { %20092 = vmatmul.mubr.msk.f32.vlgmr.msra.gmra.mrb[232].mxu1 %vm7094_vm1, %v16948_v42  ;;  %20785 = vmatmul.mubr.msk.f32.gmra.mrb[58].mxu0 %vm7094_vm1, %v17634_v30  ;;  %v16952_v30 = vld [vmem:[%s29124_s7 + $0x328] sm:$0xff] }
 0x6fe   :  { %21550 = vmatpush3.bf16.msra.mxu1 %v24850_v34  ;;  %20094 = vmatprep.mubr.msk.f32.mxu1 %vm7094_vm1, %v16949_v52  ;;  %v17637_v34 = vld [vmem:[%s29124_s7 + $0xe10] sm:$0xff]  ;;  %v17638_v52 = vld [vmem:[%s29124_s7 + $0xe18] sm:$0xff] }
 0x6ff   :  { %21552 = vmatprep.subr.bf16.mxu1 %v24862_v12  ;;  %20787 = vmatprep.mubr.msk.f32.mxu0 %vm7094_vm1, %v17635_v5 }
 0x700   :  { %v6978_v56 = vpop.f32.mrb[224].mxu1 }
 0x701   :  { %v6980_v29 = vpop.f32.mrb[225].mxu1  ;;  %20095 = vmatmul.mubr.msk.f32.gmra.mrb[234].mxu1 %vm7094_vm1, %v16950_v13  ;;  %20788 = vmatmul.mubr.msk.f32.gmra.mrb[60].mxu0 %vm7094_vm1, %v17636_v20 }
 0x702   :  { %21554 = vmatpush3.bf16.msra.mxu1 %v24862_v12  ;;  %v6982_v42 = vpop.f32.mrb[226].mxu1  ;;  %20097 = vmatprep.mubr.msk.f32.mxu1 %vm7094_vm1, %v16951_v10  ;;  %v16953_v12 = vld [vmem:[%s29124_s7 + $0x330] sm:$0xff]  ;;  %v17639_v10 = vld [vmem:[%s29124_s7 + $0xe20] sm:$0xff] }
 0x703   :  { %v25875_v5 = vpack.c.bf16 %v6982_v42, %v6978_v56  ;;  %21556 = vmatprep.subr.bf16.mxu1 %v24868_v17  ;;  %v6984_v13 = vpop.f32.mrb[227].mxu1  ;;  %20790 = vmatprep.mubr.msk.f32.mxu0 %vm7094_vm1, %v17637_v34  ;;  %v16954_v56 = vld [vmem:[%s29124_s7 + $0x338] sm:$0xff]  ;;  %v17640_v34 = vld [vmem:[%s29124_s7 + $0xe28] sm:$0xff] }
 0x704   :  { %v25882_v20 = vpack.c.bf16 %v6984_v13, %v6980_v29  ;;  %v16955_v29 = vld [vmem:[%s29124_s7 + $0x340] sm:$0xff]  ;;  %v16956_v13 = vld [vmem:[%s29124_s7 + $0x348] sm:$0xff] }
 0x705   :  { %20098 = vmatmul.mubr.msk.f32.gmra.mrb[236].mxu1 %vm7094_vm1, %v16952_v30  ;;  %20791 = vmatmul.mubr.msk.f32.gmra.mrb[62].mxu0 %vm7094_vm1, %v17638_v52 }
 0x706   :  { %21558 = vmatpush3.bf16.msra.mxu1 %v24868_v17  ;;  %20100 = vmatprep.mubr.msk.f32.mxu1 %vm7094_vm1, %v16953_v12  ;;  %v17641_v17 = vld [vmem:[%s29124_s7 + $0xe30] sm:$0xff]  ;;  %v17642_v12 = vld [vmem:[%s29124_s7 + $0xe38] sm:$0xff] }
 0x707   :  { %21560 = vmatprep.subr.bf16.mxu1 %v24884_v39  ;;  %20793 = vmatprep.mubr.msk.f32.mxu0 %vm7094_vm1, %v17639_v10 }
 0x708   :  { %v6988_v42 = vpop.f32.mrb[228].mxu1 }
 0x709   :  { %v6990_v30 = vpop.f32.mrb[229].mxu1  ;;  %20101 = vmatmul.mubr.msk.f32.gmra.mrb[238].mxu1 %vm7094_vm1, %v16954_v56  ;;  %20794 = vmatmul.mubr.msk.f32.gmra.mrb[64].mxu0 %vm7094_vm1, %v17640_v34 }
 0x70a   :  { %21562 = vmatpush3.bf16.msra.mxu1 %v24884_v39  ;;  %v6992_v52 = vpop.f32.mrb[230].mxu1  ;;  %20103 = vmatprep.mubr.msk.f32.mxu1 %vm7094_vm1, %v16955_v29  ;;  %v16957_v39 = vld [vmem:[%s29124_s7 + $0x350] sm:$0xff]  ;;  %v17643_v29 = vld [vmem:[%s29124_s7 + $0xe40] sm:$0xff] }
 0x70b   :  { %v25915_v10 = vpack.c.bf16 %v6992_v52, %v6988_v42  ;;  %21564 = vmatprep.subr.bf16.mxu1 %v24902_v8  ;;  %v6994_v56 = vpop.f32.mrb[231].mxu1  ;;  %20796 = vmatprep.mubr.msk.f32.mxu0 %vm7094_vm1, %v17641_v17  ;;  %v16958_v42 = vld [vmem:[%s29124_s7 + $0x358] sm:$0xff]  ;;  %v17644_v17 = vld [vmem:[%s29124_s7 + $0xe48] sm:$0xff] }
 0x70c   :  { %v25922_v34 = vpack.c.bf16 %v6994_v56, %v6990_v30  ;;  %v16959_v30 = vld [vmem:[%s29124_s7 + $0x360] sm:$0xff]  ;;  %v16960_v52 = vld [vmem:[%s29124_s7 + $0x368] sm:$0xff]  ;;  %v16962_v56 = vld [vmem:[%s29124_s7 + $0x378] sm:$0xff] }
 0x70d   :  { %20104 = vmatmul.mubr.msk.f32.gmra.mrb[240].mxu1 %vm7094_vm1, %v16956_v13  ;;  %20797 = vmatmul.mubr.msk.f32.gmra.mrb[66].mxu0 %vm7094_vm1, %v17642_v12  ;;  %v17646_v13 = vld [vmem:[%s29124_s7 + $0xe58] sm:$0xff]  ;;  %v16961_v12 = vld [vmem:[%s29124_s7 + $0x370] sm:$0xff] }
 0x70e   :  { %21566 = vmatpush3.bf16.msra.mxu1 %v24902_v8  ;;  %20106 = vmatprep.mubr.msk.f32.mxu1 %vm7094_vm1, %v16957_v39  ;;  %v17645_v8 = vld [vmem:[%s29124_s7 + $0xe50] sm:$0xff]  ;;  %v17648_v39 = vld [vmem:[%s29124_s7 + $0xe68] sm:$0xff] }
 0x70f   :  { %21568 = vmatprep.subr.bf16.mxu1 %v24920_v0  ;;  %20799 = vmatprep.mubr.msk.f32.mxu0 %vm7094_vm1, %v17643_v29  ;;  %v16963_v29 = vld [vmem:[%s29124_s7 + $0x380] sm:$0xff] }
 0x711   :  { %20107 = vmatmul.mubr.msk.f32.gmra.mrb[242].mxu1 %vm7094_vm1, %v16958_v42  ;;  %20800 = vmatmul.mubr.msk.f32.gmra.mrb[68].mxu0 %vm7094_vm1, %v17644_v17  ;;  %v17649_v42 = vld [vmem:[%s29124_s7 + $0xe70] sm:$0xff]  ;;  %v16964_v17 = vld [vmem:[%s29124_s7 + $0x388] sm:$0xff] }
 0x712   :  { %21570 = vmatpush3.bf16.msra.mxu1 %v24920_v0  ;;  %20109 = vmatprep.mubr.msk.f32.mxu1 %vm7094_vm1, %v16959_v30  ;;  %v17647_v0 = vld [vmem:[%s29124_s7 + $0xe60] sm:$0xff]  ;;  %v17650_v30 = vld [vmem:[%s29124_s7 + $0xe78] sm:$0xff] }
 0x713   :  { %21572 = vmatprep.subr.bf16.mxu1 %v24936_v31  ;;  %20802 = vmatprep.mubr.msk.f32.mxu0 %vm7094_vm1, %v17645_v8  ;;  %v16965_v8 = vld [vmem:[%s29124_s7 + $0x390] sm:$0xff] }
 0x715   :  { %20110 = vmatmul.mubr.msk.f32.gmra.mrb[244].mxu1 %vm7094_vm1, %v16960_v52  ;;  %20803 = vmatmul.mubr.msk.f32.gmra.mrb[70].mxu0 %vm7094_vm1, %v17646_v13  ;;  %v17651_v52 = vld [vmem:[%s29124_s7 + $0xe80] sm:$0xff]  ;;  %v16966_v13 = vld [vmem:[%s29124_s7 + $0x398] sm:$0xff] }
 0x716   :  { %20112 = vmatprep.mubr.msk.f32.mxu1 %vm7094_vm1, %v16961_v12  ;;  %20805 = vmatprep.mubr.msk.f32.mxu0 %vm7094_vm1, %v17647_v0  ;;  %v17652_v12 = vld [vmem:[%s29124_s7 + $0xe88] sm:$0xff]  ;;  %v16967_v0 = vld [vmem:[%s29124_s7 + $0x3a0] sm:$0xff] }
 0x719   :  { %20113 = vmatmul.mubr.msk.f32.gmra.mrb[246].mxu1 %vm7094_vm1, %v16962_v56  ;;  %20806 = vmatmul.mubr.msk.f32.gmra.mrb[72].mxu0 %vm7094_vm1, %v17648_v39  ;;  %v17653_v56 = vld [vmem:[%s29124_s7 + $0xe90] sm:$0xff]  ;;  %v16968_v39 = vld [vmem:[%s29124_s7 + $0x3a8] sm:$0xff] }
 0x71a   :  { %20115 = vmatprep.mubr.msk.f32.mxu1 %vm7094_vm1, %v16963_v29  ;;  %20808 = vmatprep.mubr.msk.f32.mxu0 %vm7094_vm1, %v17649_v42  ;;  %v17654_v29 = vld [vmem:[%s29124_s7 + $0xe98] sm:$0xff]  ;;  %v16969_v42 = vld [vmem:[%s29124_s7 + $0x3b0] sm:$0xff] }
 0x71d   :  { %20116 = vmatmul.mubr.msk.f32.gmra.mrb[248].mxu1 %vm7094_vm1, %v16964_v17  ;;  %20809 = vmatmul.mubr.msk.f32.gmra.mrb[74].mxu0 %vm7094_vm1, %v17650_v30  ;;  %v17655_v17 = vld [vmem:[%s29124_s7 + $0xea0] sm:$0xff]  ;;  %v16970_v30 = vld [vmem:[%s29124_s7 + $0x3b8] sm:$0xff] }
 0x71e   :  { %20118 = vmatprep.mubr.msk.f32.mxu1 %vm7094_vm1, %v16965_v8  ;;  %20811 = vmatprep.mubr.msk.f32.mxu0 %vm7094_vm1, %v17651_v52  ;;  %v17656_v8 = vld [vmem:[%s29124_s7 + $0xea8] sm:$0xff]  ;;  %v16971_v52 = vld [vmem:[%s29124_s7 + $0x3c0] sm:$0xff] }
 0x721   :  { %20119 = vmatmul.mubr.msk.f32.gmra.mrb[250].mxu1 %vm7094_vm1, %v16966_v13  ;;  %20812 = vmatmul.mubr.msk.f32.gmra.mrb[76].mxu0 %vm7094_vm1, %v17652_v12  ;;  %v17657_v13 = vld [vmem:[%s29124_s7 + $0xeb0] sm:$0xff]  ;;  %v16972_v12 = vld [vmem:[%s29124_s7 + $0x3c8] sm:$0xff] }
 0x722   :  { %20121 = vmatprep.mubr.msk.f32.mxu1 %vm7094_vm1, %v16967_v0  ;;  %20814 = vmatprep.mubr.msk.f32.mxu0 %vm7094_vm1, %v17653_v56  ;;  %v17658_v0 = vld [vmem:[%s29124_s7 + $0xeb8] sm:$0xff]  ;;  %v16973_v56 = vld [vmem:[%s29124_s7 + $0x3d0] sm:$0xff] }
 0x725   :  { %20122 = vmatmul.mubr.msk.f32.gmra.mrb[252].mxu1 %vm7094_vm1, %v16968_v39  ;;  %20815 = vmatmul.mubr.msk.f32.gmra.mrb[78].mxu0 %vm7094_vm1, %v17654_v29  ;;  %v17659_v39 = vld [vmem:[%s29124_s7 + $0xec0] sm:$0xff]  ;;  %v16974_v29 = vld [vmem:[%s29124_s7 + $0x3d8] sm:$0xff] }
 0x726   :  { %20124 = vmatprep.mubr.msk.f32.mxu1 %vm7094_vm1, %v16969_v42  ;;  %20817 = vmatprep.mubr.msk.f32.mxu0 %vm7094_vm1, %v17655_v17  ;;  %v17660_v42 = vld [vmem:[%s29124_s7 + $0xec8] sm:$0xff]  ;;  %v16975_v17 = vld [vmem:[%s29124_s7 + $0x3e0] sm:$0xff] }
 0x729   :  { %20125 = vmatmul.mubr.msk.f32.gmra.mrb[254].mxu1 %vm7094_vm1, %v16970_v30  ;;  %20818 = vmatmul.mubr.msk.f32.gmra.mrb[80].mxu0 %vm7094_vm1, %v17656_v8  ;;  %v17661_v30 = vld [vmem:[%s29124_s7 + $0xed0] sm:$0xff]  ;;  %v16976_v8 = vld [vmem:[%s29124_s7 + $0x3e8] sm:$0xff] }
 0x72a   :  { %20127 = vmatprep.mubr.msk.f32.mxu1 %vm7094_vm1, %v16971_v52  ;;  %20820 = vmatprep.mubr.msk.f32.mxu0 %vm7094_vm1, %v17657_v13  ;;  %v17662_v52 = vld [vmem:[%s29124_s7 + $0xed8] sm:$0xff]  ;;  %v16977_v13 = vld [vmem:[%s29124_s7 + $0x3f0] sm:$0xff] }
 0x72d   :  { %20128 = vmatmul.mubr.msk.f32.gmra.mrb[0].mxu1 %vm7094_vm1, %v16972_v12  ;;  %20821 = vmatmul.mubr.msk.f32.gmra.mrb[82].mxu0 %vm7094_vm1, %v17658_v0  ;;  %v17663_v12 = vld [vmem:[%s29124_s7 + $0xee0] sm:$0xff]  ;;  %v16978_v0 = vld [vmem:[%s29124_s7 + $0x3f8] sm:$0xff] }
 0x72e   :  { %20130 = vmatprep.mubr.msk.f32.mxu1 %vm7094_vm1, %v16973_v56  ;;  %20823 = vmatprep.mubr.msk.f32.mxu0 %vm7094_vm1, %v17659_v39  ;;  %v17664_v56 = vld [vmem:[%s29124_s7 + $0xee8] sm:$0xff]  ;;  %v16979_v39 = vld [vmem:[%s29124_s7 + $0x400] sm:$0xff] }
 0x731   :  { %20131 = vmatmul.mubr.msk.f32.gmra.mrb[2].mxu1 %vm7094_vm1, %v16974_v29  ;;  %20824 = vmatmul.mubr.msk.f32.gmra.mrb[84].mxu0 %vm7094_vm1, %v17660_v42  ;;  %v17665_v29 = vld [vmem:[%s29124_s7 + $0xef0] sm:$0xff]  ;;  %v16980_v42 = vld [vmem:[%s29124_s7 + $0x408] sm:$0xff] }
 0x732   :  { %20133 = vmatprep.mubr.msk.f32.mxu1 %vm7094_vm1, %v16975_v17  ;;  %20826 = vmatprep.mubr.msk.f32.mxu0 %vm7094_vm1, %v17661_v30  ;;  %v17666_v17 = vld [vmem:[%s29124_s7 + $0xef8] sm:$0xff]  ;;  %v16981_v30 = vld [vmem:[%s29124_s7 + $0x410] sm:$0xff] }
 0x735   :  { %20134 = vmatmul.mubr.msk.f32.gmra.mrb[4].mxu1 %vm7094_vm1, %v16976_v8  ;;  %20827 = vmatmul.mubr.msk.f32.gmra.mrb[86].mxu0 %vm7094_vm1, %v17662_v52  ;;  %v17715_v8 = vld [vmem:[%s29124_s7 + $0xf00] sm:$0xff]  ;;  %v16982_v52 = vld [vmem:[%s29124_s7 + $0x418] sm:$0xff] }
 0x736   :  { %20136 = vmatprep.mubr.msk.f32.mxu1 %vm7094_vm1, %v16977_v13  ;;  %20829 = vmatprep.mubr.msk.f32.mxu0 %vm7094_vm1, %v17663_v12  ;;  %v17716_v13 = vld [vmem:[%s29124_s7 + $0xf08] sm:$0xff]  ;;  %v16983_v12 = vld [vmem:[%s29124_s7 + $0x420] sm:$0xff] }
 0x739   :  { %20137 = vmatmul.mubr.msk.f32.gmra.mrb[6].mxu1 %vm7094_vm1, %v16978_v0  ;;  %20830 = vmatmul.mubr.msk.f32.gmra.mrb[88].mxu0 %vm7094_vm1, %v17664_v56  ;;  %v17717_v0 = vld [vmem:[%s29124_s7 + $0xf10] sm:$0xff]  ;;  %v16984_v56 = vld [vmem:[%s29124_s7 + $0x428] sm:$0xff] }
 0x73a   :  { %20139 = vmatprep.mubr.msk.f32.mxu1 %vm7094_vm1, %v16979_v39  ;;  %20832 = vmatprep.mubr.msk.f32.mxu0 %vm7094_vm1, %v17665_v29  ;;  %v17718_v39 = vld [vmem:[%s29124_s7 + $0xf18] sm:$0xff]  ;;  %v16985_v29 = vld [vmem:[%s29124_s7 + $0x430] sm:$0xff] }
 0x73d   :  { %20140 = vmatmul.mubr.msk.f32.gmra.mrb[8].mxu1 %vm7094_vm1, %v16980_v42  ;;  %20833 = vmatmul.mubr.msk.f32.gmra.mrb[90].mxu0 %vm7094_vm1, %v17666_v17  ;;  %v16986_v42 = vld [vmem:[%s29124_s7 + $0x438] sm:$0xff]  ;;  %v17720_v17 = vld [vmem:[%s29124_s7 + $0xf28] sm:$0xff] }
 0x73e   :  { %20142 = vmatprep.mubr.msk.f32.mxu1 %vm7094_vm1, %v16981_v30  ;;  %20859 = vmatprep.mubr.msk.f32.mxu0 %vm7094_vm1, %v17715_v8  ;;  %v16987_v30 = vld [vmem:[%s29124_s7 + $0x440] sm:$0xff]  ;;  %v16988_v8 = vld [vmem:[%s29124_s7 + $0x448] sm:$0xff] }
 0x741   :  { %20143 = vmatmul.mubr.msk.f32.gmra.mrb[10].mxu1 %vm7094_vm1, %v16982_v52  ;;  %20860 = vmatmul.mubr.msk.f32.vlgmr.msra.gmra.mrb[44].mxu0 %vm7094_vm1, %v17716_v13  ;;  %v17722_v52 = vld [vmem:[%s29124_s7 + $0xf38] sm:$0xff]  ;;  %v16989_v13 = vld [vmem:[%s29124_s7 + $0x450] sm:$0xff] }
 0x742   :  { %21742 = vmatpush3.bf16.msra.mxu0 %v25268_v21  ;;  %20145 = vmatprep.mubr.msk.f32.mxu1 %vm7094_vm1, %v16983_v12  ;;  %v17719_v21 = vld [vmem:[%s29124_s7 + $0xf20] sm:$0xff]  ;;  %v16990_v12 = vld [vmem:[%s29124_s7 + $0x458] sm:$0xff] }
 0x743   :  { %21744 = vmatprep.subr.bf16.mxu0 %v25308_v47  ;;  %20862 = vmatprep.mubr.msk.f32.mxu0 %vm7094_vm1, %v17717_v0  ;;  %v17724_v0 = vld [vmem:[%s29124_s7 + $0xf48] sm:$0xff] }
 0x745   :  { %20146 = vmatmul.mubr.msk.f32.gmra.mrb[12].mxu1 %vm7094_vm1, %v16984_v56  ;;  %20863 = vmatmul.mubr.msk.f32.gmra.mrb[46].mxu0 %vm7094_vm1, %v17718_v39  ;;  %v16991_v56 = vld [vmem:[%s29124_s7 + $0x460] sm:$0xff]  ;;  %v16992_v39 = vld [vmem:[%s29124_s7 + $0x468] sm:$0xff] }
 0x746   :  { %21746 = vmatpush3.bf16.msra.mxu0 %v25308_v47  ;;  %20148 = vmatprep.mubr.msk.f32.mxu1 %vm7094_vm1, %v16985_v29  ;;  %v17721_v47 = vld [vmem:[%s29124_s7 + $0xf30] sm:$0xff]  ;;  %v17726_v29 = vld [vmem:[%s29124_s7 + $0xf58] sm:$0xff] }
 0x747   :  { %21748 = vmatprep.subr.bf16.mxu0 %v25348_v54  ;;  %20865 = vmatprep.mubr.msk.f32.mxu0 %vm7094_vm1, %v17719_v21  ;;  %v16993_v21 = vld [vmem:[%s29124_s7 + $0x470] sm:$0xff] }
 0x749   :  { %20149 = vmatmul.mubr.msk.f32.gmra.mrb[14].mxu1 %vm7094_vm1, %v16986_v42  ;;  %20866 = vmatmul.mubr.msk.f32.gmra.mrb[48].mxu0 %vm7094_vm1, %v17720_v17  ;;  %v16994_v42 = vld [vmem:[%s29124_s7 + $0x478] sm:$0xff]  ;;  %v17728_v17 = vld [vmem:[%s29124_s7 + $0xf68] sm:$0xff] }
 0x74a   :  { %21750 = vmatpush3.bf16.msra.mxu0 %v25348_v54  ;;  %20151 = vmatprep.mubr.msk.f32.mxu1 %vm7094_vm1, %v16987_v30  ;;  %v17723_v54 = vld [vmem:[%s29124_s7 + $0xf40] sm:$0xff] }
 0x74b   :  { %21752 = vmatprep.subr.bf16.mxu0 %v25386_v45  ;;  %20868 = vmatprep.mubr.msk.f32.mxu0 %vm7094_vm1, %v17721_v47  ;;  %v17043_v30 = vld [vmem:[%s29124_s7 + $0x480] sm:$0xff]  ;;  %v17044_v47 = vld [vmem:[%s29124_s7 + $0x488] sm:$0xff] }
 0x74d   :  { %20152 = vmatmul.mubr.msk.f32.gmra.mrb[16].mxu1 %vm7094_vm1, %v16988_v8  ;;  %20869 = vmatmul.mubr.msk.f32.gmra.mrb[50].mxu0 %vm7094_vm1, %v17722_v52  ;;  %v17730_v8 = vld [vmem:[%s29124_s7 + $0xf78] sm:$0xff]  ;;  %v17045_v52 = vld [vmem:[%s29124_s7 + $0x490] sm:$0xff] }
 0x74e   :  { %21754 = vmatpush3.bf16.msra.mxu0 %v25386_v45  ;;  %20154 = vmatprep.mubr.msk.f32.mxu1 %vm7094_vm1, %v16989_v13  ;;  %v17725_v45 = vld [vmem:[%s29124_s7 + $0xf50] sm:$0xff]  ;;  %v17731_v13 = vld [vmem:[%s29124_s7 + $0xf80] sm:$0xff] }
 0x74f   :  { %21756 = vmatprep.subr.bf16.mxu0 %v25426_v48  ;;  %20871 = vmatprep.mubr.msk.f32.mxu0 %vm7094_vm1, %v17723_v54  ;;  %v17046_v54 = vld [vmem:[%s29124_s7 + $0x498] sm:$0xff] }
 0x751   :  { %20155 = vmatmul.mubr.msk.f32.gmra.mrb[18].mxu1 %vm7094_vm1, %v16990_v12  ;;  %20872 = vmatmul.mubr.msk.f32.gmra.mrb[52].mxu0 %vm7094_vm1, %v17724_v0  ;;  %v17732_v12 = vld [vmem:[%s29124_s7 + $0xf88] sm:$0xff]  ;;  %v17047_v0 = vld [vmem:[%s29124_s7 + $0x4a0] sm:$0xff] }
 0x752   :  { %21758 = vmatpush3.bf16.msra.mxu0 %v25426_v48  ;;  %20157 = vmatprep.mubr.msk.f32.mxu1 %vm7094_vm1, %v16991_v56  ;;  %v17727_v48 = vld [vmem:[%s29124_s7 + $0xf60] sm:$0xff]  ;;  %v17048_v56 = vld [vmem:[%s29124_s7 + $0x4a8] sm:$0xff] }
 0x753   :  { %21760 = vmatprep.subr.bf16.mxu0 %v25466_v23  ;;  %20874 = vmatprep.mubr.msk.f32.mxu0 %vm7094_vm1, %v17725_v45  ;;  %v17734_v45 = vld [vmem:[%s29124_s7 + $0xf98] sm:$0xff] }
 0x755   :  { %20158 = vmatmul.mubr.msk.f32.gmra.mrb[20].mxu1 %vm7094_vm1, %v16992_v39  ;;  %20875 = vmatmul.mubr.msk.f32.gmra.mrb[54].mxu0 %vm7094_vm1, %v17726_v29  ;;  %v17049_v39 = vld [vmem:[%s29124_s7 + $0x4b0] sm:$0xff]  ;;  %v17050_v29 = vld [vmem:[%s29124_s7 + $0x4b8] sm:$0xff] }
 0x756   :  { %21762 = vmatpush3.bf16.msra.mxu0 %v25466_v23  ;;  %20160 = vmatprep.mubr.msk.f32.mxu1 %vm7094_vm1, %v16993_v21  ;;  %v17729_v23 = vld [vmem:[%s29124_s7 + $0xf70] sm:$0xff]  ;;  %v17736_v21 = vld [vmem:[%s29124_s7 + $0xfa8] sm:$0xff] }
 0x757   :  { %21764 = vmatprep.subr.bf16.mxu0 %v25499_v59  ;;  %20877 = vmatprep.mubr.msk.f32.mxu0 %vm7094_vm1, %v17727_v48  ;;  %v17051_v48 = vld [vmem:[%s29124_s7 + $0x4c0] sm:$0xff] }
 0x759   :  { %20161 = vmatmul.mubr.msk.f32.gmra.mrb[22].mxu1 %vm7094_vm1, %v16994_v42  ;;  %20878 = vmatmul.mubr.msk.f32.gmra.mrb[56].mxu0 %vm7094_vm1, %v17728_v17  ;;  %v17052_v42 = vld [vmem:[%s29124_s7 + $0x4c8] sm:$0xff]  ;;  %v17738_v17 = vld [vmem:[%s29124_s7 + $0xfb8] sm:$0xff] }
 0x75a   :  { %20187 = vmatprep.mubr.msk.f32.mxu1 %vm7094_vm1, %v17043_v30  ;;  %20880 = vmatprep.mubr.msk.f32.mxu0 %vm7094_vm1, %v17729_v23  ;;  %v17053_v30 = vld [vmem:[%s29124_s7 + $0x4d0] sm:$0xff]  ;;  %v17054_v23 = vld [vmem:[%s29124_s7 + $0x4d8] sm:$0xff] }
 0x75d   :  { %20188 = vmatmul.mubr.msk.f32.vlgmr.msra.gmra.mrb[232].mxu1 %vm7094_vm1, %v17044_v47  ;;  %20881 = vmatmul.mubr.msk.f32.gmra.mrb[58].mxu0 %vm7094_vm1, %v17730_v8  ;;  %v17740_v47 = vld [vmem:[%s29124_s7 + $0xfc8] sm:$0xff]  ;;  %v17055_v8 = vld [vmem:[%s29124_s7 + $0x4e0] sm:$0xff] }
 0x75e   :  { %21574 = vmatpush3.bf16.msra.mxu1 %v24936_v31  ;;  %20190 = vmatprep.mubr.msk.f32.mxu1 %vm7094_vm1, %v17045_v52  ;;  %v17733_v31 = vld [vmem:[%s29124_s7 + $0xf90] sm:$0xff]  ;;  %v17056_v52 = vld [vmem:[%s29124_s7 + $0x4e8] sm:$0xff] }
 0x75f   :  { %21576 = vmatprep.subr.bf16.mxu1 %v24942_v2  ;;  %20883 = vmatprep.mubr.msk.f32.mxu0 %vm7094_vm1, %v17731_v13  ;;  %v17742_v13 = vld [vmem:[%s29124_s7 + $0xfd8] sm:$0xff] }
 0x761   :  { %20191 = vmatmul.mubr.msk.f32.gmra.mrb[234].mxu1 %vm7094_vm1, %v17046_v54  ;;  %20884 = vmatmul.mubr.msk.f32.gmra.mrb[60].mxu0 %vm7094_vm1, %v17732_v12  ;;  %v17057_v54 = vld [vmem:[%s29124_s7 + $0x4f0] sm:$0xff]  ;;  %v17058_v12 = vld [vmem:[%s29124_s7 + $0x4f8] sm:$0xff] }
 0x762   :  { %21578 = vmatpush3.bf16.msra.mxu1 %v24942_v2  ;;  %20193 = vmatprep.mubr.msk.f32.mxu1 %vm7094_vm1, %v17047_v0  ;;  %v17735_v2 = vld [vmem:[%s29124_s7 + $0xfa0] sm:$0xff]  ;;  %v17744_v0 = vld [vmem:[%s29124_s7 + $0xfe8] sm:$0xff] }
 0x763   :  { %21580 = vmatprep.subr.bf16.mxu1 %v24949_v1  ;;  %20886 = vmatprep.mubr.msk.f32.mxu0 %vm7094_vm1, %v17733_v31  ;;  %v17059_v31 = vld [vmem:[%s29124_s7 + $0x500] sm:$0xff] }
 0x765   :  { %20194 = vmatmul.mubr.msk.f32.gmra.mrb[236].mxu1 %vm7094_vm1, %v17048_v56  ;;  %20887 = vmatmul.mubr.msk.f32.gmra.mrb[62].mxu0 %vm7094_vm1, %v17734_v45  ;;  %v17745_v56 = vld [vmem:[%s29124_s7 + $0xff0] sm:$0xff]  ;;  %v17060_v45 = vld [vmem:[%s29124_s7 + $0x508] sm:$0xff] }
 0x766   :  { %21582 = vmatpush3.bf16.msra.mxu1 %v24949_v1  ;;  %20196 = vmatprep.mubr.msk.f32.mxu1 %vm7094_vm1, %v17049_v39  ;;  %v17737_v1 = vld [vmem:[%s29124_s7 + $0xfb0] sm:$0xff]  ;;  %v17746_v39 = vld [vmem:[%s29124_s7 + $0xff8] sm:$0xff] }
 0x767   :  { %21584 = vmatprep.subr.bf16.mxu1 %v24955_v14  ;;  %20889 = vmatprep.mubr.msk.f32.mxu0 %vm7094_vm1, %v17735_v2  ;;  %v17061_v2 = vld [vmem:[%s29124_s7 + $0x510] sm:$0xff] }
 0x769   :  { %20197 = vmatmul.mubr.msk.f32.gmra.mrb[238].mxu1 %vm7094_vm1, %v17050_v29  ;;  %20890 = vmatmul.mubr.msk.f32.gmra.mrb[64].mxu0 %vm7094_vm1, %v17736_v21  ;;  %v17747_v29 = vld [vmem:[%s29124_s7 + $0x1000] sm:$0xff]  ;;  %v17062_v21 = vld [vmem:[%s29124_s7 + $0x518] sm:$0xff] }
 0x76a   :  { %21586 = vmatpush3.bf16.msra.mxu1 %v24955_v14  ;;  %20199 = vmatprep.mubr.msk.f32.mxu1 %vm7094_vm1, %v17051_v48  ;;  %v17739_v14 = vld [vmem:[%s29124_s7 + $0xfc0] sm:$0xff]  ;;  %v17748_v48 = vld [vmem:[%s29124_s7 + $0x1008] sm:$0xff] }
 0x76b   :  { %21588 = vmatprep.subr.bf16.mxu1 %v24964_v24  ;;  %20892 = vmatprep.mubr.msk.f32.mxu0 %vm7094_vm1, %v17737_v1  ;;  %v17063_v1 = vld [vmem:[%s29124_s7 + $0x520] sm:$0xff] }
 0x76d   :  { %20200 = vmatmul.mubr.msk.f32.gmra.mrb[240].mxu1 %vm7094_vm1, %v17052_v42  ;;  %20893 = vmatmul.mubr.msk.f32.gmra.mrb[66].mxu0 %vm7094_vm1, %v17738_v17  ;;  %v17749_v42 = vld [vmem:[%s29124_s7 + $0x1010] sm:$0xff]  ;;  %v17064_v17 = vld [vmem:[%s29124_s7 + $0x528] sm:$0xff] }
 0x76e   :  { %21590 = vmatpush3.bf16.msra.mxu1 %v24964_v24  ;;  %20202 = vmatprep.mubr.msk.f32.mxu1 %vm7094_vm1, %v17053_v30  ;;  %v17741_v24 = vld [vmem:[%s29124_s7 + $0xfd0] sm:$0xff]  ;;  %v17750_v30 = vld [vmem:[%s29124_s7 + $0x1018] sm:$0xff] }
 0x76f   :  { %21592 = vmatprep.subr.bf16.mxu1 %v24974_v36  ;;  %20895 = vmatprep.mubr.msk.f32.mxu0 %vm7094_vm1, %v17739_v14  ;;  %v17065_v14 = vld [vmem:[%s29124_s7 + $0x530] sm:$0xff] }
 0x771   :  { %20203 = vmatmul.mubr.msk.f32.gmra.mrb[242].mxu1 %vm7094_vm1, %v17054_v23  ;;  %20896 = vmatmul.mubr.msk.f32.gmra.mrb[68].mxu0 %vm7094_vm1, %v17740_v47  ;;  %v17751_v23 = vld [vmem:[%s29124_s7 + $0x1020] sm:$0xff]  ;;  %v17066_v47 = vld [vmem:[%s29124_s7 + $0x538] sm:$0xff] }
 0x772   :  { %21594 = vmatpush3.bf16.msra.mxu1 %v24974_v36  ;;  %20205 = vmatprep.mubr.msk.f32.mxu1 %vm7094_vm1, %v17055_v8  ;;  %v17743_v36 = vld [vmem:[%s29124_s7 + $0xfe0] sm:$0xff]  ;;  %v17752_v8 = vld [vmem:[%s29124_s7 + $0x1028] sm:$0xff] }
 0x773   :  { %21596 = vmatprep.subr.bf16.mxu1 %v24938_v43  ;;  %20898 = vmatprep.mubr.msk.f32.mxu0 %vm7094_vm1, %v17741_v24  ;;  %v17067_v24 = vld [vmem:[%s29124_s7 + $0x540] sm:$0xff] }
 0x775   :  { %20206 = vmatmul.mubr.msk.f32.gmra.mrb[244].mxu1 %vm7094_vm1, %v17056_v52  ;;  %20899 = vmatmul.mubr.msk.f32.gmra.mrb[70].mxu0 %vm7094_vm1, %v17742_v13  ;;  %v17753_v52 = vld [vmem:[%s29124_s7 + $0x1030] sm:$0xff]  ;;  %v17068_v13 = vld [vmem:[%s29124_s7 + $0x548] sm:$0xff] }
 0x776   :  { %20208 = vmatprep.mubr.msk.f32.mxu1 %vm7094_vm1, %v17057_v54  ;;  %20901 = vmatprep.mubr.msk.f32.mxu0 %vm7094_vm1, %v17743_v36  ;;  %v17754_v54 = vld [vmem:[%s29124_s7 + $0x1038] sm:$0xff]  ;;  %v17069_v36 = vld [vmem:[%s29124_s7 + $0x550] sm:$0xff] }
 0x779   :  { %20209 = vmatmul.mubr.msk.f32.gmra.mrb[246].mxu1 %vm7094_vm1, %v17058_v12  ;;  %20902 = vmatmul.mubr.msk.f32.gmra.mrb[72].mxu0 %vm7094_vm1, %v17744_v0  ;;  %v17755_v12 = vld [vmem:[%s29124_s7 + $0x1040] sm:$0xff]  ;;  %v17070_v0 = vld [vmem:[%s29124_s7 + $0x558] sm:$0xff] }
 0x77a   :  { %20211 = vmatprep.mubr.msk.f32.mxu1 %vm7094_vm1, %v17059_v31  ;;  %20904 = vmatprep.mubr.msk.f32.mxu0 %vm7094_vm1, %v17745_v56  ;;  %v17756_v31 = vld [vmem:[%s29124_s7 + $0x1048] sm:$0xff]  ;;  %v17071_v56 = vld [vmem:[%s29124_s7 + $0x560] sm:$0xff] }
 0x77d   :  { %20212 = vmatmul.mubr.msk.f32.gmra.mrb[248].mxu1 %vm7094_vm1, %v17060_v45  ;;  %20905 = vmatmul.mubr.msk.f32.gmra.mrb[74].mxu0 %vm7094_vm1, %v17746_v39  ;;  %v17757_v45 = vld [vmem:[%s29124_s7 + $0x1050] sm:$0xff]  ;;  %v17072_v39 = vld [vmem:[%s29124_s7 + $0x568] sm:$0xff] }
 0x77e   :  { %20214 = vmatprep.mubr.msk.f32.mxu1 %vm7094_vm1, %v17061_v2  ;;  %20907 = vmatprep.mubr.msk.f32.mxu0 %vm7094_vm1, %v17747_v29  ;;  %v17758_v2 = vld [vmem:[%s29124_s7 + $0x1058] sm:$0xff]  ;;  %v17073_v29 = vld [vmem:[%s29124_s7 + $0x570] sm:$0xff] }
 0x781   :  { %20215 = vmatmul.mubr.msk.f32.gmra.mrb[250].mxu1 %vm7094_vm1, %v17062_v21  ;;  %20908 = vmatmul.mubr.msk.f32.gmra.mrb[76].mxu0 %vm7094_vm1, %v17748_v48  ;;  %v17759_v21 = vld [vmem:[%s29124_s7 + $0x1060] sm:$0xff]  ;;  %v17074_v48 = vld [vmem:[%s29124_s7 + $0x578] sm:$0xff] }
 0x782   :  { %20217 = vmatprep.mubr.msk.f32.mxu1 %vm7094_vm1, %v17063_v1  ;;  %20910 = vmatprep.mubr.msk.f32.mxu0 %vm7094_vm1, %v17749_v42  ;;  %v17760_v1 = vld [vmem:[%s29124_s7 + $0x1068] sm:$0xff]  ;;  %v17075_v42 = vld [vmem:[%s29124_s7 + $0x580] sm:$0xff] }
 0x785   :  { %20218 = vmatmul.mubr.msk.f32.gmra.mrb[252].mxu1 %vm7094_vm1, %v17064_v17  ;;  %20911 = vmatmul.mubr.msk.f32.gmra.mrb[78].mxu0 %vm7094_vm1, %v17750_v30  ;;  %v17761_v17 = vld [vmem:[%s29124_s7 + $0x1070] sm:$0xff]  ;;  %v17076_v30 = vld [vmem:[%s29124_s7 + $0x588] sm:$0xff] }
 0x786   :  { %20220 = vmatprep.mubr.msk.f32.mxu1 %vm7094_vm1, %v17065_v14  ;;  %20913 = vmatprep.mubr.msk.f32.mxu0 %vm7094_vm1, %v17751_v23  ;;  %v17762_v14 = vld [vmem:[%s29124_s7 + $0x1078] sm:$0xff]  ;;  %v17077_v23 = vld [vmem:[%s29124_s7 + $0x590] sm:$0xff] }
 0x789   :  { %20221 = vmatmul.mubr.msk.f32.gmra.mrb[254].mxu1 %vm7094_vm1, %v17066_v47  ;;  %20914 = vmatmul.mubr.msk.f32.gmra.mrb[80].mxu0 %vm7094_vm1, %v17752_v8  ;;  %v17811_v47 = vld [vmem:[%s29124_s7 + $0x1080] sm:$0xff]  ;;  %v17078_v8 = vld [vmem:[%s29124_s7 + $0x598] sm:$0xff] }
 0x78a   :  { %20223 = vmatprep.mubr.msk.f32.mxu1 %vm7094_vm1, %v17067_v24  ;;  %20916 = vmatprep.mubr.msk.f32.mxu0 %vm7094_vm1, %v17753_v52  ;;  %v17812_v24 = vld [vmem:[%s29124_s7 + $0x1088] sm:$0xff]  ;;  %v17079_v52 = vld [vmem:[%s29124_s7 + $0x5a0] sm:$0xff] }
 0x78d   :  { %20224 = vmatmul.mubr.msk.f32.gmra.mrb[0].mxu1 %vm7094_vm1, %v17068_v13  ;;  %20917 = vmatmul.mubr.msk.f32.gmra.mrb[82].mxu0 %vm7094_vm1, %v17754_v54  ;;  %v17813_v13 = vld [vmem:[%s29124_s7 + $0x1090] sm:$0xff]  ;;  %v17080_v54 = vld [vmem:[%s29124_s7 + $0x5a8] sm:$0xff] }
 0x78e   :  { %20226 = vmatprep.mubr.msk.f32.mxu1 %vm7094_vm1, %v17069_v36  ;;  %20919 = vmatprep.mubr.msk.f32.mxu0 %vm7094_vm1, %v17755_v12  ;;  %v17814_v36 = vld [vmem:[%s29124_s7 + $0x1098] sm:$0xff]  ;;  %v17081_v12 = vld [vmem:[%s29124_s7 + $0x5b0] sm:$0xff] }
 0x791   :  { %20227 = vmatmul.mubr.msk.f32.gmra.mrb[2].mxu1 %vm7094_vm1, %v17070_v0  ;;  %20920 = vmatmul.mubr.msk.f32.gmra.mrb[84].mxu0 %vm7094_vm1, %v17756_v31  ;;  %v17082_v0 = vld [vmem:[%s29124_s7 + $0x5b8] sm:$0xff]  ;;  %v17816_v31 = vld [vmem:[%s29124_s7 + $0x10a8] sm:$0xff] }
 0x792   :  { %20229 = vmatprep.mubr.msk.f32.mxu1 %vm7094_vm1, %v17071_v56  ;;  %20922 = vmatprep.mubr.msk.f32.mxu0 %vm7094_vm1, %v17757_v45  ;;  %v17083_v56 = vld [vmem:[%s29124_s7 + $0x5c0] sm:$0xff]  ;;  %v17084_v45 = vld [vmem:[%s29124_s7 + $0x5c8] sm:$0xff] }
 0x795   :  { %20230 = vmatmul.mubr.msk.f32.gmra.mrb[4].mxu1 %vm7094_vm1, %v17072_v39  ;;  %20923 = vmatmul.mubr.msk.f32.gmra.mrb[86].mxu0 %vm7094_vm1, %v17758_v2  ;;  %v17818_v39 = vld [vmem:[%s29124_s7 + $0x10b8] sm:$0xff]  ;;  %v17085_v2 = vld [vmem:[%s29124_s7 + $0x5d0] sm:$0xff] }
 0x796   :  { %20232 = vmatprep.mubr.msk.f32.mxu1 %vm7094_vm1, %v17073_v29  ;;  %20925 = vmatprep.mubr.msk.f32.mxu0 %vm7094_vm1, %v17759_v21  ;;  %v17086_v29 = vld [vmem:[%s29124_s7 + $0x5d8] sm:$0xff]  ;;  %v17820_v21 = vld [vmem:[%s29124_s7 + $0x10c8] sm:$0xff] }
 0x799   :  { %20233 = vmatmul.mubr.msk.f32.gmra.mrb[6].mxu1 %vm7094_vm1, %v17074_v48  ;;  %20926 = vmatmul.mubr.msk.f32.gmra.mrb[88].mxu0 %vm7094_vm1, %v17760_v1  ;;  %v17087_v48 = vld [vmem:[%s29124_s7 + $0x5e0] sm:$0xff]  ;;  %v17088_v1 = vld [vmem:[%s29124_s7 + $0x5e8] sm:$0xff] }
 0x79a   :  { %20235 = vmatprep.mubr.msk.f32.mxu1 %vm7094_vm1, %v17075_v42  ;;  %20928 = vmatprep.mubr.msk.f32.mxu0 %vm7094_vm1, %v17761_v17  ;;  %v17822_v42 = vld [vmem:[%s29124_s7 + $0x10d8] sm:$0xff]  ;;  %v17089_v17 = vld [vmem:[%s29124_s7 + $0x5f0] sm:$0xff] }
 0x79d   :  { %20236 = vmatmul.mubr.msk.f32.gmra.mrb[8].mxu1 %vm7094_vm1, %v17076_v30  ;;  %20929 = vmatmul.mubr.msk.f32.gmra.mrb[90].mxu0 %vm7094_vm1, %v17762_v14  ;;  %v17090_v30 = vld [vmem:[%s29124_s7 + $0x5f8] sm:$0xff]  ;;  %v17824_v14 = vld [vmem:[%s29124_s7 + $0x10e8] sm:$0xff] }
 0x79e   :  { %20238 = vmatprep.mubr.msk.f32.mxu1 %vm7094_vm1, %v17077_v23  ;;  %20955 = vmatprep.mubr.msk.f32.mxu0 %vm7094_vm1, %v17811_v47  ;;  %v17139_v23 = vld [vmem:[%s29124_s7 + $0x600] sm:$0xff]  ;;  %v17140_v47 = vld [vmem:[%s29124_s7 + $0x608] sm:$0xff] }
 0x7a1   :  { %20239 = vmatmul.mubr.msk.f32.gmra.mrb[10].mxu1 %vm7094_vm1, %v17078_v8  ;;  %20956 = vmatmul.mubr.msk.f32.vlgmr.msra.gmra.mrb[44].mxu0 %vm7094_vm1, %v17812_v24  ;;  %v17826_v8 = vld [vmem:[%s29124_s7 + $0x10f8] sm:$0xff]  ;;  %v17141_v24 = vld [vmem:[%s29124_s7 + $0x610] sm:$0xff] }
 0x7a2   :  { %21766 = vmatpush3.bf16.msra.mxu0 %v25499_v59  ;;  %20241 = vmatprep.mubr.msk.f32.mxu1 %vm7094_vm1, %v17079_v52  ;;  %v17815_v59 = vld [vmem:[%s29124_s7 + $0x10a0] sm:$0xff] }
 0x7a3   :  { %21768 = vmatprep.subr.bf16.mxu0 %v25537_v37  ;;  %20958 = vmatprep.mubr.msk.f32.mxu0 %vm7094_vm1, %v17813_v13  ;;  %v17827_v52 = vld [vmem:[%s29124_s7 + $0x1100] sm:$0xff]  ;;  %v17142_v13 = vld [vmem:[%s29124_s7 + $0x618] sm:$0xff] }
 0x7a5   :  { %20242 = vmatmul.mubr.msk.f32.gmra.mrb[12].mxu1 %vm7094_vm1, %v17080_v54  ;;  %20959 = vmatmul.mubr.msk.f32.gmra.mrb[46].mxu0 %vm7094_vm1, %v17814_v36  ;;  %v17828_v54 = vld [vmem:[%s29124_s7 + $0x1108] sm:$0xff]  ;;  %v17143_v36 = vld [vmem:[%s29124_s7 + $0x620] sm:$0xff] }
 0x7a6   :  { %21770 = vmatpush3.bf16.msra.mxu0 %v25537_v37  ;;  %20244 = vmatprep.mubr.msk.f32.mxu1 %vm7094_vm1, %v17081_v12  ;;  %v17817_v37 = vld [vmem:[%s29124_s7 + $0x10b0] sm:$0xff]  ;;  %v17144_v12 = vld [vmem:[%s29124_s7 + $0x628] sm:$0xff] }
 0x7a7   :  { %21772 = vmatprep.subr.bf16.mxu0 %v25573_v25  ;;  %20961 = vmatprep.mubr.msk.f32.mxu0 %vm7094_vm1, %v17815_v59  ;;  %v17830_v59 = vld [vmem:[%s29124_s7 + $0x1118] sm:$0xff] }
 0x7a9   :  { %20245 = vmatmul.mubr.msk.f32.gmra.mrb[14].mxu1 %vm7094_vm1, %v17082_v0  ;;  %20962 = vmatmul.mubr.msk.f32.gmra.mrb[48].mxu0 %vm7094_vm1, %v17816_v31  ;;  %v17145_v0 = vld [vmem:[%s29124_s7 + $0x630] sm:$0xff]  ;;  %v17146_v31 = vld [vmem:[%s29124_s7 + $0x638] sm:$0xff] }
 0x7aa   :  { %21774 = vmatpush3.bf16.msra.mxu0 %v25573_v25  ;;  %20247 = vmatprep.mubr.msk.f32.mxu1 %vm7094_vm1, %v17083_v56  ;;  %v17819_v25 = vld [vmem:[%s29124_s7 + $0x10c0] sm:$0xff]  ;;  %v17832_v56 = vld [vmem:[%s29124_s7 + $0x1128] sm:$0xff] }
 0x7ab   :  { %21776 = vmatprep.subr.bf16.mxu0 %v25609_v18  ;;  %20964 = vmatprep.mubr.msk.f32.mxu0 %vm7094_vm1, %v17817_v37  ;;  %v17147_v37 = vld [vmem:[%s29124_s7 + $0x640] sm:$0xff] }
 0x7ad   :  { %20248 = vmatmul.mubr.msk.f32.gmra.mrb[16].mxu1 %vm7094_vm1, %v17084_v45  ;;  %20965 = vmatmul.mubr.msk.f32.gmra.mrb[50].mxu0 %vm7094_vm1, %v17818_v39  ;;  %v17148_v45 = vld [vmem:[%s29124_s7 + $0x648] sm:$0xff]  ;;  %v17834_v39 = vld [vmem:[%s29124_s7 + $0x1138] sm:$0xff] }
 0x7ae   :  { %21778 = vmatpush3.bf16.msra.mxu0 %v25609_v18  ;;  %20250 = vmatprep.mubr.msk.f32.mxu1 %vm7094_vm1, %v17085_v2  ;;  %v17821_v18 = vld [vmem:[%s29124_s7 + $0x10d0] sm:$0xff] }
 0x7af   :  { %21780 = vmatprep.subr.bf16.mxu0 %v25645_v4  ;;  %20967 = vmatprep.mubr.msk.f32.mxu0 %vm7094_vm1, %v17819_v25  ;;  %v17149_v2 = vld [vmem:[%s29124_s7 + $0x650] sm:$0xff]  ;;  %v17150_v25 = vld [vmem:[%s29124_s7 + $0x658] sm:$0xff] }
 0x7b1   :  { %20251 = vmatmul.mubr.msk.f32.gmra.mrb[18].mxu1 %vm7094_vm1, %v17086_v29  ;;  %20968 = vmatmul.mubr.msk.f32.gmra.mrb[52].mxu0 %vm7094_vm1, %v17820_v21  ;;  %v17836_v29 = vld [vmem:[%s29124_s7 + $0x1148] sm:$0xff]  ;;  %v17151_v21 = vld [vmem:[%s29124_s7 + $0x660] sm:$0xff] }
 0x7b2   :  { %21782 = vmatpush3.bf16.msra.mxu0 %v25645_v4  ;;  %20253 = vmatprep.mubr.msk.f32.mxu1 %vm7094_vm1, %v17087_v48  ;;  %v17823_v4 = vld [vmem:[%s29124_s7 + $0x10e0] sm:$0xff]  ;;  %v17152_v48 = vld [vmem:[%s29124_s7 + $0x668] sm:$0xff] }
 0x7b3   :  { %21784 = vmatprep.subr.bf16.mxu0 %v25681_v63  ;;  %20970 = vmatprep.mubr.msk.f32.mxu0 %vm7094_vm1, %v17821_v18  ;;  %v17838_v18 = vld [vmem:[%s29124_s7 + $0x1158] sm:$0xff] }
 0x7b5   :  { %20254 = vmatmul.mubr.msk.f32.gmra.mrb[20].mxu1 %vm7094_vm1, %v17088_v1  ;;  %20971 = vmatmul.mubr.msk.f32.gmra.mrb[54].mxu0 %vm7094_vm1, %v17822_v42  ;;  %v17153_v1 = vld [vmem:[%s29124_s7 + $0x670] sm:$0xff]  ;;  %v17154_v42 = vld [vmem:[%s29124_s7 + $0x678] sm:$0xff] }
 0x7b6   :  { %21786 = vmatpush3.bf16.msra.mxu0 %v25681_v63  ;;  %20256 = vmatprep.mubr.msk.f32.mxu1 %vm7094_vm1, %v17089_v17  ;;  %v17825_v63 = vld [vmem:[%s29124_s7 + $0x10f0] sm:$0xff]  ;;  %v17840_v17 = vld [vmem:[%s29124_s7 + $0x1168] sm:$0xff] }
 0x7b7   :  { %21788 = vmatprep.subr.bf16.mxu0 %v25509_v15  ;;  %20973 = vmatprep.mubr.msk.f32.mxu0 %vm7094_vm1, %v17823_v4  ;;  %v17155_v4 = vld [vmem:[%s29124_s7 + $0x680] sm:$0xff] }
 0x7b9   :  { %20257 = vmatmul.mubr.msk.f32.gmra.mrb[22].mxu1 %vm7094_vm1, %v17090_v30  ;;  %20974 = vmatmul.mubr.msk.f32.gmra.mrb[56].mxu0 %vm7094_vm1, %v17824_v14  ;;  %v17841_v30 = vld [vmem:[%s29124_s7 + $0x1170] sm:$0xff]  ;;  %v17156_v14 = vld [vmem:[%s29124_s7 + $0x688] sm:$0xff] }
 0x7ba   :  { %20283 = vmatprep.mubr.msk.f32.mxu1 %vm7094_vm1, %v17139_v23  ;;  %20976 = vmatprep.mubr.msk.f32.mxu0 %vm7094_vm1, %v17825_v63  ;;  %v17842_v23 = vld [vmem:[%s29124_s7 + $0x1178] sm:$0xff]  ;;  %v17157_v63 = vld [vmem:[%s29124_s7 + $0x690] sm:$0xff] }
 0x7bd   :  { %20284 = vmatmul.mubr.msk.f32.vlgmr.msra.gmra.mrb[232].mxu1 %vm7094_vm1, %v17140_v47  ;;  %20977 = vmatmul.mubr.msk.f32.gmra.mrb[58].mxu0 %vm7094_vm1, %v17826_v8  ;;  %v17843_v47 = vld [vmem:[%s29124_s7 + $0x1180] sm:$0xff]  ;;  %v17158_v8 = vld [vmem:[%s29124_s7 + $0x698] sm:$0xff] }
 0x7be   :  { %21598 = vmatpush3.bf16.msra.mxu1 %v24938_v43  ;;  %20286 = vmatprep.mubr.msk.f32.mxu1 %vm7094_vm1, %v17141_v24  ;;  %v17829_v43 = vld [vmem:[%s29124_s7 + $0x1110] sm:$0xff]  ;;  %v17844_v24 = vld [vmem:[%s29124_s7 + $0x1188] sm:$0xff] }
 0x7bf   :  { %21600 = vmatprep.subr.bf16.mxu1 %v24945_v32  ;;  %20979 = vmatprep.mubr.msk.f32.mxu0 %vm7094_vm1, %v17827_v52  ;;  %v17159_v52 = vld [vmem:[%s29124_s7 + $0x6a0] sm:$0xff] }
 0x7c1   :  { %20287 = vmatmul.mubr.msk.f32.gmra.mrb[234].mxu1 %vm7094_vm1, %v17142_v13  ;;  %20980 = vmatmul.mubr.msk.f32.gmra.mrb[60].mxu0 %vm7094_vm1, %v17828_v54  ;;  %v17845_v13 = vld [vmem:[%s29124_s7 + $0x1190] sm:$0xff]  ;;  %v17160_v54 = vld [vmem:[%s29124_s7 + $0x6a8] sm:$0xff] }
 0x7c2   :  { %21602 = vmatpush3.bf16.msra.mxu1 %v24945_v32  ;;  %20289 = vmatprep.mubr.msk.f32.mxu1 %vm7094_vm1, %v17143_v36  ;;  %v17831_v32 = vld [vmem:[%s29124_s7 + $0x1120] sm:$0xff]  ;;  %v17846_v36 = vld [vmem:[%s29124_s7 + $0x1198] sm:$0xff] }
 0x7c3   :  { %21604 = vmatprep.subr.bf16.mxu1 %v24951_v6  ;;  %20982 = vmatprep.mubr.msk.f32.mxu0 %vm7094_vm1, %v17829_v43  ;;  %v17161_v43 = vld [vmem:[%s29124_s7 + $0x6b0] sm:$0xff] }
 0x7c5   :  { %20290 = vmatmul.mubr.msk.f32.gmra.mrb[236].mxu1 %vm7094_vm1, %v17144_v12  ;;  %20983 = vmatmul.mubr.msk.f32.gmra.mrb[62].mxu0 %vm7094_vm1, %v17830_v59  ;;  %v17847_v12 = vld [vmem:[%s29124_s7 + $0x11a0] sm:$0xff]  ;;  %v17162_v59 = vld [vmem:[%s29124_s7 + $0x6b8] sm:$0xff] }
 0x7c6   :  { %21606 = vmatpush3.bf16.msra.mxu1 %v24951_v6  ;;  %20292 = vmatprep.mubr.msk.f32.mxu1 %vm7094_vm1, %v17145_v0  ;;  %v17833_v6 = vld [vmem:[%s29124_s7 + $0x1130] sm:$0xff]  ;;  %v17848_v0 = vld [vmem:[%s29124_s7 + $0x11a8] sm:$0xff] }
 0x7c7   :  { %21608 = vmatprep.subr.bf16.mxu1 %v24957_v19  ;;  %20985 = vmatprep.mubr.msk.f32.mxu0 %vm7094_vm1, %v17831_v32  ;;  %v17163_v32 = vld [vmem:[%s29124_s7 + $0x6c0] sm:$0xff] }
 0x7c9   :  { %20293 = vmatmul.mubr.msk.f32.gmra.mrb[238].mxu1 %vm7094_vm1, %v17146_v31  ;;  %20986 = vmatmul.mubr.msk.f32.gmra.mrb[64].mxu0 %vm7094_vm1, %v17832_v56  ;;  %v17849_v31 = vld [vmem:[%s29124_s7 + $0x11b0] sm:$0xff]  ;;  %v17164_v56 = vld [vmem:[%s29124_s7 + $0x6c8] sm:$0xff] }
 0x7ca   :  { %21610 = vmatpush3.bf16.msra.mxu1 %v24957_v19  ;;  %20295 = vmatprep.mubr.msk.f32.mxu1 %vm7094_vm1, %v17147_v37  ;;  %v17835_v19 = vld [vmem:[%s29124_s7 + $0x1140] sm:$0xff]  ;;  %v17850_v37 = vld [vmem:[%s29124_s7 + $0x11b8] sm:$0xff] }
 0x7cb   :  { %21612 = vmatprep.subr.bf16.mxu1 %v24967_v35  ;;  %20988 = vmatprep.mubr.msk.f32.mxu0 %vm7094_vm1, %v17833_v6  ;;  %v17165_v6 = vld [vmem:[%s29124_s7 + $0x6d0] sm:$0xff] }
 0x7cd   :  { %20296 = vmatmul.mubr.msk.f32.gmra.mrb[240].mxu1 %vm7094_vm1, %v17148_v45  ;;  %20989 = vmatmul.mubr.msk.f32.gmra.mrb[66].mxu0 %vm7094_vm1, %v17834_v39  ;;  %v17851_v45 = vld [vmem:[%s29124_s7 + $0x11c0] sm:$0xff]  ;;  %v17166_v39 = vld [vmem:[%s29124_s7 + $0x6d8] sm:$0xff] }
 0x7ce   :  { %21614 = vmatpush3.bf16.msra.mxu1 %v24967_v35  ;;  %20298 = vmatprep.mubr.msk.f32.mxu1 %vm7094_vm1, %v17149_v2  ;;  %v17837_v35 = vld [vmem:[%s29124_s7 + $0x1150] sm:$0xff]  ;;  %v17852_v2 = vld [vmem:[%s29124_s7 + $0x11c8] sm:$0xff] }
 0x7cf   :  { %21616 = vmatprep.subr.bf16.mxu1 %v24977_v51  ;;  %20991 = vmatprep.mubr.msk.f32.mxu0 %vm7094_vm1, %v17835_v19  ;;  %v17167_v19 = vld [vmem:[%s29124_s7 + $0x6e0] sm:$0xff] }
 0x7d1   :  { %20299 = vmatmul.mubr.msk.f32.gmra.mrb[242].mxu1 %vm7094_vm1, %v17150_v25  ;;  %20992 = vmatmul.mubr.msk.f32.gmra.mrb[68].mxu0 %vm7094_vm1, %v17836_v29  ;;  %v17853_v25 = vld [vmem:[%s29124_s7 + $0x11d0] sm:$0xff]  ;;  %v17168_v29 = vld [vmem:[%s29124_s7 + $0x6e8] sm:$0xff] }
 0x7d2   :  { %21618 = vmatpush3.bf16.msra.mxu1 %v24977_v51  ;;  %20301 = vmatprep.mubr.msk.f32.mxu1 %vm7094_vm1, %v17151_v21  ;;  %v17839_v51 = vld [vmem:[%s29124_s7 + $0x1160] sm:$0xff]  ;;  %v17854_v21 = vld [vmem:[%s29124_s7 + $0x11d8] sm:$0xff] }
 0x7d3   :  { %21620 = vmatprep.subr.bf16.mxu1 %v24984_v40  ;;  %20994 = vmatprep.mubr.msk.f32.mxu0 %vm7094_vm1, %v17837_v35  ;;  %v17169_v35 = vld [vmem:[%s29124_s7 + $0x6f0] sm:$0xff] }
 0x7d5   :  { %20302 = vmatmul.mubr.msk.f32.gmra.mrb[244].mxu1 %vm7094_vm1, %v17152_v48  ;;  %20995 = vmatmul.mubr.msk.f32.gmra.mrb[70].mxu0 %vm7094_vm1, %v17838_v18  ;;  %v17855_v48 = vld [vmem:[%s29124_s7 + $0x11e0] sm:$0xff]  ;;  %v17170_v18 = vld [vmem:[%s29124_s7 + $0x6f8] sm:$0xff] }
 0x7d6   :  { %20304 = vmatprep.mubr.msk.f32.mxu1 %vm7094_vm1, %v17153_v1  ;;  %20997 = vmatprep.mubr.msk.f32.mxu0 %vm7094_vm1, %v17839_v51  ;;  %v17856_v1 = vld [vmem:[%s29124_s7 + $0x11e8] sm:$0xff]  ;;  %v17171_v51 = vld [vmem:[%s29124_s7 + $0x700] sm:$0xff] }
 0x7d9   :  { %20305 = vmatmul.mubr.msk.f32.gmra.mrb[246].mxu1 %vm7094_vm1, %v17154_v42  ;;  %20998 = vmatmul.mubr.msk.f32.gmra.mrb[72].mxu0 %vm7094_vm1, %v17840_v17  ;;  %v17857_v42 = vld [vmem:[%s29124_s7 + $0x11f0] sm:$0xff]  ;;  %v17172_v17 = vld [vmem:[%s29124_s7 + $0x708] sm:$0xff] }
 0x7da   :  { %20307 = vmatprep.mubr.msk.f32.mxu1 %vm7094_vm1, %v17155_v4  ;;  %21000 = vmatprep.mubr.msk.f32.mxu0 %vm7094_vm1, %v17841_v30  ;;  %v17858_v4 = vld [vmem:[%s29124_s7 + $0x11f8] sm:$0xff]  ;;  %v17173_v30 = vld [vmem:[%s29124_s7 + $0x710] sm:$0xff] }
 0x7dd   :  { %20308 = vmatmul.mubr.msk.f32.gmra.mrb[248].mxu1 %vm7094_vm1, %v17156_v14  ;;  %21001 = vmatmul.mubr.msk.f32.gmra.mrb[74].mxu0 %vm7094_vm1, %v17842_v23  ;;  %v17907_v14 = vld [vmem:[%s29124_s7 + $0x1200] sm:$0xff]  ;;  %v17174_v23 = vld [vmem:[%s29124_s7 + $0x718] sm:$0xff] }
 0x7de   :  { %20310 = vmatprep.mubr.msk.f32.mxu1 %vm7094_vm1, %v17157_v63  ;;  %21003 = vmatprep.mubr.msk.f32.mxu0 %vm7094_vm1, %v17843_v47  ;;  %v17908_v63 = vld [vmem:[%s29124_s7 + $0x1208] sm:$0xff]  ;;  %v17175_v47 = vld [vmem:[%s29124_s7 + $0x720] sm:$0xff] }
 0x7e1   :  { %20311 = vmatmul.mubr.msk.f32.gmra.mrb[250].mxu1 %vm7094_vm1, %v17158_v8  ;;  %21004 = vmatmul.mubr.msk.f32.gmra.mrb[76].mxu0 %vm7094_vm1, %v17844_v24  ;;  %v17909_v8 = vld [vmem:[%s29124_s7 + $0x1210] sm:$0xff]  ;;  %v17176_v24 = vld [vmem:[%s29124_s7 + $0x728] sm:$0xff] }
 0x7e2   :  { %20313 = vmatprep.mubr.msk.f32.mxu1 %vm7094_vm1, %v17159_v52  ;;  %21006 = vmatprep.mubr.msk.f32.mxu0 %vm7094_vm1, %v17845_v13  ;;  %v17910_v52 = vld [vmem:[%s29124_s7 + $0x1218] sm:$0xff]  ;;  %v17177_v13 = vld [vmem:[%s29124_s7 + $0x730] sm:$0xff] }
 0x7e5   :  { %20314 = vmatmul.mubr.msk.f32.gmra.mrb[252].mxu1 %vm7094_vm1, %v17160_v54  ;;  %21007 = vmatmul.mubr.msk.f32.gmra.mrb[78].mxu0 %vm7094_vm1, %v17846_v36  ;;  %v17178_v54 = vld [vmem:[%s29124_s7 + $0x738] sm:$0xff]  ;;  %v17912_v36 = vld [vmem:[%s29124_s7 + $0x1228] sm:$0xff] }
 0x7e6   :  { %20316 = vmatprep.mubr.msk.f32.mxu1 %vm7094_vm1, %v17161_v43  ;;  %21009 = vmatprep.mubr.msk.f32.mxu0 %vm7094_vm1, %v17847_v12  ;;  %v17179_v43 = vld [vmem:[%s29124_s7 + $0x740] sm:$0xff]  ;;  %v17180_v12 = vld [vmem:[%s29124_s7 + $0x748] sm:$0xff] }
 0x7e9   :  { %20317 = vmatmul.mubr.msk.f32.gmra.mrb[254].mxu1 %vm7094_vm1, %v17162_v59  ;;  %21010 = vmatmul.mubr.msk.f32.gmra.mrb[80].mxu0 %vm7094_vm1, %v17848_v0  ;;  %v17914_v59 = vld [vmem:[%s29124_s7 + $0x1238] sm:$0xff]  ;;  %v17181_v0 = vld [vmem:[%s29124_s7 + $0x750] sm:$0xff] }
 0x7ea   :  { %20319 = vmatprep.mubr.msk.f32.mxu1 %vm7094_vm1, %v17163_v32  ;;  %21012 = vmatprep.mubr.msk.f32.mxu0 %vm7094_vm1, %v17849_v31  ;;  %v17182_v32 = vld [vmem:[%s29124_s7 + $0x758] sm:$0xff]  ;;  %v17916_v31 = vld [vmem:[%s29124_s7 + $0x1248] sm:$0xff] }
 0x7ed   :  { %20320 = vmatmul.mubr.msk.f32.gmra.mrb[0].mxu1 %vm7094_vm1, %v17164_v56  ;;  %21013 = vmatmul.mubr.msk.f32.gmra.mrb[82].mxu0 %vm7094_vm1, %v17850_v37  ;;  %v17183_v56 = vld [vmem:[%s29124_s7 + $0x760] sm:$0xff]  ;;  %v17184_v37 = vld [vmem:[%s29124_s7 + $0x768] sm:$0xff] }
 0x7ee   :  { %20322 = vmatprep.mubr.msk.f32.mxu1 %vm7094_vm1, %v17165_v6  ;;  %21015 = vmatprep.mubr.msk.f32.mxu0 %vm7094_vm1, %v17851_v45  ;;  %v17918_v6 = vld [vmem:[%s29124_s7 + $0x1258] sm:$0xff]  ;;  %v17185_v45 = vld [vmem:[%s29124_s7 + $0x770] sm:$0xff] }
 0x7f1   :  { %20323 = vmatmul.mubr.msk.f32.gmra.mrb[2].mxu1 %vm7094_vm1, %v17166_v39  ;;  %21016 = vmatmul.mubr.msk.f32.gmra.mrb[84].mxu0 %vm7094_vm1, %v17852_v2  ;;  %v17186_v39 = vld [vmem:[%s29124_s7 + $0x778] sm:$0xff]  ;;  %v17920_v2 = vld [vmem:[%s29124_s7 + $0x1268] sm:$0xff] }
 0x7f2   :  { %20325 = vmatprep.mubr.msk.f32.mxu1 %vm7094_vm1, %v17167_v19  ;;  %21018 = vmatprep.mubr.msk.f32.mxu0 %vm7094_vm1, %v17853_v25  ;;  %v17235_v19 = vld [vmem:[%s29124_s7 + $0x780] sm:$0xff]  ;;  %v17236_v25 = vld [vmem:[%s29124_s7 + $0x788] sm:$0xff] }
 0x7f5   :  { %20326 = vmatmul.mubr.msk.f32.gmra.mrb[4].mxu1 %vm7094_vm1, %v17168_v29  ;;  %21019 = vmatmul.mubr.msk.f32.gmra.mrb[86].mxu0 %vm7094_vm1, %v17854_v21  ;;  %v17922_v29 = vld [vmem:[%s29124_s7 + $0x1278] sm:$0xff]  ;;  %v17237_v21 = vld [vmem:[%s29124_s7 + $0x790] sm:$0xff] }
 0x7f6   :  { %20328 = vmatprep.mubr.msk.f32.mxu1 %vm7094_vm1, %v17169_v35  ;;  %21021 = vmatprep.mubr.msk.f32.mxu0 %vm7094_vm1, %v17855_v48  ;;  %v17923_v35 = vld [vmem:[%s29124_s7 + $0x1280] sm:$0xff]  ;;  %v17238_v48 = vld [vmem:[%s29124_s7 + $0x798] sm:$0xff] }
 0x7f9   :  { %20329 = vmatmul.mubr.msk.f32.gmra.mrb[6].mxu1 %vm7094_vm1, %v17170_v18  ;;  %21022 = vmatmul.mubr.msk.f32.gmra.mrb[88].mxu0 %vm7094_vm1, %v17856_v1  ;;  %v17924_v18 = vld [vmem:[%s29124_s7 + $0x1288] sm:$0xff]  ;;  %v17239_v1 = vld [vmem:[%s29124_s7 + $0x7a0] sm:$0xff] }
 0x7fa   :  { %20331 = vmatprep.mubr.msk.f32.mxu1 %vm7094_vm1, %v17171_v51  ;;  %21024 = vmatprep.mubr.msk.f32.mxu0 %vm7094_vm1, %v17857_v42  ;;  %v17240_v51 = vld [vmem:[%s29124_s7 + $0x7a8] sm:$0xff]  ;;  %v17926_v42 = vld [vmem:[%s29124_s7 + $0x1298] sm:$0xff] }
 0x7fd   :  { %20332 = vmatmul.mubr.msk.f32.gmra.mrb[8].mxu1 %vm7094_vm1, %v17172_v17  ;;  %21025 = vmatmul.mubr.msk.f32.gmra.mrb[90].mxu0 %vm7094_vm1, %v17858_v4  ;;  %v17241_v17 = vld [vmem:[%s29124_s7 + $0x7b0] sm:$0xff]  ;;  %v17242_v4 = vld [vmem:[%s29124_s7 + $0x7b8] sm:$0xff] }
 0x7fe   :  { %20334 = vmatprep.mubr.msk.f32.mxu1 %vm7094_vm1, %v17173_v30  ;;  %21051 = vmatprep.mubr.msk.f32.mxu0 %vm7094_vm1, %v17907_v14  ;;  %v17928_v30 = vld [vmem:[%s29124_s7 + $0x12a8] sm:$0xff]  ;;  %v17243_v14 = vld [vmem:[%s29124_s7 + $0x7c0] sm:$0xff] }
 0x801   :  { %20335 = vmatmul.mubr.msk.f32.gmra.mrb[10].mxu1 %vm7094_vm1, %v17174_v23  ;;  %21052 = vmatmul.mubr.msk.f32.vlgmr.msra.gmra.mrb[44].mxu0 %vm7094_vm1, %v17908_v63  ;;  %v17244_v23 = vld [vmem:[%s29124_s7 + $0x7c8] sm:$0xff]  ;;  %v17930_v63 = vld [vmem:[%s29124_s7 + $0x12b8] sm:$0xff] }
 0x802   :  { %21790 = vmatpush3.bf16.msra.mxu0 %v25509_v15  ;;  %20337 = vmatprep.mubr.msk.f32.mxu1 %vm7094_vm1, %v17175_v47  ;;  %v17911_v15 = vld [vmem:[%s29124_s7 + $0x1220] sm:$0xff]  ;;  %v17245_v47 = vld [vmem:[%s29124_s7 + $0x7d0] sm:$0xff] }
 0x803   :  { %21792 = vmatprep.subr.bf16.mxu0 %v25545_v9  ;;  %21054 = vmatprep.mubr.msk.f32.mxu0 %vm7094_vm1, %v17909_v8  ;;  %v17246_v8 = vld [vmem:[%s29124_s7 + $0x7d8] sm:$0xff] }
 0x805   :  { %20338 = vmatmul.mubr.msk.f32.gmra.mrb[12].mxu1 %vm7094_vm1, %v17176_v24  ;;  %21055 = vmatmul.mubr.msk.f32.gmra.mrb[46].mxu0 %vm7094_vm1, %v17910_v52  ;;  %v17932_v24 = vld [vmem:[%s29124_s7 + $0x12c8] sm:$0xff]  ;;  %v17247_v52 = vld [vmem:[%s29124_s7 + $0x7e0] sm:$0xff] }
 0x806   :  { %21794 = vmatpush3.bf16.msra.mxu0 %v25545_v9  ;;  %20340 = vmatprep.mubr.msk.f32.mxu1 %vm7094_vm1, %v17177_v13  ;;  %v17913_v9 = vld [vmem:[%s29124_s7 + $0x1230] sm:$0xff]  ;;  %v17248_v13 = vld [vmem:[%s29124_s7 + $0x7e8] sm:$0xff] }
 0x807   :  { %21796 = vmatprep.subr.bf16.mxu0 %v25581_v11  ;;  %21057 = vmatprep.mubr.msk.f32.mxu0 %vm7094_vm1, %v17911_v15  ;;  %v17934_v15 = vld [vmem:[%s29124_s7 + $0x12d8] sm:$0xff] }
 0x809   :  { %20341 = vmatmul.mubr.msk.f32.gmra.mrb[14].mxu1 %vm7094_vm1, %v17178_v54  ;;  %21058 = vmatmul.mubr.msk.f32.gmra.mrb[48].mxu0 %vm7094_vm1, %v17912_v36  ;;  %v17249_v54 = vld [vmem:[%s29124_s7 + $0x7f0] sm:$0xff]  ;;  %v17250_v36 = vld [vmem:[%s29124_s7 + $0x7f8] sm:$0xff] }
 0x80a   :  { %21798 = vmatpush3.bf16.msra.mxu0 %v25581_v11  ;;  %20343 = vmatprep.mubr.msk.f32.mxu1 %vm7094_vm1, %v17179_v43  ;;  %v17915_v11 = vld [vmem:[%s29124_s7 + $0x1240] sm:$0xff]  ;;  %v17936_v43 = vld [vmem:[%s29124_s7 + $0x12e8] sm:$0xff] }
 0x80b   :  { %21800 = vmatprep.subr.bf16.mxu0 %v25617_v53  ;;  %21060 = vmatprep.mubr.msk.f32.mxu0 %vm7094_vm1, %v17913_v9  ;;  %v17251_v9 = vld [vmem:[%s29124_s7 + $0x800] sm:$0xff] }
 0x80d   :  { %20344 = vmatmul.mubr.msk.f32.gmra.mrb[16].mxu1 %vm7094_vm1, %v17180_v12  ;;  %21061 = vmatmul.mubr.msk.f32.gmra.mrb[50].mxu0 %vm7094_vm1, %v17914_v59  ;;  %v17937_v12 = vld [vmem:[%s29124_s7 + $0x12f0] sm:$0xff]  ;;  %v17252_v59 = vld [vmem:[%s29124_s7 + $0x808] sm:$0xff] }
 0x80e   :  { %21802 = vmatpush3.bf16.msra.mxu0 %v25617_v53  ;;  %20346 = vmatprep.mubr.msk.f32.mxu1 %vm7094_vm1, %v17181_v0  ;;  %v17917_v53 = vld [vmem:[%s29124_s7 + $0x1250] sm:$0xff]  ;;  %v17938_v0 = vld [vmem:[%s29124_s7 + $0x12f8] sm:$0xff] }
 0x80f   :  { %21804 = vmatprep.subr.bf16.mxu0 %v25653_v33  ;;  %21063 = vmatprep.mubr.msk.f32.mxu0 %vm7094_vm1, %v17915_v11  ;;  %v17253_v11 = vld [vmem:[%s29124_s7 + $0x810] sm:$0xff] }
 0x811   :  { %20347 = vmatmul.mubr.msk.f32.gmra.mrb[18].mxu1 %vm7094_vm1, %v17182_v32  ;;  %21064 = vmatmul.mubr.msk.f32.gmra.mrb[52].mxu0 %vm7094_vm1, %v17916_v31  ;;  %v17939_v32 = vld [vmem:[%s29124_s7 + $0x1300] sm:$0xff]  ;;  %v17254_v31 = vld [vmem:[%s29124_s7 + $0x818] sm:$0xff] }
 0x812   :  { %21806 = vmatpush3.bf16.msra.mxu0 %v25653_v33  ;;  %20349 = vmatprep.mubr.msk.f32.mxu1 %vm7094_vm1, %v17183_v56  ;;  %v17919_v33 = vld [vmem:[%s29124_s7 + $0x1260] sm:$0xff]  ;;  %v17940_v56 = vld [vmem:[%s29124_s7 + $0x1308] sm:$0xff] }
 0x813   :  { %21808 = vmatprep.subr.bf16.mxu0 %v25689_v50  ;;  %21066 = vmatprep.mubr.msk.f32.mxu0 %vm7094_vm1, %v17917_v53  ;;  %v17255_v53 = vld [vmem:[%s29124_s7 + $0x820] sm:$0xff] }
 0x815   :  { %20350 = vmatmul.mubr.msk.f32.gmra.mrb[20].mxu1 %vm7094_vm1, %v17184_v37  ;;  %21067 = vmatmul.mubr.msk.f32.gmra.mrb[54].mxu0 %vm7094_vm1, %v17918_v6  ;;  %v17941_v37 = vld [vmem:[%s29124_s7 + $0x1310] sm:$0xff]  ;;  %v17256_v6 = vld [vmem:[%s29124_s7 + $0x828] sm:$0xff] }
 0x816   :  { %21810 = vmatpush3.bf16.msra.mxu0 %v25689_v50  ;;  %20352 = vmatprep.mubr.msk.f32.mxu1 %vm7094_vm1, %v17185_v45  ;;  %v17921_v50 = vld [vmem:[%s29124_s7 + $0x1270] sm:$0xff]  ;;  %v17942_v45 = vld [vmem:[%s29124_s7 + $0x1318] sm:$0xff] }
 0x817   :  { %21812 = vmatprep.subr.bf16.mxu0 %v25717_v61  ;;  %21069 = vmatprep.mubr.msk.f32.mxu0 %vm7094_vm1, %v17919_v33  ;;  %v17257_v33 = vld [vmem:[%s29124_s7 + $0x830] sm:$0xff] }
 0x819   :  { %20353 = vmatmul.mubr.msk.f32.gmra.mrb[22].mxu1 %vm7094_vm1, %v17186_v39  ;;  %21070 = vmatmul.mubr.msk.f32.gmra.mrb[56].mxu0 %vm7094_vm1, %v17920_v2  ;;  %v17943_v39 = vld [vmem:[%s29124_s7 + $0x1320] sm:$0xff]  ;;  %v17258_v2 = vld [vmem:[%s29124_s7 + $0x838] sm:$0xff] }
 0x81a   :  { %20379 = vmatprep.mubr.msk.f32.mxu1 %vm7094_vm1, %v17235_v19  ;;  %21072 = vmatprep.mubr.msk.f32.mxu0 %vm7094_vm1, %v17921_v50  ;;  %v17944_v19 = vld [vmem:[%s29124_s7 + $0x1328] sm:$0xff]  ;;  %v17259_v50 = vld [vmem:[%s29124_s7 + $0x840] sm:$0xff] }
 0x81d   :  { %20380 = vmatmul.mubr.msk.f32.vlgmr.msra.gmra.mrb[232].mxu1 %vm7094_vm1, %v17236_v25  ;;  %21073 = vmatmul.mubr.msk.f32.gmra.mrb[58].mxu0 %vm7094_vm1, %v17922_v29  ;;  %v17945_v25 = vld [vmem:[%s29124_s7 + $0x1330] sm:$0xff]  ;;  %v17260_v29 = vld [vmem:[%s29124_s7 + $0x848] sm:$0xff] }
 0x81e   :  { %21622 = vmatpush3.bf16.msra.mxu1 %v24984_v40  ;;  %20382 = vmatprep.mubr.msk.f32.mxu1 %vm7094_vm1, %v17237_v21  ;;  %v17925_v40 = vld [vmem:[%s29124_s7 + $0x1290] sm:$0xff]  ;;  %v17946_v21 = vld [vmem:[%s29124_s7 + $0x1338] sm:$0xff] }
 0x81f   :  { %21624 = vmatprep.subr.bf16.mxu1 %v24993_v57  ;;  %21075 = vmatprep.mubr.msk.f32.mxu0 %vm7094_vm1, %v17923_v35  ;;  %v17261_v35 = vld [vmem:[%s29124_s7 + $0x850] sm:$0xff] }
 0x821   :  { %20383 = vmatmul.mubr.msk.f32.gmra.mrb[234].mxu1 %vm7094_vm1, %v17238_v48  ;;  %21076 = vmatmul.mubr.msk.f32.gmra.mrb[60].mxu0 %vm7094_vm1, %v17924_v18  ;;  %v17947_v48 = vld [vmem:[%s29124_s7 + $0x1340] sm:$0xff]  ;;  %v17262_v18 = vld [vmem:[%s29124_s7 + $0x858] sm:$0xff] }
 0x822   :  { %21626 = vmatpush3.bf16.msra.mxu1 %v24993_v57  ;;  %20385 = vmatprep.mubr.msk.f32.mxu1 %vm7094_vm1, %v17239_v1  ;;  %v17927_v57 = vld [vmem:[%s29124_s7 + $0x12a0] sm:$0xff]  ;;  %v17948_v1 = vld [vmem:[%s29124_s7 + $0x1348] sm:$0xff] }
 0x823   :  { %21628 = vmatprep.subr.bf16.mxu1 %v25001_v62  ;;  %21078 = vmatprep.mubr.msk.f32.mxu0 %vm7094_vm1, %v17925_v40  ;;  %v17263_v40 = vld [vmem:[%s29124_s7 + $0x860] sm:$0xff] }
 0x825   :  { %20386 = vmatmul.mubr.msk.f32.gmra.mrb[236].mxu1 %vm7094_vm1, %v17240_v51  ;;  %21079 = vmatmul.mubr.msk.f32.gmra.mrb[62].mxu0 %vm7094_vm1, %v17926_v42  ;;  %v17949_v51 = vld [vmem:[%s29124_s7 + $0x1350] sm:$0xff]  ;;  %v17264_v42 = vld [vmem:[%s29124_s7 + $0x868] sm:$0xff] }
 0x826   :  { %21630 = vmatpush3.bf16.msra.mxu1 %v25001_v62  ;;  %20388 = vmatprep.mubr.msk.f32.mxu1 %vm7094_vm1, %v17241_v17  ;;  %v17929_v62 = vld [vmem:[%s29124_s7 + $0x12b0] sm:$0xff]  ;;  %v17950_v17 = vld [vmem:[%s29124_s7 + $0x1358] sm:$0xff] }
 0x827   :  { %21632 = vmatprep.subr.bf16.mxu1 %v25015_v16  ;;  %21081 = vmatprep.mubr.msk.f32.mxu0 %vm7094_vm1, %v17927_v57  ;;  %v17265_v57 = vld [vmem:[%s29124_s7 + $0x870] sm:$0xff] }
 0x829   :  { %20389 = vmatmul.mubr.msk.f32.gmra.mrb[238].mxu1 %vm7094_vm1, %v17242_v4  ;;  %21082 = vmatmul.mubr.msk.f32.gmra.mrb[64].mxu0 %vm7094_vm1, %v17928_v30  ;;  %v17951_v4 = vld [vmem:[%s29124_s7 + $0x1360] sm:$0xff]  ;;  %v17266_v30 = vld [vmem:[%s29124_s7 + $0x878] sm:$0xff] }
 0x82a   :  { %21634 = vmatpush3.bf16.msra.mxu1 %v25015_v16  ;;  %20391 = vmatprep.mubr.msk.f32.mxu1 %vm7094_vm1, %v17243_v14  ;;  %v17931_v16 = vld [vmem:[%s29124_s7 + $0x12c0] sm:$0xff]  ;;  %v17952_v14 = vld [vmem:[%s29124_s7 + $0x1368] sm:$0xff] }
 0x82b   :  { %21636 = vmatprep.subr.bf16.mxu1 %v25040_v28  ;;  %21084 = vmatprep.mubr.msk.f32.mxu0 %vm7094_vm1, %v17929_v62  ;;  %v17267_v62 = vld [vmem:[%s29124_s7 + $0x880] sm:$0xff] }
 0x82d   :  { %20392 = vmatmul.mubr.msk.f32.gmra.mrb[240].mxu1 %vm7094_vm1, %v17244_v23  ;;  %21085 = vmatmul.mubr.msk.f32.gmra.mrb[66].mxu0 %vm7094_vm1, %v17930_v63  ;;  %v17953_v23 = vld [vmem:[%s29124_s7 + $0x1370] sm:$0xff]  ;;  %v17268_v63 = vld [vmem:[%s29124_s7 + $0x888] sm:$0xff] }
 0x82e   :  { %21638 = vmatpush3.bf16.msra.mxu1 %v25040_v28  ;;  %20394 = vmatprep.mubr.msk.f32.mxu1 %vm7094_vm1, %v17245_v47  ;;  %v17933_v28 = vld [vmem:[%s29124_s7 + $0x12d0] sm:$0xff]  ;;  %v17954_v47 = vld [vmem:[%s29124_s7 + $0x1378] sm:$0xff] }
 0x82f   :  { %21640 = vmatprep.subr.bf16.mxu1 %v25066_v26  ;;  %21087 = vmatprep.mubr.msk.f32.mxu0 %vm7094_vm1, %v17931_v16  ;;  %v17269_v16 = vld [vmem:[%s29124_s7 + $0x890] sm:$0xff] }
 0x831   :  { %20395 = vmatmul.mubr.msk.f32.gmra.mrb[242].mxu1 %vm7094_vm1, %v17246_v8  ;;  %21088 = vmatmul.mubr.msk.f32.gmra.mrb[68].mxu0 %vm7094_vm1, %v17932_v24  ;;  %v18003_v8 = vld [vmem:[%s29124_s7 + $0x1380] sm:$0xff]  ;;  %v17270_v24 = vld [vmem:[%s29124_s7 + $0x898] sm:$0xff] }
 0x832   :  { %21642 = vmatpush3.bf16.msra.mxu1 %v25066_v26  ;;  %20397 = vmatprep.mubr.msk.f32.mxu1 %vm7094_vm1, %v17247_v52  ;;  %v17935_v26 = vld [vmem:[%s29124_s7 + $0x12e0] sm:$0xff]  ;;  %v18004_v52 = vld [vmem:[%s29124_s7 + $0x1388] sm:$0xff] }
 0x833   :  { %21859 = vmatprep.subr.bf16.mxu1 %v24987_v44  ;;  %21090 = vmatprep.mubr.msk.f32.mxu0 %vm7094_vm1, %v17933_v28  ;;  %v17271_v28 = vld [vmem:[%s29124_s7 + $0x8a0] sm:$0xff] }
 0x835   :  { %20398 = vmatmul.mubr.msk.f32.gmra.mrb[244].mxu1 %vm7094_vm1, %v17248_v13  ;;  %21091 = vmatmul.mubr.msk.f32.gmra.mrb[70].mxu0 %vm7094_vm1, %v17934_v15  ;;  %v18005_v13 = vld [vmem:[%s29124_s7 + $0x1390] sm:$0xff]  ;;  %v17272_v15 = vld [vmem:[%s29124_s7 + $0x8a8] sm:$0xff] }
 0x836   :  { %20400 = vmatprep.mubr.msk.f32.mxu1 %vm7094_vm1, %v17249_v54  ;;  %21093 = vmatprep.mubr.msk.f32.mxu0 %vm7094_vm1, %v17935_v26  ;;  %v18006_v54 = vld [vmem:[%s29124_s7 + $0x1398] sm:$0xff]  ;;  %v17273_v26 = vld [vmem:[%s29124_s7 + $0x8b0] sm:$0xff] }
 0x839   :  { %20401 = vmatmul.mubr.msk.f32.gmra.mrb[246].mxu1 %vm7094_vm1, %v17250_v36  ;;  %21094 = vmatmul.mubr.msk.f32.gmra.mrb[72].mxu0 %vm7094_vm1, %v17936_v43  ;;  %v17274_v36 = vld [vmem:[%s29124_s7 + $0x8b8] sm:$0xff]  ;;  %v18008_v43 = vld [vmem:[%s29124_s7 + $0x13a8] sm:$0xff] }
 0x83a   :  { %20403 = vmatprep.mubr.msk.f32.mxu1 %vm7094_vm1, %v17251_v9  ;;  %21096 = vmatprep.mubr.msk.f32.mxu0 %vm7094_vm1, %v17937_v12  ;;  %v17275_v9 = vld [vmem:[%s29124_s7 + $0x8c0] sm:$0xff]  ;;  %v17276_v12 = vld [vmem:[%s29124_s7 + $0x8c8] sm:$0xff] }
 0x83d   :  { %20404 = vmatmul.mubr.msk.f32.gmra.mrb[248].mxu1 %vm7094_vm1, %v17252_v59  ;;  %21097 = vmatmul.mubr.msk.f32.gmra.mrb[74].mxu0 %vm7094_vm1, %v17938_v0  ;;  %v18010_v59 = vld [vmem:[%s29124_s7 + $0x13b8] sm:$0xff]  ;;  %v17277_v0 = vld [vmem:[%s29124_s7 + $0x8d0] sm:$0xff] }
 0x83e   :  { %20406 = vmatprep.mubr.msk.f32.mxu1 %vm7094_vm1, %v17253_v11  ;;  %21099 = vmatprep.mubr.msk.f32.mxu0 %vm7094_vm1, %v17939_v32  ;;  %v17278_v11 = vld [vmem:[%s29124_s7 + $0x8d8] sm:$0xff]  ;;  %v18012_v32 = vld [vmem:[%s29124_s7 + $0x13c8] sm:$0xff] }
 0x841   :  { %20407 = vmatmul.mubr.msk.f32.gmra.mrb[250].mxu1 %vm7094_vm1, %v17254_v31  ;;  %21100 = vmatmul.mubr.msk.f32.gmra.mrb[76].mxu0 %vm7094_vm1, %v17940_v56  ;;  %v17279_v31 = vld [vmem:[%s29124_s7 + $0x8e0] sm:$0xff]  ;;  %v17280_v56 = vld [vmem:[%s29124_s7 + $0x8e8] sm:$0xff] }
 0x842   :  { %20409 = vmatprep.mubr.msk.f32.mxu1 %vm7094_vm1, %v17255_v53  ;;  %21102 = vmatprep.mubr.msk.f32.mxu0 %vm7094_vm1, %v17941_v37  ;;  %v18014_v53 = vld [vmem:[%s29124_s7 + $0x13d8] sm:$0xff]  ;;  %v17281_v37 = vld [vmem:[%s29124_s7 + $0x8f0] sm:$0xff] }
 0x845   :  { %20410 = vmatmul.mubr.msk.f32.gmra.mrb[252].mxu1 %vm7094_vm1, %v17256_v6  ;;  %21103 = vmatmul.mubr.msk.f32.gmra.mrb[78].mxu0 %vm7094_vm1, %v17942_v45  ;;  %v17282_v6 = vld [vmem:[%s29124_s7 + $0x8f8] sm:$0xff]  ;;  %v18016_v45 = vld [vmem:[%s29124_s7 + $0x13e8] sm:$0xff] }
 0x846   :  { %20412 = vmatprep.mubr.msk.f32.mxu1 %vm7094_vm1, %v17257_v33  ;;  %21105 = vmatprep.mubr.msk.f32.mxu0 %vm7094_vm1, %v17943_v39  ;;  %v17331_v33 = vld [vmem:[%s29124_s7 + $0x900] sm:$0xff]  ;;  %v17332_v39 = vld [vmem:[%s29124_s7 + $0x908] sm:$0xff] }
 0x849   :  { %20413 = vmatmul.mubr.msk.f32.gmra.mrb[254].mxu1 %vm7094_vm1, %v17258_v2  ;;  %21106 = vmatmul.mubr.msk.f32.gmra.mrb[80].mxu0 %vm7094_vm1, %v17944_v19  ;;  %v18018_v2 = vld [vmem:[%s29124_s7 + $0x13f8] sm:$0xff]  ;;  %v17333_v19 = vld [vmem:[%s29124_s7 + $0x910] sm:$0xff] }
 0x84a   :  { %20415 = vmatprep.mubr.msk.f32.mxu1 %vm7094_vm1, %v17259_v50  ;;  %21108 = vmatprep.mubr.msk.f32.mxu0 %vm7094_vm1, %v17945_v25  ;;  %v18019_v50 = vld [vmem:[%s29124_s7 + $0x1400] sm:$0xff]  ;;  %v17334_v25 = vld [vmem:[%s29124_s7 + $0x918] sm:$0xff] }
 0x84d   :  { %20416 = vmatmul.mubr.msk.f32.gmra.mrb[0].mxu1 %vm7094_vm1, %v17260_v29  ;;  %21109 = vmatmul.mubr.msk.f32.gmra.mrb[82].mxu0 %vm7094_vm1, %v17946_v21  ;;  %v18020_v29 = vld [vmem:[%s29124_s7 + $0x1408] sm:$0xff]  ;;  %v17335_v21 = vld [vmem:[%s29124_s7 + $0x920] sm:$0xff] }
 0x84e   :  { %20418 = vmatprep.mubr.msk.f32.mxu1 %vm7094_vm1, %v17261_v35  ;;  %21111 = vmatprep.mubr.msk.f32.mxu0 %vm7094_vm1, %v17947_v48  ;;  %v17336_v35 = vld [vmem:[%s29124_s7 + $0x928] sm:$0xff]  ;;  %v18022_v48 = vld [vmem:[%s29124_s7 + $0x1418] sm:$0xff] }
 0x851   :  { %20419 = vmatmul.mubr.msk.f32.gmra.mrb[2].mxu1 %vm7094_vm1, %v17262_v18  ;;  %21112 = vmatmul.mubr.msk.f32.gmra.mrb[84].mxu0 %vm7094_vm1, %v17948_v1  ;;  %v17337_v18 = vld [vmem:[%s29124_s7 + $0x930] sm:$0xff]  ;;  %v17338_v1 = vld [vmem:[%s29124_s7 + $0x938] sm:$0xff] }
 0x852   :  { %20421 = vmatprep.mubr.msk.f32.mxu1 %vm7094_vm1, %v17263_v40  ;;  %21114 = vmatprep.mubr.msk.f32.mxu0 %vm7094_vm1, %v17949_v51  ;;  %v18024_v40 = vld [vmem:[%s29124_s7 + $0x1428] sm:$0xff]  ;;  %v17339_v51 = vld [vmem:[%s29124_s7 + $0x940] sm:$0xff] }
 0x855   :  { %20422 = vmatmul.mubr.msk.f32.gmra.mrb[4].mxu1 %vm7094_vm1, %v17264_v42  ;;  %21115 = vmatmul.mubr.msk.f32.gmra.mrb[86].mxu0 %vm7094_vm1, %v17950_v17  ;;  %v17340_v42 = vld [vmem:[%s29124_s7 + $0x948] sm:$0xff]  ;;  %v18026_v17 = vld [vmem:[%s29124_s7 + $0x1438] sm:$0xff] }
 0x856   :  { %20424 = vmatprep.mubr.msk.f32.mxu1 %vm7094_vm1, %v17265_v57  ;;  %21117 = vmatprep.mubr.msk.f32.mxu0 %vm7094_vm1, %v17951_v4  ;;  %v17341_v57 = vld [vmem:[%s29124_s7 + $0x950] sm:$0xff]  ;;  %v17342_v4 = vld [vmem:[%s29124_s7 + $0x958] sm:$0xff] }
 0x859   :  { %20425 = vmatmul.mubr.msk.f32.gmra.mrb[6].mxu1 %vm7094_vm1, %v17266_v30  ;;  %21118 = vmatmul.mubr.msk.f32.gmra.mrb[88].mxu0 %vm7094_vm1, %v17952_v14  ;;  %v18028_v30 = vld [vmem:[%s29124_s7 + $0x1448] sm:$0xff]  ;;  %v17343_v14 = vld [vmem:[%s29124_s7 + $0x960] sm:$0xff] }
 0x85a   :  { %20427 = vmatprep.mubr.msk.f32.mxu1 %vm7094_vm1, %v17267_v62  ;;  %21120 = vmatprep.mubr.msk.f32.mxu0 %vm7094_vm1, %v17953_v23  ;;  %v17344_v62 = vld [vmem:[%s29124_s7 + $0x968] sm:$0xff]  ;;  %v18030_v23 = vld [vmem:[%s29124_s7 + $0x1458] sm:$0xff] }
 0x85d   :  { %20428 = vmatmul.mubr.msk.f32.gmra.mrb[8].mxu1 %vm7094_vm1, %v17268_v63  ;;  %21121 = vmatmul.mubr.msk.f32.gmra.mrb[90].mxu0 %vm7094_vm1, %v17954_v47  ;;  %v17345_v63 = vld [vmem:[%s29124_s7 + $0x970] sm:$0xff]  ;;  %v17346_v47 = vld [vmem:[%s29124_s7 + $0x978] sm:$0xff] }
 0x85e   :  { %20430 = vmatprep.mubr.msk.f32.mxu1 %vm7094_vm1, %v17269_v16  ;;  %21147 = vmatprep.mubr.msk.f32.mxu0 %vm7094_vm1, %v18003_v8  ;;  %v18032_v16 = vld [vmem:[%s29124_s7 + $0x1468] sm:$0xff]  ;;  %v17347_v8 = vld [vmem:[%s29124_s7 + $0x980] sm:$0xff] }
 0x861   :  { %20431 = vmatmul.mubr.msk.f32.gmra.mrb[10].mxu1 %vm7094_vm1, %v17270_v24  ;;  %21148 = vmatmul.mubr.msk.f32.vlgmr.msra.gmra.mrb[44].mxu0 %vm7094_vm1, %v18004_v52  ;;  %v18033_v24 = vld [vmem:[%s29124_s7 + $0x1470] sm:$0xff]  ;;  %v17348_v52 = vld [vmem:[%s29124_s7 + $0x988] sm:$0xff] }
 0x862   :  { %21814 = vmatpush3.bf16.msra.mxu0 %v25717_v61  ;;  %20433 = vmatprep.mubr.msk.f32.mxu1 %vm7094_vm1, %v17271_v28  ;;  %v18007_v61 = vld [vmem:[%s29124_s7 + $0x13a0] sm:$0xff]  ;;  %v18034_v28 = vld [vmem:[%s29124_s7 + $0x1478] sm:$0xff] }
 0x863   :  { %21816 = vmatprep.subr.bf16.mxu0 %v25757_v27  ;;  %21150 = vmatprep.mubr.msk.f32.mxu0 %vm7094_vm1, %v18005_v13  ;;  %v17349_v13 = vld [vmem:[%s29124_s7 + $0x990] sm:$0xff] }
 0x865   :  { %20434 = vmatmul.mubr.msk.f32.gmra.mrb[12].mxu1 %vm7094_vm1, %v17272_v15  ;;  %21151 = vmatmul.mubr.msk.f32.gmra.mrb[46].mxu0 %vm7094_vm1, %v18006_v54  ;;  %v18035_v15 = vld [vmem:[%s29124_s7 + $0x1480] sm:$0xff]  ;;  %v17350_v54 = vld [vmem:[%s29124_s7 + $0x998] sm:$0xff] }
 0x866   :  { %21818 = vmatpush3.bf16.msra.mxu0 %v25757_v27  ;;  %20436 = vmatprep.mubr.msk.f32.mxu1 %vm7094_vm1, %v17273_v26  ;;  %v18009_v27 = vld [vmem:[%s29124_s7 + $0x13b0] sm:$0xff]  ;;  %v18036_v26 = vld [vmem:[%s29124_s7 + $0x1488] sm:$0xff] }
 0x867   :  { %21820 = vmatprep.subr.bf16.mxu0 %v25797_v3  ;;  %21153 = vmatprep.mubr.msk.f32.mxu0 %vm7094_vm1, %v18007_v61  ;;  %v17351_v61 = vld [vmem:[%s29124_s7 + $0x9a0] sm:$0xff] }
 0x869   :  { %20437 = vmatmul.mubr.msk.f32.gmra.mrb[14].mxu1 %vm7094_vm1, %v17274_v36  ;;  %21154 = vmatmul.mubr.msk.f32.gmra.mrb[48].mxu0 %vm7094_vm1, %v18008_v43  ;;  %v18037_v36 = vld [vmem:[%s29124_s7 + $0x1490] sm:$0xff]  ;;  %v17352_v43 = vld [vmem:[%s29124_s7 + $0x9a8] sm:$0xff] }
 0x86a   :  { %21822 = vmatpush3.bf16.msra.mxu0 %v25797_v3  ;;  %20439 = vmatprep.mubr.msk.f32.mxu1 %vm7094_vm1, %v17275_v9  ;;  %v18011_v3 = vld [vmem:[%s29124_s7 + $0x13c0] sm:$0xff]  ;;  %v18038_v9 = vld [vmem:[%s29124_s7 + $0x1498] sm:$0xff] }
 0x86b   :  { %21824 = vmatprep.subr.bf16.mxu0 %v25837_v55  ;;  %21156 = vmatprep.mubr.msk.f32.mxu0 %vm7094_vm1, %v18009_v27  ;;  %v17353_v27 = vld [vmem:[%s29124_s7 + $0x9b0] sm:$0xff] }
 0x86d   :  { %20440 = vmatmul.mubr.msk.f32.gmra.mrb[16].mxu1 %vm7094_vm1, %v17276_v12  ;;  %21157 = vmatmul.mubr.msk.f32.gmra.mrb[50].mxu0 %vm7094_vm1, %v18010_v59  ;;  %v18039_v12 = vld [vmem:[%s29124_s7 + $0x14a0] sm:$0xff]  ;;  %v17354_v59 = vld [vmem:[%s29124_s7 + $0x9b8] sm:$0xff] }
 0x86e   :  { %21826 = vmatpush3.bf16.msra.mxu0 %v25837_v55  ;;  %20442 = vmatprep.mubr.msk.f32.mxu1 %vm7094_vm1, %v17277_v0  ;;  %v18013_v55 = vld [vmem:[%s29124_s7 + $0x13d0] sm:$0xff]  ;;  %v18040_v0 = vld [vmem:[%s29124_s7 + $0x14a8] sm:$0xff] }
 0x86f   :  { %21828 = vmatprep.subr.bf16.mxu0 %v25875_v5  ;;  %21159 = vmatprep.mubr.msk.f32.mxu0 %vm7094_vm1, %v18011_v3  ;;  %v17355_v3 = vld [vmem:[%s29124_s7 + $0x9c0] sm:$0xff] }
 0x871   :  { %20443 = vmatmul.mubr.msk.f32.gmra.mrb[18].mxu1 %vm7094_vm1, %v17278_v11  ;;  %21160 = vmatmul.mubr.msk.f32.gmra.mrb[52].mxu0 %vm7094_vm1, %v18012_v32  ;;  %v18041_v11 = vld [vmem:[%s29124_s7 + $0x14b0] sm:$0xff]  ;;  %v17356_v32 = vld [vmem:[%s29124_s7 + $0x9c8] sm:$0xff] }
 0x872   :  { %21830 = vmatpush3.bf16.msra.mxu0 %v25875_v5  ;;  %20445 = vmatprep.mubr.msk.f32.mxu1 %vm7094_vm1, %v17279_v31  ;;  %v18015_v5 = vld [vmem:[%s29124_s7 + $0x13e0] sm:$0xff]  ;;  %v18042_v31 = vld [vmem:[%s29124_s7 + $0x14b8] sm:$0xff] }
 0x873   :  { %21832 = vmatprep.subr.bf16.mxu0 %v25915_v10  ;;  %21162 = vmatprep.mubr.msk.f32.mxu0 %vm7094_vm1, %v18013_v55  ;;  %v17357_v55 = vld [vmem:[%s29124_s7 + $0x9d0] sm:$0xff] }
 0x875   :  { %20446 = vmatmul.mubr.msk.f32.gmra.mrb[20].mxu1 %vm7094_vm1, %v17280_v56  ;;  %21163 = vmatmul.mubr.msk.f32.gmra.mrb[54].mxu0 %vm7094_vm1, %v18014_v53  ;;  %v18043_v56 = vld [vmem:[%s29124_s7 + $0x14c0] sm:$0xff]  ;;  %v17358_v53 = vld [vmem:[%s29124_s7 + $0x9d8] sm:$0xff] }
 0x876   :  { %21834 = vmatpush3.bf16.msra.mxu0 %v25915_v10  ;;  %20448 = vmatprep.mubr.msk.f32.mxu1 %vm7094_vm1, %v17281_v37  ;;  %v18017_v10 = vld [vmem:[%s29124_s7 + $0x13f0] sm:$0xff]  ;;  %v18044_v37 = vld [vmem:[%s29124_s7 + $0x14c8] sm:$0xff] }
 0x877   :  { %21836 = vmatprep.subr.bf16.mxu0 %v25724_v41  ;;  %21165 = vmatprep.mubr.msk.f32.mxu0 %vm7094_vm1, %v18015_v5  ;;  %v17359_v5 = vld [vmem:[%s29124_s7 + $0x9e0] sm:$0xff] }
 0x879   :  { %20449 = vmatmul.mubr.msk.f32.gmra.mrb[22].mxu1 %vm7094_vm1, %v17282_v6  ;;  %21166 = vmatmul.mubr.msk.f32.gmra.mrb[56].mxu0 %vm7094_vm1, %v18016_v45  ;;  %v18045_v6 = vld [vmem:[%s29124_s7 + $0x14d0] sm:$0xff]  ;;  %v17360_v45 = vld [vmem:[%s29124_s7 + $0x9e8] sm:$0xff] }
 0x87a   :  { %20475 = vmatprep.mubr.msk.f32.mxu1 %vm7094_vm1, %v17331_v33  ;;  %21168 = vmatprep.mubr.msk.f32.mxu0 %vm7094_vm1, %v18017_v10  ;;  %v18046_v33 = vld [vmem:[%s29124_s7 + $0x14d8] sm:$0xff]  ;;  %v17361_v10 = vld [vmem:[%s29124_s7 + $0x9f0] sm:$0xff] }
 0x87d   :  { %20476 = vmatmul.mubr.msk.f32.vlgmr.msra.gmra.mrb[232].mxu1 %vm7094_vm1, %v17332_v39  ;;  %21169 = vmatmul.mubr.msk.f32.gmra.mrb[58].mxu0 %vm7094_vm1, %v18018_v2  ;;  %v18047_v39 = vld [vmem:[%s29124_s7 + $0x14e0] sm:$0xff]  ;;  %v17362_v2 = vld [vmem:[%s29124_s7 + $0x9f8] sm:$0xff] }
 0x87e   :  { %21865 = vmatpush3.bf16.msra.mxu1 %v24987_v44  ;;  %20478 = vmatprep.mubr.msk.f32.mxu1 %vm7094_vm1, %v17333_v19  ;;  %v18021_v44 = vld [vmem:[%s29124_s7 + $0x1410] sm:$0xff]  ;;  %v18048_v19 = vld [vmem:[%s29124_s7 + $0x14e8] sm:$0xff] }
 0x87f   :  { %21860 = vmatprep.subr.bf16.mxu1 %v24995_v49  ;;  %21171 = vmatprep.mubr.msk.f32.mxu0 %vm7094_vm1, %v18019_v50  ;;  %v17363_v50 = vld [vmem:[%s29124_s7 + $0xa00] sm:$0xff] }
 0x881   :  { %20479 = vmatmul.mubr.msk.f32.gmra.mrb[234].mxu1 %vm7094_vm1, %v17334_v25  ;;  %21172 = vmatmul.mubr.msk.f32.gmra.mrb[60].mxu0 %vm7094_vm1, %v18020_v29  ;;  %v18049_v25 = vld [vmem:[%s29124_s7 + $0x14f0] sm:$0xff]  ;;  %v17364_v29 = vld [vmem:[%s29124_s7 + $0xa08] sm:$0xff] }
 0x882   :  { %21866 = vmatpush3.bf16.msra.mxu1 %v24995_v49  ;;  %20481 = vmatprep.mubr.msk.f32.mxu1 %vm7094_vm1, %v17335_v21  ;;  %v18023_v49 = vld [vmem:[%s29124_s7 + $0x1420] sm:$0xff]  ;;  %v18050_v21 = vld [vmem:[%s29124_s7 + $0x14f8] sm:$0xff] }
 0x883   :  { %21861 = vmatprep.subr.bf16.mxu1 %v25006_v7  ;;  %21174 = vmatprep.mubr.msk.f32.mxu0 %vm7094_vm1, %v18021_v44  ;;  %v17365_v44 = vld [vmem:[%s29124_s7 + $0xa10] sm:$0xff] }
 0x885   :  { %20482 = vmatmul.mubr.msk.f32.gmra.mrb[236].mxu1 %vm7094_vm1, %v17336_v35  ;;  %21175 = vmatmul.mubr.msk.f32.gmra.mrb[62].mxu0 %vm7094_vm1, %v18022_v48  ;;  %v18099_v35 = vld [vmem:[%s29124_s7 + $0x1500] sm:$0xff]  ;;  %v17366_v48 = vld [vmem:[%s29124_s7 + $0xa18] sm:$0xff] }
 0x886   :  { %21867 = vmatpush3.bf16.msra.mxu1 %v25006_v7  ;;  %20484 = vmatprep.mubr.msk.f32.mxu1 %vm7094_vm1, %v17337_v18  ;;  %v18025_v7 = vld [vmem:[%s29124_s7 + $0x1430] sm:$0xff]  ;;  %v18100_v18 = vld [vmem:[%s29124_s7 + $0x1508] sm:$0xff] }
 0x887   :  { %21862 = vmatprep.subr.bf16.mxu1 %v25017_v22  ;;  %21177 = vmatprep.mubr.msk.f32.mxu0 %vm7094_vm1, %v18023_v49  ;;  %v17367_v49 = vld [vmem:[%s29124_s7 + $0xa20] sm:$0xff] }
 0x889   :  { %20485 = vmatmul.mubr.msk.f32.gmra.mrb[238].mxu1 %vm7094_vm1, %v17338_v1  ;;  %21178 = vmatmul.mubr.msk.f32.gmra.mrb[64].mxu0 %vm7094_vm1, %v18024_v40  ;;  %v18101_v1 = vld [vmem:[%s29124_s7 + $0x1510] sm:$0xff]  ;;  %v17368_v40 = vld [vmem:[%s29124_s7 + $0xa28] sm:$0xff] }
 0x88a   :  { %21868 = vmatpush3.bf16.msra.mxu1 %v25017_v22  ;;  %20487 = vmatprep.mubr.msk.f32.mxu1 %vm7094_vm1, %v17339_v51  ;;  %v18027_v22 = vld [vmem:[%s29124_s7 + $0x1440] sm:$0xff]  ;;  %v18102_v51 = vld [vmem:[%s29124_s7 + $0x1518] sm:$0xff] }
 0x88b   :  { %21863 = vmatprep.subr.bf16.mxu1 %v25043_v58  ;;  %21180 = vmatprep.mubr.msk.f32.mxu0 %vm7094_vm1, %v18025_v7  ;;  %v17369_v7 = vld [vmem:[%s29124_s7 + $0xa30] sm:$0xff] }
 0x88d   :  { %20488 = vmatmul.mubr.msk.f32.gmra.mrb[240].mxu1 %vm7094_vm1, %v17340_v42  ;;  %21181 = vmatmul.mubr.msk.f32.gmra.mrb[66].mxu0 %vm7094_vm1, %v18026_v17  ;;  %v17370_v42 = vld [vmem:[%s29124_s7 + $0xa38] sm:$0xff]  ;;  %v18104_v17 = vld [vmem:[%s29124_s7 + $0x1528] sm:$0xff] }
 0x88e   :  { %21869 = vmatpush3.bf16.msra.mxu1 %v25043_v58  ;;  %20490 = vmatprep.mubr.msk.f32.mxu1 %vm7094_vm1, %v17341_v57  ;;  %v18029_v58 = vld [vmem:[%s29124_s7 + $0x1450] sm:$0xff]  ;;  %v29129_v57 = vld [vmem:[#allocation5_spill] sm:$0xff] }
 0x88f   :  { %21864 = vmatprep.subr.bf16.mxu1 %v25069_v46  ;;  %21183 = vmatprep.mubr.msk.f32.mxu0 %vm7094_vm1, %v18027_v22  ;;  %v17371_v22 = vld [vmem:[%s29124_s7 + $0xa40] sm:$0xff] }
 0x891   :  { %20491 = vmatmul.mubr.msk.f32.gmra.mrb[242].mxu1 %vm7094_vm1, %v17342_v4  ;;  %21184 = vmatmul.mubr.msk.f32.gmra.mrb[68].mxu0 %vm7094_vm1, %v18028_v30  ;;  %v17372_v4 = vld [vmem:[%s29124_s7 + $0xa48] sm:$0xff]  ;;  %v18106_v30 = vld [vmem:[%s29124_s7 + $0x1538] sm:$0xff] }
 0x892   :  { %21870 = vmatpush3.bf16.msra.mxu1 %v25069_v46  ;;  %20493 = vmatprep.mubr.msk.f32.mxu1 %vm7094_vm1, %v17343_v14  ;;  %v18031_v46 = vld [vmem:[%s29124_s7 + $0x1460] sm:$0xff]  ;;  %v17373_v14 = vld [vmem:[%s29124_s7 + $0xa50] sm:$0xff] }
 0x893   :  { %21186 = vmatprep.mubr.msk.f32.mxu0 %vm7094_vm1, %v18029_v58  ;;  %v18107_v58 = vld [vmem:[%s29124_s7 + $0x1540] sm:$0xff] }
 0x895   :  { %20494 = vmatmul.mubr.msk.f32.gmra.mrb[244].mxu1 %vm7094_vm1, %v17344_v62  ;;  %21187 = vmatmul.mubr.msk.f32.gmra.mrb[70].mxu0 %vm7094_vm1, %v18030_v23  ;;  %v17374_v62 = vld [vmem:[%s29124_s7 + $0xa58] sm:$0xff]  ;;  %v18108_v23 = vld [vmem:[%s29124_s7 + $0x1548] sm:$0xff] }
 0x896   :  { %20496 = vmatprep.mubr.msk.f32.mxu1 %vm7094_vm1, %v17345_v63  ;;  %21189 = vmatprep.mubr.msk.f32.mxu0 %vm7094_vm1, %v18031_v46  ;;  %v17375_v63 = vld [vmem:[%s29124_s7 + $0xa60] sm:$0xff]  ;;  %v17376_v46 = vld [vmem:[%s29124_s7 + $0xa68] sm:$0xff] }
 0x899   :  { %20497 = vmatmul.mubr.msk.f32.gmra.mrb[246].mxu1 %vm7094_vm1, %v17346_v47  ;;  %21190 = vmatmul.mubr.msk.f32.gmra.mrb[72].mxu0 %vm7094_vm1, %v18032_v16  ;;  %v18110_v47 = vld [vmem:[%s29124_s7 + $0x1558] sm:$0xff]  ;;  %v17377_v16 = vld [vmem:[%s29124_s7 + $0xa70] sm:$0xff] }
 0x89a   :  { %20499 = vmatprep.mubr.msk.f32.mxu1 %vm7094_vm1, %v17347_v8  ;;  %21192 = vmatprep.mubr.msk.f32.mxu0 %vm7094_vm1, %v18033_v24  ;;  %v17378_v8 = vld [vmem:[%s29124_s7 + $0xa78] sm:$0xff]  ;;  %v18112_v24 = vld [vmem:[%s29124_s7 + $0x1568] sm:$0xff] }
 0x89d   :  { %20500 = vmatmul.mubr.msk.f32.gmra.mrb[248].mxu1 %vm7094_vm1, %v17348_v52  ;;  %21193 = vmatmul.mubr.msk.f32.gmra.mrb[74].mxu0 %vm7094_vm1, %v18034_v28  ;;  %v17439_v52 = vld [vmem:[%s29124_s7 + $0xae0] sm:$0xff]  ;;  %v17440_v28 = vld [vmem:[%s29124_s7 + $0xae8] sm:$0xff] }
 0x89e   :  { %20502 = vmatprep.mubr.msk.f32.mxu1 %vm7094_vm1, %v17349_v13  ;;  %21195 = vmatprep.mubr.msk.f32.mxu0 %vm7094_vm1, %v18035_v15  ;;  %v18114_v13 = vld [vmem:[%s29124_s7 + $0x1578] sm:$0xff]  ;;  %v17441_v15 = vld [vmem:[%s29124_s7 + $0xaf0] sm:$0xff] }
 0x8a1   :  { %20503 = vmatmul.mubr.msk.f32.gmra.mrb[250].mxu1 %vm7094_vm1, %v17350_v54  ;;  %21196 = vmatmul.mubr.msk.f32.gmra.mrb[76].mxu0 %vm7094_vm1, %v18036_v26  ;;  %v18115_v54 = vld [vmem:[%s29124_s7 + $0x1580] sm:$0xff]  ;;  %v17442_v26 = vld [vmem:[%s29124_s7 + $0xaf8] sm:$0xff] }
 0x8a2   :  { %20505 = vmatprep.mubr.msk.f32.mxu1 %vm7094_vm1, %v17351_v61  ;;  %21198 = vmatprep.mubr.msk.f32.mxu0 %vm7094_vm1, %v18037_v36  ;;  %v18116_v61 = vld [vmem:[%s29124_s7 + $0x1588] sm:$0xff]  ;;  %v17443_v36 = vld [vmem:[%s29124_s7 + $0xb00] sm:$0xff] }
 0x8a5   :  { %20506 = vmatmul.mubr.msk.f32.gmra.mrb[252].mxu1 %vm7094_vm1, %v17352_v43  ;;  %21199 = vmatmul.mubr.msk.f32.gmra.mrb[78].mxu0 %vm7094_vm1, %v18038_v9  ;;  %v18117_v43 = vld [vmem:[%s29124_s7 + $0x1590] sm:$0xff]  ;;  %v17444_v9 = vld [vmem:[%s29124_s7 + $0xb08] sm:$0xff] }
 0x8a6   :  { %20508 = vmatprep.mubr.msk.f32.mxu1 %vm7094_vm1, %v17353_v27  ;;  %21201 = vmatprep.mubr.msk.f32.mxu0 %vm7094_vm1, %v18039_v12  ;;  %v18118_v27 = vld [vmem:[%s29124_s7 + $0x1598] sm:$0xff]  ;;  %v17445_v12 = vld [vmem:[%s29124_s7 + $0xb10] sm:$0xff] }
 0x8a9   :  { %20509 = vmatmul.mubr.msk.f32.gmra.mrb[254].mxu1 %vm7094_vm1, %v17354_v59  ;;  %21202 = vmatmul.mubr.msk.f32.gmra.mrb[80].mxu0 %vm7094_vm1, %v18040_v0  ;;  %v18119_v59 = vld [vmem:[%s29124_s7 + $0x15a0] sm:$0xff]  ;;  %v17446_v0 = vld [vmem:[%s29124_s7 + $0xb18] sm:$0xff] }
 0x8aa   :  { %20511 = vmatprep.mubr.msk.f32.mxu1 %vm7094_vm1, %v17355_v3  ;;  %21204 = vmatprep.mubr.msk.f32.mxu0 %vm7094_vm1, %v18041_v11  ;;  %v18120_v3 = vld [vmem:[%s29124_s7 + $0x15a8] sm:$0xff]  ;;  %v17447_v11 = vld [vmem:[%s29124_s7 + $0xb20] sm:$0xff] }
 0x8ad   :  { %20512 = vmatmul.mubr.msk.f32.gmra.mrb[0].mxu1 %vm7094_vm1, %v17356_v32  ;;  %21205 = vmatmul.mubr.msk.f32.gmra.mrb[82].mxu0 %vm7094_vm1, %v18042_v31  ;;  %v18121_v32 = vld [vmem:[%s29124_s7 + $0x15b0] sm:$0xff]  ;;  %v17448_v31 = vld [vmem:[%s29124_s7 + $0xb28] sm:$0xff] }
 0x8ae   :  { %20514 = vmatprep.mubr.msk.f32.mxu1 %vm7094_vm1, %v17357_v55  ;;  %21207 = vmatprep.mubr.msk.f32.mxu0 %vm7094_vm1, %v18043_v56  ;;  %v18122_v55 = vld [vmem:[%s29124_s7 + $0x15b8] sm:$0xff]  ;;  %v17449_v56 = vld [vmem:[%s29124_s7 + $0xb30] sm:$0xff] }
 0x8b1   :  { %20515 = vmatmul.mubr.msk.f32.gmra.mrb[2].mxu1 %vm7094_vm1, %v17358_v53  ;;  %21208 = vmatmul.mubr.msk.f32.gmra.mrb[84].mxu0 %vm7094_vm1, %v18044_v37  ;;  %v18123_v53 = vld [vmem:[%s29124_s7 + $0x15c0] sm:$0xff]  ;;  %v17450_v37 = vld [vmem:[%s29124_s7 + $0xb38] sm:$0xff] }
 0x8b2   :  { %20517 = vmatprep.mubr.msk.f32.mxu1 %vm7094_vm1, %v17359_v5  ;;  %21210 = vmatprep.mubr.msk.f32.mxu0 %vm7094_vm1, %v18045_v6  ;;  %v18124_v5 = vld [vmem:[%s29124_s7 + $0x15c8] sm:$0xff]  ;;  %v17451_v6 = vld [vmem:[%s29124_s7 + $0xb40] sm:$0xff] }
 0x8b5   :  { %20518 = vmatmul.mubr.msk.f32.gmra.mrb[4].mxu1 %vm7094_vm1, %v17360_v45  ;;  %21211 = vmatmul.mubr.msk.f32.gmra.mrb[86].mxu0 %vm7094_vm1, %v18046_v33  ;;  %v18125_v45 = vld [vmem:[%s29124_s7 + $0x15d0] sm:$0xff]  ;;  %v17452_v33 = vld [vmem:[%s29124_s7 + $0xb48] sm:$0xff] }
 0x8b6   :  { %20520 = vmatprep.mubr.msk.f32.mxu1 %vm7094_vm1, %v17361_v10  ;;  %21213 = vmatprep.mubr.msk.f32.mxu0 %vm7094_vm1, %v18047_v39  ;;  %v18126_v10 = vld [vmem:[%s29124_s7 + $0x15d8] sm:$0xff]  ;;  %v17453_v39 = vld [vmem:[%s29124_s7 + $0xb50] sm:$0xff] }
 0x8b9   :  { %20521 = vmatmul.mubr.msk.f32.gmra.mrb[6].mxu1 %vm7094_vm1, %v17362_v2  ;;  %21214 = vmatmul.mubr.msk.f32.gmra.mrb[88].mxu0 %vm7094_vm1, %v18048_v19  ;;  %v18127_v2 = vld [vmem:[%s29124_s7 + $0x15e0] sm:$0xff]  ;;  %v17454_v19 = vld [vmem:[%s29124_s7 + $0xb58] sm:$0xff] }
 0x8ba   :  { %20523 = vmatprep.mubr.msk.f32.mxu1 %vm7094_vm1, %v17363_v50  ;;  %21216 = vmatprep.mubr.msk.f32.mxu0 %vm7094_vm1, %v18049_v25  ;;  %v18128_v50 = vld [vmem:[%s29124_s7 + $0x15e8] sm:$0xff]  ;;  %v17455_v25 = vld [vmem:[%s29124_s7 + $0xb60] sm:$0xff] }
 0x8bd   :  { %20524 = vmatmul.mubr.msk.f32.gmra.mrb[8].mxu1 %vm7094_vm1, %v17364_v29  ;;  %21217 = vmatmul.mubr.msk.f32.gmra.mrb[90].mxu0 %vm7094_vm1, %v18050_v21  ;;  %v18129_v29 = vld [vmem:[%s29124_s7 + $0x15f0] sm:$0xff]  ;;  %v17456_v21 = vld [vmem:[%s29124_s7 + $0xb68] sm:$0xff] }
 0x8be   :  { %20526 = vmatprep.mubr.msk.f32.mxu1 %vm7094_vm1, %v17365_v44  ;;  %21243 = vmatprep.mubr.msk.f32.mxu0 %vm7094_vm1, %v18099_v35  ;;  %v18130_v44 = vld [vmem:[%s29124_s7 + $0x15f8] sm:$0xff]  ;;  %v17457_v35 = vld [vmem:[%s29124_s7 + $0xb70] sm:$0xff] }
 0x8c1   :  { %20527 = vmatmul.mubr.msk.f32.gmra.mrb[10].mxu1 %vm7094_vm1, %v17366_v48  ;;  %21244 = vmatmul.mubr.msk.f32.vlgmr.msra.gmra.mrb[44].mxu0 %vm7094_vm1, %v18100_v18  ;;  %v18131_v48 = vld [vmem:[%s29124_s7 + $0x1600] sm:$0xff]  ;;  %v17458_v18 = vld [vmem:[%s29124_s7 + $0xb78] sm:$0xff] }
 0x8c2   :  { %21838 = vmatpush3.bf16.msra.mxu0 %v25724_v41  ;;  %20529 = vmatprep.mubr.msk.f32.mxu1 %vm7094_vm1, %v17367_v49  ;;  %v18103_v41 = vld [vmem:[%s29124_s7 + $0x1520] sm:$0xff]  ;;  %v18132_v49 = vld [vmem:[%s29124_s7 + $0x1608] sm:$0xff] }
 0x8c3   :  { %21840 = vmatprep.subr.bf16.mxu0 %v25764_v60  ;;  %21246 = vmatprep.mubr.msk.f32.mxu0 %vm7094_vm1, %v18101_v1  ;;  %v17459_v1 = vld [vmem:[%s29124_s7 + $0xb80] sm:$0xff] }
 0x8c5   :  { %20530 = vmatmul.mubr.msk.f32.gmra.mrb[12].mxu1 %vm7094_vm1, %v17368_v40  ;;  %21247 = vmatmul.mubr.msk.f32.gmra.mrb[46].mxu0 %vm7094_vm1, %v18102_v51  ;;  %v18133_v40 = vld [vmem:[%s29124_s7 + $0x1610] sm:$0xff]  ;;  %v17460_v51 = vld [vmem:[%s29124_s7 + $0xb88] sm:$0xff] }
 0x8c6   :  { %21842 = vmatpush3.bf16.msra.mxu0 %v25764_v60  ;;  %20532 = vmatprep.mubr.msk.f32.mxu1 %vm7094_vm1, %v17369_v7  ;;  %v18105_v60 = vld [vmem:[%s29124_s7 + $0x1530] sm:$0xff]  ;;  %v18134_v7 = vld [vmem:[%s29124_s7 + $0x1618] sm:$0xff] }
 0x8c7   :  { %21844 = vmatprep.subr.bf16.mxu0 %v29129_v57  ;;  %21249 = vmatprep.mubr.msk.f32.mxu0 %vm7094_vm1, %v18103_v41  ;;  %v17461_v41 = vld [vmem:[%s29124_s7 + $0xb90] sm:$0xff] }
 0x8c9   :  { %20533 = vmatmul.mubr.msk.f32.gmra.mrb[14].mxu1 %vm7094_vm1, %v17370_v42  ;;  %21250 = vmatmul.mubr.msk.f32.gmra.mrb[48].mxu0 %vm7094_vm1, %v18104_v17  ;;  %v18135_v42 = vld [vmem:[%s29124_s7 + $0x1620] sm:$0xff]  ;;  %v17462_v17 = vld [vmem:[%s29124_s7 + $0xb98] sm:$0xff] }
 0x8ca   :  { %21846 = vmatpush3.bf16.msra.mxu0 %v29129_v57  ;;  %20535 = vmatprep.mubr.msk.f32.mxu1 %vm7094_vm1, %v17371_v22  ;;  %v18136_v57 = vld [vmem:[%s29124_s7 + $0x1628] sm:$0xff]  ;;  %v17463_v22 = vld [vmem:[%s29124_s7 + $0xba0] sm:$0xff] }
 0x8cb   :  { %21848 = vmatprep.subr.bf16.mxu0 %v25842_v38  ;;  %21252 = vmatprep.mubr.msk.f32.mxu0 %vm7094_vm1, %v18105_v60  ;;  %v18137_v60 = vld [vmem:[%s29124_s7 + $0x1630] sm:$0xff] }
 0x8cd   :  { %20536 = vmatmul.mubr.msk.f32.gmra.mrb[16].mxu1 %vm7094_vm1, %v17372_v4  ;;  %21253 = vmatmul.mubr.msk.f32.gmra.mrb[50].mxu0 %vm7094_vm1, %v18106_v30  ;;  %v17464_v4 = vld [vmem:[%s29124_s7 + $0xba8] sm:$0xff]  ;;  %v18138_v30 = vld [vmem:[%s29124_s7 + $0x1638] sm:$0xff] }
 0x8ce   :  { %21850 = vmatpush3.bf16.msra.mxu0 %v25842_v38  ;;  %20538 = vmatprep.mubr.msk.f32.mxu1 %vm7094_vm1, %v17373_v14  ;;  %v18109_v38 = vld [vmem:[%s29124_s7 + $0x1550] sm:$0xff] }
 0x8cf   :  { %21852 = vmatprep.subr.bf16.mxu0 %v25882_v20  ;;  %21255 = vmatprep.mubr.msk.f32.mxu0 %vm7094_vm1, %v18107_v58  ;;  %v17465_v14 = vld [vmem:[%s29124_s7 + $0xbb0] sm:$0xff]  ;;  %v18139_v58 = vld [vmem:[%s29124_s7 + $0x1640] sm:$0xff] }
 0x8d1   :  { %20539 = vmatmul.mubr.msk.f32.gmra.mrb[18].mxu1 %vm7094_vm1, %v17374_v62  ;;  %21256 = vmatmul.mubr.msk.f32.gmra.mrb[52].mxu0 %vm7094_vm1, %v18108_v23  ;;  %v17466_v62 = vld [vmem:[%s29124_s7 + $0xbb8] sm:$0xff]  ;;  %v18140_v23 = vld [vmem:[%s29124_s7 + $0x1648] sm:$0xff] }
 0x8d2   :  { %21854 = vmatpush3.bf16.msra.mxu0 %v25882_v20  ;;  %20541 = vmatprep.mubr.msk.f32.mxu1 %vm7094_vm1, %v17375_v63  ;;  %v18111_v20 = vld [vmem:[%s29124_s7 + $0x1560] sm:$0xff] }
 0x8d3   :  { %21856 = vmatprep.subr.bf16.mxu0 %v25922_v34  ;;  %21258 = vmatprep.mubr.msk.f32.mxu0 %vm7094_vm1, %v18109_v38  ;;  %v17467_v63 = vld [vmem:[%s29124_s7 + $0xbc0] sm:$0xff]  ;;  %v18141_v38 = vld [vmem:[%s29124_s7 + $0x1650] sm:$0xff] }
 0x8d5   :  { %20542 = vmatmul.mubr.msk.f32.gmra.mrb[20].mxu1 %vm7094_vm1, %v17376_v46  ;;  %21259 = vmatmul.mubr.msk.f32.gmra.mrb[54].mxu0 %vm7094_vm1, %v18110_v47  ;;  %v17468_v46 = vld [vmem:[%s29124_s7 + $0xbc8] sm:$0xff]  ;;  %v18142_v47 = vld [vmem:[%s29124_s7 + $0x1658] sm:$0xff] }
 0x8d6   :  { %21858 = vmatpush3.bf16.msra.mxu0 %v25922_v34  ;;  %20544 = vmatprep.mubr.msk.f32.mxu1 %vm7094_vm1, %v17377_v16  ;;  %v18113_v34 = vld [vmem:[%s29124_s7 + $0x1570] sm:$0xff] }
 0x8d7   :  { %21261 = vmatprep.mubr.msk.f32.mxu0 %vm7094_vm1, %v18111_v20  ;;  %v17469_v16 = vld [vmem:[%s29124_s7 + $0xbd0] sm:$0xff]  ;;  %v18143_v20 = vld [vmem:[%s29124_s7 + $0x1660] sm:$0xff] }
 0x8d9   :  { %20545 = vmatmul.mubr.msk.f32.gmra.mrb[22].mxu1 %vm7094_vm1, %v17378_v8  ;;  %21262 = vmatmul.mubr.msk.f32.gmra.mrb[56].mxu0 %vm7094_vm1, %v18112_v24  ;;  %v17470_v8 = vld [vmem:[%s29124_s7 + $0xbd8] sm:$0xff]  ;;  %v18144_v24 = vld [vmem:[%s29124_s7 + $0x1668] sm:$0xff] }
 0x8da   :  { %20589 = vmatprep.mubr.msk.f32.mxu1 %vm7094_vm1, %v17439_v52  ;;  %21264 = vmatprep.mubr.msk.f32.mxu0 %vm7094_vm1, %v18113_v34  ;;  %v17471_v52 = vld [vmem:[%s29124_s7 + $0xbe0] sm:$0xff]  ;;  %v18145_v34 = vld [vmem:[%s29124_s7 + $0x1670] sm:$0xff] }
 0x8dd   :  { %20590 = vmatmul.mubr.msk.f32.vlgmr.msra.gmra.mrb[244].mxu1 %vm7094_vm1, %v17440_v28  ;;  %21265 = vmatmul.mubr.msk.f32.gmra.mrb[58].mxu0 %vm7094_vm1, %v18114_v13  ;;  %v17472_v28 = vld [vmem:[%s29124_s7 + $0xbe8] sm:$0xff]  ;;  %v18146_v13 = vld [vmem:[%s29124_s7 + $0x1678] sm:$0xff] }
 0x8de   :  { %20592 = vmatprep.mubr.msk.f32.mxu1 %vm7094_vm1, %v17441_v15  ;;  %21267 = vmatprep.mubr.msk.f32.mxu0 %vm7094_vm1, %v18115_v54  ;;  %v17473_v15 = vld [vmem:[%s29124_s7 + $0xbf0] sm:$0xff]  ;;  %v18195_v54 = vld [vmem:[%s29124_s7 + $0x1680] sm:$0xff] }
 0x8e1   :  { %20593 = vmatmul.mubr.msk.f32.gmra.mrb[246].mxu1 %vm7094_vm1, %v17442_v26  ;;  %21268 = vmatmul.mubr.msk.f32.gmra.mrb[60].mxu0 %vm7094_vm1, %v18116_v61  ;;  %v17474_v26 = vld [vmem:[%s29124_s7 + $0xbf8] sm:$0xff]  ;;  %v18196_v61 = vld [vmem:[%s29124_s7 + $0x1688] sm:$0xff] }
 0x8e2   :  { %20595 = vmatprep.mubr.msk.f32.mxu1 %vm7094_vm1, %v17443_v36  ;;  %21270 = vmatprep.mubr.msk.f32.mxu0 %vm7094_vm1, %v18117_v43  ;;  %v18197_v36 = vld [vmem:[%s29124_s7 + $0x1690] sm:$0xff]  ;;  %v18198_v43 = vld [vmem:[%s29124_s7 + $0x1698] sm:$0xff] }
 0x8e5   :  { %20596 = vmatmul.mubr.msk.f32.gmra.mrb[248].mxu1 %vm7094_vm1, %v17444_v9  ;;  %21271 = vmatmul.mubr.msk.f32.gmra.mrb[62].mxu0 %vm7094_vm1, %v18118_v27  ;;  %v18199_v9 = vld [vmem:[%s29124_s7 + $0x16a0] sm:$0xff]  ;;  %v18200_v27 = vld [vmem:[%s29124_s7 + $0x16a8] sm:$0xff] }
 0x8e6   :  { %20598 = vmatprep.mubr.msk.f32.mxu1 %vm7094_vm1, %v17445_v12  ;;  %21273 = vmatprep.mubr.msk.f32.mxu0 %vm7094_vm1, %v18119_v59  ;;  %v18201_v12 = vld [vmem:[%s29124_s7 + $0x16b0] sm:$0xff]  ;;  %v18202_v59 = vld [vmem:[%s29124_s7 + $0x16b8] sm:$0xff] }
 0x8e9   :  { %20599 = vmatmul.mubr.msk.f32.gmra.mrb[250].mxu1 %vm7094_vm1, %v17446_v0  ;;  %21274 = vmatmul.mubr.msk.f32.gmra.mrb[64].mxu0 %vm7094_vm1, %v18120_v3  ;;  %v18203_v0 = vld [vmem:[%s29124_s7 + $0x16c0] sm:$0xff]  ;;  %v18204_v3 = vld [vmem:[%s29124_s7 + $0x16c8] sm:$0xff] }
 0x8ea   :  { %20601 = vmatprep.mubr.msk.f32.mxu1 %vm7094_vm1, %v17447_v11  ;;  %21276 = vmatprep.mubr.msk.f32.mxu0 %vm7094_vm1, %v18121_v32  ;;  %v18205_v11 = vld [vmem:[%s29124_s7 + $0x16d0] sm:$0xff]  ;;  %v18206_v32 = vld [vmem:[%s29124_s7 + $0x16d8] sm:$0xff] }
 0x8ed   :  { %20602 = vmatmul.mubr.msk.f32.gmra.mrb[252].mxu1 %vm7094_vm1, %v17448_v31  ;;  %21277 = vmatmul.mubr.msk.f32.gmra.mrb[66].mxu0 %vm7094_vm1, %v18122_v55  ;;  %v18207_v31 = vld [vmem:[%s29124_s7 + $0x16e0] sm:$0xff]  ;;  %v18208_v55 = vld [vmem:[%s29124_s7 + $0x16e8] sm:$0xff] }
 0x8ee   :  { %20604 = vmatprep.mubr.msk.f32.mxu1 %vm7094_vm1, %v17449_v56  ;;  %21279 = vmatprep.mubr.msk.f32.mxu0 %vm7094_vm1, %v18123_v53  ;;  %v18209_v56 = vld [vmem:[%s29124_s7 + $0x16f0] sm:$0xff]  ;;  %v18210_v53 = vld [vmem:[%s29124_s7 + $0x16f8] sm:$0xff] }
 0x8f1   :  { %20605 = vmatmul.mubr.msk.f32.gmra.mrb[254].mxu1 %vm7094_vm1, %v17450_v37  ;;  %21280 = vmatmul.mubr.msk.f32.gmra.mrb[68].mxu0 %vm7094_vm1, %v18124_v5  ;;  %v18211_v37 = vld [vmem:[%s29124_s7 + $0x1700] sm:$0xff]  ;;  %v18212_v5 = vld [vmem:[%s29124_s7 + $0x1708] sm:$0xff] }
 0x8f2   :  { %20607 = vmatprep.mubr.msk.f32.mxu1 %vm7094_vm1, %v17451_v6  ;;  %21282 = vmatprep.mubr.msk.f32.mxu0 %vm7094_vm1, %v18125_v45  ;;  %v18213_v6 = vld [vmem:[%s29124_s7 + $0x1710] sm:$0xff]  ;;  %v18214_v45 = vld [vmem:[%s29124_s7 + $0x1718] sm:$0xff] }
 0x8f5   :  { %20608 = vmatmul.mubr.msk.f32.gmra.mrb[0].mxu1 %vm7094_vm1, %v17452_v33  ;;  %21283 = vmatmul.mubr.msk.f32.gmra.mrb[70].mxu0 %vm7094_vm1, %v18126_v10  ;;  %v18215_v33 = vld [vmem:[%s29124_s7 + $0x1720] sm:$0xff]  ;;  %v18216_v10 = vld [vmem:[%s29124_s7 + $0x1728] sm:$0xff] }
 0x8f6   :  { %20610 = vmatprep.mubr.msk.f32.mxu1 %vm7094_vm1, %v17453_v39  ;;  %21285 = vmatprep.mubr.msk.f32.mxu0 %vm7094_vm1, %v18127_v2  ;;  %v18217_v39 = vld [vmem:[%s29124_s7 + $0x1730] sm:$0xff]  ;;  %v18218_v2 = vld [vmem:[%s29124_s7 + $0x1738] sm:$0xff] }
 0x8f9   :  { %20611 = vmatmul.mubr.msk.f32.gmra.mrb[2].mxu1 %vm7094_vm1, %v17454_v19  ;;  %21286 = vmatmul.mubr.msk.f32.gmra.mrb[72].mxu0 %vm7094_vm1, %v18128_v50  ;;  %v18219_v19 = vld [vmem:[%s29124_s7 + $0x1740] sm:$0xff]  ;;  %v18220_v50 = vld [vmem:[%s29124_s7 + $0x1748] sm:$0xff] }
 0x8fa   :  { %20613 = vmatprep.mubr.msk.f32.mxu1 %vm7094_vm1, %v17455_v25  ;;  %21288 = vmatprep.mubr.msk.f32.mxu0 %vm7094_vm1, %v18129_v29  ;;  %v18221_v25 = vld [vmem:[%s29124_s7 + $0x1750] sm:$0xff] }
 0x8fd   :  { %20614 = vmatmul.mubr.msk.f32.gmra.mrb[4].mxu1 %vm7094_vm1, %v17456_v21  ;;  %21289 = vmatmul.mubr.msk.f32.gmra.mrb[74].mxu0 %vm7094_vm1, %v18130_v44  ;;  %v18222_v44 = vld [vmem:[%s29124_s7 + $0x1758] sm:$0xff] }
 0x8fe   :  { %20616 = vmatprep.mubr.msk.f32.mxu1 %vm7094_vm1, %v17457_v35  ;;  %21291 = vmatprep.mubr.msk.f32.mxu0 %vm7094_vm1, %v18131_v48  ;;  %v18223_v35 = vld [vmem:[%s29124_s7 + $0x1760] sm:$0xff] }
 0x901   :  { %20617 = vmatmul.mubr.msk.f32.gmra.mrb[6].mxu1 %vm7094_vm1, %v17458_v18  ;;  %21292 = vmatmul.mubr.msk.f32.gmra.mrb[76].mxu0 %vm7094_vm1, %v18132_v49  ;;  %v18224_v49 = vld [vmem:[%s29124_s7 + $0x1768] sm:$0xff] }
 0x902   :  { %20619 = vmatprep.mubr.msk.f32.mxu1 %vm7094_vm1, %v17459_v1  ;;  %21294 = vmatprep.mubr.msk.f32.mxu0 %vm7094_vm1, %v18133_v40  ;;  %v18225_v1 = vld [vmem:[%s29124_s7 + $0x1770] sm:$0xff] }
 0x905   :  { %20620 = vmatmul.mubr.msk.f32.gmra.mrb[8].mxu1 %vm7094_vm1, %v17460_v51  ;;  %21295 = vmatmul.mubr.msk.f32.gmra.mrb[78].mxu0 %vm7094_vm1, %v18134_v7  ;;  %v18226_v7 = vld [vmem:[%s29124_s7 + $0x1778] sm:$0xff] }
 0x906   :  { %20622 = vmatprep.mubr.msk.f32.mxu1 %vm7094_vm1, %v17461_v41  ;;  %21297 = vmatprep.mubr.msk.f32.mxu0 %vm7094_vm1, %v18135_v42  ;;  %v18227_v41 = vld [vmem:[%s29124_s7 + $0x1780] sm:$0xff] }
 0x909   :  { %20623 = vmatmul.mubr.msk.f32.gmra.mrb[10].mxu1 %vm7094_vm1, %v17462_v17  ;;  %21298 = vmatmul.mubr.msk.f32.gmra.mrb[80].mxu0 %vm7094_vm1, %v18136_v57  ;;  %v18228_v57 = vld [vmem:[%s29124_s7 + $0x1788] sm:$0xff] }
 0x90a   :  { %20625 = vmatprep.mubr.msk.f32.mxu1 %vm7094_vm1, %v17463_v22  ;;  %21300 = vmatprep.mubr.msk.f32.mxu0 %vm7094_vm1, %v18137_v60  ;;  %v18229_v22 = vld [vmem:[%s29124_s7 + $0x1790] sm:$0xff] }
 0x90d   :  { %20626 = vmatmul.mubr.msk.f32.gmra.mrb[12].mxu1 %vm7094_vm1, %v17464_v4  ;;  %21301 = vmatmul.mubr.msk.f32.gmra.mrb[82].mxu0 %vm7094_vm1, %v18138_v30  ;;  %v18230_v30 = vld [vmem:[%s29124_s7 + $0x1798] sm:$0xff] }
 0x90e   :  { %20628 = vmatprep.mubr.msk.f32.mxu1 %vm7094_vm1, %v17465_v14  ;;  %21303 = vmatprep.mubr.msk.f32.mxu0 %vm7094_vm1, %v18139_v58  ;;  %v18231_v14 = vld [vmem:[%s29124_s7 + $0x17a0] sm:$0xff] }
 0x911   :  { %20629 = vmatmul.mubr.msk.f32.gmra.mrb[14].mxu1 %vm7094_vm1, %v17466_v62  ;;  %21304 = vmatmul.mubr.msk.f32.gmra.mrb[84].mxu0 %vm7094_vm1, %v18140_v23  ;;  %v18232_v23 = vld [vmem:[%s29124_s7 + $0x17a8] sm:$0xff] }
 0x912   :  { %20631 = vmatprep.mubr.msk.f32.mxu1 %vm7094_vm1, %v17467_v63  ;;  %21306 = vmatprep.mubr.msk.f32.mxu0 %vm7094_vm1, %v18141_v38  ;;  %v18233_v63 = vld [vmem:[%s29124_s7 + $0x17b0] sm:$0xff]  ;;  %v18234_v38 = vld [vmem:[%s29124_s7 + $0x17b8] sm:$0xff] }
 0x915   :  { %20632 = vmatmul.mubr.msk.f32.gmra.mrb[16].mxu1 %vm7094_vm1, %v17468_v46  ;;  %21307 = vmatmul.mubr.msk.f32.gmra.mrb[86].mxu0 %vm7094_vm1, %v18142_v47  ;;  %v18235_v46 = vld [vmem:[%s29124_s7 + $0x17c0] sm:$0xff]  ;;  %v18236_v47 = vld [vmem:[%s29124_s7 + $0x17c8] sm:$0xff] }
 0x916   :  { %20634 = vmatprep.mubr.msk.f32.mxu1 %vm7094_vm1, %v17469_v16  ;;  %21309 = vmatprep.mubr.msk.f32.mxu0 %vm7094_vm1, %v18143_v20  ;;  %v18237_v16 = vld [vmem:[%s29124_s7 + $0x17d0] sm:$0xff]  ;;  %v18238_v20 = vld [vmem:[%s29124_s7 + $0x17d8] sm:$0xff] }
 0x919   :  { %20635 = vmatmul.mubr.msk.f32.gmra.mrb[18].mxu1 %vm7094_vm1, %v17470_v8  ;;  %21310 = vmatmul.mubr.msk.f32.gmra.mrb[88].mxu0 %vm7094_vm1, %v18144_v24  ;;  %v18239_v8 = vld [vmem:[%s29124_s7 + $0x17e0] sm:$0xff]  ;;  %v18240_v24 = vld [vmem:[%s29124_s7 + $0x17e8] sm:$0xff] }
 0x91a   :  { %20637 = vmatprep.mubr.msk.f32.mxu1 %vm7094_vm1, %v17471_v52  ;;  %21312 = vmatprep.mubr.msk.f32.mxu0 %vm7094_vm1, %v18145_v34  ;;  %v18241_v52 = vld [vmem:[%s29124_s7 + $0x17f0] sm:$0xff]  ;;  %v18242_v34 = vld [vmem:[%s29124_s7 + $0x17f8] sm:$0xff] }
 0x91d   :  { %20638 = vmatmul.mubr.msk.f32.gmra.mrb[20].mxu1 %vm7094_vm1, %v17472_v28  ;;  %21313 = vmatmul.mubr.msk.f32.gmra.mrb[90].mxu0 %vm7094_vm1, %v18146_v13 }
 0x91e   :  { %20640 = vmatprep.mubr.msk.f32.mxu1 %vm7094_vm1, %v17473_v15  ;;  %21339 = vmatprep.mubr.msk.f32.mxu0 %vm7094_vm1, %v18195_v54 }
 0x921   :  { %20641 = vmatmul.mubr.msk.f32.gmra.mrb[22].mxu1 %vm7094_vm1, %v17474_v26  ;;  %21340 = vmatmul.mubr.msk.f32.vlgmr.msra.gmra.mrb[44].mxu0 %vm7094_vm1, %v18196_v61 }
 0x922   :  { %21342 = vmatprep.mubr.msk.f32.mxu0 %vm7094_vm1, %v18197_v36 }
 0x925   :  { %21343 = vmatmul.mubr.msk.f32.gmra.mrb[46].mxu0 %vm7094_vm1, %v18198_v43 }
 0x926   :  { %21345 = vmatprep.mubr.msk.f32.mxu0 %vm7094_vm1, %v18199_v9 }
 0x929   :  { %21346 = vmatmul.mubr.msk.f32.gmra.mrb[48].mxu0 %vm7094_vm1, %v18200_v27 }
 0x92a   :  { %21348 = vmatprep.mubr.msk.f32.mxu0 %vm7094_vm1, %v18201_v12 }
 0x92d   :  { %21349 = vmatmul.mubr.msk.f32.gmra.mrb[50].mxu0 %vm7094_vm1, %v18202_v59 }
 0x92e   :  { %21351 = vmatprep.mubr.msk.f32.mxu0 %vm7094_vm1, %v18203_v0 }
 0x931   :  { %21352 = vmatmul.mubr.msk.f32.gmra.mrb[52].mxu0 %vm7094_vm1, %v18204_v3 }
 0x932   :  { %21354 = vmatprep.mubr.msk.f32.mxu0 %vm7094_vm1, %v18205_v11 }
 0x935   :  { %21355 = vmatmul.mubr.msk.f32.gmra.mrb[54].mxu0 %vm7094_vm1, %v18206_v32 }
 0x936   :  { %21357 = vmatprep.mubr.msk.f32.mxu0 %vm7094_vm1, %v18207_v31 }
 0x939   :  { %21358 = vmatmul.mubr.msk.f32.gmra.mrb[56].mxu0 %vm7094_vm1, %v18208_v55 }
 0x93a   :  { %21360 = vmatprep.mubr.msk.f32.mxu0 %vm7094_vm1, %v18209_v56 }
 0x93d   :  { %21361 = vmatmul.mubr.msk.f32.gmra.mrb[58].mxu0 %vm7094_vm1, %v18210_v53 }
 0x93e   :  { %21363 = vmatprep.mubr.msk.f32.mxu0 %vm7094_vm1, %v18211_v37 }
 0x941   :  { %21364 = vmatmul.mubr.msk.f32.gmra.mrb[60].mxu0 %vm7094_vm1, %v18212_v5 }
 0x942   :  { %21366 = vmatprep.mubr.msk.f32.mxu0 %vm7094_vm1, %v18213_v6 }
 0x945   :  { %21367 = vmatmul.mubr.msk.f32.gmra.mrb[62].mxu0 %vm7094_vm1, %v18214_v45 }
 0x946   :  { %21369 = vmatprep.mubr.msk.f32.mxu0 %vm7094_vm1, %v18215_v33 }
 0x949   :  { %21370 = vmatmul.mubr.msk.f32.gmra.mrb[64].mxu0 %vm7094_vm1, %v18216_v10 }
 0x94a   :  { %21372 = vmatprep.mubr.msk.f32.mxu0 %vm7094_vm1, %v18217_v39 }
 0x94d   :  { %21373 = vmatmul.mubr.msk.f32.gmra.mrb[66].mxu0 %vm7094_vm1, %v18218_v2 }
 0x94e   :  { %21375 = vmatprep.mubr.msk.f32.mxu0 %vm7094_vm1, %v18219_v19 }
 0x950   :  { %v28259_v29 = vpop.f32.mrb[232].mxu1 }
 0x951   :  { %v28261_v21 = vpop.f32.mrb[233].mxu1  ;;  %21376 = vmatmul.mubr.msk.f32.gmra.mrb[68].mxu0 %vm7094_vm1, %v18220_v50 }
 0x952   :  { %21378 = vmatprep.mubr.msk.f32.mxu0 %vm7094_vm1, %v18221_v25 }
 0x954   :  { %v28271_v48 = vpop.f32.mrb[234].mxu1 }
 0x955   :  { %v28273_v18 = vpop.f32.mrb[235].mxu1  ;;  %21379 = vmatmul.mubr.msk.f32.gmra.mrb[70].mxu0 %vm7094_vm1, %v18222_v44 }
 0x956   :  { %21381 = vmatprep.mubr.msk.f32.mxu0 %vm7094_vm1, %v18223_v35  ;;  %v29130_v35 = vlaneseq }
 0x958   :  { %v28283_v40 = vpop.f32.mrb[236].mxu1 }
 0x959   :  { %v28285_v51 = vpop.f32.mrb[237].mxu1  ;;  %21382 = vmatmul.mubr.msk.f32.gmra.mrb[72].mxu0 %vm7094_vm1, %v18224_v49  ;;  %v28434_v49 = vand.u32 127, %v29130_v35 }
 0x95a   :  { %21384 = vmatprep.mubr.msk.f32.mxu0 %vm7094_vm1, %v18225_v1 }
 0x95b   :  { %vm15639_vm2 = vcmp.lt.s32.totalorder %v28434_v49, 4 }
 0x95c   :  { %v28295_v42 = vpop.f32.mrb[238].mxu1 }
 0x95d   :  { %v28297_v17 = vpop.f32.mrb[239].mxu1  ;;  %21385 = vmatmul.mubr.msk.f32.gmra.mrb[74].mxu0 %vm7094_vm1, %v18226_v7 }
 0x95e   :  { %21387 = vmatprep.mubr.msk.f32.mxu0 %vm7094_vm1, %v18227_v41 }
 0x960   :  { %v28307_v60 = vpop.f32.mrb[240].mxu1 }
 0x961   :  { %v28309_v4 = vpop.f32.mrb[241].mxu1  ;;  %21388 = vmatmul.mubr.msk.f32.gmra.mrb[76].mxu0 %vm7094_vm1, %v18228_v57 }
 0x962   :  { %21390 = vmatprep.mubr.msk.f32.mxu0 %vm7094_vm1, %v18229_v22 }
 0x964   :  { %v28319_v58 = vpop.f32.mrb[242].mxu1 }
 0x965   :  { %v28321_v62 = vpop.f32.mrb[243].mxu1  ;;  %21391 = vmatmul.mubr.msk.f32.gmra.mrb[78].mxu0 %vm7094_vm1, %v18230_v30 }
 0x966   :  { %21393 = vmatprep.mubr.msk.f32.mxu0 %vm7094_vm1, %v18231_v14 }
 0x969   :  { %21394 = vmatmul.mubr.msk.f32.gmra.mrb[80].mxu0 %vm7094_vm1, %v18232_v23 }
 0x96a   :  { %21396 = vmatprep.mubr.msk.f32.mxu0 %vm7094_vm1, %v18233_v63 }
 0x96d   :  { %21397 = vmatmul.mubr.msk.f32.gmra.mrb[82].mxu0 %vm7094_vm1, %v18234_v38 }
 0x96e   :  { %21399 = vmatprep.mubr.msk.f32.mxu0 %vm7094_vm1, %v18235_v46 }
 0x971   :  { %21400 = vmatmul.mubr.msk.f32.gmra.mrb[84].mxu0 %vm7094_vm1, %v18236_v47 }
 0x972   :  { %21402 = vmatprep.mubr.msk.f32.mxu0 %vm7094_vm1, %v18237_v16 }
 0x975   :  { %21403 = vmatmul.mubr.msk.f32.gmra.mrb[86].mxu0 %vm7094_vm1, %v18238_v20 }
 0x976   :  { %21405 = vmatprep.mubr.msk.f32.mxu0 %vm7094_vm1, %v18239_v8 }
 0x979   :  { %21406 = vmatmul.mubr.msk.f32.gmra.mrb[88].mxu0 %vm7094_vm1, %v18240_v24 }
 0x97a   :  { %21408 = vmatprep.mubr.msk.f32.mxu0 %vm7094_vm1, %v18241_v52 }
 0x97d   :  { %21409 = vmatmul.mubr.msk.f32.gmra.mrb[90].mxu0 %vm7094_vm1, %v18242_v34 }
 0x9b0   :  { %v28369_v28 = vpop.f32.mrb[244].mxu1 }
 0x9b1   :  { %v28371_v13 = vpop.f32.mrb[245].mxu1 }
 0x9b4   :  { %v28373_v15 = vpop.f32.mrb[246].mxu1 }
 0x9b5   :  { %v28375_v54 = vpop.f32.mrb[247].mxu1 }
 0x9b8   :  { %v28377_v26 = vpop.f32.mrb[248].mxu1 }
 0x9b9   :  { %v28379_v61 = vpop.f32.mrb[249].mxu1 }
 0x9bc   :  { %v28381_v36 = vpop.f32.mrb[250].mxu1 }
 0x9bd   :  { %v28383_v43 = vpop.f32.mrb[251].mxu1 }
 0x9c0   :  { %v28385_v9 = vpop.f32.mrb[252].mxu1 }
 0x9c1   :  { %v28387_v27 = vpop.f32.mrb[253].mxu1 }
 0x9c4   :  { %v28389_v12 = vpop.f32.mrb[254].mxu1 }
 0x9c5   :  { %v28391_v59 = vpop.f32.mrb[255].mxu1 }
 0x9c8   :  { %v28393_v0 = vpop.f32.mrb[0].mxu1 }
 0x9c9   :  { %v28395_v3 = vpop.f32.mrb[1].mxu1 }
 0x9cc   :  { %v28397_v11 = vpop.f32.mrb[2].mxu1 }
 0x9cd   :  { %v28399_v32 = vpop.f32.mrb[3].mxu1 }
 0x9d0   :  { %v28401_v31 = vpop.f32.mrb[4].mxu1 }
 0x9d1   :  { %v28403_v55 = vpop.f32.mrb[5].mxu1 }
 0x9d4   :  { %v28405_v56 = vpop.f32.mrb[6].mxu1 }
 0x9d5   :  { %v28407_v53 = vpop.f32.mrb[7].mxu1 }
 0x9d8   :  { %v28409_v37 = vpop.f32.mrb[8].mxu1 }
 0x9d9   :  { %v28411_v5 = vpop.f32.mrb[9].mxu1 }
 0x9dc   :  { %v28413_v6 = vpop.f32.mrb[10].mxu1 }
 0x9dd   :  { %v28415_v45 = vpop.f32.mrb[11].mxu1 }
 0x9e0   :  { %v28417_v33 = vpop.f32.mrb[12].mxu1 }
 0x9e1   :  { %v28419_v10 = vpop.f32.mrb[13].mxu1 }
 0x9e4   :  { %v28421_v39 = vpop.f32.mrb[14].mxu1 }
 0x9e5   :  { %v28423_v2 = vpop.f32.mrb[15].mxu1 }
 0x9e8   :  { %v28425_v19 = vpop.f32.mrb[16].mxu1 }
 0x9e9   :  { %v28427_v50 = vpop.f32.mrb[17].mxu1 }
 0x9ec   :  { %v28429_v25 = vpop.f32.mrb[18].mxu1 }
 0x9ed   :  { %v28431_v44 = vpop.f32.mrb[19].mxu1 }
 0x9f0   :  { %v28436_v1 = vpop.f32.mrb[20].mxu1 }
 0x9f1   :  { %v28438_v7 = vpop.f32.mrb[21].mxu1 }
 0x9f4   :  { %v28441_v41 = vpop.f32.mrb[22].mxu1  ;;  %v21341_v57 = vpop.f32.mrb[44].mxu0 }
 0x9f5   :  { %v21871_v22 = vadd.f32 %v21341_v57, %v28259_v29  ;;  %v28444_v30 = vpop.f32.mrb[23].mxu1  ;;  %v15350_v14 = vpop.f32.mrb[45].mxu0 }
 0x9f6   :  { %v21872_v23 = vadd.f32 %v15350_v14, %v28261_v21 }
 0x9f7   :  { %v28449_v63 = vsel %vm15639_vm2, %v21871_v22, -1e+30 }
 0x9f8   :  { %v21344_v38 = vpop.f32.mrb[46].mxu0  ;;  %15690 = vmax.xlane.f32.xlu0 %v28449_v63  ;;  %v28456_v29 = vsel %vm15639_vm2, %v21872_v23, -1e+30 }
 0x9f9   :  { %v21873_v46 = vadd.f32 %v21344_v38, %v28271_v48  ;;  %v15360_v47 = vpop.f32.mrb[47].mxu0 }
 0x9fa   :  { %v21874_v16 = vadd.f32 %v15360_v47, %v28273_v18 }
 0x9fb   :  { %v28460_v20 = vsel %vm15639_vm2, %v21873_v46, -1e+30 }
 0x9fc   :  { %v21347_v21 = vpop.f32.mrb[48].mxu0  ;;  %15688 = vmax.xlane.f32.xlu0 %v28456_v29  ;;  %15694 = vmax.xlane.f32.xlu1 %v28460_v20  ;;  %v28468_v18 = vsel %vm15639_vm2, %v21874_v16, -1e+30 }
 0x9fd   :  { %v21875_v8 = vadd.f32 %v21347_v21, %v28283_v40  ;;  %v15370_v24 = vpop.f32.mrb[49].mxu0 }
 0x9fe   :  { %v21876_v48 = vadd.f32 %v15370_v24, %v28285_v51 }
 0x9ff   :  { %v28480_v51 = vsel %vm15639_vm2, %v21875_v8, -1e+30 }
 0xa00   :  { %v21350_v52 = vpop.f32.mrb[50].mxu0  ;;  %15692 = vmax.xlane.f32.xlu1 %v28468_v18  ;;  %v28473_v34 = vsel %vm15639_vm2, %v21876_v48, -1e+30 }
 0xa01   :  { %v21877_v35 = vadd.f32 %v21350_v52, %v28295_v42  ;;  %v15380_v57 = vpop.f32.mrb[51].mxu0  ;;  %15696 = vmax.xlane.f32.xlu0 %v28473_v34 }
 0xa02   :  { %v21878_v40 = vadd.f32 %v15380_v57, %v28297_v17 }
 0xa03   :  { %v28492_v17 = vsel %vm15639_vm2, %v21877_v35, -1e+30 }
 0xa04   :  { %v21353_v22 = vpop.f32.mrb[52].mxu0  ;;  %15698 = vmax.xlane.f32.xlu1 %v28480_v51  ;;  %v28485_v14 = vsel %vm15639_vm2, %v21878_v40, -1e+30 }
 0xa05   :  { %v21879_v23 = vadd.f32 %v21353_v22, %v28307_v60  ;;  %v15390_v38 = vpop.f32.mrb[53].mxu0  ;;  %15700 = vmax.xlane.f32.xlu0 %v28485_v14 }
 0xa06   :  { %v21880_v42 = vadd.f32 %v15390_v38, %v28309_v4 }
 0xa07   :  { %v28504_v4 = vsel %vm15639_vm2, %v21879_v23, -1e+30 }
 0xa08   :  { %v21356_v46 = vpop.f32.mrb[54].mxu0  ;;  %15702 = vmax.xlane.f32.xlu1 %v28492_v17  ;;  %v28497_v47 = vsel %vm15639_vm2, %v21880_v42, -1e+30 }
 0xa09   :  { %v21881_v16 = vadd.f32 %v21356_v46, %v28319_v58  ;;  %v15400_v21 = vpop.f32.mrb[55].mxu0  ;;  %15704 = vmax.xlane.f32.xlu0 %v28497_v47 }
 0xa0a   :  { %v21882_v60 = vadd.f32 %v15400_v21, %v28321_v62 }
 0xa0b   :  { %v28516_v62 = vsel %vm15639_vm2, %v21881_v16, -1e+30 }
 0xa0c   :  { %v21359_v8 = vpop.f32.mrb[56].mxu0  ;;  %15706 = vmax.xlane.f32.xlu1 %v28504_v4  ;;  %v28509_v24 = vsel %vm15639_vm2, %v21882_v60, -1e+30 }
 0xa0d   :  { %v21883_v48 = vadd.f32 %v21359_v8, %v28369_v28  ;;  %v15410_v52 = vpop.f32.mrb[57].mxu0  ;;  %15708 = vmax.xlane.f32.xlu0 %v28509_v24 }
 0xa0e   :  { %v21884_v58 = vadd.f32 %v15410_v52, %v28371_v13 }
 0xa0f   :  { %v28528_v13 = vsel %vm15639_vm2, %v21883_v48, -1e+30 }
 0xa10   :  { %v21362_v35 = vpop.f32.mrb[58].mxu0  ;;  %15710 = vmax.xlane.f32.xlu1 %v28516_v62  ;;  %v28521_v57 = vsel %vm15639_vm2, %v21884_v58, -1e+30 }
 0xa11   :  { %v21885_v40 = vadd.f32 %v21362_v35, %v28373_v15  ;;  %v15420_v22 = vpop.f32.mrb[59].mxu0  ;;  %15712 = vmax.xlane.f32.xlu0 %v28521_v57 }
 0xa12   :  { %v21886_v28 = vadd.f32 %v15420_v22, %v28375_v54 }
 0xa13   :  { %v28540_v54 = vsel %vm15639_vm2, %v21885_v40, -1e+30 }
 0xa14   :  { %v21365_v23 = vpop.f32.mrb[60].mxu0  ;;  %15714 = vmax.xlane.f32.xlu1 %v28528_v13  ;;  %v28533_v38 = vsel %vm15639_vm2, %v21886_v28, -1e+30 }
 0xa15   :  { %v21887_v42 = vadd.f32 %v21365_v23, %v28377_v26  ;;  %v15430_v46 = vpop.f32.mrb[61].mxu0  ;;  %15716 = vmax.xlane.f32.xlu0 %v28533_v38 }
 0xa16   :  { %v21888_v15 = vadd.f32 %v15430_v46, %v28379_v61 }
 0xa17   :  { %v28552_v61 = vsel %vm15639_vm2, %v21887_v42, -1e+30 }
 0xa18   :  { %v21368_v16 = vpop.f32.mrb[62].mxu0  ;;  %15718 = vmax.xlane.f32.xlu1 %v28540_v54  ;;  %v28545_v21 = vsel %vm15639_vm2, %v21888_v15, -1e+30 }
 0xa19   :  { %v21889_v60 = vadd.f32 %v21368_v16, %v28381_v36  ;;  %v15440_v8 = vpop.f32.mrb[63].mxu0  ;;  %15720 = vmax.xlane.f32.xlu0 %v28545_v21 }
 0xa1a   :  { %v21890_v26 = vadd.f32 %v15440_v8, %v28383_v43 }
 0xa1b   :  { %v28564_v43 = vsel %vm15639_vm2, %v21889_v60, -1e+30 }
 0xa1c   :  { %v21371_v48 = vpop.f32.mrb[64].mxu0  ;;  %15722 = vmax.xlane.f32.xlu1 %v28552_v61  ;;  %v28557_v52 = vsel %vm15639_vm2, %v21890_v26, -1e+30 }
 0xa1d   :  { %v21891_v58 = vadd.f32 %v21371_v48, %v28385_v9  ;;  %v15450_v35 = vpop.f32.mrb[65].mxu0  ;;  %15724 = vmax.xlane.f32.xlu0 %v28557_v52 }
 0xa1e   :  { %v21892_v36 = vadd.f32 %v15450_v35, %v28387_v27 }
 0xa1f   :  { %v28576_v27 = vsel %vm15639_vm2, %v21891_v58, -1e+30 }
 0xa20   :  { %v21374_v40 = vpop.f32.mrb[66].mxu0  ;;  %15726 = vmax.xlane.f32.xlu1 %v28564_v43  ;;  %v28569_v22 = vsel %vm15639_vm2, %v21892_v36, -1e+30 }
 0xa21   :  { %v21893_v28 = vadd.f32 %v21374_v40, %v28389_v12  ;;  %v15460_v23 = vpop.f32.mrb[67].mxu0  ;;  %15728 = vmax.xlane.f32.xlu0 %v28569_v22 }
 0xa22   :  { %v21894_v9 = vadd.f32 %v15460_v23, %v28391_v59 }
 0xa23   :  { %v28588_v59 = vsel %vm15639_vm2, %v21893_v28, -1e+30 }
 0xa24   :  { %v21377_v42 = vpop.f32.mrb[68].mxu0  ;;  %15730 = vmax.xlane.f32.xlu1 %v28576_v27  ;;  %v28581_v46 = vsel %vm15639_vm2, %v21894_v9, -1e+30 }
 0xa25   :  { %v21895_v15 = vadd.f32 %v21377_v42, %v28393_v0  ;;  %v15470_v16 = vpop.f32.mrb[69].mxu0  ;;  %15732 = vmax.xlane.f32.xlu0 %v28581_v46 }
 0xa26   :  { %v21896_v12 = vadd.f32 %v15470_v16, %v28395_v3 }
 0xa27   :  { %v28600_v3 = vsel %vm15639_vm2, %v21895_v15, -1e+30 }
 0xa28   :  { %v21380_v60 = vpop.f32.mrb[70].mxu0  ;;  %15734 = vmax.xlane.f32.xlu1 %v28588_v59  ;;  %v28593_v8 = vsel %vm15639_vm2, %v21896_v12, -1e+30 }
 0xa29   :  { %v21897_v26 = vadd.f32 %v21380_v60, %v28397_v11  ;;  %v15480_v48 = vpop.f32.mrb[71].mxu0  ;;  %15736 = vmax.xlane.f32.xlu0 %v28593_v8 }
 0xa2a   :  { %v21898_v0 = vadd.f32 %v15480_v48, %v28399_v32 }
 0xa2b   :  { %v28612_v32 = vsel %vm15639_vm2, %v21897_v26, -1e+30 }
 0xa2c   :  { %v21383_v58 = vpop.f32.mrb[72].mxu0  ;;  %15738 = vmax.xlane.f32.xlu1 %v28600_v3  ;;  %v28605_v35 = vsel %vm15639_vm2, %v21898_v0, -1e+30 }
 0xa2d   :  { %v21899_v36 = vadd.f32 %v21383_v58, %v28401_v31  ;;  %v15490_v40 = vpop.f32.mrb[73].mxu0  ;;  %15740 = vmax.xlane.f32.xlu0 %v28605_v35 }
 0xa2e   :  { %v21900_v11 = vadd.f32 %v15490_v40, %v28403_v55 }
 0xa2f   :  { %v28624_v55 = vsel %vm15639_vm2, %v21899_v36, -1e+30 }
 0xa30   :  { %v21386_v28 = vpop.f32.mrb[74].mxu0  ;;  %15742 = vmax.xlane.f32.xlu1 %v28612_v32  ;;  %v28617_v23 = vsel %vm15639_vm2, %v21900_v11, -1e+30 }
 0xa31   :  { %v21901_v9 = vadd.f32 %v21386_v28, %v28405_v56  ;;  %v15500_v42 = vpop.f32.mrb[75].mxu0  ;;  %15744 = vmax.xlane.f32.xlu0 %v28617_v23 }
 0xa32   :  { %v21902_v31 = vadd.f32 %v15500_v42, %v28407_v53 }
 0xa33   :  { %v28636_v53 = vsel %vm15639_vm2, %v21901_v9, -1e+30 }
 0xa34   :  { %v21389_v15 = vpop.f32.mrb[76].mxu0  ;;  %15746 = vmax.xlane.f32.xlu1 %v28624_v55  ;;  %v28629_v16 = vsel %vm15639_vm2, %v21902_v31, -1e+30 }
 0xa35   :  { %v21903_v12 = vadd.f32 %v21389_v15, %v28409_v37  ;;  %v15510_v60 = vpop.f32.mrb[77].mxu0  ;;  %15748 = vmax.xlane.f32.xlu0 %v28629_v16 }
 0xa36   :  { %v21904_v56 = vadd.f32 %v15510_v60, %v28411_v5 }
 0xa37   :  { %v28648_v5 = vsel %vm15639_vm2, %v21903_v12, -1e+30 }
 0xa38   :  { %v21392_v26 = vpop.f32.mrb[78].mxu0  ;;  %15750 = vmax.xlane.f32.xlu1 %v28636_v53  ;;  %v28641_v48 = vsel %vm15639_vm2, %v21904_v56, -1e+30 }
 0xa39   :  { %v21905_v0 = vadd.f32 %v21392_v26, %v28413_v6  ;;  %v15520_v58 = vpop.f32.mrb[79].mxu0  ;;  %15752 = vmax.xlane.f32.xlu0 %v28641_v48 }
 0xa3a   :  { %v21906_v37 = vadd.f32 %v15520_v58, %v28415_v45 }
 0xa3b   :  { %v28660_v45 = vsel %vm15639_vm2, %v21905_v0, -1e+30 }
 0xa3c   :  { %v21395_v36 = vpop.f32.mrb[80].mxu0  ;;  %15754 = vmax.xlane.f32.xlu1 %v28648_v5  ;;  %v28653_v40 = vsel %vm15639_vm2, %v21906_v37, -1e+30 }
 0xa3d   :  { %v21907_v11 = vadd.f32 %v21395_v36, %v28417_v33  ;;  %v15530_v28 = vpop.f32.mrb[81].mxu0  ;;  %15756 = vmax.xlane.f32.xlu0 %v28653_v40 }
 0xa3e   :  { %v21908_v6 = vadd.f32 %v15530_v28, %v28419_v10 }
 0xa3f   :  { %v28672_v10 = vsel %vm15639_vm2, %v21907_v11, -1e+30 }
 0xa40   :  { %v21398_v9 = vpop.f32.mrb[82].mxu0  ;;  %15758 = vmax.xlane.f32.xlu1 %v28660_v45  ;;  %v28665_v42 = vsel %vm15639_vm2, %v21908_v6, -1e+30 }
 0xa41   :  { %v21909_v31 = vadd.f32 %v21398_v9, %v28421_v39  ;;  %v15540_v15 = vpop.f32.mrb[83].mxu0  ;;  %15760 = vmax.xlane.f32.xlu0 %v28665_v42 }
 0xa42   :  { %v21910_v33 = vadd.f32 %v15540_v15, %v28423_v2 }
 0xa43   :  { %v28684_v2 = vsel %vm15639_vm2, %v21909_v31, -1e+30 }
 0xa44   :  { %v21401_v12 = vpop.f32.mrb[84].mxu0  ;;  %15762 = vmax.xlane.f32.xlu1 %v28672_v10  ;;  %v28677_v60 = vsel %vm15639_vm2, %v21910_v33, -1e+30 }
 0xa45   :  { %v21911_v56 = vadd.f32 %v21401_v12, %v28425_v19  ;;  %v15550_v26 = vpop.f32.mrb[85].mxu0  ;;  %15764 = vmax.xlane.f32.xlu0 %v28677_v60 }
 0xa46   :  { %v21912_v39 = vadd.f32 %v15550_v26, %v28427_v50 }
 0xa47   :  { %v28696_v50 = vsel %vm15639_vm2, %v21911_v56, -1e+30 }
 0xa48   :  { %v21404_v0 = vpop.f32.mrb[86].mxu0  ;;  %15766 = vmax.xlane.f32.xlu1 %v28684_v2  ;;  %v28689_v58 = vsel %vm15639_vm2, %v21912_v39, -1e+30 }
 0xa49   :  { %v21913_v37 = vadd.f32 %v21404_v0, %v28429_v25  ;;  %v15560_v36 = vpop.f32.mrb[87].mxu0  ;;  %15768 = vmax.xlane.f32.xlu0 %v28689_v58 }
 0xa4a   :  { %v21914_v19 = vadd.f32 %v15560_v36, %v28431_v44 }
 0xa4b   :  { %v28708_v44 = vsel %vm15639_vm2, %v21913_v37, -1e+30 }
 0xa4c   :  { %v21407_v11 = vpop.f32.mrb[88].mxu0  ;;  %15770 = vmax.xlane.f32.xlu1 %v28696_v50  ;;  %v28701_v28 = vsel %vm15639_vm2, %v21914_v19, -1e+30 }
 0xa4d   :  { %v21915_v6 = vadd.f32 %v21407_v11, %v28436_v1  ;;  %v15570_v9 = vpop.f32.mrb[89].mxu0  ;;  %15772 = vmax.xlane.f32.xlu0 %v28701_v28 }
 0xa4e   :  { %v21916_v25 = vadd.f32 %v15570_v9, %v28438_v7 }
 0xa4f   :  { %v28720_v7 = vsel %vm15639_vm2, %v21915_v6, -1e+30 }
 0xa50   :  { %v21410_v31 = vpop.f32.mrb[90].mxu0  ;;  %15774 = vmax.xlane.f32.xlu1 %v28708_v44  ;;  %v28713_v15 = vsel %vm15639_vm2, %v21916_v25, -1e+30 }
 0xa51   :  { %v21917_v33 = vadd.f32 %v21410_v31, %v28441_v41  ;;  %v15580_v12 = vpop.f32.mrb[91].mxu0  ;;  %15776 = vmax.xlane.f32.xlu0 %v28713_v15 }
 0xa52   :  { %v21918_v1 = vadd.f32 %v15580_v12, %v28444_v30 }
 0xa53   :  { %v28730_v41 = vsel %vm15639_vm2, %v21917_v33, -1e+30 }
 0xa54   :  { %15778 = vmax.xlane.f32.xlu1 %v28720_v7  ;;  %v28725_v56 = vsel %vm15639_vm2, %v21918_v1, -1e+30 }
 0xa55   :  { %15780 = vmax.xlane.f32.xlu0 %v28725_v56 }
 0xa58   :  { %15782 = vmax.xlane.f32.xlu1 %v28730_v41 }
 0xa85   :  { %v15691_v26 = vpop.xlane.xlu0 %15690 }
 0xa86   :  { %v15785_v30 = vsub.f32 %v28449_v63, %v15691_v26 }
 0xa88   :  { %v15834_v39 = vmul.f32 1.442695, %v15785_v30 }
 0xa89   :  { %v15689_v0 = vpop.xlane.xlu0 %15688  ;;  %v15695_v37 = vpop.xlane.xlu1 %15694 }
 0xa8a   :  { %22866 = vpow2.f32 %v15834_v39  ;;  %v15784_v36 = vsub.f32 %v28456_v29, %v15689_v0  ;;  %v15787_v19 = vsub.f32 %v28460_v20, %v15695_v37 }
 0xa8c   :  { %v15832_v11 = vmul.f32 1.442695, %v15784_v36  ;;  %v15838_v6 = vmul.f32 1.442695, %v15787_v19 }
 0xa8d   :  { %v15693_v9 = vpop.xlane.xlu1 %15692 }
 0xa8e   :  { %22868 = vpow2.f32 %v15832_v11  ;;  %v15786_v49 = vsub.f32 %v28468_v18, %v15693_v9  ;;  %v15697_v25 = vpop.xlane.xlu0 %15696 }
 0xa8f   :  { %22870 = vpow2.f32 %v15838_v6  ;;  %v15788_v31 = vsub.f32 %v28473_v34, %v15697_v25 }
 0xa90   :  { %v15836_v33 = vmul.f32 1.442695, %v15786_v49 }
 0xa91   :  { %v15840_v63 = vmul.f32 1.442695, %v15788_v31  ;;  %v15699_v12 = vpop.xlane.xlu1 %15698 }
 0xa92   :  { %22872 = vpow2.f32 %v15836_v33  ;;  %v15789_v1 = vsub.f32 %v28480_v51, %v15699_v12  ;;  %v15701_v26 = vpop.xlane.xlu0 %15700 }
 0xa93   :  { %v15790_v29 = vsub.f32 %v28485_v14, %v15701_v26  ;;  %22874 = vpow2.f32 %v15840_v63 }
 0xa94   :  { %v28740_v20 = vpop.eup %22866  ;;  %v15842_v30 = vmul.f32 1.442695, %v15789_v1 }
 0xa95   :  { %v15844_v39 = vmul.f32 1.442695, %v15790_v29  ;;  %v15703_v0 = vpop.xlane.xlu1 %15702  ;;  %15930 = vadd.xlane.f32.xlu1 %v28740_v20 }
 0xa96   :  { %22876 = vpow2.f32 %v15842_v30  ;;  %v15791_v18 = vsub.f32 %v28492_v17, %v15703_v0  ;;  %v15705_v34 = vpop.xlane.xlu0 %15704 }
 0xa97   :  { %v15792_v37 = vsub.f32 %v28497_v47, %v15705_v34  ;;  %22878 = vpow2.f32 %v15844_v39 }
 0xa98   :  { %v28745_v36 = vpop.eup %22868  ;;  %v15846_v51 = vmul.f32 1.442695, %v15791_v18 }
 0xa99   :  { %v28747_v19 = vpop.eup %22870  ;;  %v15848_v14 = vmul.f32 1.442695, %v15792_v37  ;;  %v15707_v11 = vpop.xlane.xlu1 %15706  ;;  %15928 = vadd.xlane.f32.xlu0 %v28745_v36 }
 0xa9a   :  { %22880 = vpow2.f32 %v15846_v51  ;;  %v15793_v6 = vsub.f32 %v28504_v4, %v15707_v11  ;;  %15934 = vadd.xlane.f32.xlu1 %v28747_v19  ;;  %v15709_v9 = vpop.xlane.xlu0 %15708 }
 0xa9b   :  { %v15794_v17 = vsub.f32 %v28509_v24, %v15709_v9  ;;  %22882 = vpow2.f32 %v15848_v14 }
 0xa9c   :  { %v28753_v49 = vpop.eup %22872  ;;  %v15850_v47 = vmul.f32 1.442695, %v15793_v6 }
 0xa9d   :  { %v15852_v25 = vmul.f32 1.442695, %v15794_v17  ;;  %v15711_v31 = vpop.xlane.xlu1 %15710  ;;  %15932 = vadd.xlane.f32.xlu0 %v28753_v49  ;;  %v28757_v12 = vpop.eup %22874 }
 0xa9e   :  { %22884 = vpow2.f32 %v15850_v47  ;;  %v15795_v33 = vsub.f32 %v28516_v62, %v15711_v31  ;;  %v15713_v63 = vpop.xlane.xlu0 %15712 }
 0xa9f   :  { %v15796_v4 = vsub.f32 %v28521_v57, %v15713_v63  ;;  %22886 = vpow2.f32 %v15852_v25 }
 0xaa0   :  { %v28760_v1 = vpop.eup %22876  ;;  %v15854_v26 = vmul.f32 1.442695, %v15795_v33 }
 0xaa1   :  { %v15856_v24 = vmul.f32 1.442695, %v15796_v4  ;;  %v15715_v29 = vpop.xlane.xlu1 %15714  ;;  %15938 = vadd.xlane.f32.xlu1 %v28760_v1  ;;  %15936 = vadd.xlane.f32.xlu0 %v28757_v12  ;;  %v28765_v62 = vpop.eup %22878 }
 0xaa2   :  { %22888 = vpow2.f32 %v15854_v26  ;;  %v15797_v30 = vsub.f32 %v28528_v13, %v15715_v29  ;;  %v15717_v39 = vpop.xlane.xlu0 %15716 }
 0xaa3   :  { %v15798_v0 = vsub.f32 %v28533_v38, %v15717_v39  ;;  %22890 = vpow2.f32 %v15856_v24 }
 0xaa4   :  { %v28768_v18 = vpop.eup %22880  ;;  %v15858_v57 = vmul.f32 1.442695, %v15797_v30 }
 0xaa5   :  { %v15860_v34 = vmul.f32 1.442695, %v15798_v0  ;;  %v15719_v37 = vpop.xlane.xlu1 %15718  ;;  %15942 = vadd.xlane.f32.xlu1 %v28768_v18  ;;  %15940 = vadd.xlane.f32.xlu0 %v28765_v62  ;;  %v28773_v13 = vpop.eup %22882 }
 0xaa6   :  { %22892 = vpow2.f32 %v15858_v57  ;;  %v15799_v51 = vsub.f32 %v28540_v54, %v15719_v37  ;;  %v15721_v14 = vpop.xlane.xlu0 %15720 }
 0xaa7   :  { %v15800_v11 = vsub.f32 %v28545_v21, %v15721_v14  ;;  %22894 = vpow2.f32 %v15860_v34 }
 0xaa8   :  { %v28776_v6 = vpop.eup %22884  ;;  %v15862_v38 = vmul.f32 1.442695, %v15799_v51 }
 0xaa9   :  { %v15864_v9 = vmul.f32 1.442695, %v15800_v11  ;;  %v15723_v17 = vpop.xlane.xlu1 %15722  ;;  %15946 = vadd.xlane.f32.xlu1 %v28776_v6  ;;  %15944 = vadd.xlane.f32.xlu0 %v28773_v13  ;;  %v28781_v54 = vpop.eup %22886 }
 0xaaa   :  { %22896 = vpow2.f32 %v15862_v38  ;;  %v15801_v47 = vsub.f32 %v28552_v61, %v15723_v17  ;;  %v15725_v25 = vpop.xlane.xlu0 %15724 }
 0xaab   :  { %v15802_v31 = vsub.f32 %v28557_v52, %v15725_v25  ;;  %22898 = vpow2.f32 %v15864_v9 }
 0xaac   :  { %v28784_v33 = vpop.eup %22888  ;;  %v15866_v21 = vmul.f32 1.442695, %v15801_v47 }
 0xaad   :  { %v15868_v63 = vmul.f32 1.442695, %v15802_v31  ;;  %v15727_v4 = vpop.xlane.xlu1 %15726  ;;  %15950 = vadd.xlane.f32.xlu1 %v28784_v33  ;;  %15948 = vadd.xlane.f32.xlu0 %v28781_v54  ;;  %v28789_v61 = vpop.eup %22890 }
 0xaae   :  { %22900 = vpow2.f32 %v15866_v21  ;;  %v15803_v26 = vsub.f32 %v28564_v43, %v15727_v4  ;;  %v15729_v24 = vpop.xlane.xlu0 %15728 }
 0xaaf   :  { %v15804_v29 = vsub.f32 %v28569_v22, %v15729_v24  ;;  %22902 = vpow2.f32 %v15868_v63 }
 0xab0   :  { %v28792_v30 = vpop.eup %22892  ;;  %v15870_v52 = vmul.f32 1.442695, %v15803_v26 }
 0xab1   :  { %v15872_v39 = vmul.f32 1.442695, %v15804_v29  ;;  %v15731_v0 = vpop.xlane.xlu1 %15730  ;;  %15954 = vadd.xlane.f32.xlu1 %v28792_v30  ;;  %15952 = vadd.xlane.f32.xlu0 %v28789_v61  ;;  %v28797_v43 = vpop.eup %22894 }
 0xab2   :  { %22904 = vpow2.f32 %v15870_v52  ;;  %v15805_v57 = vsub.f32 %v28576_v27, %v15731_v0  ;;  %v15733_v34 = vpop.xlane.xlu0 %15732 }
 0xab3   :  { %v15806_v37 = vsub.f32 %v28581_v46, %v15733_v34  ;;  %22906 = vpow2.f32 %v15872_v39 }
 0xab4   :  { %v28800_v51 = vpop.eup %22896  ;;  %v15874_v22 = vmul.f32 1.442695, %v15805_v57 }
 0xab5   :  { %v15876_v14 = vmul.f32 1.442695, %v15806_v37  ;;  %v15735_v11 = vpop.xlane.xlu1 %15734  ;;  %15958 = vadd.xlane.f32.xlu1 %v28800_v51  ;;  %15956 = vadd.xlane.f32.xlu0 %v28797_v43  ;;  %v28805_v27 = vpop.eup %22898 }
 0xab6   :  { %22908 = vpow2.f32 %v15874_v22  ;;  %v15807_v38 = vsub.f32 %v28588_v59, %v15735_v11  ;;  %v15737_v9 = vpop.xlane.xlu0 %15736 }
 0xab7   :  { %v15808_v17 = vsub.f32 %v28593_v8, %v15737_v9  ;;  %22910 = vpow2.f32 %v15876_v14 }
 0xab8   :  { %v28808_v47 = vpop.eup %22900  ;;  %v15878_v46 = vmul.f32 1.442695, %v15807_v38 }
 0xab9   :  { %v15880_v25 = vmul.f32 1.442695, %v15808_v17  ;;  %v15739_v31 = vpop.xlane.xlu1 %15738  ;;  %15962 = vadd.xlane.f32.xlu1 %v28808_v47  ;;  %15960 = vadd.xlane.f32.xlu0 %v28805_v27  ;;  %v28813_v59 = vpop.eup %22902 }
 0xaba   :  { %22912 = vpow2.f32 %v15878_v46  ;;  %v15809_v21 = vsub.f32 %v28600_v3, %v15739_v31  ;;  %v15741_v63 = vpop.xlane.xlu0 %15740 }
 0xabb   :  { %v15810_v4 = vsub.f32 %v28605_v35, %v15741_v63  ;;  %22914 = vpow2.f32 %v15880_v25 }
 0xabc   :  { %v28816_v26 = vpop.eup %22904  ;;  %v15882_v8 = vmul.f32 1.442695, %v15809_v21 }
 0xabd   :  { %v15884_v24 = vmul.f32 1.442695, %v15810_v4  ;;  %v15743_v29 = vpop.xlane.xlu1 %15742  ;;  %15966 = vadd.xlane.f32.xlu1 %v28816_v26  ;;  %15964 = vadd.xlane.f32.xlu0 %v28813_v59  ;;  %v28821_v3 = vpop.eup %22906 }
 0xabe   :  { %22916 = vpow2.f32 %v15882_v8  ;;  %v15811_v52 = vsub.f32 %v28612_v32, %v15743_v29  ;;  %v15745_v39 = vpop.xlane.xlu0 %15744 }
 0xabf   :  { %v15812_v0 = vsub.f32 %v28617_v23, %v15745_v39  ;;  %22918 = vpow2.f32 %v15884_v24 }
 0xac0   :  { %v28824_v57 = vpop.eup %22908  ;;  %v15886_v35 = vmul.f32 1.442695, %v15811_v52 }
 0xac1   :  { %v15888_v34 = vmul.f32 1.442695, %v15812_v0  ;;  %v15747_v37 = vpop.xlane.xlu1 %15746  ;;  %15970 = vadd.xlane.f32.xlu1 %v28824_v57  ;;  %15968 = vadd.xlane.f32.xlu0 %v28821_v3  ;;  %v28829_v32 = vpop.eup %22910 }
 0xac2   :  { %22920 = vpow2.f32 %v15886_v35  ;;  %v15813_v22 = vsub.f32 %v28624_v55, %v15747_v37  ;;  %v15749_v14 = vpop.xlane.xlu0 %15748 }
 0xac3   :  { %v15814_v11 = vsub.f32 %v28629_v16, %v15749_v14  ;;  %22922 = vpow2.f32 %v15888_v34 }
 0xac4   :  { %v28832_v38 = vpop.eup %22912  ;;  %v15890_v23 = vmul.f32 1.442695, %v15813_v22 }
 0xac5   :  { %v15892_v9 = vmul.f32 1.442695, %v15814_v11  ;;  %v15751_v17 = vpop.xlane.xlu1 %15750  ;;  %15974 = vadd.xlane.f32.xlu1 %v28832_v38  ;;  %15972 = vadd.xlane.f32.xlu0 %v28829_v32  ;;  %v28837_v55 = vpop.eup %22914 }
 0xac6   :  { %22924 = vpow2.f32 %v15890_v23  ;;  %v15815_v46 = vsub.f32 %v28636_v53, %v15751_v17  ;;  %v15753_v25 = vpop.xlane.xlu0 %15752 }
 0xac7   :  { %v15816_v31 = vsub.f32 %v28641_v48, %v15753_v25  ;;  %22926 = vpow2.f32 %v15892_v9 }
 0xac8   :  { %v28840_v21 = vpop.eup %22916  ;;  %v15894_v16 = vmul.f32 1.442695, %v15815_v46 }
 0xac9   :  { %v15896_v63 = vmul.f32 1.442695, %v15816_v31  ;;  %v15755_v4 = vpop.xlane.xlu1 %15754  ;;  %15978 = vadd.xlane.f32.xlu1 %v28840_v21  ;;  %15976 = vadd.xlane.f32.xlu0 %v28837_v55  ;;  %v28845_v53 = vpop.eup %22918 }
 0xaca   :  { %22928 = vpow2.f32 %v15894_v16  ;;  %v15817_v8 = vsub.f32 %v28648_v5, %v15755_v4  ;;  %v15757_v24 = vpop.xlane.xlu0 %15756 }
 0xacb   :  { %v15818_v29 = vsub.f32 %v28653_v40, %v15757_v24  ;;  %22930 = vpow2.f32 %v15896_v63 }
 0xacc   :  { %v28848_v52 = vpop.eup %22920  ;;  %v15898_v48 = vmul.f32 1.442695, %v15817_v8 }
 0xacd   :  { %v15900_v39 = vmul.f32 1.442695, %v15818_v29  ;;  %v15759_v0 = vpop.xlane.xlu1 %15758  ;;  %15982 = vadd.xlane.f32.xlu1 %v28848_v52  ;;  %15980 = vadd.xlane.f32.xlu0 %v28845_v53  ;;  %v28853_v5 = vpop.eup %22922 }
 0xace   :  { %22932 = vpow2.f32 %v15898_v48  ;;  %v15819_v35 = vsub.f32 %v28660_v45, %v15759_v0  ;;  %v15761_v34 = vpop.xlane.xlu0 %15760 }
 0xacf   :  { %v15820_v37 = vsub.f32 %v28665_v42, %v15761_v34  ;;  %22934 = vpow2.f32 %v15900_v39 }
 0xad0   :  { %v28856_v22 = vpop.eup %22924  ;;  %v15902_v40 = vmul.f32 1.442695, %v15819_v35 }
 0xad1   :  { %v15904_v14 = vmul.f32 1.442695, %v15820_v37  ;;  %v15763_v11 = vpop.xlane.xlu1 %15762  ;;  %15986 = vadd.xlane.f32.xlu1 %v28856_v22  ;;  %15984 = vadd.xlane.f32.xlu0 %v28853_v5  ;;  %v28861_v45 = vpop.eup %22926 }
 0xad2   :  { %22936 = vpow2.f32 %v15902_v40  ;;  %v15821_v23 = vsub.f32 %v28672_v10, %v15763_v11  ;;  %v15765_v9 = vpop.xlane.xlu0 %15764 }
 0xad3   :  { %v15822_v17 = vsub.f32 %v28677_v60, %v15765_v9  ;;  %22938 = vpow2.f32 %v15904_v14 }
 0xad4   :  { %v28864_v46 = vpop.eup %22928  ;;  %v15906_v42 = vmul.f32 1.442695, %v15821_v23 }
 0xad5   :  { %v15908_v25 = vmul.f32 1.442695, %v15822_v17  ;;  %v15767_v31 = vpop.xlane.xlu1 %15766  ;;  %15990 = vadd.xlane.f32.xlu1 %v28864_v46  ;;  %15988 = vadd.xlane.f32.xlu0 %v28861_v45  ;;  %v28869_v10 = vpop.eup %22930 }
 0xad6   :  { %22940 = vpow2.f32 %v15906_v42  ;;  %v15823_v16 = vsub.f32 %v28684_v2, %v15767_v31  ;;  %v15769_v63 = vpop.xlane.xlu0 %15768 }
 0xad7   :  { %v15824_v4 = vsub.f32 %v28689_v58, %v15769_v63  ;;  %22942 = vpow2.f32 %v15908_v25 }
 0xad8   :  { %v28872_v8 = vpop.eup %22932  ;;  %v15910_v60 = vmul.f32 1.442695, %v15823_v16 }
 0xad9   :  { %v15912_v24 = vmul.f32 1.442695, %v15824_v4  ;;  %v15771_v29 = vpop.xlane.xlu1 %15770  ;;  %15994 = vadd.xlane.f32.xlu1 %v28872_v8  ;;  %15992 = vadd.xlane.f32.xlu0 %v28869_v10  ;;  %v28877_v2 = vpop.eup %22934 }
 0xada   :  { %22944 = vpow2.f32 %v15910_v60  ;;  %v15825_v48 = vsub.f32 %v28696_v50, %v15771_v29  ;;  %v15773_v39 = vpop.xlane.xlu0 %15772 }
 0xadb   :  { %v15826_v0 = vsub.f32 %v28701_v28, %v15773_v39  ;;  %22946 = vpow2.f32 %v15912_v24 }
 0xadc   :  { %v28880_v35 = vpop.eup %22936  ;;  %v15914_v58 = vmul.f32 1.442695, %v15825_v48 }
 0xadd   :  { %v15916_v34 = vmul.f32 1.442695, %v15826_v0  ;;  %v15775_v37 = vpop.xlane.xlu1 %15774  ;;  %15998 = vadd.xlane.f32.xlu1 %v28880_v35  ;;  %15996 = vadd.xlane.f32.xlu0 %v28877_v2  ;;  %v28885_v50 = vpop.eup %22938 }
 0xade   :  { %22948 = vpow2.f32 %v15914_v58  ;;  %v15827_v40 = vsub.f32 %v28708_v44, %v15775_v37  ;;  %v15777_v14 = vpop.xlane.xlu0 %15776 }
 0xadf   :  { %v15828_v11 = vsub.f32 %v28713_v15, %v15777_v14  ;;  %22950 = vpow2.f32 %v15916_v34 }
 0xae0   :  { %v28888_v23 = vpop.eup %22940  ;;  %v15918_v28 = vmul.f32 1.442695, %v15827_v40 }
 0xae1   :  { %v15920_v9 = vmul.f32 1.442695, %v15828_v11  ;;  %v15779_v17 = vpop.xlane.xlu1 %15778  ;;  %16002 = vadd.xlane.f32.xlu1 %v28888_v23  ;;  %16000 = vadd.xlane.f32.xlu0 %v28885_v50  ;;  %v28893_v44 = vpop.eup %22942 }
 0xae2   :  { %22952 = vpow2.f32 %v15918_v28  ;;  %v15829_v42 = vsub.f32 %v28720_v7, %v15779_v17  ;;  %v15781_v25 = vpop.xlane.xlu0 %15780 }
 0xae3   :  { %v15830_v31 = vsub.f32 %v28725_v56, %v15781_v25  ;;  %22954 = vpow2.f32 %v15920_v9 }
 0xae4   :  { %v28896_v16 = vpop.eup %22944  ;;  %v15922_v15 = vmul.f32 1.442695, %v15829_v42 }
 0xae5   :  { %v15924_v63 = vmul.f32 1.442695, %v15830_v31  ;;  %16006 = vadd.xlane.f32.xlu1 %v28896_v16  ;;  %v15783_v4 = vpop.xlane.xlu1 %15782  ;;  %16004 = vadd.xlane.f32.xlu0 %v28893_v44  ;;  %v28901_v24 = vpop.eup %22946 }
 0xae6   :  { %22956 = vpow2.f32 %v15922_v15  ;;  %v15831_v60 = vsub.f32 %v28730_v41, %v15783_v4 }
 0xae7   :  { %22958 = vpow2.f32 %v15924_v63 }
 0xae8   :  { %v28903_v7 = vpop.eup %22948  ;;  %v15926_v29 = vmul.f32 1.442695, %v15831_v60 }
 0xae9   :  { %16010 = vadd.xlane.f32.xlu1 %v28903_v7  ;;  %16008 = vadd.xlane.f32.xlu0 %v28901_v24  ;;  %v28907_v56 = vpop.eup %22950 }
 0xaea   :  { %22960 = vpow2.f32 %v15926_v29 }
 0xaec   :  { %v28909_v48 = vpop.eup %22952 }
 0xaed   :  { %16014 = vadd.xlane.f32.xlu1 %v28909_v48  ;;  %16012 = vadd.xlane.f32.xlu0 %v28907_v56  ;;  %v28913_v41 = vpop.eup %22954 }
 0xaf0   :  { %v28915_v39 = vpop.eup %22956 }
 0xaf1   :  { %16018 = vadd.xlane.f32.xlu1 %v28915_v39  ;;  %16016 = vadd.xlane.f32.xlu0 %v28913_v41  ;;  %v28919_v0 = vpop.eup %22958 }
 0xaf4   :  { %v28921_v58 = vpop.eup %22960 }
 0xaf5   :  { %16022 = vadd.xlane.f32.xlu1 %v28921_v58  ;;  %16020 = vadd.xlane.f32.xlu0 %v28919_v0 }
 0xb22   :  { %v15931_v34 = vpop.xlane.xlu1 %15930 }
 0xb23   :  { %22962 = vrcp.f32 %v15931_v34 }
 0xb26   :  { %v15929_v37 = vpop.xlane.xlu0 %15928 }
 0xb27   :  { %v15935_v40 = vpop.xlane.xlu1 %15934  ;;  %22964 = vrcp.f32 %v15929_v37 }
 0xb28   :  { %22966 = vrcp.f32 %v15935_v40 }
 0xb2a   :  { %v15933_v14 = vpop.xlane.xlu0 %15932 }
 0xb2b   :  { %22968 = vrcp.f32 %v15933_v14 }
 0xb2d   :  { %v22963_v11 = vpop.eup %22962 }
 0xb2e   :  { %v16027_v28 = vmul.f32 %v22963_v11, %v28740_v20  ;;  %v15939_v9 = vpop.xlane.xlu1 %15938  ;;  %v15937_v17 = vpop.xlane.xlu0 %15936 }
 0xb2f   :  { %22970 = vrcp.f32 %v15939_v9 }
 0xb30   :  { %16121 = vst [vmem:[%s29125_s8 + $0x8] sm:$0xff] %v16027_v28  ;;  %22972 = vrcp.f32 %v15937_v17 }
 0xb31   :  { %v22965_v42 = vpop.eup %22964 }
 0xb32   :  { %v22967_v25 = vpop.eup %22966  ;;  %v16025_v31 = vmul.f32 %v22965_v42, %v28745_v36  ;;  %v15943_v15 = vpop.xlane.xlu1 %15942 }
 0xb33   :  { %v15941_v63 = vpop.xlane.xlu0 %15940  ;;  %v16031_v4 = vmul.f32 %v22967_v25, %v28747_v19  ;;  %22974 = vrcp.f32 %v15943_v15 }
 0xb34   :  { %16120 = vst [vmem:[%s29125_s8] sm:$0xff] %v16025_v31  ;;  %22976 = vrcp.f32 %v15941_v63 }
 0xb35   :  { %v22969_v20 = vpop.eup %22968  ;;  %16123 = vst [vmem:[%s29125_s8 + $0x18] sm:$0xff] %v16031_v4 }
 0xb36   :  { %v16029_v60 = vmul.f32 %v22969_v20, %v28753_v49  ;;  %v15947_v29 = vpop.xlane.xlu1 %15946 }
 0xb37   :  { %v15945_v34 = vpop.xlane.xlu0 %15944  ;;  %22978 = vrcp.f32 %v15947_v29 }
 0xb38   :  { %16122 = vst [vmem:[%s29125_s8 + $0x10] sm:$0xff] %v16029_v60  ;;  %22980 = vrcp.f32 %v15945_v34 }
 0xb39   :  { %v22971_v36 = vpop.eup %22970 }
 0xb3a   :  { %v22973_v19 = vpop.eup %22972  ;;  %v16035_v37 = vmul.f32 %v22971_v36, %v28760_v1  ;;  %v15951_v40 = vpop.xlane.xlu1 %15950 }
 0xb3b   :  { %v15949_v14 = vpop.xlane.xlu0 %15948  ;;  %v16033_v11 = vmul.f32 %v22973_v19, %v28757_v12  ;;  %22982 = vrcp.f32 %v15951_v40 }
 0xb3c   :  { %16125 = vst [vmem:[%s29125_s8 + $0x28] sm:$0xff] %v16035_v37  ;;  %22984 = vrcp.f32 %v15949_v14 }
 0xb3d   :  { %v22975_v49 = vpop.eup %22974  ;;  %16124 = vst [vmem:[%s29125_s8 + $0x20] sm:$0xff] %v16033_v11 }
 0xb3e   :  { %v22977_v28 = vpop.eup %22976  ;;  %v16039_v9 = vmul.f32 %v22975_v49, %v28768_v18  ;;  %v15955_v17 = vpop.xlane.xlu1 %15954 }
 0xb3f   :  { %v15953_v1 = vpop.xlane.xlu0 %15952  ;;  %v16037_v42 = vmul.f32 %v22977_v28, %v28765_v62  ;;  %22986 = vrcp.f32 %v15955_v17 }
 0xb40   :  { %16127 = vst [vmem:[%s29125_s8 + $0x38] sm:$0xff] %v16039_v9  ;;  %22988 = vrcp.f32 %v15953_v1 }
 0xb41   :  { %v22979_v12 = vpop.eup %22978  ;;  %16126 = vst [vmem:[%s29125_s8 + $0x30] sm:$0xff] %v16037_v42 }
 0xb42   :  { %v22981_v25 = vpop.eup %22980  ;;  %v16043_v31 = vmul.f32 %v22979_v12, %v28776_v6  ;;  %v15959_v15 = vpop.xlane.xlu1 %15958 }
 0xb43   :  { %v15957_v18 = vpop.xlane.xlu0 %15956  ;;  %v16041_v63 = vmul.f32 %v22981_v25, %v28773_v13  ;;  %22990 = vrcp.f32 %v15959_v15 }
 0xb44   :  { %16129 = vst [vmem:[%s29125_s8 + $0x48] sm:$0xff] %v16043_v31  ;;  %22992 = vrcp.f32 %v15957_v18 }
 0xb45   :  { %v22983_v62 = vpop.eup %22982  ;;  %16128 = vst [vmem:[%s29125_s8 + $0x40] sm:$0xff] %v16041_v63 }
 0xb46   :  { %v22985_v4 = vpop.eup %22984  ;;  %v16047_v20 = vmul.f32 %v22983_v62, %v28784_v33  ;;  %v15963_v60 = vpop.xlane.xlu1 %15962 }
 0xb47   :  { %v15961_v6 = vpop.xlane.xlu0 %15960  ;;  %v16045_v29 = vmul.f32 %v22985_v4, %v28781_v54  ;;  %22994 = vrcp.f32 %v15963_v60 }
 0xb48   :  { %16131 = vst [vmem:[%s29125_s8 + $0x58] sm:$0xff] %v16047_v20  ;;  %22996 = vrcp.f32 %v15961_v6 }
 0xb49   :  { %v22987_v13 = vpop.eup %22986  ;;  %16130 = vst [vmem:[%s29125_s8 + $0x50] sm:$0xff] %v16045_v29 }
 0xb4a   :  { %v22989_v34 = vpop.eup %22988  ;;  %v16051_v36 = vmul.f32 %v22987_v13, %v28792_v30  ;;  %v15967_v19 = vpop.xlane.xlu1 %15966 }
 0xb4b   :  { %v15965_v33 = vpop.xlane.xlu0 %15964  ;;  %v16049_v37 = vmul.f32 %v22989_v34, %v28789_v61  ;;  %22998 = vrcp.f32 %v15967_v19 }
 0xb4c   :  { %16133 = vst [vmem:[%s29125_s8 + $0x68] sm:$0xff] %v16051_v36  ;;  %23000 = vrcp.f32 %v15965_v33 }
 0xb4d   :  { %v22991_v54 = vpop.eup %22990  ;;  %16132 = vst [vmem:[%s29125_s8 + $0x60] sm:$0xff] %v16049_v37 }
 0xb4e   :  { %v22993_v40 = vpop.eup %22992  ;;  %v16055_v14 = vmul.f32 %v22991_v54, %v28800_v51  ;;  %v15971_v11 = vpop.xlane.xlu1 %15970 }
 0xb4f   :  { %v15969_v30 = vpop.xlane.xlu0 %15968  ;;  %v16053_v49 = vmul.f32 %v22993_v40, %v28797_v43  ;;  %23002 = vrcp.f32 %v15971_v11 }
 0xb50   :  { %16135 = vst [vmem:[%s29125_s8 + $0x78] sm:$0xff] %v16055_v14  ;;  %23004 = vrcp.f32 %v15969_v30 }
 0xb51   :  { %v22995_v61 = vpop.eup %22994  ;;  %16134 = vst [vmem:[%s29125_s8 + $0x70] sm:$0xff] %v16053_v49 }
 0xb52   :  { %v22997_v28 = vpop.eup %22996  ;;  %v16059_v9 = vmul.f32 %v22995_v61, %v28808_v47  ;;  %v15975_v17 = vpop.xlane.xlu1 %15974 }
 0xb53   :  { %v15973_v51 = vpop.xlane.xlu0 %15972  ;;  %v16057_v1 = vmul.f32 %v22997_v28, %v28805_v27  ;;  %23006 = vrcp.f32 %v15975_v17 }
 0xb54   :  { %16137 = vst [vmem:[%s29125_s8 + $0x88] sm:$0xff] %v16059_v9  ;;  %23008 = vrcp.f32 %v15973_v51 }
 0xb55   :  { %v22999_v43 = vpop.eup %22998  ;;  %16136 = vst [vmem:[%s29125_s8 + $0x80] sm:$0xff] %v16057_v1 }
 0xb56   :  { %v23001_v42 = vpop.eup %23000  ;;  %v16063_v12 = vmul.f32 %v22999_v43, %v28816_v26  ;;  %v15979_v25 = vpop.xlane.xlu1 %15978 }
 0xb57   :  { %v15977_v47 = vpop.xlane.xlu0 %15976  ;;  %v16061_v31 = vmul.f32 %v23001_v42, %v28813_v59  ;;  %23010 = vrcp.f32 %v15979_v25 }
 0xb58   :  { %16139 = vst [vmem:[%s29125_s8 + $0x98] sm:$0xff] %v16063_v12  ;;  %23012 = vrcp.f32 %v15977_v47 }
 0xb59   :  { %v23003_v27 = vpop.eup %23002  ;;  %16138 = vst [vmem:[%s29125_s8 + $0x90] sm:$0xff] %v16061_v31 }
 0xb5a   :  { %v23005_v15 = vpop.eup %23004  ;;  %v16067_v18 = vmul.f32 %v23003_v27, %v28824_v57  ;;  %v15983_v63 = vpop.xlane.xlu1 %15982 }
 0xb5b   :  { %v15981_v26 = vpop.xlane.xlu0 %15980  ;;  %v16065_v62 = vmul.f32 %v23005_v15, %v28821_v3  ;;  %23014 = vrcp.f32 %v15983_v63 }
 0xb5c   :  { %16141 = vst [vmem:[%s29125_s8 + $0xa8] sm:$0xff] %v16067_v18  ;;  %23016 = vrcp.f32 %v15981_v26 }
 0xb5d   :  { %v23007_v59 = vpop.eup %23006  ;;  %16140 = vst [vmem:[%s29125_s8 + $0xa0] sm:$0xff] %v16065_v62 }
 0xb5e   :  { %v23009_v4 = vpop.eup %23008  ;;  %v16071_v20 = vmul.f32 %v23007_v59, %v28832_v38  ;;  %v15987_v60 = vpop.xlane.xlu1 %15986 }
 0xb5f   :  { %v15985_v57 = vpop.xlane.xlu0 %15984  ;;  %v16069_v6 = vmul.f32 %v23009_v4, %v28829_v32  ;;  %23018 = vrcp.f32 %v15987_v60 }
 0xb60   :  { %16143 = vst [vmem:[%s29125_s8 + $0xb8] sm:$0xff] %v16071_v20  ;;  %23020 = vrcp.f32 %v15985_v57 }
 0xb61   :  { %v23011_v3 = vpop.eup %23010  ;;  %16142 = vst [vmem:[%s29125_s8 + $0xb0] sm:$0xff] %v16069_v6 }
 0xb62   :  { %v23013_v29 = vpop.eup %23012  ;;  %v16075_v13 = vmul.f32 %v23011_v3, %v28840_v21  ;;  %v15991_v34 = vpop.xlane.xlu1 %15990 }
 0xb63   :  { %v15989_v38 = vpop.xlane.xlu0 %15988  ;;  %v16073_v36 = vmul.f32 %v23013_v29, %v28837_v55  ;;  %23022 = vrcp.f32 %v15991_v34 }
 0xb64   :  { %16145 = vst [vmem:[%s29125_s8 + $0xc8] sm:$0xff] %v16075_v13  ;;  %23024 = vrcp.f32 %v15989_v38 }
 0xb65   :  { %v23015_v32 = vpop.eup %23014  ;;  %16144 = vst [vmem:[%s29125_s8 + $0xc0] sm:$0xff] %v16073_v36 }
 0xb66   :  { %v23017_v19 = vpop.eup %23016  ;;  %v16079_v33 = vmul.f32 %v23015_v32, %v28848_v52  ;;  %v15995_v37 = vpop.xlane.xlu1 %15994 }
 0xb67   :  { %v15993_v21 = vpop.xlane.xlu0 %15992  ;;  %v16077_v54 = vmul.f32 %v23017_v19, %v28845_v53  ;;  %23026 = vrcp.f32 %v15995_v37 }
 0xb68   :  { %16147 = vst [vmem:[%s29125_s8 + $0xd8] sm:$0xff] %v16079_v33  ;;  %23028 = vrcp.f32 %v15993_v21 }
 0xb69   :  { %v23019_v55 = vpop.eup %23018  ;;  %16146 = vst [vmem:[%s29125_s8 + $0xd0] sm:$0xff] %v16077_v54 }
 0xb6a   :  { %v23021_v40 = vpop.eup %23020  ;;  %v16083_v14 = vmul.f32 %v23019_v55, %v28856_v22  ;;  %v15999_v11 = vpop.xlane.xlu1 %15998 }
 0xb6b   :  { %v15997_v52 = vpop.xlane.xlu0 %15996  ;;  %v16081_v30 = vmul.f32 %v23021_v40, %v28853_v5  ;;  %23030 = vrcp.f32 %v15999_v11 }
 0xb6c   :  { %16149 = vst [vmem:[%s29125_s8 + $0xe8] sm:$0xff] %v16083_v14  ;;  %23032 = vrcp.f32 %v15997_v52 }
 0xb6d   :  { %v23023_v53 = vpop.eup %23022  ;;  %16148 = vst [vmem:[%s29125_s8 + $0xe0] sm:$0xff] %v16081_v30 }
 0xb6e   :  { %v23025_v49 = vpop.eup %23024  ;;  %v16087_v61 = vmul.f32 %v23023_v53, %v28864_v46  ;;  %v16003_v28 = vpop.xlane.xlu1 %16002 }
 0xb6f   :  { %v16001_v22 = vpop.xlane.xlu0 %16000  ;;  %v16085_v9 = vmul.f32 %v23025_v49, %v28861_v45  ;;  %23034 = vrcp.f32 %v16003_v28 }
 0xb70   :  { %16151 = vst [vmem:[%s29125_s8 + $0xf8] sm:$0xff] %v16087_v61  ;;  %23036 = vrcp.f32 %v16001_v22 }
 0xb71   :  { %v23027_v5 = vpop.eup %23026  ;;  %16150 = vst [vmem:[%s29125_s8 + $0xf0] sm:$0xff] %v16085_v9 }
 0xb72   :  { %v23029_v17 = vpop.eup %23028  ;;  %v16091_v51 = vmul.f32 %v23027_v5, %v28872_v8  ;;  %v16007_v1 = vpop.xlane.xlu1 %16006 }
 0xb73   :  { %v16005_v46 = vpop.xlane.xlu0 %16004  ;;  %v16089_v43 = vmul.f32 %v23029_v17, %v28869_v10  ;;  %23038 = vrcp.f32 %v16007_v1 }
 0xb74   :  { %16153 = vst [vmem:[%s29125_s8 + $0x108] sm:$0xff] %v16091_v51  ;;  %23040 = vrcp.f32 %v16005_v46 }
 0xb75   :  { %v23031_v45 = vpop.eup %23030  ;;  %16152 = vst [vmem:[%s29125_s8 + $0x100] sm:$0xff] %v16089_v43 }
 0xb76   :  { %v23033_v42 = vpop.eup %23032  ;;  %v16095_v12 = vmul.f32 %v23031_v45, %v28880_v35  ;;  %v16011_v25 = vpop.xlane.xlu1 %16010 }
 0xb77   :  { %v16009_v8 = vpop.xlane.xlu0 %16008  ;;  %v16093_v47 = vmul.f32 %v23033_v42, %v28877_v2  ;;  %23042 = vrcp.f32 %v16011_v25 }
 0xb78   :  { %16155 = vst [vmem:[%s29125_s8 + $0x118] sm:$0xff] %v16095_v12  ;;  %23044 = vrcp.f32 %v16009_v8 }
 0xb79   :  { %v23035_v10 = vpop.eup %23034  ;;  %16154 = vst [vmem:[%s29125_s8 + $0x110] sm:$0xff] %v16093_v47 }
 0xb7a   :  { %v23037_v31 = vpop.eup %23036  ;;  %v16099_v27 = vmul.f32 %v23035_v10, %v28888_v23  ;;  %v16015_v15 = vpop.xlane.xlu1 %16014 }
 0xb7b   :  { %v16013_v35 = vpop.xlane.xlu0 %16012  ;;  %v16097_v18 = vmul.f32 %v23037_v31, %v28885_v50  ;;  %23046 = vrcp.f32 %v16015_v15 }
 0xb7c   :  { %16157 = vst [vmem:[%s29125_s8 + $0x128] sm:$0xff] %v16099_v27  ;;  %23048 = vrcp.f32 %v16013_v35 }
 0xb7d   :  { %v23039_v2 = vpop.eup %23038  ;;  %16156 = vst [vmem:[%s29125_s8 + $0x120] sm:$0xff] %v16097_v18 }
 0xb7e   :  { %v23041_v63 = vpop.eup %23040  ;;  %v16103_v26 = vmul.f32 %v23039_v2, %v28896_v16  ;;  %v16019_v62 = vpop.xlane.xlu1 %16018 }
 0xb7f   :  { %v16017_v23 = vpop.xlane.xlu0 %16016  ;;  %v16101_v59 = vmul.f32 %v23041_v63, %v28893_v44  ;;  %23050 = vrcp.f32 %v16019_v62 }
 0xb80   :  { %16159 = vst [vmem:[%s29125_s8 + $0x138] sm:$0xff] %v16103_v26  ;;  %23052 = vrcp.f32 %v16017_v23 }
 0xb81   :  { %v23043_v50 = vpop.eup %23042  ;;  %16158 = vst [vmem:[%s29125_s8 + $0x130] sm:$0xff] %v16101_v59 }
 0xb82   :  { %v23045_v4 = vpop.eup %23044  ;;  %v16107_v20 = vmul.f32 %v23043_v50, %v28903_v7  ;;  %v16023_v60 = vpop.xlane.xlu1 %16022 }
 0xb83   :  { %v16021_v16 = vpop.xlane.xlu0 %16020  ;;  %v16105_v57 = vmul.f32 %v23045_v4, %v28901_v24  ;;  %23054 = vrcp.f32 %v16023_v60 }
 0xb84   :  { %16161 = vst [vmem:[%s29125_s8 + $0x148] sm:$0xff] %v16107_v20  ;;  %23056 = vrcp.f32 %v16021_v16 }
 0xb85   :  { %v23047_v44 = vpop.eup %23046  ;;  %16160 = vst [vmem:[%s29125_s8 + $0x140] sm:$0xff] %v16105_v57 }
 0xb86   :  { %v23049_v6 = vpop.eup %23048  ;;  %v16111_v3 = vmul.f32 %v23047_v44, %v28909_v48 }
 0xb87   :  { %v16109_v7 = vmul.f32 %v23049_v6, %v28907_v56 }
 0xb88   :  { %16163 = vst [vmem:[%s29125_s8 + $0x158] sm:$0xff] %v16111_v3 }
 0xb89   :  { %v23051_v24 = vpop.eup %23050  ;;  %16162 = vst [vmem:[%s29125_s8 + $0x150] sm:$0xff] %v16109_v7 }
 0xb8a   :  { %v23053_v29 = vpop.eup %23052  ;;  %v16115_v13 = vmul.f32 %v23051_v24, %v28915_v39 }
 0xb8b   :  { %v16113_v34 = vmul.f32 %v23053_v29, %v28913_v41 }
 0xb8c   :  { %16165 = vst [vmem:[%s29125_s8 + $0x168] sm:$0xff] %v16115_v13 }
 0xb8d   :  { %v23055_v48 = vpop.eup %23054  ;;  %16164 = vst [vmem:[%s29125_s8 + $0x160] sm:$0xff] %v16113_v34 }
 0xb8e   :  { %v23057_v56 = vpop.eup %23056  ;;  %v16119_v38 = vmul.f32 %v23055_v48, %v28921_v58 }
 0xb8f   :  { %v16117_v36 = vmul.f32 %v23057_v56, %v28919_v0 }
 0xb90   :  { %16167 = vst [vmem:[%s29125_s8 + $0x178] sm:$0xff] %v16119_v38 }
 0xb91   :  { %16166 = vst [vmem:[%s29125_s8 + $0x170] sm:$0xff] %v16117_v36 }
 0xb92   :  { %16172 = vsyncpa [#allocation3], 1 }

</bundles_post_ra>
